<compile_context>
chip_gen: v6e
topology: v6e:2x2x1
jax: 0.10.0
libtpu: 0.0.40
codegen_flags: <defaults>
</compile_context>

<pallas_src>
import functools

import jax
import jax.numpy as jnp
from jax.experimental import pallas as pl
from jax.experimental.pallas import tpu as pltpu

CP = 128                       # padded channel width (lane-dense everywhere)
KSIZE = 5                      # conv kernel size
VMEM_LIMIT = 48 * 1024 * 1024  # explicit scoped-VMEM budget (<= v7x 64 MiB physical)


# ------------------------------ fused kernel --------------------------------

def _fedavg_fused_kernel(p1_ref, w1_ref, b1_ref, w2_ref, b2_ref,
                         wf1_ref, bf1_ref, wf2_ref, bf2_ref,
                         o_ref, im2col_ref, *, bt, s0):
    """Whole FedAvgCNN forward for one batch tile of `bt` images.

    p1_ref:     (bt, s0*s0, K1)     bf16  conv1 im2col patches (K1 = 25*Cin, padded to 8)
    w1_ref:     (K1, 128)           bf16  conv1 weights, tap-major rows
    w2_ref:     (25*128, 128)       bf16  conv2 weights, tap-major row blocks
    wf1_ref:    (s3*s3*128, 512)    bf16  fc1 weights, rows permuted to NHWC order
    wf2_ref:    (512, 128)          bf16  fc weights (classes padded to 128)
    biases:     (1, N)              f32
    o_ref:      (bt, 1, 128)        f32   logits (padded classes)
    im2col_ref: (bt*s2*s2, 25*128)  bf16  VMEM scratch (conv2 long-K operand)
    """
    s1 = s0 // 2              # pooled conv1 spatial (12 for 28x28 input)
    s2 = s1 - KSIZE + 1       # conv2 output spatial (8)
    s3 = s2 // 2              # pooled conv2 spatial (4)

    # ---- conv1: one (bt*s0*s0, K1) @ (K1, 128) matmul + bias + ReLU ----
    k1 = p1_ref.shape[-1]
    p1 = p1_ref[...].reshape(bt * s0 * s0, k1)
    a1 = jnp.dot(p1, w1_ref[...], preferred_element_type=jnp.float32)
    a1 = jnp.maximum(a1 + b1_ref[...], 0.0)                      # (bt*s0*s0, 128)

    # ---- 2x2 / stride-2 max pool (W pairs, then H pairs) ----
    y = a1.reshape(bt * s0 * s1, 2, CP)
    y = jnp.maximum(y[:, 0], y[:, 1])                            # pool along W
    y = y.reshape(bt * s1, 2, s1, CP)
    y = jnp.maximum(y[:, 0], y[:, 1])                            # pool along H
    h1 = y.reshape(bt, s1, s1, CP).astype(jnp.bfloat16)          # (bt, s1, s1, 128)

    # ---- conv2: build long-K im2col slab in VMEM, one K=25*128 matmul ----
    # Hoist the unaligned W (sublane) shift: 5 shifted slabs, one per dw.
    for dw in range(KSIZE):
        sdw = h1[:, :, dw:dw + s2, :]                            # (bt, s1, s2, 128)
        for dh in range(KSIZE):
            t = dh * KSIZE + dw
            patch = sdw[:, dh:dh + s2]                           # 8-aligned H slab slice
            im2col_ref[:, t * CP:(t + 1) * CP] = patch.reshape(bt * s2 * s2, CP)

    a2 = jnp.dot(im2col_ref[...], w2_ref[...],
                 preferred_element_type=jnp.float32)             # (bt*s2*s2, 128)
    a2 = jnp.maximum(a2 + b2_ref[...], 0.0)

    y = a2.reshape(bt * s2 * s3, 2, CP)
    y = jnp.maximum(y[:, 0], y[:, 1])                            # pool along W
    y = y.reshape(bt * s3, 2, s3, CP)
    y = jnp.maximum(y[:, 0], y[:, 1])                            # pool along H
    feat = y.reshape(bt, s3 * s3 * CP).astype(jnp.bfloat16)      # NHWC flatten (bt, 2048)

    # ---- fc1 (+ReLU) and fc; the 512-wide intermediate never leaves VMEM ----
    h = jnp.dot(feat, wf1_ref[...], preferred_element_type=jnp.float32)
    h = jnp.maximum(h + bf1_ref[...], 0.0).astype(jnp.bfloat16)
    out = jnp.dot(h, wf2_ref[...], preferred_element_type=jnp.float32)
    out = out + bf2_ref[...]
    o_ref[...] = out.reshape(bt, 1, CP)


# ----------------------------- pallas_call wrapper ---------------------------

def fedavg_cnn_pallas(p1, w1, b1, w2, b2, wf1, bf1, wf2, bf2, *, bt, s0):
    b_pad = p1.shape[0]
    n_pos, k1 = p1.shape[1], p1.shape[2]
    s2 = s0 // 2 - KSIZE + 1
    kernel = functools.partial(_fedavg_fused_kernel, bt=bt, s0=s0)
    return pl.pallas_call(
        kernel,
        out_shape=jax.ShapeDtypeStruct((b_pad, 1, CP), jnp.float32),
        grid=(b_pad // bt,),
        in_specs=[
            pl.BlockSpec((bt, n_pos, k1), lambda i: (i, 0, 0)),
            pl.BlockSpec(w1.shape, lambda i: (0, 0)),
            pl.BlockSpec(b1.shape, lambda i: (0, 0)),
            pl.BlockSpec(w2.shape, lambda i: (0, 0)),
            pl.BlockSpec(b2.shape, lambda i: (0, 0)),
            pl.BlockSpec(wf1.shape, lambda i: (0, 0)),
            pl.BlockSpec(bf1.shape, lambda i: (0, 0)),
            pl.BlockSpec(wf2.shape, lambda i: (0, 0)),
            pl.BlockSpec(bf2.shape, lambda i: (0, 0)),
        ],
        out_specs=pl.BlockSpec((bt, 1, CP), lambda i: (i, 0, 0)),
        scratch_shapes=[
            pltpu.VMEM((bt * s2 * s2, KSIZE * KSIZE * CP), jnp.bfloat16)],
        compiler_params=pltpu.CompilerParams(
            dimension_semantics=("parallel",),
            vmem_limit_bytes=VMEM_LIMIT),
    )(p1, w1, b1, w2, b2, wf1, bf1, wf2, bf2)


# ------------------------------- host-side prep ------------------------------

def _pad_last(a, n):
    d = n - a.shape[-1]
    return a if d == 0 else jnp.pad(a, [(0, 0)] * (a.ndim - 1) + [(0, d)])


def _prep_bias(b):
    return _pad_last(b, CP).astype(jnp.float32).reshape(1, CP)


def _prep_conv1_w(w_oihw, k1p):
    """PyTorch (Cout, Cin, kh, kw) -> (k1p, 128) bf16, rows ordered (tap, cin)."""
    co, ci, kh, kw = w_oihw.shape
    wt = jnp.transpose(w_oihw, (2, 3, 1, 0)).reshape(kh * kw * ci, co)
    wt = jnp.pad(wt, ((0, k1p - kh * kw * ci), (0, CP - co)))
    return wt.astype(jnp.bfloat16)


def _prep_conv2_w(w_oihw):
    """PyTorch (Cout, Cin, kh, kw) -> (kh*kw*128, 128) bf16, tap-major row blocks."""
    co, ci, kh, kw = w_oihw.shape
    wt = jnp.transpose(w_oihw, (2, 3, 1, 0))                 # (kh, kw, ci, co)
    wt = jnp.pad(wt, ((0, 0), (0, 0), (0, CP - ci), (0, CP - co)))
    return wt.reshape(kh * kw * CP, CP).astype(jnp.bfloat16)


def _prep_fc1_w(w_in_out, c_valid, hh, ww):
    """Permute fc1 rows from torch (C,H,W)-flatten order to padded NHWC order."""
    n_out = w_in_out.shape[1]
    wt = w_in_out.reshape(c_valid, hh, ww, n_out)            # (c, h, w, out)
    wt = jnp.transpose(wt, (1, 2, 0, 3))                     # (h, w, c, out)
    wt = jnp.pad(wt, ((0, 0), (0, 0), (0, CP - c_valid), (0, 0)))
    return wt.reshape(hh * ww * CP, n_out).astype(jnp.bfloat16)


def _conv1_patches(x_nchw, s0):
    """Tiny host-side im2col for conv1 (1 input channel): (B, s0*s0, 25*C -> pad8)."""
    B, C, _, _ = x_nchw.shape
    cols = []
    for dh in range(KSIZE):
        for dw in range(KSIZE):
            cols.append(x_nchw[:, :, dh:dh + s0, dw:dw + s0])   # (B, C, s0, s0)
    p = jnp.stack(cols, axis=1)                                 # (B, 25, C, s0, s0)
    p = jnp.transpose(p, (0, 3, 4, 1, 2))                       # (B, s0, s0, 25, C)
    k1 = KSIZE * KSIZE * C
    k1p = max(8, -(-k1 // 8) * 8)
    p = p.reshape(B, s0 * s0, k1)
    return jnp.pad(p, ((0, 0), (0, 0), (0, k1p - k1))).astype(jnp.bfloat16)


def fedavg_cnn_forward(params, x_nchw):
    B, C, H, W = x_nchw.shape
    s0 = H - KSIZE + 1                      # 24 for 28x28
    s1 = s0 // 2                            # 12
    s2 = s1 - KSIZE + 1                     # 8
    s3 = s2 // 2                            # 4
    num_classes = params["wfc"].shape[1]

    # Batch tile: 8 images for large batches; >=2 grid steps for small even
    # batches so both v7x TensorCores get work.
    if B >= 16:
        bt = 8
    elif B % 2 == 0 and B > 1:
        bt = B // 2
    else:
        bt = B
    b_pad = -(-B // bt) * bt

    p1 = _conv1_patches(x_nchw, s0)                           # (B, s0*s0, K1) bf16
    if b_pad != B:
        p1 = jnp.pad(p1, ((0, b_pad - B), (0, 0), (0, 0)))

    w1 = _prep_conv1_w(params["w1"], p1.shape[-1])
    b1 = _prep_bias(params["b1"])
    w2 = _prep_conv2_w(params["w2"])
    b2 = _prep_bias(params["b2"])
    c2 = params["w2"].shape[0]                                # 64 real conv2 channels
    wf1 = _prep_fc1_w(params["wfc1"], c2, s3, s3)             # (2048, 512) bf16
    bf1 = params["bfc1"].astype(jnp.float32).reshape(1, -1)   # (1, 512)
    wf2 = _pad_last(params["wfc"], CP).astype(jnp.bfloat16)   # (512, 128)
    bf2 = _prep_bias(params["bfc"])                           # (1, 128)

    out = fedavg_cnn_pallas(p1, w1, b1, w2, b2, wf1, bf1, wf2, bf2, bt=bt, s0=s0)
    return out.reshape(b_pad, CP)[:B, :num_classes]


def init_params(key, in_features=1, num_classes=10, dim=1024):
    ks = jax.random.split(key, 8)

    def u(k, shape, fan_in):
        bound = 1.0 / jnp.sqrt(jnp.float32(fan_in))
        return jax.random.uniform(k, shape, jnp.float32, -bound, bound)

    return {
        # conv weights kept in PyTorch (Cout, Cin, kH, kW) layout
        "w1": u(ks[0], (32, in_features, 5, 5), in_features * 25),
        "b1": u(ks[1], (32,), in_features * 25),
        "w2": u(ks[2], (64, 32, 5, 5), 32 * 25),
        "b2": u(ks[3], (64,), 32 * 25),
        # linear weights stored already transposed to (in, out) for x @ w
        "wfc1": u(ks[4], (dim, 512), dim),
        "bfc1": u(ks[5], (512,), dim),
        "wfc": u(ks[6], (512, num_classes), 512),
        "bfc": u(ks[7], (num_classes,), 512),
    }


if __name__ == "__main__":
    key = jax.random.PRNGKey(0)
    pkey, xkey = jax.random.split(key)
    params = init_params(pkey, in_features=1, num_classes=10, dim=1024)
    # dim=1024 implies 28x28 single-channel input (MNIST-style); batch=2.
    x = jax.random.normal(xkey, (2, 1, 28, 28), dtype=jnp.float32)

    logits = jax.jit(fedavg_cnn_forward)(params, x)
    jax.block_until_ready(logits)
    assert logits.shape == (2, 10), logits.shape
    assert bool(jnp.all(jnp.isfinite(logits)))
    print("KERNEL_OK")
</pallas_src>

<mosaic_0001>
module attributes {stable_mosaic.version = 11 : i64} {
  func.func @_fedavg_fused_kernel(%arg0: i32, %arg1: memref<1x576x32xbf16, #tpu.memory_space<vmem>>, %arg2: memref<32x128xbf16, #tpu.memory_space<vmem>>, %arg3: memref<1x128xf32, #tpu.memory_space<vmem>>, %arg4: memref<3200x128xbf16, #tpu.memory_space<vmem>>, %arg5: memref<1x128xf32, #tpu.memory_space<vmem>>, %arg6: memref<2048x512xbf16, #tpu.memory_space<vmem>>, %arg7: memref<1x512xf32, #tpu.memory_space<vmem>>, %arg8: memref<512x128xbf16, #tpu.memory_space<vmem>>, %arg9: memref<1x128xf32, #tpu.memory_space<vmem>>, %arg10: memref<1x1x128xf32, #tpu.memory_space<vmem>>, %arg11: memref<64x3200xbf16, #tpu.memory_space<vmem>>) attributes {dimension_semantics = [#tpu.dimension_semantics<parallel>], iteration_bounds = array<i64: 2>, scalar_prefetch = 0 : i64, scratch_operands = 1 : i64, tpu.core_type = #tpu.core_type<tc>, window_params = [{transform_indices = @transform_0, window_bounds = array<i64: 1, 576, 32>}, {pipeline_mode = #tpu.pipeline_mode<synchronous>, transform_indices = @transform_1, window_bounds = array<i64: 32, 128>}, {pipeline_mode = #tpu.pipeline_mode<synchronous>, transform_indices = @transform_2, window_bounds = array<i64: 1, 128>}, {pipeline_mode = #tpu.pipeline_mode<synchronous>, transform_indices = @transform_3, window_bounds = array<i64: 3200, 128>}, {pipeline_mode = #tpu.pipeline_mode<synchronous>, transform_indices = @transform_4, window_bounds = array<i64: 1, 128>}, {pipeline_mode = #tpu.pipeline_mode<synchronous>, transform_indices = @transform_5, window_bounds = array<i64: 2048, 512>}, {pipeline_mode = #tpu.pipeline_mode<synchronous>, transform_indices = @transform_6, window_bounds = array<i64: 1, 512>}, {pipeline_mode = #tpu.pipeline_mode<synchronous>, transform_indices = @transform_7, window_bounds = array<i64: 512, 128>}, {pipeline_mode = #tpu.pipeline_mode<synchronous>, transform_indices = @transform_8, window_bounds = array<i64: 1, 128>}, {transform_indices = @transform_9, window_bounds = array<i64: 1, 1, 128>}]} {
    %c0 = arith.constant 0 : index
    %c0_0 = arith.constant 0 : index
    %c0_1 = arith.constant 0 : index
    %0 = vector.load %arg1[%c0, %c0_0, %c0_1] : memref<1x576x32xbf16, #tpu.memory_space<vmem>>, vector<1x576x32xbf16>
    %1 = vector.shape_cast %0 : vector<1x576x32xbf16> to vector<576x32xbf16>
    %c0_2 = arith.constant 0 : index
    %c0_3 = arith.constant 0 : index
    %2 = vector.load %arg2[%c0_2, %c0_3] : memref<32x128xbf16, #tpu.memory_space<vmem>>, vector<32x128xbf16>
    %cst = arith.constant dense<0.000000e+00> : vector<576x128xf32>
    %3 = tpu.matmul %1, %2, %cst {dimension_numbers = #tpu.dot_dimension_numbers<[1], [0], [0], [1], [0, 0, 1, 1], [], []>} : vector<576x32xbf16>, vector<32x128xbf16>, vector<576x128xf32> -> vector<576x128xf32>
    %c0_4 = arith.constant 0 : index
    %c0_5 = arith.constant 0 : index
    %4 = vector.load %arg3[%c0_4, %c0_5] : memref<1x128xf32, #tpu.memory_space<vmem>>, vector<1x128xf32>
    %5 = vector.broadcast %4 : vector<1x128xf32> to vector<576x128xf32>
    %6 = arith.addf %3, %5 : vector<576x128xf32>
    %cst_6 = arith.constant 0.000000e+00 : f32
    %7 = vector.broadcast %cst_6 : f32 to vector<576x128xf32>
    %8 = arith.maximumf %6, %7 : vector<576x128xf32>
    %9 = vector.shape_cast %8 : vector<576x128xf32> to vector<288x2x128xf32>
    %10 = vector.extract_strided_slice %9 {offsets = [0, 0, 0], sizes = [288, 1, 128], strides = [1, 1, 1]} : vector<288x2x128xf32> to vector<288x1x128xf32>
    %11 = vector.shape_cast %10 : vector<288x1x128xf32> to vector<288x128xf32>
    %12 = vector.extract_strided_slice %9 {offsets = [0, 1, 0], sizes = [288, 1, 128], strides = [1, 1, 1]} : vector<288x2x128xf32> to vector<288x1x128xf32>
    %13 = vector.shape_cast %12 : vector<288x1x128xf32> to vector<288x128xf32>
    %14 = arith.maximumf %11, %13 : vector<288x128xf32>
    %15 = vector.shape_cast %14 : vector<288x128xf32> to vector<12x2x12x128xf32>
    %16 = vector.extract_strided_slice %15 {offsets = [0, 0, 0, 0], sizes = [12, 1, 12, 128], strides = [1, 1, 1, 1]} : vector<12x2x12x128xf32> to vector<12x1x12x128xf32>
    %17 = vector.shape_cast %16 : vector<12x1x12x128xf32> to vector<12x12x128xf32>
    %18 = vector.extract_strided_slice %15 {offsets = [0, 1, 0, 0], sizes = [12, 1, 12, 128], strides = [1, 1, 1, 1]} : vector<12x2x12x128xf32> to vector<12x1x12x128xf32>
    %19 = vector.shape_cast %18 : vector<12x1x12x128xf32> to vector<12x12x128xf32>
    %20 = arith.maximumf %17, %19 : vector<12x12x128xf32>
    %21 = vector.shape_cast %20 : vector<12x12x128xf32> to vector<1x12x12x128xf32>
    %22 = arith.truncf %21 : vector<1x12x12x128xf32> to vector<1x12x12x128xbf16>
    %23 = vector.extract_strided_slice %22 {offsets = [0, 0, 0, 0], sizes = [1, 12, 8, 128], strides = [1, 1, 1, 1]} : vector<1x12x12x128xbf16> to vector<1x12x8x128xbf16>
    %24 = vector.extract_strided_slice %23 {offsets = [0, 0, 0, 0], sizes = [1, 8, 8, 128], strides = [1, 1, 1, 1]} : vector<1x12x8x128xbf16> to vector<1x8x8x128xbf16>
    %25 = vector.shape_cast %24 : vector<1x8x8x128xbf16> to vector<64x128xbf16>
    %c0_7 = arith.constant 0 : index
    %c0_8 = arith.constant 0 : index
    %26 = vector.load %arg11[%c0_7, %c0_8] : memref<64x3200xbf16, #tpu.memory_space<vmem>>, vector<64x128xbf16>
    tpu.vector_store %arg11[%c0_7, %c0_8], %25 {strides = array<i32>} : memref<64x3200xbf16, #tpu.memory_space<vmem>>, vector<64x128xbf16>,
    %27 = vector.extract_strided_slice %23 {offsets = [0, 1, 0, 0], sizes = [1, 8, 8, 128], strides = [1, 1, 1, 1]} : vector<1x12x8x128xbf16> to vector<1x8x8x128xbf16>
    %28 = vector.shape_cast %27 : vector<1x8x8x128xbf16> to vector<64x128xbf16>
    %c0_9 = arith.constant 0 : index
    %c640 = arith.constant 640 : index
    %29 = vector.load %arg11[%c0_9, %c640] : memref<64x3200xbf16, #tpu.memory_space<vmem>>, vector<64x128xbf16>
    tpu.vector_store %arg11[%c0_9, %c640], %28 {strides = array<i32>} : memref<64x3200xbf16, #tpu.memory_space<vmem>>, vector<64x128xbf16>,
    %30 = vector.extract_strided_slice %23 {offsets = [0, 2, 0, 0], sizes = [1, 8, 8, 128], strides = [1, 1, 1, 1]} : vector<1x12x8x128xbf16> to vector<1x8x8x128xbf16>
    %31 = vector.shape_cast %30 : vector<1x8x8x128xbf16> to vector<64x128xbf16>
    %c0_10 = arith.constant 0 : index
    %c1280 = arith.constant 1280 : index
    %32 = vector.load %arg11[%c0_10, %c1280] : memref<64x3200xbf16, #tpu.memory_space<vmem>>, vector<64x128xbf16>
    tpu.vector_store %arg11[%c0_10, %c1280], %31 {strides = array<i32>} : memref<64x3200xbf16, #tpu.memory_space<vmem>>, vector<64x128xbf16>,
    %33 = vector.extract_strided_slice %23 {offsets = [0, 3, 0, 0], sizes = [1, 8, 8, 128], strides = [1, 1, 1, 1]} : vector<1x12x8x128xbf16> to vector<1x8x8x128xbf16>
    %34 = vector.shape_cast %33 : vector<1x8x8x128xbf16> to vector<64x128xbf16>
    %c0_11 = arith.constant 0 : index
    %c1920 = arith.constant 1920 : index
    %35 = vector.load %arg11[%c0_11, %c1920] : memref<64x3200xbf16, #tpu.memory_space<vmem>>, vector<64x128xbf16>
    tpu.vector_store %arg11[%c0_11, %c1920], %34 {strides = array<i32>} : memref<64x3200xbf16, #tpu.memory_space<vmem>>, vector<64x128xbf16>,
    %36 = vector.extract_strided_slice %23 {offsets = [0, 4, 0, 0], sizes = [1, 8, 8, 128], strides = [1, 1, 1, 1]} : vector<1x12x8x128xbf16> to vector<1x8x8x128xbf16>
    %37 = vector.shape_cast %36 : vector<1x8x8x128xbf16> to vector<64x128xbf16>
    %c0_12 = arith.constant 0 : index
    %c2560 = arith.constant 2560 : index
    %38 = vector.load %arg11[%c0_12, %c2560] : memref<64x3200xbf16, #tpu.memory_space<vmem>>, vector<64x128xbf16>
    tpu.vector_store %arg11[%c0_12, %c2560], %37 {strides = array<i32>} : memref<64x3200xbf16, #tpu.memory_space<vmem>>, vector<64x128xbf16>,
    %39 = vector.extract_strided_slice %22 {offsets = [0, 0, 1, 0], sizes = [1, 12, 8, 128], strides = [1, 1, 1, 1]} : vector<1x12x12x128xbf16> to vector<1x12x8x128xbf16>
    %40 = vector.extract_strided_slice %39 {offsets = [0, 0, 0, 0], sizes = [1, 8, 8, 128], strides = [1, 1, 1, 1]} : vector<1x12x8x128xbf16> to vector<1x8x8x128xbf16>
    %41 = vector.shape_cast %40 : vector<1x8x8x128xbf16> to vector<64x128xbf16>
    %c0_13 = arith.constant 0 : index
    %c128 = arith.constant 128 : index
    %42 = vector.load %arg11[%c0_13, %c128] : memref<64x3200xbf16, #tpu.memory_space<vmem>>, vector<64x128xbf16>
    tpu.vector_store %arg11[%c0_13, %c128], %41 {strides = array<i32>} : memref<64x3200xbf16, #tpu.memory_space<vmem>>, vector<64x128xbf16>,
    %43 = vector.extract_strided_slice %39 {offsets = [0, 1, 0, 0], sizes = [1, 8, 8, 128], strides = [1, 1, 1, 1]} : vector<1x12x8x128xbf16> to vector<1x8x8x128xbf16>
    %44 = vector.shape_cast %43 : vector<1x8x8x128xbf16> to vector<64x128xbf16>
    %c0_14 = arith.constant 0 : index
    %c768 = arith.constant 768 : index
    %45 = vector.load %arg11[%c0_14, %c768] : memref<64x3200xbf16, #tpu.memory_space<vmem>>, vector<64x128xbf16>
    tpu.vector_store %arg11[%c0_14, %c768], %44 {strides = array<i32>} : memref<64x3200xbf16, #tpu.memory_space<vmem>>, vector<64x128xbf16>,
    %46 = vector.extract_strided_slice %39 {offsets = [0, 2, 0, 0], sizes = [1, 8, 8, 128], strides = [1, 1, 1, 1]} : vector<1x12x8x128xbf16> to vector<1x8x8x128xbf16>
    %47 = vector.shape_cast %46 : vector<1x8x8x128xbf16> to vector<64x128xbf16>
    %c0_15 = arith.constant 0 : index
    %c1408 = arith.constant 1408 : index
    %48 = vector.load %arg11[%c0_15, %c1408] : memref<64x3200xbf16, #tpu.memory_space<vmem>>, vector<64x128xbf16>
    tpu.vector_store %arg11[%c0_15, %c1408], %47 {strides = array<i32>} : memref<64x3200xbf16, #tpu.memory_space<vmem>>, vector<64x128xbf16>,
    %49 = vector.extract_strided_slice %39 {offsets = [0, 3, 0, 0], sizes = [1, 8, 8, 128], strides = [1, 1, 1, 1]} : vector<1x12x8x128xbf16> to vector<1x8x8x128xbf16>
    %50 = vector.shape_cast %49 : vector<1x8x8x128xbf16> to vector<64x128xbf16>
    %c0_16 = arith.constant 0 : index
    %c2048 = arith.constant 2048 : index
    %51 = vector.load %arg11[%c0_16, %c2048] : memref<64x3200xbf16, #tpu.memory_space<vmem>>, vector<64x128xbf16>
    tpu.vector_store %arg11[%c0_16, %c2048], %50 {strides = array<i32>} : memref<64x3200xbf16, #tpu.memory_space<vmem>>, vector<64x128xbf16>,
    %52 = vector.extract_strided_slice %39 {offsets = [0, 4, 0, 0], sizes = [1, 8, 8, 128], strides = [1, 1, 1, 1]} : vector<1x12x8x128xbf16> to vector<1x8x8x128xbf16>
    %53 = vector.shape_cast %52 : vector<1x8x8x128xbf16> to vector<64x128xbf16>
    %c0_17 = arith.constant 0 : index
    %c2688 = arith.constant 2688 : index
    %54 = vector.load %arg11[%c0_17, %c2688] : memref<64x3200xbf16, #tpu.memory_space<vmem>>, vector<64x128xbf16>
    tpu.vector_store %arg11[%c0_17, %c2688], %53 {strides = array<i32>} : memref<64x3200xbf16, #tpu.memory_space<vmem>>, vector<64x128xbf16>,
    %55 = vector.extract_strided_slice %22 {offsets = [0, 0, 2, 0], sizes = [1, 12, 8, 128], strides = [1, 1, 1, 1]} : vector<1x12x12x128xbf16> to vector<1x12x8x128xbf16>
    %56 = vector.extract_strided_slice %55 {offsets = [0, 0, 0, 0], sizes = [1, 8, 8, 128], strides = [1, 1, 1, 1]} : vector<1x12x8x128xbf16> to vector<1x8x8x128xbf16>
    %57 = vector.shape_cast %56 : vector<1x8x8x128xbf16> to vector<64x128xbf16>
    %c0_18 = arith.constant 0 : index
    %c256 = arith.constant 256 : index
    %58 = vector.load %arg11[%c0_18, %c256] : memref<64x3200xbf16, #tpu.memory_space<vmem>>, vector<64x128xbf16>
    tpu.vector_store %arg11[%c0_18, %c256], %57 {strides = array<i32>} : memref<64x3200xbf16, #tpu.memory_space<vmem>>, vector<64x128xbf16>,
    %59 = vector.extract_strided_slice %55 {offsets = [0, 1, 0, 0], sizes = [1, 8, 8, 128], strides = [1, 1, 1, 1]} : vector<1x12x8x128xbf16> to vector<1x8x8x128xbf16>
    %60 = vector.shape_cast %59 : vector<1x8x8x128xbf16> to vector<64x128xbf16>
    %c0_19 = arith.constant 0 : index
    %c896 = arith.constant 896 : index
    %61 = vector.load %arg11[%c0_19, %c896] : memref<64x3200xbf16, #tpu.memory_space<vmem>>, vector<64x128xbf16>
    tpu.vector_store %arg11[%c0_19, %c896], %60 {strides = array<i32>} : memref<64x3200xbf16, #tpu.memory_space<vmem>>, vector<64x128xbf16>,
    %62 = vector.extract_strided_slice %55 {offsets = [0, 2, 0, 0], sizes = [1, 8, 8, 128], strides = [1, 1, 1, 1]} : vector<1x12x8x128xbf16> to vector<1x8x8x128xbf16>
    %63 = vector.shape_cast %62 : vector<1x8x8x128xbf16> to vector<64x128xbf16>
    %c0_20 = arith.constant 0 : index
    %c1536 = arith.constant 1536 : index
    %64 = vector.load %arg11[%c0_20, %c1536] : memref<64x3200xbf16, #tpu.memory_space<vmem>>, vector<64x128xbf16>
    tpu.vector_store %arg11[%c0_20, %c1536], %63 {strides = array<i32>} : memref<64x3200xbf16, #tpu.memory_space<vmem>>, vector<64x128xbf16>,
    %65 = vector.extract_strided_slice %55 {offsets = [0, 3, 0, 0], sizes = [1, 8, 8, 128], strides = [1, 1, 1, 1]} : vector<1x12x8x128xbf16> to vector<1x8x8x128xbf16>
    %66 = vector.shape_cast %65 : vector<1x8x8x128xbf16> to vector<64x128xbf16>
    %c0_21 = arith.constant 0 : index
    %c2176 = arith.constant 2176 : index
    %67 = vector.load %arg11[%c0_21, %c2176] : memref<64x3200xbf16, #tpu.memory_space<vmem>>, vector<64x128xbf16>
    tpu.vector_store %arg11[%c0_21, %c2176], %66 {strides = array<i32>} : memref<64x3200xbf16, #tpu.memory_space<vmem>>, vector<64x128xbf16>,
    %68 = vector.extract_strided_slice %55 {offsets = [0, 4, 0, 0], sizes = [1, 8, 8, 128], strides = [1, 1, 1, 1]} : vector<1x12x8x128xbf16> to vector<1x8x8x128xbf16>
    %69 = vector.shape_cast %68 : vector<1x8x8x128xbf16> to vector<64x128xbf16>
    %c0_22 = arith.constant 0 : index
    %c2816 = arith.constant 2816 : index
    %70 = vector.load %arg11[%c0_22, %c2816] : memref<64x3200xbf16, #tpu.memory_space<vmem>>, vector<64x128xbf16>
    tpu.vector_store %arg11[%c0_22, %c2816], %69 {strides = array<i32>} : memref<64x3200xbf16, #tpu.memory_space<vmem>>, vector<64x128xbf16>,
    %71 = vector.extract_strided_slice %22 {offsets = [0, 0, 3, 0], sizes = [1, 12, 8, 128], strides = [1, 1, 1, 1]} : vector<1x12x12x128xbf16> to vector<1x12x8x128xbf16>
    %72 = vector.extract_strided_slice %71 {offsets = [0, 0, 0, 0], sizes = [1, 8, 8, 128], strides = [1, 1, 1, 1]} : vector<1x12x8x128xbf16> to vector<1x8x8x128xbf16>
    %73 = vector.shape_cast %72 : vector<1x8x8x128xbf16> to vector<64x128xbf16>
    %c0_23 = arith.constant 0 : index
    %c384 = arith.constant 384 : index
    %74 = vector.load %arg11[%c0_23, %c384] : memref<64x3200xbf16, #tpu.memory_space<vmem>>, vector<64x128xbf16>
    tpu.vector_store %arg11[%c0_23, %c384], %73 {strides = array<i32>} : memref<64x3200xbf16, #tpu.memory_space<vmem>>, vector<64x128xbf16>,
    %75 = vector.extract_strided_slice %71 {offsets = [0, 1, 0, 0], sizes = [1, 8, 8, 128], strides = [1, 1, 1, 1]} : vector<1x12x8x128xbf16> to vector<1x8x8x128xbf16>
    %76 = vector.shape_cast %75 : vector<1x8x8x128xbf16> to vector<64x128xbf16>
    %c0_24 = arith.constant 0 : index
    %c1024 = arith.constant 1024 : index
    %77 = vector.load %arg11[%c0_24, %c1024] : memref<64x3200xbf16, #tpu.memory_space<vmem>>, vector<64x128xbf16>
    tpu.vector_store %arg11[%c0_24, %c1024], %76 {strides = array<i32>} : memref<64x3200xbf16, #tpu.memory_space<vmem>>, vector<64x128xbf16>,
    %78 = vector.extract_strided_slice %71 {offsets = [0, 2, 0, 0], sizes = [1, 8, 8, 128], strides = [1, 1, 1, 1]} : vector<1x12x8x128xbf16> to vector<1x8x8x128xbf16>
    %79 = vector.shape_cast %78 : vector<1x8x8x128xbf16> to vector<64x128xbf16>
    %c0_25 = arith.constant 0 : index
    %c1664 = arith.constant 1664 : index
    %80 = vector.load %arg11[%c0_25, %c1664] : memref<64x3200xbf16, #tpu.memory_space<vmem>>, vector<64x128xbf16>
    tpu.vector_store %arg11[%c0_25, %c1664], %79 {strides = array<i32>} : memref<64x3200xbf16, #tpu.memory_space<vmem>>, vector<64x128xbf16>,
    %81 = vector.extract_strided_slice %71 {offsets = [0, 3, 0, 0], sizes = [1, 8, 8, 128], strides = [1, 1, 1, 1]} : vector<1x12x8x128xbf16> to vector<1x8x8x128xbf16>
    %82 = vector.shape_cast %81 : vector<1x8x8x128xbf16> to vector<64x128xbf16>
    %c0_26 = arith.constant 0 : index
    %c2304 = arith.constant 2304 : index
    %83 = vector.load %arg11[%c0_26, %c2304] : memref<64x3200xbf16, #tpu.memory_space<vmem>>, vector<64x128xbf16>
    tpu.vector_store %arg11[%c0_26, %c2304], %82 {strides = array<i32>} : memref<64x3200xbf16, #tpu.memory_space<vmem>>, vector<64x128xbf16>,
    %84 = vector.extract_strided_slice %71 {offsets = [0, 4, 0, 0], sizes = [1, 8, 8, 128], strides = [1, 1, 1, 1]} : vector<1x12x8x128xbf16> to vector<1x8x8x128xbf16>
    %85 = vector.shape_cast %84 : vector<1x8x8x128xbf16> to vector<64x128xbf16>
    %c0_27 = arith.constant 0 : index
    %c2944 = arith.constant 2944 : index
    %86 = vector.load %arg11[%c0_27, %c2944] : memref<64x3200xbf16, #tpu.memory_space<vmem>>, vector<64x128xbf16>
    tpu.vector_store %arg11[%c0_27, %c2944], %85 {strides = array<i32>} : memref<64x3200xbf16, #tpu.memory_space<vmem>>, vector<64x128xbf16>,
    %87 = vector.extract_strided_slice %22 {offsets = [0, 0, 4, 0], sizes = [1, 12, 8, 128], strides = [1, 1, 1, 1]} : vector<1x12x12x128xbf16> to vector<1x12x8x128xbf16>
    %88 = vector.extract_strided_slice %87 {offsets = [0, 0, 0, 0], sizes = [1, 8, 8, 128], strides = [1, 1, 1, 1]} : vector<1x12x8x128xbf16> to vector<1x8x8x128xbf16>
    %89 = vector.shape_cast %88 : vector<1x8x8x128xbf16> to vector<64x128xbf16>
    %c0_28 = arith.constant 0 : index
    %c512 = arith.constant 512 : index
    %90 = vector.load %arg11[%c0_28, %c512] : memref<64x3200xbf16, #tpu.memory_space<vmem>>, vector<64x128xbf16>
    tpu.vector_store %arg11[%c0_28, %c512], %89 {strides = array<i32>} : memref<64x3200xbf16, #tpu.memory_space<vmem>>, vector<64x128xbf16>,
    %91 = vector.extract_strided_slice %87 {offsets = [0, 1, 0, 0], sizes = [1, 8, 8, 128], strides = [1, 1, 1, 1]} : vector<1x12x8x128xbf16> to vector<1x8x8x128xbf16>
    %92 = vector.shape_cast %91 : vector<1x8x8x128xbf16> to vector<64x128xbf16>
    %c0_29 = arith.constant 0 : index
    %c1152 = arith.constant 1152 : index
    %93 = vector.load %arg11[%c0_29, %c1152] : memref<64x3200xbf16, #tpu.memory_space<vmem>>, vector<64x128xbf16>
    tpu.vector_store %arg11[%c0_29, %c1152], %92 {strides = array<i32>} : memref<64x3200xbf16, #tpu.memory_space<vmem>>, vector<64x128xbf16>,
    %94 = vector.extract_strided_slice %87 {offsets = [0, 2, 0, 0], sizes = [1, 8, 8, 128], strides = [1, 1, 1, 1]} : vector<1x12x8x128xbf16> to vector<1x8x8x128xbf16>
    %95 = vector.shape_cast %94 : vector<1x8x8x128xbf16> to vector<64x128xbf16>
    %c0_30 = arith.constant 0 : index
    %c1792 = arith.constant 1792 : index
    %96 = vector.load %arg11[%c0_30, %c1792] : memref<64x3200xbf16, #tpu.memory_space<vmem>>, vector<64x128xbf16>
    tpu.vector_store %arg11[%c0_30, %c1792], %95 {strides = array<i32>} : memref<64x3200xbf16, #tpu.memory_space<vmem>>, vector<64x128xbf16>,
    %97 = vector.extract_strided_slice %87 {offsets = [0, 3, 0, 0], sizes = [1, 8, 8, 128], strides = [1, 1, 1, 1]} : vector<1x12x8x128xbf16> to vector<1x8x8x128xbf16>
    %98 = vector.shape_cast %97 : vector<1x8x8x128xbf16> to vector<64x128xbf16>
    %c0_31 = arith.constant 0 : index
    %c2432 = arith.constant 2432 : index
    %99 = vector.load %arg11[%c0_31, %c2432] : memref<64x3200xbf16, #tpu.memory_space<vmem>>, vector<64x128xbf16>
    tpu.vector_store %arg11[%c0_31, %c2432], %98 {strides = array<i32>} : memref<64x3200xbf16, #tpu.memory_space<vmem>>, vector<64x128xbf16>,
    %100 = vector.extract_strided_slice %87 {offsets = [0, 4, 0, 0], sizes = [1, 8, 8, 128], strides = [1, 1, 1, 1]} : vector<1x12x8x128xbf16> to vector<1x8x8x128xbf16>
    %101 = vector.shape_cast %100 : vector<1x8x8x128xbf16> to vector<64x128xbf16>
    %c0_32 = arith.constant 0 : index
    %c3072 = arith.constant 3072 : index
    %102 = vector.load %arg11[%c0_32, %c3072] : memref<64x3200xbf16, #tpu.memory_space<vmem>>, vector<64x128xbf16>
    tpu.vector_store %arg11[%c0_32, %c3072], %101 {strides = array<i32>} : memref<64x3200xbf16, #tpu.memory_space<vmem>>, vector<64x128xbf16>,
    %c0_33 = arith.constant 0 : index
    %c0_34 = arith.constant 0 : index
    %103 = vector.load %arg11[%c0_33, %c0_34] : memref<64x3200xbf16, #tpu.memory_space<vmem>>, vector<64x3200xbf16>
    %c0_35 = arith.constant 0 : index
    %c0_36 = arith.constant 0 : index
    %104 = vector.load %arg4[%c0_35, %c0_36] : memref<3200x128xbf16, #tpu.memory_space<vmem>>, vector<3200x128xbf16>
    %cst_37 = arith.constant dense<0.000000e+00> : vector<64x128xf32>
    %105 = tpu.matmul %103, %104, %cst_37 {dimension_numbers = #tpu.dot_dimension_numbers<[1], [0], [0], [1], [0, 0, 1, 1], [], []>} : vector<64x3200xbf16>, vector<3200x128xbf16>, vector<64x128xf32> -> vector<64x128xf32>
    %c0_38 = arith.constant 0 : index
    %c0_39 = arith.constant 0 : index
    %106 = vector.load %arg5[%c0_38, %c0_39] : memref<1x128xf32, #tpu.memory_space<vmem>>, vector<1x128xf32>
    %107 = vector.broadcast %106 : vector<1x128xf32> to vector<64x128xf32>
    %108 = arith.addf %105, %107 : vector<64x128xf32>
    %cst_40 = arith.constant 0.000000e+00 : f32
    %109 = vector.broadcast %cst_40 : f32 to vector<64x128xf32>
    %110 = arith.maximumf %108, %109 : vector<64x128xf32>
    %111 = vector.shape_cast %110 : vector<64x128xf32> to vector<32x2x128xf32>
    %112 = vector.extract_strided_slice %111 {offsets = [0, 0, 0], sizes = [32, 1, 128], strides = [1, 1, 1]} : vector<32x2x128xf32> to vector<32x1x128xf32>
    %113 = vector.shape_cast %112 : vector<32x1x128xf32> to vector<32x128xf32>
    %114 = vector.extract_strided_slice %111 {offsets = [0, 1, 0], sizes = [32, 1, 128], strides = [1, 1, 1]} : vector<32x2x128xf32> to vector<32x1x128xf32>
    %115 = vector.shape_cast %114 : vector<32x1x128xf32> to vector<32x128xf32>
    %116 = arith.maximumf %113, %115 : vector<32x128xf32>
    %117 = vector.shape_cast %116 : vector<32x128xf32> to vector<4x2x4x128xf32>
    %118 = vector.extract_strided_slice %117 {offsets = [0, 0, 0, 0], sizes = [4, 1, 4, 128], strides = [1, 1, 1, 1]} : vector<4x2x4x128xf32> to vector<4x1x4x128xf32>
    %119 = vector.shape_cast %118 : vector<4x1x4x128xf32> to vector<4x4x128xf32>
    %120 = vector.extract_strided_slice %117 {offsets = [0, 1, 0, 0], sizes = [4, 1, 4, 128], strides = [1, 1, 1, 1]} : vector<4x2x4x128xf32> to vector<4x1x4x128xf32>
    %121 = vector.shape_cast %120 : vector<4x1x4x128xf32> to vector<4x4x128xf32>
    %122 = arith.maximumf %119, %121 : vector<4x4x128xf32>
    %123 = vector.shape_cast %122 : vector<4x4x128xf32> to vector<1x2048xf32>
    %124 = arith.truncf %123 : vector<1x2048xf32> to vector<1x2048xbf16>
    %c0_41 = arith.constant 0 : index
    %c0_42 = arith.constant 0 : index
    %125 = vector.load %arg6[%c0_41, %c0_42] : memref<2048x512xbf16, #tpu.memory_space<vmem>>, vector<2048x512xbf16>
    %cst_43 = arith.constant dense<0.000000e+00> : vector<1x512xf32>
    %126 = tpu.matmul %124, %125, %cst_43 {dimension_numbers = #tpu.dot_dimension_numbers<[1], [0], [0], [1], [0, 0, 1, 1], [], []>} : vector<1x2048xbf16>, vector<2048x512xbf16>, vector<1x512xf32> -> vector<1x512xf32>
    %c0_44 = arith.constant 0 : index
    %c0_45 = arith.constant 0 : index
    %127 = vector.load %arg7[%c0_44, %c0_45] : memref<1x512xf32, #tpu.memory_space<vmem>>, vector<1x512xf32>
    %128 = arith.addf %126, %127 : vector<1x512xf32>
    %cst_46 = arith.constant 0.000000e+00 : f32
    %129 = vector.broadcast %cst_46 : f32 to vector<1x512xf32>
    %130 = arith.maximumf %128, %129 : vector<1x512xf32>
    %131 = arith.truncf %130 : vector<1x512xf32> to vector<1x512xbf16>
    %c0_47 = arith.constant 0 : index
    %c0_48 = arith.constant 0 : index
    %132 = vector.load %arg8[%c0_47, %c0_48] : memref<512x128xbf16, #tpu.memory_space<vmem>>, vector<512x128xbf16>
    %cst_49 = arith.constant dense<0.000000e+00> : vector<1x128xf32>
    %133 = tpu.matmul %131, %132, %cst_49 {dimension_numbers = #tpu.dot_dimension_numbers<[1], [0], [0], [1], [0, 0, 1, 1], [], []>} : vector<1x512xbf16>, vector<512x128xbf16>, vector<1x128xf32> -> vector<1x128xf32>
    %c0_50 = arith.constant 0 : index
    %c0_51 = arith.constant 0 : index
    %134 = vector.load %arg9[%c0_50, %c0_51] : memref<1x128xf32, #tpu.memory_space<vmem>>, vector<1x128xf32>
    %135 = arith.addf %133, %134 : vector<1x128xf32>
    %136 = vector.shape_cast %135 : vector<1x128xf32> to vector<1x1x128xf32>
    %c0_52 = arith.constant 0 : index
    %c0_53 = arith.constant 0 : index
    %c0_54 = arith.constant 0 : index
    %137 = vector.load %arg10[%c0_52, %c0_53, %c0_54] : memref<1x1x128xf32, #tpu.memory_space<vmem>>, vector<1x1x128xf32>
    tpu.vector_store %arg10[%c0_52, %c0_53, %c0_54], %136 {strides = array<i32>} : memref<1x1x128xf32, #tpu.memory_space<vmem>>, vector<1x1x128xf32>,
    return
  }
  func.func @transform_0(%arg0: i32) -> (i32, i32, i32) {
    %c0_i32 = arith.constant 0 : i32
    %c0_i32_0 = arith.constant 0 : i32
    %c0_i32_1 = arith.constant 0 : i32
    return %arg0, %c0_i32, %c0_i32_0 : i32, i32, i32
  }
  func.func @transform_1(%arg0: i32) -> (i32, i32) {
    %c0_i32 = arith.constant 0 : i32
    %c0_i32_0 = arith.constant 0 : i32
    %c0_i32_1 = arith.constant 0 : i32
    return %c0_i32, %c0_i32_0 : i32, i32
  }
  func.func @transform_2(%arg0: i32) -> (i32, i32) {
    %c0_i32 = arith.constant 0 : i32
    %c0_i32_0 = arith.constant 0 : i32
    %c0_i32_1 = arith.constant 0 : i32
    return %c0_i32, %c0_i32_0 : i32, i32
  }
  func.func @transform_3(%arg0: i32) -> (i32, i32) {
    %c0_i32 = arith.constant 0 : i32
    %c0_i32_0 = arith.constant 0 : i32
    %c0_i32_1 = arith.constant 0 : i32
    return %c0_i32, %c0_i32_0 : i32, i32
  }
  func.func @transform_4(%arg0: i32) -> (i32, i32) {
    %c0_i32 = arith.constant 0 : i32
    %c0_i32_0 = arith.constant 0 : i32
    %c0_i32_1 = arith.constant 0 : i32
    return %c0_i32, %c0_i32_0 : i32, i32
  }
  func.func @transform_5(%arg0: i32) -> (i32, i32) {
    %c0_i32 = arith.constant 0 : i32
    %c0_i32_0 = arith.constant 0 : i32
    %c0_i32_1 = arith.constant 0 : i32
    return %c0_i32, %c0_i32_0 : i32, i32
  }
  func.func @transform_6(%arg0: i32) -> (i32, i32) {
    %c0_i32 = arith.constant 0 : i32
    %c0_i32_0 = arith.constant 0 : i32
    %c0_i32_1 = arith.constant 0 : i32
    return %c0_i32, %c0_i32_0 : i32, i32
  }
  func.func @transform_7(%arg0: i32) -> (i32, i32) {
    %c0_i32 = arith.constant 0 : i32
    %c0_i32_0 = arith.constant 0 : i32
    %c0_i32_1 = arith.constant 0 : i32
    return %c0_i32, %c0_i32_0 : i32, i32
  }
  func.func @transform_8(%arg0: i32) -> (i32, i32) {
    %c0_i32 = arith.constant 0 : i32
    %c0_i32_0 = arith.constant 0 : i32
    %c0_i32_1 = arith.constant 0 : i32
    return %c0_i32, %c0_i32_0 : i32, i32
  }
  func.func @transform_9(%arg0: i32) -> (i32, i32, i32) {
    %c0_i32 = arith.constant 0 : i32
    %c0_i32_0 = arith.constant 0 : i32
    %c0_i32_1 = arith.constant 0 : i32
    return %arg0, %c0_i32, %c0_i32_0 : i32, i32, i32
  }
}

</mosaic_0001>

<bundles_post_ra>
// kernel: fedavg_cnn_forward.1
= control target key start
LH: loop header
LB: loop body
LE: loop exit
PB: predicated region body
PF: predicated region fallthrough
CT: control target
= control target key end

     0   :  { %14 = vsyncpa [#allocation4], 0  ;;  %s22150_s0 = inlined_call_operand.vmem [shape: bf16[2,576,32], index: 0, kind: input, shape index: {}]   ;;  %s22151_s1 = inlined_call_operand.vmem [shape: bf16[32,128], index: 1, kind: input, shape index: {}]   ;;  %s22152_s2 = inlined_call_operand.vmem [shape: f32[1,128], index: 2, kind: input, shape index: {}]   ;;  %s22153_s3 = inlined_call_operand.vmem [shape: bf16[3200,128], index: 3, kind: input, shape index: {}]   ;;  %s22154_s4 = inlined_call_operand.vmem [shape: f32[1,128], index: 4, kind: input, shape index: {}]   ;;  %s22155_s5 = inlined_call_operand.vmem [shape: bf16[2048,512], index: 5, kind: input, shape index: {}]   ;;  %s22156_s6 = inlined_call_operand.vmem [shape: f32[1,512], index: 6, kind: input, shape index: {}]   ;;  %s22157_s7 = inlined_call_operand.vmem [shape: bf16[512,128], index: 7, kind: input, shape index: {}]   ;;  %s22158_s8 = inlined_call_operand.vmem [shape: f32[1,128], index: 8, kind: input, shape index: {}]   ;;  %s22159_s9 = inlined_call_operand.hbm [shape: f32[2,1,128], index: 9, kind: output, shape index: {}]  }
   0x1   :  { %16 = vsyncpa [#allocation4 + $0x1], 0  ;;  %s17222_s30 = smov 0   ;;  %s17224_s10 = smov 0  }
   0x2   :  { %s17226_s11 = smov 0   ;;  %s17228_s12 = smov 0  }
   0x3 LB: > { %s17243_s13 = sadd.s32 4294967295, %s17168_s12   ;;  %s13568_s14 = sadd.s32 4294967294, %s17168_s12   ;;  %s17168_s12 = sphi %s17228_s12, %s22175_s12   ;;  %s17164_s11 = sphi %s17226_s11, %s22174_s11   ;;  %s17160_s10 = sphi %s17224_s10, %s22173_s10   ;;  %s17156_s30 = sphi %s17222_s30, %s22172_s30  }
   0x4   : > { %s17247_s15 = sadd.s32 1, %s17168_s12   ;;  %s223_s16 = sadd.s32 1, %s17164_s11 }
   0x5   : > { %s220_s17 = ssub.s32 %s17168_s12, %s17247_s15  ;;  %p233_p0 = scmp.ne.s32.totalorder %s17164_s11, %s17160_s10 }
   0x6   : > { %p221_p1 = scmp.eq.s32.totalorder %s220_s17, 0  ;;  %p234_p2 = scmp.eq.s32.totalorder %s17243_s13, 1 }
   0x7   : > { %p239_p3 = scmp.ne.s32.totalorder %s17160_s10, %s17156_s30  ;;  %p240_p4 = scmp.eq.s32.totalorder %s13568_s14, 1 }
   0x8   : > { %s17258_s18 = scalar_select %p221_p1, %s17164_s11, %s223_s16  }
   0x9   : > { %p17260_p5 = por %p234_p2, %p233_p0  ;;  %p17264_p6 = por %p240_p4, %p239_p3 }
   0xa   : > { %p13571_p7 = scmp.ge.s32.totalorder %s17168_s12, 1  ;;  %p290_p8 = scmp.lt.s32.totalorder %s17168_s12, 3 }
   0xc   : > { %p291_p9 = pnand %p13571_p7, %p290_p8 }
   0xd   : > { %p325_p10 = scmp.lt.s32.totalorder (!%p291_p9), %s17243_s13, 1 }
   0xe   : > { %294 = sbr.rel (%p291_p9) target bundleno = 1963 (0x7ab), region = 56 }
  0x13   : > { %v15915_v0 = vld [vmem:[%s22151_s1 + $0x8] sm:$0xff]   ;;  %v15916_v1 = vld [vmem:[%s22151_s1] sm:$0xff]   ;;  %vm606_vm0 = vcmask 261120   ;;  %s326_s25 = scalar_select %p325_p10, %s17243_s13, 1  ;;  %v15953_v38 = vld [vmem:[%s22153_s3 + $0x78] sm:$0xff]   ;;  %v1184_v42 = vlaneseq  ;;  %vm4389_vm1 = vcmask 1041409  }
  0x14   : > { %15774 = vmatprep.subr.bf16.mxu0 %v15915_v0  ;;  %v15954_v39 = vld [vmem:[%s22153_s3 + $0x38] sm:$0xff]   ;;  %15238 = vmatprep.subr.bf16.mxu1 %v15953_v38  ;;  %v17170_v40 = vmov 1983009808   ;;  %v17364_v43 = vld [vmem:[%s22152_s2] ss:$0 sm:$0xff]  ;;  %v15955_v52 = vld [vmem:[%s22153_s3 + $0x70] sm:$0xff]  }
  0x15   : > { %15775 = vmatpush3.bf16.msra.mxu0 %v15915_v0  ;;  %s15874_s26 = smul.u32 288, %s326_s25  ;;  %15239 = vmatpush3.bf16.msra.mxu1 %v15954_v39  ;;  %v1182_v41 = vunpack.c.l.s4 %v17170_v40  ;;  %v17366_v45 = vshrl.u32 %v1184_v42, 7  ;;  %v15956_v54 = vld [vmem:[%s22153_s3 + $0x30] sm:$0xff]   ;;  %vm4392_vm2 = vcmask 1042434   ;;  %vm4395_vm3 = vcmask 1043459  }
  0x16   : > { %15776 = vmatprep.subr.bf16.mxu0 %v15916_v1  ;;  %15240 = vmatprep.subr.bf16.mxu1 %v15955_v52  ;;  %vm4398_vm4 = vcmask 1044484   ;;  %vm4401_vm5 = vcmask 1045509   ;;  %vm4404_vm6 = vcmask 1046534   ;;  %vm4407_vm7 = vcmask 1047559  }
  0x17   : > { %s17281_s29 = scalar_lea.vmem %s22150_s0, %s15874_s26  ;;  %v1183_v44 = vunpack.c.0.s8 %v1182_v41  ;;  %vm9359_vm8 = vcmask 1040384   ;;  %s323_s26 = sand.u32 1, %s17160_s10  }
  0x18   : > { %v15917_v2 = vld [vmem:[%s17281_s29] sm:$0xff]   ;;  %v15918_v3 = vld [vmem:[%s17281_s29 + $0x8] sm:$0xff]   ;;  %v15919_v4 = vld [vmem:[%s17281_s29 + $0x10] sm:$0xff]   ;;  %s324_s14 = scalar_lea.vmem [#allocation3], %s323_s26  ;;  %s13501_s23 = scalar_lea.sflag [#allocation4], %s323_s26 }
  0x19   : > { %15777 = vmatpush3.bf16.msra.mxu0 %v15916_v1  ;;  %15778 = vmatprep.mubr.msk.bf16.mxu0 %vm606_vm0, %v15917_v2  ;;  %v15920_v5 = vld [vmem:[%s17281_s29 + $0x18] sm:$0xff]   ;;  %v15921_v6 = vld [vmem:[%s17281_s29 + $0x20] sm:$0xff]   ;;  %v15922_v7 = vld [vmem:[%s17281_s29 + $0x28] sm:$0xff]   ;;  %v17370_v48 = vsub.s32 %v1183_v44, %v17366_v45  ;;  %s13513_s16 = sshll.u32 %s324_s14, 4  ;;  %s13514_s16 = int_to_ptr.vmem [resolvable:$true] %s13513_s16 }
  0x1a   : > { %v15923_v8 = vld [vmem:[%s17281_s29 + $0x30] sm:$0xff]   ;;  %v15924_v9 = vld [vmem:[%s17281_s29 + $0x38] sm:$0xff]   ;;  %v15925_v10 = vld [vmem:[%s17281_s29 + $0x40] sm:$0xff]   ;;  %15241 = vmatpush3.bf16.msra.mxu1 %v15956_v54  ;;  %s17108_s24 = scalar_lea.vmem %s13514_s16, 16 }
  0x1b   : > { %v15926_v11 = vld [vmem:[%s17281_s29 + $0x48] sm:$0xff]   ;;  %v15927_v12 = vld [vmem:[%s17281_s29 + $0x50] sm:$0xff]   ;;  %v15928_v13 = vld [vmem:[%s17281_s29 + $0x58] sm:$0xff]   ;;  %p17109_p11 = scmp.ne.s32.totalorder %s13514_s16, %s17108_s24 }
  0x1c   : > { %15779 = vmatmul.mubr.msk.bf16.vlgmr.msra.gmra.mxu0 %vm606_vm0, %v15918_v3  ;;  %v15929_v14 = vld [vmem:[%s17281_s29 + $0x60] sm:$0xff]   ;;  %v15930_v15 = vld [vmem:[%s17281_s29 + $0x68] sm:$0xff]   ;;  %v15931_v16 = vld [vmem:[%s17281_s29 + $0x70] sm:$0xff]  }
  0x1d   : > { %15782 = vmatprep.mubr.msk.bf16.mxu0 %vm606_vm0, %v15919_v4  ;;  %v15932_v17 = vld [vmem:[%s17281_s29 + $0x78] sm:$0xff]   ;;  %v15933_v18 = vld [vmem:[%s17281_s29 + $0x80] sm:$0xff]   ;;  %v15934_v19 = vld [vmem:[%s17281_s29 + $0x88] sm:$0xff]   ;;  %p17110_p12 = pnand %p17109_p11, %p17260_p5 }
  0x1e   : > { %v15935_v20 = vld [vmem:[%s17281_s29 + $0x90] sm:$0xff]   ;;  %v15936_v21 = vld [vmem:[%s17281_s29 + $0x98] sm:$0xff]   ;;  %v15937_v22 = vld [vmem:[%s17281_s29 + $0xa0] sm:$0xff]  }
  0x1f   : > { %v15938_v23 = vld [vmem:[%s17281_s29 + $0xa8] sm:$0xff]   ;;  %v15939_v24 = vld [vmem:[%s17281_s29 + $0xb0] sm:$0xff]   ;;  %v15940_v25 = vld [vmem:[%s17281_s29 + $0xb8] sm:$0xff]   ;;  %p17111_p13 = pneg %p17110_p12 }
  0x20   : > { %v15941_v26 = vld [vmem:[%s17281_s29 + $0xc0] sm:$0xff]   ;;  %v15942_v27 = vld [vmem:[%s17281_s29 + $0xc8] sm:$0xff]   ;;  %v15943_v28 = vld [vmem:[%s17281_s29 + $0xd0] sm:$0xff]  }
  0x21   : > { %v15944_v29 = vld [vmem:[%s17281_s29 + $0xd8] sm:$0xff]   ;;  %v15945_v30 = vld [vmem:[%s17281_s29 + $0xe0] sm:$0xff]   ;;  %v15946_v31 = vld [vmem:[%s17281_s29 + $0xe8] sm:$0xff]  }
  0x22   : > { %v15947_v32 = vld [vmem:[%s17281_s29 + $0xf0] sm:$0xff]   ;;  %v15948_v33 = vld [vmem:[%s17281_s29 + $0xf8] sm:$0xff]   ;;  %v15949_v34 = vld [vmem:[%s17281_s29 + $0x100] sm:$0xff]  }
  0x23   : > { %v15950_v35 = vld [vmem:[%s17281_s29 + $0x108] sm:$0xff]   ;;  %v15951_v36 = vld [vmem:[%s17281_s29 + $0x110] sm:$0xff]   ;;  %v15952_v37 = vld [vmem:[%s17281_s29 + $0x118] sm:$0xff]   ;;  %s15053_s29 = sshll.u32 %s17243_s13, 4  ;;  %s17171_s13 = smov [#allocation3]  }
  0x24   : > { %15783 = vmatmul.mubr.msk.bf16.gmra.mxu0 %vm606_vm0, %v15920_v5  ;;  %vm20464_vm9 = vmpackc.low %vm9359_vm8, %vm9359_vm8  ;;  %s22115_s22 = scalar_lea.hbm %s22159_s9, %s15053_s29  ;;  %s17112_s25 = sshll.u32 %s17171_s13, 4  ;;  %s17113_s25 = int_to_ptr.vmem [resolvable:$false] %s17112_s25 }
  0x25   : > { %15786 = vmatprep.mubr.msk.bf16.mxu0 %vm606_vm0, %v15921_v6  ;;  %s17114_s27 = scalar_lea.vmem %s17113_s25, 32  ;;  %p17115_p0 = scmp.lt.s32.totalorder %s13514_s16, %s17113_s25 }
  0x26   : > { %p17116_p1 = scmp.lt.s32.totalorder %s17114_s27, %s17108_s24 }
  0x28   : > { %p17117_p2 = por %p17116_p1, %p17115_p0 }
  0x2a   : > { %p17118_p3 = pnand %p17117_p2, %p17111_p13 }
  0x2c   : > { %15787 = vmatmul.mubr.msk.bf16.gmra.mxu0 %vm606_vm0, %v15922_v7 }
  0x2d   : > { %15790 = vmatprep.mubr.msk.bf16.mxu0 %vm606_vm0, %v15923_v8 }
  0x34   : > { %15791 = vmatmul.mubr.msk.bf16.gmra.mxu0 %vm606_vm0, %v15924_v9 }
  0x35   : > { %15794 = vmatprep.mubr.msk.bf16.mxu0 %vm606_vm0, %v15925_v10 }
  0x3c   : > { %15795 = vmatmul.mubr.msk.bf16.gmra.mxu0 %vm606_vm0, %v15926_v11 }
  0x3d   : > { %15798 = vmatprep.mubr.msk.bf16.mxu0 %vm606_vm0, %v15927_v12 }
  0x44   : > { %15799 = vmatmul.mubr.msk.bf16.gmra.mxu0 %vm606_vm0, %v15928_v13 }
  0x45   : > { %15802 = vmatprep.mubr.msk.bf16.mxu0 %vm606_vm0, %v15929_v14 }
  0x4c   : > { %15803 = vmatmul.mubr.msk.bf16.gmra.mxu0 %vm606_vm0, %v15930_v15 }
  0x4d   : > { %15806 = vmatprep.mubr.msk.bf16.mxu0 %vm606_vm0, %v15931_v16 }
  0x54   : > { %15807 = vmatmul.mubr.msk.bf16.gmra.mxu0 %vm606_vm0, %v15932_v17 }
  0x55   : > { %15810 = vmatprep.mubr.msk.bf16.mxu0 %vm606_vm0, %v15933_v18 }
  0x5c   : > { %15811 = vmatmul.mubr.msk.bf16.gmra.mxu0 %vm606_vm0, %v15934_v19 }
  0x5d   : > { %15814 = vmatprep.mubr.msk.bf16.mxu0 %vm606_vm0, %v15935_v20 }
  0x64   : > { %15815 = vmatmul.mubr.msk.bf16.gmra.mxu0 %vm606_vm0, %v15936_v21 }
  0x65   : > { %15818 = vmatprep.mubr.msk.bf16.mxu0 %vm606_vm0, %v15937_v22 }
  0x6c   : > { %15819 = vmatmul.mubr.msk.bf16.gmra.mxu0 %vm606_vm0, %v15938_v23 }
  0x6d   : > { %15822 = vmatprep.mubr.msk.bf16.mxu0 %vm606_vm0, %v15939_v24 }
  0x74   : > { %15823 = vmatmul.mubr.msk.bf16.gmra.mxu0 %vm606_vm0, %v15940_v25 }
  0x75   : > { %15826 = vmatprep.mubr.msk.bf16.mxu0 %vm606_vm0, %v15941_v26 }
  0x7c   : > { %15827 = vmatmul.mubr.msk.bf16.gmra.mxu0 %vm606_vm0, %v15942_v27 }
  0x7d   : > { %15830 = vmatprep.mubr.msk.bf16.mxu0 %vm606_vm0, %v15943_v28 }
  0x84   : > { %15831 = vmatmul.mubr.msk.bf16.gmra.mxu0 %vm606_vm0, %v15944_v29 }
  0x85   : > { %15834 = vmatprep.mubr.msk.bf16.mxu0 %vm606_vm0, %v15945_v30 }
  0x8c   : > { %15835 = vmatmul.mubr.msk.bf16.gmra.mxu0 %vm606_vm0, %v15946_v31 }
  0x8d   : > { %15838 = vmatprep.mubr.msk.bf16.mxu0 %vm606_vm0, %v15947_v32 }
  0x94   : > { %15839 = vmatmul.mubr.msk.bf16.gmra.mxu0 %vm606_vm0, %v15948_v33 }
  0x95   : > { %15842 = vmatprep.mubr.msk.bf16.mxu0 %vm606_vm0, %v15949_v34 }
  0x9c   : > { %15843 = vmatmul.mubr.msk.bf16.gmra.mxu0 %vm606_vm0, %v15950_v35 }
  0x9d   : > { %15846 = vmatprep.mubr.msk.bf16.mxu0 %vm606_vm0, %v15951_v36 }
  0xa4   : > { %15847 = vmatmul.mubr.msk.bf16.gmra.mxu0 %vm606_vm0, %v15952_v37 }
  0xdc   : > { %v15780_v46 = vpop.f32.mrf.mxu0 }
  0xdd   : > { %v758_v47 = vadd.f32 %v15780_v46, %v17364_v43 }
  0xde   : > { %v749_v49 = vpop.f32.mrf.mxu0 }
  0xdf   : > { %v1038_v50 = vmax.f32 %v758_v47, 0.0  ;;  %v750_v51 = vadd.f32 %v17364_v43, %v749_v49 }
  0xe0   : > { %v15781_v53 = vpop.f32.mrf.mxu0 }
  0xe1   : > { %v1214_v55 = vcombine.high %v1038_v50, %v1038_v50  ;;  %v1221_v56 = vrot.slane %v1038_v50, %v17370_v48  ;;  %v1036_v57 = vmax.f32 %v750_v51, 0.0  ;;  %v761_v58 = vadd.f32 %v15781_v53, %v17364_v43 }
  0xe2   : > { %v752_v59 = vpop.f32.mrf.mxu0 }
  0xe3   : > { %v1228_v60 = vrot.slane %v1214_v55, %v17370_v48  ;;  %v1229_v61 = vcombine.high %v1221_v56, %v1221_v56  ;;  %v13656_v62 = vrot.slane %v1221_v56, 9  ;;  %v1180_v63 = vcombine.high %v1036_v57, %v1036_v57 }
  0xe4   : > { %v1187_v0 = vrot.slane %v1036_v57, %v17370_v48  ;;  %v1039_v1 = vmax.f32 %v761_v58, 0.0  ;;  %v753_v2 = vadd.f32 %v17364_v43, %v752_v59  ;;  %v15784_v3 = vpop.f32.mrf.mxu0 }
  0xe5   : > { %v1230_v4 = vcombine.high %v1228_v60, %v1228_v60  ;;  %v13657_v5 = vrot.slane %v1229_v61, 9  ;;  %v13658_v6 = vrot.slane %v1228_v60, 9  ;;  %v17384_v7 = vmax.f32 %v1221_v56, %v13656_v62 }
  0xe6   : > { %v1194_v8 = vrot.slane %v1180_v63, %v17370_v48  ;;  %v1195_v9 = vcombine.high %v1187_v0, %v1187_v0  ;;  %v13648_v10 = vrot.slane %v1187_v0, 9  ;;  %v1231_v11 = vcombine.high %v1039_v1, %v1039_v1  ;;  %v765_v12 = vpop.f32.mrf.mxu0 }
  0xe7   : > { %v13659_v13 = vrot.slane %v1230_v4, 9  ;;  %v17387_v14 = vmax.f32 %v1229_v61, %v13657_v5  ;;  %v17389_v15 = vmax.f32 %v1228_v60, %v13658_v6  ;;  %v1238_v16 = vrot.slane %v1039_v1, %v17370_v48 }
  0xe8   : > { %v1196_v17 = vcombine.high %v1194_v8, %v1194_v8  ;;  %v13649_v18 = vrot.slane %v1195_v9, 9  ;;  %v13650_v19 = vrot.slane %v1194_v8, 9  ;;  %v3556_v20 = vmax.f32 %v1187_v0, %v13648_v10  ;;  %v15785_v21 = vpop.f32.mrf.mxu0 }
  0xe9   : > { %v17392_v22 = vmax.f32 %v1230_v4, %v13659_v13  ;;  %v1245_v23 = vrot.slane %v1231_v11, %v17370_v48  ;;  %v1246_v24 = vcombine.high %v1238_v16, %v1238_v16  ;;  %v13660_v25 = vrot.slane %v1238_v16, 9 }
  0xea   : > { %v13651_v26 = vrot.slane %v1196_v17, 9  ;;  %v3557_v27 = vmax.f32 %v1195_v9, %v13649_v18  ;;  %v3558_v28 = vmax.f32 %v1194_v8, %v13650_v19  ;;  %v1037_v29 = vmax.f32 %v753_v2, 0.0  ;;  %v17395_v30 = vpop.f32.mrf.mxu0 }
  0xeb   : > { %v1247_v31 = vcombine.high %v1245_v23, %v1245_v23  ;;  %v13661_v32 = vrot.slane %v1246_v24, 9  ;;  %v13662_v33 = vrot.slane %v1245_v23, 9  ;;  %v3568_v34 = vmax.f32 %v1238_v16, %v13660_v25 }
  0xec   : > { %v3559_v35 = vmax.f32 %v1196_v17, %v13651_v26  ;;  %v1197_v36 = vcombine.high %v1037_v29, %v1037_v29  ;;  %v1204_v37 = vrot.slane %v1037_v29, %v17370_v48  ;;  %v774_v38 = vadd.f32 %v15784_v3, %v17364_v43  ;;  %v15788_v44 = vpop.f32.mrf.mxu0 }
  0xed   : > { %v13663_v39 = vrot.slane %v1247_v31, 9  ;;  %v3569_v40 = vmax.f32 %v1246_v24, %v13661_v32  ;;  %v3570_v41 = vmax.f32 %v1245_v23, %v13662_v33  ;;  %v3844_v42 = vmax.f32 %v3556_v20, %v3568_v34 }
  0xee   : > { %v1211_v46 = vrot.slane %v1197_v36, %v17370_v48  ;;  %v1212_v47 = vcombine.high %v1204_v37, %v1204_v37  ;;  %v13652_v49 = vrot.slane %v1204_v37, 9  ;;  %v1042_v50 = vmax.f32 %v774_v38, 0.0  ;;  %v781_v63 = vpop.f32.mrf.mxu0 }
  0xef   : > { %v3571_v51 = vmax.f32 %v1247_v31, %v13663_v39  ;;  %v3845_v52 = vmax.f32 %v3557_v27, %v3569_v40  ;;  %v3846_v53 = vmax.f32 %v3558_v28, %v3570_v41  ;;  %v15056_v54 = vpack.c.bf16 %v3844_v42, %v3844_v42 }
  0xf0   : > { %v1213_v55 = vcombine.high %v1211_v46, %v1211_v46  ;;  %v13653_v56 = vrot.slane %v1212_v47, 9  ;;  %v13654_v57 = vrot.slane %v1211_v46, 9  ;;  %v17400_v58 = vmax.f32 %v1204_v37, %v13652_v49  ;;  %v15789_v20 = vpop.f32.mrf.mxu0 }
  0xf1   : > { %v3847_v59 = vmax.f32 %v3559_v35, %v3571_v51  ;;  %v15057_v60 = vpack.c.bf16 %v3845_v52, %v3845_v52  ;;  %v15058_v61 = vpack.c.bf16 %v3846_v53, %v3846_v53  ;;  %v4324_v62 = vunpack.c.l.b16 %v15056_v54  ;;  %v15958_v52 = vld [vmem:[%s22153_s3 + $0x28] sm:$0xff]  }
  0xf2   : > { %v13655_v0 = vrot.slane %v1213_v55, 9  ;;  %v17402_v1 = vmax.f32 %v1212_v47, %v13653_v56  ;;  %v17404_v2 = vmax.f32 %v1211_v46, %v13654_v57  ;;  %v1282_v3 = vcombine.high %v1042_v50, %v1042_v50  ;;  %v784_v38 = vpop.f32.mrf.mxu0  ;;  %v15957_v46 = vld [vmem:[%s22153_s3 + $0x68] sm:$0xff]  }
  0xf3   : > { %v15059_v4 = vpack.c.bf16 %v3847_v59, %v3847_v59  ;;  %v4325_v5 = vunpack.c.l.b16 %v15057_v60  ;;  %v4326_v6 = vunpack.c.l.b16 %v15058_v61  ;;  %v1289_v8 = vrot.slane %v1042_v50, %v17370_v48  ;;  %15242 = vmatprep.subr.bf16.mxu1 %v15957_v46  ;;  %v15959_v60 = vld [vmem:[%s22153_s3 + $0x278] sm:$0xff]  }
  0xf4   : > { %v17407_v9 = vmax.f32 %v1213_v55, %v13655_v0  ;;  %v1296_v10 = vrot.slane %v1282_v3, %v17370_v48  ;;  %v766_v11 = vadd.f32 %v17364_v43, %v765_v12  ;;  %v777_v13 = vadd.f32 %v15785_v21, %v17364_v43  ;;  %15243 = vmatpush3.bf16.msra.mxu1 %v15958_v52 }
  0xf5   : > { %v17412_v16 = vunpack.c.l.b16 %v15059_v4  ;;  %v4388_v17 = vrot.slane %v4325_v5, 7  ;;  %v4391_v18 = vrot.slane %v4326_v6, 6  ;;  %v4787_v19 = vrot.slane %v4326_v6, 7  ;;  %15398 = vmatprep.subr.bf16.mxu0 %v15959_v60 }
  0xf6   : > { %v1297_v23 = vcombine.high %v1289_v8, %v1289_v8  ;;  %v1298_v24 = vcombine.high %v1296_v10, %v1296_v10  ;;  %v13672_v25 = vrot.slane %v1289_v8, 9  ;;  %v13674_v26 = vrot.slane %v1296_v10, 9 }
  0xf7   : > { %v4390_v27 = vsel %vm4389_vm1, %v4388_v17, %v4324_v62  ;;  %v4394_v28 = vrot.slane %v17412_v16, 5  ;;  %v4788_v29 = vsel %vm4389_vm1, %v4787_v19, %v4325_v5  ;;  %v4789_v12 = vrot.slane %v17412_v16, 6 }
  0xf8   : > { %v4393_v21 = vsel %vm4392_vm2, %v4391_v18, %v4390_v27  ;;  %v5067_v31 = vrot.slane %v17412_v16, 7  ;;  %v13673_v32 = vrot.slane %v1297_v23, 9  ;;  %v13675_v33 = vrot.slane %v1298_v24, 9 }
  0xf9   : > { %v17421_v34 = vsel %vm4395_vm3, %v4394_v28, %v4393_v21  ;;  %v17424_v35 = vsel %vm4392_vm2, %v4789_v12, %v4788_v29  ;;  %v17426_v36 = vmax.f32 %v1289_v8, %v13672_v25  ;;  %v17428_v37 = vmax.f32 %v1296_v10, %v13674_v26 }
  0xfa   : > { %v17431_v39 = vsel %vm4389_vm1, %v5067_v31, %v4326_v6  ;;  %v17433_v40 = vmax.f32 %v1297_v23, %v13673_v32  ;;  %v17435_v41 = vmax.f32 %v1298_v24, %v13675_v33  ;;  %v1040_v42 = vmax.f32 %v766_v11, 0.0 }
  0xfb   : > { %v1043_v47 = vmax.f32 %v777_v13, 0.0  ;;  %v769_v49 = vadd.f32 %v17364_v43, %v17395_v30  ;;  %v790_v50 = vadd.f32 %v15788_v44, %v17364_v43  ;;  %v782_v51 = vadd.f32 %v17364_v43, %v781_v63 }
  0xfc   : > { %v1248_v53 = vcombine.high %v1040_v42, %v1040_v42  ;;  %v1255_v54 = vrot.slane %v1040_v42, %v17370_v48  ;;  %v17449_v55 = vadd.f32 %v15789_v20, %v17364_v43  ;;  %v17452_v56 = vadd.f32 %v17364_v43, %v784_v38 }
  0xfd   : > { %v1299_v57 = vcombine.high %v1043_v47, %v1043_v47  ;;  %v1306_v30 = vrot.slane %v1043_v47, %v17370_v48  ;;  %v1041_v44 = vmax.f32 %v769_v49, 0.0  ;;  %v17455_v59 = vmax.f32 %v790_v50, 0.0 }
  0xfe   : > { %v1262_v61 = vrot.slane %v1248_v53, %v17370_v48  ;;  %v1263_v62 = vcombine.high %v1255_v54, %v1255_v54  ;;  %v13664_v63 = vrot.slane %v1255_v54, 9  ;;  %v17461_v0 = vmax.f32 %v782_v51, 0.0 }
  0xff   : > { %v1313_v43 = vrot.slane %v1299_v57, %v17370_v48  ;;  %v1314_v3 = vcombine.high %v1306_v30, %v1306_v30  ;;  %v13676_v4 = vrot.slane %v1306_v30, 9  ;;  %v1265_v5 = vcombine.high %v1041_v44, %v1041_v44 }
 0x100   : > { %v1264_v6 = vcombine.high %v1262_v61, %v1262_v61  ;;  %v13665_v8 = vrot.slane %v1263_v62, 9  ;;  %v13666_v10 = vrot.slane %v1262_v61, 9  ;;  %v3572_v11 = vmax.f32 %v1255_v54, %v13664_v63 }
 0x101   : > { %v1315_v13 = vcombine.high %v1313_v43, %v1313_v43  ;;  %v13677_v17 = vrot.slane %v1314_v3, 9  ;;  %v13678_v18 = vrot.slane %v1313_v43, 9  ;;  %v17464_v19 = vmax.f32 %v1306_v30, %v13676_v4 }
 0x102   : > { %v13667_v20 = vrot.slane %v1264_v6, 9  ;;  %v3573_v23 = vmax.f32 %v1263_v62, %v13665_v8  ;;  %v3574_v24 = vmax.f32 %v1262_v61, %v13666_v10  ;;  %v3848_v25 = vmax.f32 %v17400_v58, %v3572_v11 }
 0x103   : > { %v13679_v26 = vrot.slane %v1315_v13, 9  ;;  %v17467_v27 = vmax.f32 %v1314_v3, %v13677_v17  ;;  %v17469_v28 = vmax.f32 %v1313_v43, %v13678_v18  ;;  %v1272_v29 = vrot.slane %v1041_v44, %v17370_v48 }
 0x104   : > { %v3575_v12 = vmax.f32 %v1264_v6, %v13667_v20  ;;  %v3849_v21 = vmax.f32 %v17402_v1, %v3573_v23  ;;  %v3850_v31 = vmax.f32 %v17404_v2, %v3574_v24  ;;  %v15060_v32 = vpack.c.bf16 %v3848_v25, %v3848_v25  ;;  %v15960_v1 = vld [vmem:[%s22153_s3 + $0x60] sm:$0xff]   ;;  %v15961_v2 = vld [vmem:[%s22153_s3 + $0x238] sm:$0xff]  }
 0x105   : > { %v17474_v33 = vmax.f32 %v1315_v13, %v13679_v26  ;;  %v1279_v38 = vrot.slane %v1265_v5, %v17370_v48  ;;  %v1280_v58 = vcombine.high %v1272_v29, %v1272_v29  ;;  %v13668_v42 = vrot.slane %v1272_v29, 9  ;;  %15244 = vmatprep.subr.bf16.mxu1 %v15960_v1  ;;  %15399 = vmatpush3.bf16.msra.mxu0 %v15961_v2 }
 0x106   : > { %v3851_v46 = vmax.f32 %v17407_v9, %v3575_v12  ;;  %v15061_v47 = vpack.c.bf16 %v3849_v21, %v3849_v21  ;;  %v15062_v49 = vpack.c.bf16 %v3850_v31, %v3850_v31  ;;  %v4328_v50 = vunpack.c.l.b16 %v15060_v32  ;;  %v15962_v9 = vld [vmem:[%s22153_s3 + $0x20] sm:$0xff]  }
 0x107   : > { %v1281_v51 = vcombine.high %v1279_v38, %v1279_v38  ;;  %v13669_v52 = vrot.slane %v1280_v58, 9  ;;  %v13670_v53 = vrot.slane %v1279_v38, 9  ;;  %v3576_v54 = vmax.f32 %v1272_v29, %v13668_v42  ;;  %15245 = vmatpush3.bf16.msra.mxu1 %v15962_v9 }
 0x108   : > { %v15063_v57 = vpack.c.bf16 %v3851_v46, %v3851_v46  ;;  %v4329_v30 = vunpack.c.l.b16 %v15061_v47  ;;  %v4330_v44 = vunpack.c.l.b16 %v15062_v49  ;;  %v4397_v60 = vrot.slane %v4328_v50, 4 }
 0x109   : > { %v4791_v61 = vrot.slane %v4328_v50, 5  ;;  %v5069_v62 = vrot.slane %v4328_v50, 6  ;;  %v5347_v63 = vrot.slane %v4328_v50, 7  ;;  %v13671_v43 = vrot.slane %v1281_v51, 9 }
 0x10a   : > { %v4331_v3 = vunpack.c.l.b16 %v15063_v57  ;;  %v4399_v4 = vsel %vm4398_vm4, %v4397_v60, %v17421_v34  ;;  %v4400_v5 = vrot.slane %v4329_v30, 3  ;;  %v4403_v6 = vrot.slane %v4330_v44, 2 }
 0x10b   : > { %v4792_v8 = vsel %vm4395_vm3, %v4791_v61, %v17424_v35  ;;  %v4793_v10 = vrot.slane %v4329_v30, 4  ;;  %v4795_v11 = vrot.slane %v4330_v44, 3  ;;  %v5070_v13 = vsel %vm4392_vm2, %v5069_v62, %v17431_v39 }
 0x10c   : > { %v4402_v17 = vsel %vm4401_vm5, %v4400_v5, %v4399_v4  ;;  %v4406_v18 = vrot.slane %v4331_v3, 1  ;;  %v4797_v20 = vrot.slane %v4331_v3, 2  ;;  %v5071_v23 = vrot.slane %v4329_v30, 5 }
 0x10d   : > { %v4405_v24 = vsel %vm4404_vm6, %v4403_v6, %v4402_v17  ;;  %v4794_v34 = vsel %vm4398_vm4, %v4793_v10, %v4792_v8  ;;  %v5073_v25 = vrot.slane %v4330_v44, 4  ;;  %v5075_v26 = vrot.slane %v4331_v3, 3  ;;  %v15965_v17 = vld [vmem:[%s22153_s3 + $0x230] sm:$0xff]  }
 0x10e   : > { %v4408_v29 = vsel %vm4407_vm7, %v4406_v18, %v4405_v24  ;;  %v5072_v35 = vsel %vm4395_vm3, %v5071_v23, %v5070_v13  ;;  %v5348_v12 = vsel %vm4389_vm1, %v5347_v63, %v17412_v16  ;;  %v5349_v21 = vrot.slane %v4329_v30, 6  ;;  %v15963_v16 = vld [vmem:[%s22153_s3 + $0x270] sm:$0xff]   ;;  %v15964_v13 = vld [vmem:[%s22153_s3 + $0x58] sm:$0xff]  }
 0x10f   : > { %v4507_v39 = vpack.c.b16 %v4408_v29, %v4408_v29  ;;  %v5351_v31 = vrot.slane %v4330_v44, 5  ;;  %v5353_v32 = vrot.slane %v4331_v3, 4  ;;  %v5627_v42 = vrot.slane %v4329_v30, 7  ;;  %15400 = vmatprep.subr.bf16.mxu0 %v15963_v16  ;;  %15246 = vmatprep.subr.bf16.mxu1 %v15964_v13 }
 0x110   : > { %v5350_v46 = vsel %vm4392_vm2, %v5349_v21, %v5348_v12  ;;  %v5629_v47 = vrot.slane %v4330_v44, 6  ;;  %v5631_v49 = vrot.slane %v4331_v3, 5  ;;  %v3577_v1 = vmax.f32 %v1280_v58, %v13669_v52  ;;  %15401 = vmatpush3.bf16.msra.mxu0 %v15965_v17 }
 0x111   : > { %4523 = vst [vmem:[#allocation2] sm:$0xf] %v4507_v39  ;;  %v5628_v2 = vsel %vm4389_vm1, %v5627_v42, %v4328_v50  ;;  %v3578_v57 = vmax.f32 %v1279_v38, %v13670_v53  ;;  %v3579_v60 = vmax.f32 %v1281_v51, %v13671_v43  ;;  %v3852_v9 = vmax.f32 %v17384_v7, %v3576_v54 }
 0x112   : > { %v5630_v61 = vsel %vm4392_vm2, %v5629_v47, %v5628_v2  ;;  %v3853_v30 = vmax.f32 %v17387_v14, %v3577_v1  ;;  %v4796_v62 = vsel %vm4401_vm5, %v4795_v11, %v4794_v34  ;;  %v5074_v44 = vsel %vm4398_vm4, %v5073_v25, %v5072_v35 }
 0x113   : > { %v3854_v58 = vmax.f32 %v17389_v15, %v3578_v57  ;;  %v3855_v50 = vmax.f32 %v17392_v22, %v3579_v60  ;;  %v15152_v38 = vpack.c.bf16 %v3852_v9, %v3852_v9  ;;  %v4798_v51 = vsel %vm4404_vm6, %v4797_v20, %v4796_v62 }
 0x114   : > { %v15164_v7 = vpack.c.bf16 %v3853_v30, %v3853_v30  ;;  %v5076_v52 = vsel %vm4401_vm5, %v5075_v26, %v5074_v44  ;;  %v5352_v53 = vsel %vm4395_vm3, %v5351_v31, %v5350_v46  ;;  %v5632_v54 = vsel %vm4395_vm3, %v5631_v49, %v5630_v61 }
 0x115   : > { %v4779_v14 = vunpack.c.l.b16 %v15152_v38  ;;  %v15176_v63 = vpack.c.bf16 %v3854_v58, %v3854_v58  ;;  %v5354_v43 = vsel %vm4398_vm4, %v5353_v32, %v5352_v53  ;;  %v15188_v3 = vpack.c.bf16 %v3855_v50, %v3855_v50 }
 0x116   : > { %v5059_v4 = vunpack.c.l.b16 %v15164_v7  ;;  %v1350_v15 = vcombine.high %v17455_v59, %v17455_v59  ;;  %v1357_v22 = vrot.slane %v17455_v59, %v17370_v48  ;;  %v1316_v5 = vcombine.high %v17461_v0, %v17461_v0  ;;  %v15966_v59 = vld [vmem:[%s22153_s3 + $0x18] sm:$0xff]   ;;  %v15792_v7 = vpop.f32.mrf.mxu0 }
 0x117   : > { %v4799_v6 = vrot.slane %v4779_v14, 1  ;;  %v5077_v8 = vrot.slane %v4779_v14, 2  ;;  %v5339_v10 = vunpack.c.l.b16 %v15176_v63  ;;  %v5355_v11 = vrot.slane %v4779_v14, 3  ;;  %15247 = vmatpush3.bf16.msra.mxu1 %v15966_v59 }
 0x118   : > { %v5079_v18 = vrot.slane %v5059_v4, 1  ;;  %v5357_v20 = vrot.slane %v5059_v4, 2  ;;  %v5619_v23 = vunpack.c.l.b16 %v15188_v3  ;;  %v5633_v24 = vrot.slane %v4779_v14, 4  ;;  %v797_v13 = vpop.f32.mrf.mxu0 }
 0x119   : > { %v4800_v34 = vsel %vm4407_vm7, %v4799_v6, %v4798_v51  ;;  %v5078_v25 = vsel %vm4404_vm6, %v5077_v8, %v5076_v52  ;;  %v5356_v26 = vsel %vm4401_vm5, %v5355_v11, %v5354_v43  ;;  %v5359_v29 = vrot.slane %v5339_v10, 1 }
 0x11a   : > { %v4899_v35 = vpack.c.b16 %v4800_v34, %v4800_v34  ;;  %v5080_v12 = vsel %vm4407_vm7, %v5079_v18, %v5078_v25  ;;  %v5358_v21 = vsel %vm4404_vm6, %v5357_v20, %v5356_v26  ;;  %v5634_v39 = vsel %vm4398_vm4, %v5633_v24, %v5632_v54  ;;  %v17565_v24 = vld [vmem:[%s22152_s2] ss:$0 sm:$0xff] }
 0x11b   : > { %v5179_v31 = vpack.c.b16 %v5080_v12, %v5080_v12  ;;  %v5360_v32 = vsel %vm4407_vm7, %v5359_v29, %v5358_v21  ;;  %v5635_v42 = vrot.slane %v5059_v4, 3  ;;  %v5637_v46 = vrot.slane %v5339_v10, 2  ;;  %v15967_v12 = vld [vmem:[%s22153_s3 + $0x268] sm:$0xff]  }
 0x11c   : > { %4915 = vst [vmem:[#allocation2 + $0x4] sm:$0xf] %v4899_v35  ;;  %v5459_v47 = vpack.c.b16 %v5360_v32, %v5360_v32  ;;  %v5639_v49 = vrot.slane %v5619_v23, 1  ;;  %v1364_v1 = vrot.slane %v1350_v15, %v17370_v48  ;;  %v1365_v2 = vcombine.high %v1357_v22, %v1357_v22  ;;  %15402 = vmatprep.subr.bf16.mxu0 %v15967_v12 }
 0x11d   : > { %5195 = vst [vmem:[#allocation2 + $0x8] sm:$0xf] %v5179_v31  ;;  %v5636_v57 = vsel %vm4401_vm5, %v5635_v42, %v5634_v39  ;;  %v13688_v60 = vrot.slane %v1357_v22, 9  ;;  %v1323_v9 = vrot.slane %v17461_v0, %v17370_v48  ;;  %v1330_v16 = vrot.slane %v1316_v5, %v17370_v48 }
 0x11e   : > { %5475 = vst [vmem:[#allocation2 + $0xc] sm:$0xf] %v5459_v47  ;;  %v5638_v61 = vsel %vm4404_vm6, %v5637_v46, %v5636_v57  ;;  %v1366_v30 = vcombine.high %v1364_v1, %v1364_v1  ;;  %v13689_v62 = vrot.slane %v1365_v2, 9  ;;  %v13690_v44 = vrot.slane %v1364_v1, 9 }
 0x11f   : > { %v5640_v58 = vsel %vm4407_vm7, %v5639_v49, %v5638_v61  ;;  %v3596_v50 = vmax.f32 %v1357_v22, %v13688_v60  ;;  %v1331_v38 = vcombine.high %v1323_v9, %v1323_v9  ;;  %v1332_v51 = vcombine.high %v1330_v16, %v1330_v16 }
 0x120   : > { %v5739_v52 = vpack.c.b16 %v5640_v58, %v5640_v58  ;;  %v13691_v53 = vrot.slane %v1366_v30, 9  ;;  %v3597_v54 = vmax.f32 %v1365_v2, %v13689_v62  ;;  %v3598_v14 = vmax.f32 %v1364_v1, %v13690_v44 }
 0x121   : > { %v3860_v0 = vmax.f32 %v17464_v19, %v3596_v50  ;;  %v13680_v63 = vrot.slane %v1323_v9, 9  ;;  %v13681_v43 = vrot.slane %v1331_v38, 9  ;;  %v13682_v3 = vrot.slane %v1330_v16, 9 }
 0x122   : > { %5755 = vst [vmem:[#allocation2 + $0x10] sm:$0xf] %v5739_v52  ;;  %v3599_v4 = vmax.f32 %v1366_v30, %v13691_v53  ;;  %v3861_v15 = vmax.f32 %v17467_v27, %v3597_v54  ;;  %v3862_v5 = vmax.f32 %v17469_v28, %v3598_v14  ;;  %v13683_v6 = vrot.slane %v1332_v51, 9 }
 0x123   : > { %v15068_v22 = vpack.c.bf16 %v3860_v0, %v3860_v0  ;;  %v17549_v8 = vmax.f32 %v1323_v9, %v13680_v63  ;;  %v17551_v10 = vmax.f32 %v1331_v38, %v13681_v43  ;;  %v17553_v11 = vmax.f32 %v1330_v16, %v13682_v3  ;;  %v15793_v9 = vpop.f32.mrf.mxu0  ;;  %v15970_v0 = vld [vmem:[%s22153_s3 + $0x10] sm:$0xff]  }
 0x124   : > { %v3863_v19 = vmax.f32 %v17474_v33, %v3599_v4  ;;  %v15069_v17 = vpack.c.bf16 %v3861_v15, %v3861_v15  ;;  %v15070_v18 = vpack.c.bf16 %v3862_v5, %v3862_v5  ;;  %v17556_v20 = vmax.f32 %v1332_v51, %v13683_v6  ;;  %v15968_v51 = vld [vmem:[%s22153_s3 + $0x50] sm:$0xff]  }
 0x125   : > { %v17558_v23 = vunpack.c.l.b16 %v15068_v22  ;;  %v1047_v27 = vmax.f32 %v17449_v55, 0.0  ;;  %v1045_v28 = vmax.f32 %v17452_v56, 0.0  ;;  %v806_v59 = vadd.f32 %v17565_v24, %v15792_v7  ;;  %v15969_v7 = vld [vmem:[%s22153_s3 + $0x228] sm:$0xff]   ;;  %15248 = vmatprep.subr.bf16.mxu1 %v15968_v51 }
 0x126   : > { %v15071_v34 = vpack.c.bf16 %v3863_v19, %v3863_v19  ;;  %v17568_v25 = vunpack.c.l.b16 %v15069_v17  ;;  %v17570_v33 = vunpack.c.l.b16 %v15070_v18  ;;  %v798_v26 = vadd.f32 %v17565_v24, %v797_v13  ;;  %15403 = vmatpush3.bf16.msra.mxu0 %v15969_v7  ;;  %15249 = vmatpush3.bf16.msra.mxu1 %v15970_v0  ;;  %v15971_v13 = vld [vmem:[%s22153_s3 + $0x260] sm:$0xff]  }
 0x127   : > { %v4415_v29 = vrot.slane %v17558_v23, 4  ;;  %v4805_v55 = vrot.slane %v17558_v23, 5  ;;  %v5083_v56 = vrot.slane %v17558_v23, 6  ;;  %v5361_v35 = vrot.slane %v17558_v23, 7  ;;  %15404 = vmatprep.subr.bf16.mxu0 %v15971_v13 }
 0x128   : > { %v17580_v21 = vunpack.c.l.b16 %v15071_v34  ;;  %v4417_v39 = vrot.slane %v17568_v25, 3  ;;  %v4419_v31 = vrot.slane %v17570_v33, 2  ;;  %v4807_v32 = vrot.slane %v17568_v25, 4 }
 0x129   : > { %v4809_v42 = vrot.slane %v17570_v33, 3  ;;  %v5085_v46 = vrot.slane %v17568_v25, 5  ;;  %v5087_v47 = vrot.slane %v17570_v33, 4  ;;  %v5363_v49 = vrot.slane %v17568_v25, 6 }
 0x12a   : > { %v4421_v1 = vrot.slane %v17580_v21, 1  ;;  %v4811_v2 = vrot.slane %v17580_v21, 2  ;;  %v5089_v57 = vrot.slane %v17580_v21, 3  ;;  %v5365_v60 = vrot.slane %v17570_v33, 5 }
 0x12b   : > { %v5367_v16 = vrot.slane %v17580_v21, 4  ;;  %v5641_v61 = vrot.slane %v17568_v25, 7  ;;  %v5643_v30 = vrot.slane %v17570_v33, 6  ;;  %v5645_v62 = vrot.slane %v17580_v21, 5 }
 0x12c   : > { %v1367_v44 = vcombine.high %v1047_v27, %v1047_v27  ;;  %v1374_v58 = vrot.slane %v1047_v27, %v17370_v48  ;;  %v1333_v50 = vcombine.high %v1045_v28, %v1045_v28  ;;  %v1340_v38 = vrot.slane %v1045_v28, %v17370_v48 }
 0x12d   : > { %v5642_v52 = vsel %vm4389_vm1, %v5641_v61, %v17558_v23  ;;  %v17607_v53 = vmax.f32 %v806_v59, 0.0  ;;  %v17609_v54 = vmax.f32 %v798_v26, 0.0  ;;  %v17612_v14 = vadd.f32 %v17565_v24, %v15793_v9 }
 0x12e   : > { %v5644_v63 = vsel %vm4392_vm2, %v5643_v30, %v5642_v52  ;;  %v1381_v43 = vrot.slane %v1367_v44, %v17370_v48  ;;  %v1382_v3 = vcombine.high %v1374_v58, %v1374_v58  ;;  %v13692_v4 = vrot.slane %v1374_v58, 9 }
 0x12f   : > { %v5646_v15 = vsel %vm4395_vm3, %v5645_v62, %v5644_v63  ;;  %v1347_v5 = vrot.slane %v1333_v50, %v17370_v48  ;;  %v1348_v6 = vcombine.high %v1340_v38, %v1340_v38  ;;  %v13684_v22 = vrot.slane %v1340_v38, 9  ;;  %v15973_v63 = vld [vmem:[%s22153_s3 + $0x220] sm:$0xff]  }
 0x130   : > { %v1383_v19 = vcombine.high %v1381_v43, %v1381_v43  ;;  %v13693_v17 = vrot.slane %v1382_v3, 9  ;;  %v13694_v18 = vrot.slane %v1381_v43, 9  ;;  %v3600_v27 = vmax.f32 %v1374_v58, %v13692_v4  ;;  %15405 = vmatpush3.bf16.msra.mxu0 %v15973_v63 }
 0x131   : > { %v1349_v28 = vcombine.high %v1347_v5, %v1347_v5  ;;  %v13685_v59 = vrot.slane %v1348_v6, 9  ;;  %v13686_v34 = vrot.slane %v1347_v5, 9  ;;  %v3592_v26 = vmax.f32 %v1340_v38, %v13684_v22  ;;  %v15972_v38 = vld [vmem:[%s22153_s3 + $0x48] sm:$0xff]  }
 0x132   : > { %v13695_v12 = vrot.slane %v1383_v19, 9  ;;  %v3601_v9 = vmax.f32 %v1382_v3, %v13693_v17  ;;  %v3602_v61 = vmax.f32 %v1381_v43, %v13694_v18  ;;  %v3864_v30 = vmax.f32 %v17549_v8, %v3600_v27  ;;  %15250 = vmatprep.subr.bf16.mxu1 %v15972_v38 }
 0x133   : > { %v13687_v62 = vrot.slane %v1349_v28, 9  ;;  %v3593_v44 = vmax.f32 %v1348_v6, %v13685_v59  ;;  %v3594_v50 = vmax.f32 %v1347_v5, %v13686_v34  ;;  %v3856_v51 = vmax.f32 %v17426_v36, %v3592_v26 }
 0x134   : > { %v3603_v7 = vmax.f32 %v1383_v19, %v13695_v12  ;;  %v3865_v52 = vmax.f32 %v17551_v10, %v3601_v9  ;;  %v3866_v58 = vmax.f32 %v17553_v11, %v3602_v61  ;;  %v15153_v0 = vpack.c.bf16 %v3864_v30, %v3864_v30  ;;  %v15974_v10 = vld [vmem:[%s22153_s3 + $0x8] sm:$0xff]  }
 0x135   : > { %v3595_v8 = vmax.f32 %v1349_v28, %v13687_v62  ;;  %v3857_v43 = vmax.f32 %v17433_v40, %v3593_v44  ;;  %v3858_v3 = vmax.f32 %v17428_v37, %v3594_v50  ;;  %v15064_v36 = vpack.c.bf16 %v3856_v51, %v3856_v51  ;;  %15251 = vmatpush3.bf16.msra.mxu1 %v15974_v10 }
 0x136   : > { %v3867_v11 = vmax.f32 %v17556_v20, %v3603_v7  ;;  %v17640_v4 = vunpack.c.l.b16 %v15153_v0  ;;  %v15165_v5 = vpack.c.bf16 %v3865_v52, %v3865_v52  ;;  %v15177_v6 = vpack.c.bf16 %v3866_v58, %v3866_v58 }
 0x137   : > { %v3859_v22 = vmax.f32 %v17435_v41, %v3595_v8  ;;  %v15065_v13 = vpack.c.bf16 %v3857_v43, %v3857_v43  ;;  %v15066_v19 = vpack.c.bf16 %v3858_v3, %v3858_v3  ;;  %v4332_v40 = vunpack.c.l.b16 %v15064_v36 }
 0x138   : > { %v4813_v37 = vrot.slane %v17640_v4, 1  ;;  %v17644_v17 = vunpack.c.l.b16 %v15165_v5  ;;  %v5091_v18 = vrot.slane %v17640_v4, 2  ;;  %v5340_v27 = vunpack.c.l.b16 %v15177_v6 }
 0x139   : > { %v5369_v20 = vrot.slane %v17640_v4, 3  ;;  %v15189_v28 = vpack.c.bf16 %v3867_v11, %v3867_v11  ;;  %v5647_v59 = vrot.slane %v17640_v4, 4  ;;  %v15067_v34 = vpack.c.bf16 %v3859_v22, %v3859_v22 }
 0x13a   : > { %v5093_v26 = vrot.slane %v17644_v17, 1  ;;  %v5371_v41 = vrot.slane %v17644_v17, 2  ;;  %v5373_v12 = vrot.slane %v5340_v27, 1  ;;  %v5649_v9 = vrot.slane %v17644_v17, 3 }
 0x13b   : > { %v5620_v61 = vunpack.c.l.b16 %v15189_v28  ;;  %v5648_v30 = vsel %vm4398_vm4, %v5647_v59, %v5646_v15  ;;  %v5651_v62 = vrot.slane %v5340_v27, 2  ;;  %v4333_v44 = vunpack.c.l.b16 %v15065_v13  ;;  %v17680_v28 = vpop.f32.mrf.mxu0 }
 0x13c   : > { %v5650_v50 = vsel %vm4401_vm5, %v5649_v9, %v5648_v30  ;;  %v4334_v51 = vunpack.c.l.b16 %v15066_v19  ;;  %v4335_v7 = vunpack.c.l.b16 %v15067_v34  ;;  %v1418_v52 = vcombine.high %v17607_v53, %v17607_v53  ;;  %v15975_v19 = vld [vmem:[%s22153_s3 + $0x258] sm:$0xff]  }
 0x13d   : > { %v5652_v58 = vsel %vm4404_vm6, %v5651_v62, %v5650_v50  ;;  %v5653_v0 = vrot.slane %v5620_v61, 1  ;;  %v4409_v38 = vrot.slane %v4333_v44, 7  ;;  %v17659_v63 = vrot.slane %v17607_v53, %v17370_v48  ;;  %15406 = vmatprep.subr.bf16.mxu0 %v15975_v19  ;;  %v15977_v30 = vld [vmem:[%s22153_s3 + $0x218] sm:$0xff]  }
 0x13e   : > { %v4411_v8 = vrot.slane %v4334_v51, 6  ;;  %v4413_v43 = vrot.slane %v4335_v7, 5  ;;  %v4801_v15 = vrot.slane %v4334_v51, 7  ;;  %v4803_v3 = vrot.slane %v4335_v7, 6  ;;  %15407 = vmatpush3.bf16.msra.mxu0 %v15977_v30 }
 0x13f   : > { %v5654_v36 = vsel %vm4407_vm7, %v5653_v0, %v5652_v58  ;;  %v4410_v10 = vsel %vm4389_vm1, %v4409_v38, %v4332_v40  ;;  %v5081_v11 = vrot.slane %v4335_v7, 7  ;;  %v5362_v5 = vsel %vm4389_vm1, %v5361_v35, %v4335_v7 }
 0x140   : > { %v5740_v6 = vpack.c.b16 %v5654_v36, %v5654_v36  ;;  %v4412_v22 = vsel %vm4392_vm2, %v4411_v8, %v4410_v10  ;;  %v4802_v13 = vsel %vm4389_vm1, %v4801_v15, %v4333_v44  ;;  %v5364_v53 = vsel %vm4392_vm2, %v5363_v49, %v5362_v5 }
 0x141   : > { %v4414_v40 = vsel %vm4395_vm3, %v4413_v43, %v4412_v22  ;;  %v4804_v17 = vsel %vm4392_vm2, %v4803_v3, %v4802_v13  ;;  %v5082_v27 = vsel %vm4389_vm1, %v5081_v11, %v4334_v51  ;;  %v5366_v35 = vsel %vm4395_vm3, %v5365_v60, %v5364_v53 }
 0x142   : > { %5756 = vst [vmem:[#allocation2 + $0x74] sm:$0xf] %v5740_v6  ;;  %5783 = vst [vmem:[#allocation2 + $0x24] sm:$0xf] %v5740_v6  ;;  %v4416_v49 = vsel %vm4398_vm4, %v4415_v29, %v4414_v40  ;;  %v4806_v59 = vsel %vm4395_vm3, %v4805_v55, %v4804_v17  ;;  %v5084_v34 = vsel %vm4392_vm2, %v5083_v56, %v5082_v27  ;;  %v1051_v51 = vmax.f32 %v17612_v14, 0.0 }
 0x143   : > { %v5368_v60 = vsel %vm4398_vm4, %v5367_v16, %v5366_v35  ;;  %v4418_v9 = vsel %vm4401_vm5, %v4417_v39, %v4416_v49  ;;  %v4808_v29 = vsel %vm4398_vm4, %v4807_v32, %v4806_v59  ;;  %v5086_v55 = vsel %vm4395_vm3, %v5085_v46, %v5084_v34 }
 0x144   : > { %v5370_v23 = vsel %vm4401_vm5, %v5369_v20, %v5368_v60  ;;  %v4420_v56 = vsel %vm4404_vm6, %v4419_v31, %v4418_v9  ;;  %v4810_v16 = vsel %vm4401_vm5, %v4809_v42, %v4808_v29  ;;  %v5088_v39 = vsel %vm4398_vm4, %v5087_v47, %v5086_v55  ;;  %v15796_v20 = vpop.f32.mrf.mxu0 }
 0x145   : > { %v5372_v32 = vsel %vm4404_vm6, %v5371_v41, %v5370_v23  ;;  %v4422_v25 = vsel %vm4407_vm7, %v4421_v1, %v4420_v56  ;;  %v4812_v46 = vsel %vm4404_vm6, %v4811_v2, %v4810_v16  ;;  %v5090_v31 = vsel %vm4401_vm5, %v5089_v57, %v5088_v39 }
 0x146   : > { %v5374_v42 = vsel %vm4407_vm7, %v5373_v12, %v5372_v32  ;;  %v4508_v33 = vpack.c.b16 %v4422_v25, %v4422_v25  ;;  %v4814_v47 = vsel %vm4407_vm7, %v4813_v37, %v4812_v46  ;;  %v5092_v1 = vsel %vm4404_vm6, %v5091_v18, %v5090_v31  ;;  %v813_v7 = vpop.f32.mrf.mxu0 }
 0x147   : > { %v5460_v41 = vpack.c.b16 %v5374_v42, %v5374_v42  ;;  %v4900_v61 = vpack.c.b16 %v4814_v47, %v4814_v47  ;;  %v5094_v2 = vsel %vm4407_vm7, %v5093_v26, %v5092_v1  ;;  %v1432_v21 = vrot.slane %v1418_v52, %v17370_v48  ;;  %v15976_v26 = vld [vmem:[%s22153_s3 + $0x40] sm:$0xff]  }
 0x148   : > { %v1433_v57 = vcombine.high %v17659_v63, %v17659_v63  ;;  %4524 = vst [vmem:[#allocation2 + $0x64] sm:$0xf] %v4508_v33  ;;  %4579 = vst [vmem:[#allocation2 + $0x14] sm:$0xf] %v4508_v33  ;;  %v5180_v12 = vpack.c.b16 %v5094_v2, %v5094_v2  ;;  %v13704_v37 = vrot.slane %v17659_v63, 9  ;;  %v1384_v4 = vcombine.high %v17609_v54, %v17609_v54  ;;  %v17763_v13 = vpop.f32.mrf.mxu0 }
 0x149   : > { %5476 = vst [vmem:[#allocation2 + $0x70] sm:$0xf] %v5460_v41  ;;  %5503 = vst [vmem:[#allocation2 + $0x20] sm:$0xf] %v5460_v41  ;;  %v1391_v18 = vrot.slane %v17609_v54, %v17370_v48  ;;  %v1434_v62 = vcombine.high %v1432_v21, %v1432_v21  ;;  %v13706_v50 = vrot.slane %v1432_v21, 9  ;;  %v15978_v54 = vld [vmem:[%s22153_s3] sm:$0xff]   ;;  %15252 = vmatprep.subr.bf16.mxu1 %v15976_v26 }
 0x14a   : > { %4943 = vst [vmem:[#allocation2 + $0x18] sm:$0xf] %v4900_v61  ;;  %4916 = vst [vmem:[#allocation2 + $0x68] sm:$0xf] %v4900_v61  ;;  %v13705_v44 = vrot.slane %v1433_v57, 9  ;;  %v17750_v52 = vmax.f32 %v17659_v63, %v13704_v37  ;;  %v1398_v58 = vrot.slane %v1384_v4, %v17370_v48  ;;  %v1435_v15 = vcombine.high %v1051_v51, %v1051_v51  ;;  %v17770_v32 = vpop.f32.mrf.mxu0 }
 0x14b   : > { %5196 = vst [vmem:[#allocation2 + $0x6c] sm:$0xf] %v5180_v12  ;;  %5223 = vst [vmem:[#allocation2 + $0x1c] sm:$0xf] %v5180_v12  ;;  %v1399_v0 = vcombine.high %v1391_v18, %v1391_v18  ;;  %v13696_v38 = vrot.slane %v1391_v18, 9  ;;  %v13707_v8 = vrot.slane %v1434_v62, 9  ;;  %v17755_v14 = vmax.f32 %v1432_v21, %v13706_v50  ;;  %15253 = vmatpush3.bf16.msra.mxu1 %v15978_v54 }
 0x14c   : > { %v17753_v43 = vmax.f32 %v1433_v57, %v13705_v44  ;;  %v1400_v3 = vcombine.high %v1398_v58, %v1398_v58  ;;  %v13698_v10 = vrot.slane %v1398_v58, 9  ;;  %v1442_v63 = vrot.slane %v1051_v51, %v17370_v48  ;;  %v15800_v26 = vpop.f32.mrf.mxu0 }
 0x14d   : > { %v13697_v36 = vrot.slane %v1399_v0, 9  ;;  %v3604_v11 = vmax.f32 %v1391_v18, %v13696_v38  ;;  %v17757_v5 = vmax.f32 %v1434_v62, %v13707_v8  ;;  %v1449_v6 = vrot.slane %v1435_v15, %v17370_v48 }
 0x14e   : > { %v801_v22 = vadd.f32 %v17565_v24, %v17680_v28  ;;  %v13699_v53 = vrot.slane %v1400_v3, 9  ;;  %v3606_v40 = vmax.f32 %v1398_v58, %v13698_v10  ;;  %v822_v17 = vadd.f32 %v17565_v24, %v15796_v20  ;;  %v15982_v28 = vld [vmem:[%s22153_s3 + $0x250] sm:$0xff]  }
 0x14f   : > { %v3605_v19 = vmax.f32 %v1399_v0, %v13697_v36  ;;  %v1450_v27 = vcombine.high %v1442_v63, %v1442_v63  ;;  %v1451_v35 = vcombine.high %v1449_v6, %v1449_v6  ;;  %v13708_v49 = vrot.slane %v1442_v63, 9  ;;  %v15979_v55 = vld [vmem:[#allocation2] ss:$100 sps:$4 sm:$0xff]   ;;  %15408 = vmatprep.subr.bf16.mxu0 %v15982_v28 }
 0x150   : > { %v13710_v59 = vrot.slane %v1449_v6, 9  ;;  %v3607_v34 = vmax.f32 %v1400_v3, %v13699_v53  ;;  %v1049_v60 = vmax.f32 %v801_v22, 0.0  ;;  %v1054_v9 = vmax.f32 %v822_v17, 0.0 }
 0x151   : > { %v814_v29 = vadd.f32 %v17565_v24, %v813_v7  ;;  %v13709_v23 = vrot.slane %v1450_v27, 9  ;;  %v13711_v56 = vrot.slane %v1451_v35, 9  ;;  %v3616_v16 = vmax.f32 %v1442_v63, %v13708_v49  ;;  %v15981_v25 = vld [vmem:[#allocation2 + $0x4] ss:$100 sps:$4 sm:$0xff]   ;;  %v829_v63 = vpop.f32.mrf.mxu0 }
 0x152   : > { %v3618_v39 = vmax.f32 %v1449_v6, %v13710_v59  ;;  %v1401_v46 = vcombine.high %v1049_v60, %v1049_v60  ;;  %v1408_v31 = vrot.slane %v1049_v60, %v17370_v48  ;;  %v1486_v42 = vcombine.high %v1054_v9, %v1054_v9  ;;  %8122 = vmatprep.mubr.bf16.mxu1 %v15981_v25 }
 0x153   : > { %v1493_v20 = vrot.slane %v1054_v9, %v17370_v48  ;;  %v3617_v33 = vmax.f32 %v1450_v27, %v13709_v23  ;;  %v3619_v47 = vmax.f32 %v1451_v35, %v13711_v56  ;;  %v3868_v1 = vmax.f32 %v3604_v11, %v3616_v16  ;;  %8123 = vmatmul.mubr.bf16.vlgmr.msra.gmra.mxu1 %v15979_v55  ;;  %v15801_v56 = vpop.f32.mrf.mxu0  ;;  %v15983_v16 = vld [vmem:[%s22153_s3 + $0x210] sm:$0xff]  }
 0x154   : > { %v3870_v41 = vmax.f32 %v3606_v40, %v3618_v39  ;;  %v1415_v61 = vrot.slane %v1401_v46, %v17370_v48  ;;  %v1416_v2 = vcombine.high %v1408_v31, %v1408_v31  ;;  %v13700_v21 = vrot.slane %v1408_v31, 9  ;;  %15409 = vmatpush3.bf16.msra.mxu0 %v15983_v16 }
 0x155   : > { %v1500_v57 = vrot.slane %v1486_v42, %v17370_v48  ;;  %v3869_v12 = vmax.f32 %v3605_v19, %v3617_v33  ;;  %v3871_v37 = vmax.f32 %v3607_v34, %v3619_v47  ;;  %v15072_v4 = vpack.c.bf16 %v3868_v1, %v3868_v1 }
 0x156   : > { %v15074_v18 = vpack.c.bf16 %v3870_v41, %v3870_v41  ;;  %v1417_v30 = vcombine.high %v1415_v61, %v1415_v61  ;;  %v13701_v62 = vrot.slane %v1416_v2, 9  ;;  %v13702_v44 = vrot.slane %v1415_v61, 9 }
 0x157   : > { %v17776_v50 = vmax.f32 %v1408_v31, %v13700_v21  ;;  %v15073_v51 = vpack.c.bf16 %v3869_v12, %v3869_v12  ;;  %v15075_v7 = vpack.c.bf16 %v3871_v37, %v3871_v37  ;;  %v4340_v54 = vunpack.c.l.b16 %v15072_v4  ;;  %v15984_v37 = vld [vmem:[%s22153_s3 + $0x248] sm:$0xff]  }
 0x158   : > { %v4342_v58 = vunpack.c.l.b16 %v15074_v18  ;;  %v13703_v0 = vrot.slane %v1417_v30, 9  ;;  %v17778_v38 = vmax.f32 %v1416_v2, %v13701_v62  ;;  %v17780_v8 = vmax.f32 %v1415_v61, %v13702_v44  ;;  %15410 = vmatprep.subr.bf16.mxu0 %v15984_v37 }
 0x159   : > { %v1501_v15 = vcombine.high %v1493_v20, %v1493_v20  ;;  %v4341_v3 = vunpack.c.l.b16 %v15073_v51  ;;  %v17782_v36 = vunpack.c.l.b16 %v15075_v7  ;;  %v1502_v22 = vcombine.high %v1500_v57, %v1500_v57 }
 0x15a   : > { %v4425_v10 = vrot.slane %v4342_v58, 6  ;;  %v4815_v11 = vrot.slane %v4342_v58, 7  ;;  %v17784_v6 = vmax.f32 %v1417_v30, %v13703_v0  ;;  %v13720_v53 = vrot.slane %v1493_v20, 9 }
 0x15b   : > { %v13721_v19 = vrot.slane %v1501_v15, 9  ;;  %v4423_v40 = vrot.slane %v4341_v3, 7  ;;  %v4427_v17 = vrot.slane %v17782_v36, 5  ;;  %v4817_v35 = vrot.slane %v17782_v36, 6 }
 0x15c   : > { %v4816_v27 = vsel %vm4389_vm1, %v4815_v11, %v4341_v3  ;;  %v5095_v49 = vrot.slane %v17782_v36, 7  ;;  %v13722_v59 = vrot.slane %v1500_v57, 9  ;;  %v13723_v34 = vrot.slane %v1502_v22, 9 }
 0x15d   : > { %v17790_v60 = vmax.f32 %v1493_v20, %v13720_v53  ;;  %v4424_v9 = vsel %vm4389_vm1, %v4423_v40, %v4340_v54  ;;  %v17794_v55 = vsel %vm4392_vm2, %v4817_v35, %v4816_v27  ;;  %v17796_v28 = vmax.f32 %v1501_v15, %v13721_v19 }
 0x15e   : > { %v1052_v23 = vmax.f32 %v814_v29, 0.0  ;;  %v4426_v39 = vsel %vm4392_vm2, %v4425_v10, %v4424_v9  ;;  %v17803_v25 = vsel %vm4389_vm1, %v5095_v49, %v4342_v58  ;;  %v17805_v46 = vmax.f32 %v1500_v57, %v13722_v59 }
 0x15f   : > { %v17807_v31 = vmax.f32 %v1502_v22, %v13723_v34  ;;  %v4428_v42 = vsel %vm4395_vm3, %v4427_v17, %v4426_v39  ;;  %v825_v29 = vadd.f32 %v17565_v24, %v17763_v13  ;;  %v817_v47 = vadd.f32 %v17565_v24, %v17770_v32 }
 0x160   : > { %v1452_v20 = vcombine.high %v1052_v23, %v1052_v23  ;;  %v1459_v33 = vrot.slane %v1052_v23, %v17370_v48  ;;  %v838_v1 = vadd.f32 %v17565_v24, %v15800_v26  ;;  %v830_v41 = vadd.f32 %v17565_v24, %v829_v63 }
 0x161   : > { %v841_v61 = vadd.f32 %v17565_v24, %v15801_v56  ;;  %v1055_v12 = vmax.f32 %v825_v29, 0.0  ;;  %v1053_v13 = vmax.f32 %v817_v47, 0.0 }
 0x162   : > { %v1466_v2 = vrot.slane %v1452_v20, %v17370_v48  ;;  %v1467_v21 = vcombine.high %v1459_v33, %v1459_v33  ;;  %v13712_v57 = vrot.slane %v1459_v33, 9  ;;  %v17822_v4 = vmax.f32 %v838_v1, 0.0 }
 0x163   : > { %v17824_v18 = vmax.f32 %v830_v41, 0.0  ;;  %v17826_v32 = vmax.f32 %v841_v61, 0.0  ;;  %v1503_v44 = vcombine.high %v1055_v12, %v1055_v12  ;;  %v1510_v51 = vrot.slane %v1055_v12, %v17370_v48  ;;  %v15985_v12 = vld [vmem:[%s22153_s3 + $0x208] sm:$0xff]  }
 0x164   : > { %v1468_v26 = vcombine.high %v1466_v2, %v1466_v2  ;;  %v13713_v30 = vrot.slane %v1467_v21, 9  ;;  %v13714_v62 = vrot.slane %v1466_v2, 9  ;;  %v3620_v24 = vmax.f32 %v1459_v33, %v13712_v57  ;;  %15411 = vmatpush3.bf16.msra.mxu0 %v15985_v12 }
 0x165   : > { %v1469_v7 = vcombine.high %v1053_v13, %v1053_v13  ;;  %v17830_v54 = vrot.slane %v1053_v13, %v17370_v48  ;;  %v1517_v10 = vrot.slane %v1503_v44, %v17370_v48  ;;  %v1518_v11 = vcombine.high %v1510_v51, %v1510_v51 }
 0x166   : > { %v13715_v58 = vrot.slane %v1468_v26, 9  ;;  %v3621_v0 = vmax.f32 %v1467_v21, %v13713_v30  ;;  %v3622_v15 = vmax.f32 %v1466_v2, %v13714_v62  ;;  %v3872_v3 = vmax.f32 %v17776_v50, %v3620_v24 }
 0x167   : > { %v13724_v63 = vrot.slane %v1510_v51, 9  ;;  %v17835_v22 = vrot.slane %v1469_v7, %v17370_v48  ;;  %v1519_v27 = vcombine.high %v1517_v10, %v1517_v10  ;;  %v13725_v35 = vrot.slane %v1518_v11, 9 }
 0x168   : > { %v3623_v53 = vmax.f32 %v1468_v26, %v13715_v58  ;;  %v3873_v19 = vmax.f32 %v17778_v38, %v3621_v0  ;;  %v3874_v40 = vmax.f32 %v17780_v8, %v3622_v15  ;;  %v15076_v17 = vpack.c.bf16 %v3872_v3, %v3872_v3 }
 0x169   : > { %v13726_v49 = vrot.slane %v1517_v10, 9  ;;  %v17839_v59 = vmax.f32 %v1510_v51, %v13724_v63  ;;  %v13727_v56 = vrot.slane %v1519_v27, 9  ;;  %v17842_v16 = vmax.f32 %v1518_v11, %v13725_v35 }
 0x16a   : > { %v3875_v50 = vmax.f32 %v17784_v6, %v3623_v53  ;;  %v15077_v34 = vpack.c.bf16 %v3873_v19, %v3873_v19  ;;  %v15078_v9 = vpack.c.bf16 %v3874_v40, %v3874_v40  ;;  %v4344_v23 = vunpack.c.l.b16 %v15076_v17 }
 0x16b   : > { %v17844_v39 = vmax.f32 %v1517_v10, %v13726_v49  ;;  %v1484_v38 = vcombine.high %v17830_v54, %v17830_v54  ;;  %v17848_v61 = vmax.f32 %v1519_v27, %v13727_v56  ;;  %v1485_v27 = vcombine.high %v17835_v22, %v17835_v22 }
 0x16c   : > { %v15079_v8 = vpack.c.bf16 %v3875_v50, %v3875_v50  ;;  %v4345_v20 = vunpack.c.l.b16 %v15077_v34  ;;  %v4346_v33 = vunpack.c.l.b16 %v15078_v9  ;;  %v4429_v29 = vrot.slane %v4344_v23, 4 }
 0x16d   : > { %v4819_v47 = vrot.slane %v4344_v23, 5  ;;  %v5097_v1 = vrot.slane %v4344_v23, 6  ;;  %v5375_v41 = vrot.slane %v4344_v23, 7  ;;  %v13716_v49 = vrot.slane %v17830_v54, 9 }
 0x16e   : > { %v4347_v6 = vunpack.c.l.b16 %v15079_v8  ;;  %v4430_v2 = vsel %vm4398_vm4, %v4429_v29, %v4428_v42  ;;  %v4431_v21 = vrot.slane %v4345_v20, 3  ;;  %v4433_v57 = vrot.slane %v4346_v33, 2 }
 0x16f   : > { %v4820_v37 = vsel %vm4395_vm3, %v4819_v47, %v17794_v55  ;;  %v4821_v13 = vrot.slane %v4345_v20, 4  ;;  %v4823_v26 = vrot.slane %v4346_v33, 3  ;;  %v5098_v30 = vsel %vm4392_vm2, %v5097_v1, %v17803_v25 }
 0x170   : > { %v4432_v62 = vsel %vm4401_vm5, %v4431_v21, %v4430_v2  ;;  %v4435_v24 = vrot.slane %v4347_v6, 1  ;;  %v4825_v44 = vrot.slane %v4347_v6, 2  ;;  %v5099_v51 = vrot.slane %v4345_v20, 5 }
 0x171   : > { %v4434_v42 = vsel %vm4404_vm6, %v4433_v57, %v4432_v62  ;;  %v4822_v7 = vsel %vm4398_vm4, %v4821_v13, %v4820_v37  ;;  %v5101_v58 = vrot.slane %v4346_v33, 4  ;;  %v5103_v0 = vrot.slane %v4347_v6, 3 }
 0x172   : > { %v4436_v15 = vsel %vm4407_vm7, %v4435_v24, %v4434_v42  ;;  %v5100_v55 = vsel %vm4395_vm3, %v5099_v51, %v5098_v30  ;;  %v5376_v3 = vsel %vm4389_vm1, %v5375_v41, %v17782_v36  ;;  %v5377_v25 = vrot.slane %v4345_v20, 6 }
 0x173   : > { %v4509_v10 = vpack.c.b16 %v4436_v15, %v4436_v15  ;;  %v5379_v11 = vrot.slane %v4346_v33, 5  ;;  %v5381_v63 = vrot.slane %v4347_v6, 4  ;;  %v5655_v53 = vrot.slane %v4345_v20, 7 }
 0x174   : > { %v5378_v19 = vsel %vm4392_vm2, %v5377_v25, %v5376_v3  ;;  %v5657_v40 = vrot.slane %v4346_v33, 6  ;;  %v5659_v17 = vrot.slane %v4347_v6, 5  ;;  %v13717_v36 = vrot.slane %v1484_v38, 9 }
 0x175   : > { %4525 = vst [vmem:[#allocation2 + $0xc8] sm:$0xf] %v4509_v10  ;;  %4580 = vst [vmem:[#allocation2 + $0x78] sm:$0xf] %v4509_v10  ;;  %v5656_v35 = vsel %vm4389_vm1, %v5655_v53, %v4344_v23  ;;  %v13718_v50 = vrot.slane %v17835_v22, 9  ;;  %v13719_v9 = vrot.slane %v1485_v27, 9  ;;  %v4824_v56 = vsel %vm4401_vm5, %v4823_v26, %v4822_v7 }
 0x176   : > { %4635 = vst [vmem:[#allocation2 + $0x28] sm:$0xf] %v4509_v10  ;;  %v5658_v34 = vsel %vm4392_vm2, %v5657_v40, %v5656_v35  ;;  %v5102_v8 = vsel %vm4398_vm4, %v5101_v58, %v5100_v55  ;;  %v3624_v20 = vmax.f32 %v17830_v54, %v13716_v49  ;;  %v3625_v33 = vmax.f32 %v1484_v38, %v13717_v36  ;;  %v15986_v23 = vld [vmem:[%s22153_s3 + $0x240] sm:$0xff]  }
 0x177   : > { %v3626_v29 = vmax.f32 %v17835_v22, %v13718_v50  ;;  %v4826_v47 = vsel %vm4404_vm6, %v4825_v44, %v4824_v56  ;;  %v3627_v1 = vmax.f32 %v1485_v27, %v13719_v9  ;;  %v5104_v41 = vsel %vm4401_vm5, %v5103_v0, %v5102_v8  ;;  %15412 = vmatprep.subr.bf16.mxu0 %v15986_v23 }
 0x178   : > { %v5380_v6 = vsel %vm4395_vm3, %v5379_v11, %v5378_v19  ;;  %v5660_v2 = vsel %vm4395_vm3, %v5659_v17, %v5658_v34  ;;  %v3876_v21 = vmax.f32 %v17750_v52, %v3624_v20  ;;  %v3877_v54 = vmax.f32 %v17753_v43, %v3625_v33  ;;  %v17913_v33 = vpop.f32.mrf.mxu0 }
 0x179   : > { %v3878_v38 = vmax.f32 %v17755_v14, %v3626_v29  ;;  %v5382_v22 = vsel %vm4398_vm4, %v5381_v63, %v5380_v6  ;;  %v3879_v57 = vmax.f32 %v17757_v5, %v3627_v1  ;;  %v1554_v12 = vcombine.high %v17822_v4, %v17822_v4 }
 0x17a   : > { %v1561_v37 = vrot.slane %v17822_v4, %v17370_v48  ;;  %v1520_v13 = vcombine.high %v17824_v18, %v17824_v18  ;;  %v15154_v26 = vpack.c.bf16 %v3876_v21, %v3876_v21  ;;  %v15166_v52 = vpack.c.bf16 %v3877_v54, %v3877_v54 }
 0x17b   : > { %v15178_v30 = vpack.c.bf16 %v3878_v38, %v3878_v38  ;;  %v17896_v43 = vrot.slane %v17824_v18, %v17370_v48  ;;  %v15190_v14 = vpack.c.bf16 %v3879_v57, %v3879_v57  ;;  %v1568_v62 = vrot.slane %v1554_v12, %v17370_v48  ;;  %v15987_v18 = vld [vmem:[%s22153_s3 + $0x200] sm:$0xff]  }
 0x17c   : > { %v1569_v5 = vcombine.high %v1561_v37, %v1561_v37  ;;  %v13736_v24 = vrot.slane %v1561_v37, 9  ;;  %v4781_v44 = vunpack.c.l.b16 %v15154_v26  ;;  %v5061_v51 = vunpack.c.l.b16 %v15166_v52  ;;  %15413 = vmatpush3.bf16.msra.mxu0 %v15987_v18  ;;  %v15804_v52 = vpop.f32.mrf.mxu0 }
 0x17d   : > { %v5341_v42 = vunpack.c.l.b16 %v15178_v30  ;;  %v17900_v4 = vrot.slane %v1520_v13, %v17370_v48  ;;  %v5621_v7 = vunpack.c.l.b16 %v15190_v14  ;;  %v1570_v58 = vcombine.high %v1568_v62, %v1568_v62 }
 0x17e   : > { %v13737_v0 = vrot.slane %v1569_v5, 9  ;;  %v13738_v15 = vrot.slane %v1568_v62, 9  ;;  %v4827_v55 = vrot.slane %v4781_v44, 1  ;;  %v5105_v3 = vrot.slane %v4781_v44, 2  ;;  %v845_v18 = vpop.f32.mrf.mxu0 }
 0x17f   : > { %v5107_v25 = vrot.slane %v5061_v51, 1  ;;  %v5383_v10 = vrot.slane %v4781_v44, 3  ;;  %v5385_v11 = vrot.slane %v5061_v51, 2  ;;  %v5387_v63 = vrot.slane %v5341_v42, 1 }
 0x180   : > { %v5661_v53 = vrot.slane %v4781_v44, 4  ;;  %v5663_v19 = vrot.slane %v5061_v51, 3  ;;  %v4828_v40 = vsel %vm4407_vm7, %v4827_v55, %v4826_v47  ;;  %v5106_v17 = vsel %vm4404_vm6, %v5105_v3, %v5104_v41 }
 0x181   : > { %v5384_v27 = vsel %vm4401_vm5, %v5383_v10, %v5382_v22  ;;  %v5665_v35 = vrot.slane %v5341_v42, 2  ;;  %v4901_v49 = vpack.c.b16 %v4828_v40, %v4828_v40  ;;  %v5108_v36 = vsel %vm4407_vm7, %v5107_v25, %v5106_v17 }
 0x182   : > { %v5386_v50 = vsel %vm4404_vm6, %v5385_v11, %v5384_v27  ;;  %v5662_v34 = vsel %vm4398_vm4, %v5661_v53, %v5660_v2  ;;  %v5181_v9 = vpack.c.b16 %v5108_v36, %v5108_v36  ;;  %v5667_v20 = vrot.slane %v5621_v7, 1  ;;  %v15805_v36 = vpop.f32.mrf.mxu0 }
 0x183   : > { %v5388_v56 = vsel %vm4407_vm7, %v5387_v63, %v5386_v50  ;;  %v5664_v8 = vsel %vm4401_vm5, %v5663_v19, %v5662_v34  ;;  %4917 = vst [vmem:[#allocation2 + $0xcc] sm:$0xf] %v4901_v49  ;;  %4944 = vst [vmem:[#allocation2 + $0x7c] sm:$0xf] %v4901_v49  ;;  %v13739_v23 = vrot.slane %v1570_v58, 9  ;;  %v3644_v1 = vmax.f32 %v1561_v37, %v13736_v24 }
 0x184   : > { %4971 = vst [vmem:[#allocation2 + $0x2c] sm:$0xf] %v4901_v49  ;;  %v5461_v29 = vpack.c.b16 %v5388_v56, %v5388_v56  ;;  %v5666_v47 = vsel %vm4404_vm6, %v5665_v35, %v5664_v8  ;;  %5197 = vst [vmem:[#allocation2 + $0xd0] sm:$0xf] %v5181_v9  ;;  %v3645_v6 = vmax.f32 %v1569_v5, %v13737_v0  ;;  %v13728_v13 = vrot.slane %v17896_v43, 9 }
 0x185   : > { %5224 = vst [vmem:[#allocation2 + $0x80] sm:$0xf] %v5181_v9  ;;  %5251 = vst [vmem:[#allocation2 + $0x30] sm:$0xf] %v5181_v9  ;;  %v5668_v41 = vsel %vm4407_vm7, %v5667_v20, %v5666_v47  ;;  %v3646_v2 = vmax.f32 %v1568_v62, %v13738_v15  ;;  %v1535_v21 = vcombine.high %v17896_v43, %v17896_v43  ;;  %v13730_v62 = vrot.slane %v17900_v4, 9 }
 0x186   : > { %5477 = vst [vmem:[#allocation2 + $0xd4] sm:$0xf] %v5461_v29  ;;  %5504 = vst [vmem:[#allocation2 + $0x84] sm:$0xf] %v5461_v29  ;;  %v5741_v54 = vpack.c.b16 %v5668_v41, %v5668_v41  ;;  %v3647_v38 = vmax.f32 %v1570_v58, %v13739_v23  ;;  %v3884_v22 = vmax.f32 %v17839_v59, %v3644_v1  ;;  %v17966_v23 = vld [vmem:[%s22152_s2] ss:$0 sm:$0xff] }
 0x187   : > { %5531 = vst [vmem:[#allocation2 + $0x34] sm:$0xf] %v5461_v29  ;;  %v1536_v57 = vcombine.high %v17900_v4, %v17900_v4  ;;  %v3885_v12 = vmax.f32 %v17842_v16, %v3645_v6  ;;  %v3886_v37 = vmax.f32 %v17844_v39, %v3646_v2  ;;  %v13729_v26 = vrot.slane %v1535_v21, 9 }
 0x188   : > { %5757 = vst [vmem:[#allocation2 + $0xd8] sm:$0xf] %v5741_v54  ;;  %5784 = vst [vmem:[#allocation2 + $0x88] sm:$0xf] %v5741_v54  ;;  %v3887_v30 = vmax.f32 %v17848_v61, %v3647_v38  ;;  %v15084_v14 = vpack.c.bf16 %v3884_v22, %v3884_v22  ;;  %v3636_v44 = vmax.f32 %v17896_v43, %v13728_v13 }
 0x189   : > { %5811 = vst [vmem:[#allocation2 + $0x38] sm:$0xf] %v5741_v54  ;;  %v13731_v59 = vrot.slane %v1536_v57, 9  ;;  %v15085_v5 = vpack.c.bf16 %v3885_v12, %v3885_v12  ;;  %v15086_v24 = vpack.c.bf16 %v3886_v37, %v3886_v37  ;;  %v3637_v16 = vmax.f32 %v1535_v21, %v13729_v26 }
 0x18a   : > { %v15087_v51 = vpack.c.bf16 %v3887_v30, %v3887_v30  ;;  %v17928_v39 = vunpack.c.l.b16 %v15084_v14  ;;  %v3638_v42 = vmax.f32 %v17900_v4, %v13730_v62  ;;  %v1571_v61 = vcombine.high %v17826_v32, %v17826_v32 }
 0x18b   : > { %v17931_v7 = vmax.f32 %v1536_v57, %v13731_v59  ;;  %v17933_v58 = vunpack.c.l.b16 %v15085_v5  ;;  %v17935_v0 = vunpack.c.l.b16 %v15086_v24  ;;  %v1578_v15 = vrot.slane %v17826_v32, %v17370_v48 }
 0x18c   : > { %v17941_v43 = vunpack.c.l.b16 %v15087_v51  ;;  %v4443_v55 = vrot.slane %v17928_v39, 4  ;;  %v4833_v3 = vrot.slane %v17928_v39, 5  ;;  %v5111_v4 = vrot.slane %v17928_v39, 6 }
 0x18d   : > { %v4445_v25 = vrot.slane %v17933_v58, 3  ;;  %v4447_v10 = vrot.slane %v17935_v0, 2  ;;  %v4835_v11 = vrot.slane %v17933_v58, 4  ;;  %v4837_v63 = vrot.slane %v17935_v0, 3  ;;  %v15988_v8 = vld [vmem:[#allocation2 + $0x20] ss:$100 sps:$4 sm:$0xff]  }
 0x18e   : > { %v4449_v53 = vrot.slane %v17941_v43, 1  ;;  %v4839_v32 = vrot.slane %v17941_v43, 2  ;;  %v5113_v19 = vrot.slane %v17933_v58, 5  ;;  %v5115_v40 = vrot.slane %v17935_v0, 4 }
 0x18f   : > { %v5117_v17 = vrot.slane %v17941_v43, 3  ;;  %v5389_v27 = vrot.slane %v17928_v39, 7  ;;  %v5391_v35 = vrot.slane %v17933_v58, 6  ;;  %v5393_v49 = vrot.slane %v17935_v0, 5  ;;  %v15990_v41 = vld [vmem:[#allocation2 + $0x24] ss:$100 sps:$4 sm:$0xff]  }
 0x190   : > { %v5395_v50 = vrot.slane %v17941_v43, 4  ;;  %v5669_v34 = vrot.slane %v17933_v58, 7  ;;  %v5671_v9 = vrot.slane %v17935_v0, 6  ;;  %v5673_v56 = vrot.slane %v17941_v43, 5  ;;  %8382 = vmatprep.mubr.bf16.mxu0 %v15990_v41 }
 0x191   : > { %v1585_v20 = vrot.slane %v1571_v61, %v17370_v48  ;;  %v1586_v29 = vcombine.high %v1578_v15, %v1578_v15  ;;  %v13740_v47 = vrot.slane %v1578_v15, 9  ;;  %v833_v1 = vadd.f32 %v17966_v23, %v17913_v33  ;;  %8383 = vmatmul.mubr.bf16.vlgmr.msra.gmra.mxu0 %v15988_v8 }
 0x192   : > { %v5670_v6 = vsel %vm4389_vm1, %v5669_v34, %v17928_v39  ;;  %v854_v2 = vadd.f32 %v17966_v23, %v15804_v52  ;;  %v846_v21 = vadd.f32 %v17966_v23, %v845_v18  ;;  %v17975_v54 = vadd.f32 %v17966_v23, %v15805_v36 }
 0x193   : > { %v5672_v38 = vsel %vm4392_vm2, %v5671_v9, %v5670_v6  ;;  %v1587_v22 = vcombine.high %v1585_v20, %v1585_v20  ;;  %v13741_v57 = vrot.slane %v1586_v29, 9  ;;  %v13742_v12 = vrot.slane %v1585_v20, 9 }
 0x194   : > { %v3648_v37 = vmax.f32 %v1578_v15, %v13740_v47  ;;  %v5674_v33 = vsel %vm4395_vm3, %v5673_v56, %v5672_v38  ;;  %v1057_v13 = vmax.f32 %v833_v1, 0.0  ;;  %v1062_v26 = vmax.f32 %v854_v2, 0.0 }
 0x195   : > { %v13743_v30 = vrot.slane %v1587_v22, 9  ;;  %v3649_v14 = vmax.f32 %v1586_v29, %v13741_v57  ;;  %v3650_v52 = vmax.f32 %v1585_v20, %v13742_v12  ;;  %v17979_v62 = vmax.f32 %v846_v21, 0.0 }
 0x196   : > { %v3888_v59 = vmax.f32 %v3636_v44, %v3648_v37  ;;  %v1537_v5 = vcombine.high %v1057_v13, %v1057_v13  ;;  %v1544_v24 = vrot.slane %v1057_v13, %v17370_v48  ;;  %v1622_v51 = vcombine.high %v1062_v26, %v1062_v26 }
 0x197   : > { %v3651_v61 = vmax.f32 %v1587_v22, %v13743_v30  ;;  %v3889_v18 = vmax.f32 %v3637_v16, %v3649_v14  ;;  %v3890_v36 = vmax.f32 %v3638_v42, %v3650_v52  ;;  %v1629_v15 = vrot.slane %v1062_v26, %v17370_v48 }
 0x198   : > { %v15155_v34 = vpack.c.bf16 %v3888_v59, %v3888_v59  ;;  %v1551_v9 = vrot.slane %v1537_v5, %v17370_v48  ;;  %v1552_v56 = vcombine.high %v1544_v24, %v1544_v24  ;;  %v13732_v8 = vrot.slane %v1544_v24, 9 }
 0x199   : > { %v3891_v29 = vmax.f32 %v17931_v7, %v3651_v61  ;;  %v15167_v20 = vpack.c.bf16 %v3889_v18, %v3889_v18  ;;  %v15179_v47 = vpack.c.bf16 %v3890_v36, %v3890_v36  ;;  %v1636_v44 = vrot.slane %v1622_v51, %v17370_v48 }
 0x19a   : > { %v17986_v1 = vunpack.c.l.b16 %v15155_v34  ;;  %v1553_v41 = vcombine.high %v1551_v9, %v1551_v9  ;;  %v13733_v6 = vrot.slane %v1552_v56, 9  ;;  %v13734_v2 = vrot.slane %v1551_v9, 9 }
 0x19b   : > { %v17988_v16 = vunpack.c.l.b16 %v15167_v20  ;;  %v17990_v42 = vunpack.c.l.b16 %v15179_v47  ;;  %v15191_v21 = vpack.c.bf16 %v3891_v29, %v3891_v29  ;;  %v3640_v38 = vmax.f32 %v1544_v24, %v13732_v8 }
 0x19c   : > { %v4841_v22 = vrot.slane %v17986_v1, 1  ;;  %v5119_v57 = vrot.slane %v17986_v1, 2  ;;  %v5397_v7 = vrot.slane %v17986_v1, 3  ;;  %v5675_v12 = vrot.slane %v17986_v1, 4 }
 0x19d   : > { %v5121_v37 = vrot.slane %v17988_v16, 1  ;;  %v5399_v13 = vrot.slane %v17988_v16, 2  ;;  %v5401_v26 = vrot.slane %v17990_v42, 1  ;;  %v5622_v30 = vunpack.c.l.b16 %v15191_v21 }
 0x19e   : > { %v5676_v14 = vsel %vm4398_vm4, %v5675_v12, %v5674_v33  ;;  %v5677_v52 = vrot.slane %v17988_v16, 3  ;;  %v5679_v59 = vrot.slane %v17990_v42, 2  ;;  %v13735_v5 = vrot.slane %v1553_v41, 9 }
 0x19f   : > { %v5681_v24 = vrot.slane %v5622_v30, 1  ;;  %v3641_v51 = vmax.f32 %v1552_v56, %v13733_v6  ;;  %v3642_v61 = vmax.f32 %v1551_v9, %v13734_v2  ;;  %v3880_v18 = vmax.f32 %v17790_v60, %v3640_v38  ;;  %v18009_v6 = vpop.f32.mrf.mxu0 }
 0x1a0   : > { %v5678_v36 = vsel %vm4401_vm5, %v5677_v52, %v5676_v14  ;;  %v3643_v34 = vmax.f32 %v1553_v41, %v13735_v5  ;;  %v1637_v8 = vcombine.high %v1629_v15, %v1629_v15  ;;  %v1638_v29 = vcombine.high %v1636_v44, %v1636_v44 }
 0x1a1   : > { %v5680_v20 = vsel %vm4404_vm6, %v5679_v59, %v5678_v36  ;;  %v3881_v47 = vmax.f32 %v17796_v28, %v3641_v51  ;;  %v3882_v33 = vmax.f32 %v17805_v46, %v3642_v61  ;;  %v15080_v21 = vpack.c.bf16 %v3880_v18, %v3880_v18  ;;  %v15808_v36 = vpop.f32.mrf.mxu0 }
 0x1a2   : > { %v5682_v12 = vsel %vm4407_vm7, %v5681_v24, %v5680_v20  ;;  %v3883_v30 = vmax.f32 %v17807_v31, %v3643_v34  ;;  %v13752_v56 = vrot.slane %v1629_v15, 9  ;;  %v13753_v9 = vrot.slane %v1637_v8, 9 }
 0x1a3   : > { %v5742_v60 = vpack.c.b16 %v5682_v12, %v5682_v12  ;;  %v15081_v2 = vpack.c.bf16 %v3881_v47, %v3881_v47  ;;  %v15082_v41 = vpack.c.bf16 %v3882_v33, %v3882_v33  ;;  %v4348_v38 = vunpack.c.l.b16 %v15080_v21 }
 0x1a4   : > { %v15083_v14 = vpack.c.bf16 %v3883_v30, %v3883_v30  ;;  %v13754_v52 = vrot.slane %v1636_v44, 9  ;;  %v13755_v59 = vrot.slane %v1638_v29, 9  ;;  %v18011_v5 = vmax.f32 %v1629_v15, %v13752_v56 }
 0x1a5   : > { %5758 = vst [vmem:[#allocation2 + $0x13c] sm:$0xf] %v5742_v60  ;;  %5785 = vst [vmem:[#allocation2 + $0xec] sm:$0xf] %v5742_v60  ;;  %v4349_v28 = vunpack.c.l.b16 %v15081_v2  ;;  %v4350_v46 = vunpack.c.l.b16 %v15082_v41  ;;  %v18013_v31 = vmax.f32 %v1637_v8, %v13753_v9  ;;  %v1588_v24 = vcombine.high %v17979_v62, %v17979_v62  ;;  %v861_v41 = vpop.f32.mrf.mxu0 }
 0x1a6   : > { %5812 = vst [vmem:[#allocation2 + $0x9c] sm:$0xf] %v5742_v60  ;;  %5839 = vst [vmem:[#allocation2 + $0x4c] sm:$0xf] %v5742_v60  ;;  %v4351_v51 = vunpack.c.l.b16 %v15083_v14  ;;  %v18017_v61 = vmax.f32 %v1636_v44, %v13754_v52  ;;  %v18019_v18 = vmax.f32 %v1638_v29, %v13755_v59  ;;  %v18023_v15 = vrot.slane %v17979_v62, %v17370_v48 }
 0x1a7   : > { %v4437_v34 = vrot.slane %v4349_v28, 7  ;;  %v4439_v20 = vrot.slane %v4350_v46, 6  ;;  %v4829_v47 = vrot.slane %v4350_v46, 7  ;;  %v18026_v33 = vrot.slane %v1588_v24, %v17370_v48 }
 0x1a8   : > { %v4441_v8 = vrot.slane %v4351_v51, 5  ;;  %v4831_v21 = vrot.slane %v4351_v51, 6  ;;  %v5109_v12 = vrot.slane %v4351_v51, 7  ;;  %v5390_v44 = vsel %vm4389_vm1, %v5389_v27, %v4351_v51 }
 0x1a9   : > { %v4438_v29 = vsel %vm4389_vm1, %v4437_v34, %v4348_v38  ;;  %v4830_v30 = vsel %vm4389_vm1, %v4829_v47, %v4349_v28  ;;  %v5392_v62 = vsel %vm4392_vm2, %v5391_v35, %v5390_v44  ;;  %v1603_v56 = vcombine.high %v18023_v15, %v18023_v15 }
 0x1aa   : > { %v4440_v9 = vsel %vm4392_vm2, %v4439_v20, %v4438_v29  ;;  %v4832_v60 = vsel %vm4392_vm2, %v4831_v21, %v4830_v30  ;;  %v5110_v2 = vsel %vm4389_vm1, %v5109_v12, %v4350_v46  ;;  %v5394_v27 = vsel %vm4395_vm3, %v5393_v49, %v5392_v62 }
 0x1ab   : > { %v4442_v38 = vsel %vm4395_vm3, %v4441_v8, %v4440_v9  ;;  %v4834_v35 = vsel %vm4395_vm3, %v4833_v3, %v4832_v60  ;;  %v5112_v14 = vsel %vm4392_vm2, %v5111_v4, %v5110_v2  ;;  %v5396_v52 = vsel %vm4398_vm4, %v5395_v50, %v5394_v27 }
 0x1ac   : > { %v4444_v59 = vsel %vm4398_vm4, %v4443_v55, %v4442_v38  ;;  %v4836_v49 = vsel %vm4398_vm4, %v4835_v11, %v4834_v35  ;;  %v5114_v3 = vsel %vm4395_vm3, %v5113_v19, %v5112_v14  ;;  %v5398_v4 = vsel %vm4401_vm5, %v5397_v7, %v5396_v52 }
 0x1ad   : > { %v4446_v50 = vsel %vm4401_vm5, %v4445_v25, %v4444_v59  ;;  %v4838_v39 = vsel %vm4401_vm5, %v4837_v63, %v4836_v49  ;;  %v5116_v55 = vsel %vm4398_vm4, %v5115_v40, %v5114_v3  ;;  %v5400_v11 = vsel %vm4404_vm6, %v5399_v13, %v5398_v4  ;;  %v15809_v40 = vpop.f32.mrf.mxu0 }
 0x1ae   : > { %v4448_v19 = vsel %vm4404_vm6, %v4447_v10, %v4446_v50  ;;  %v4840_v58 = vsel %vm4404_vm6, %v4839_v32, %v4838_v39  ;;  %v5118_v25 = vsel %vm4401_vm5, %v5117_v17, %v5116_v55  ;;  %v5402_v63 = vsel %vm4407_vm7, %v5401_v26, %v5400_v11 }
 0x1af   : > { %v4450_v7 = vsel %vm4407_vm7, %v4449_v53, %v4448_v19  ;;  %v4842_v0 = vsel %vm4407_vm7, %v4841_v22, %v4840_v58  ;;  %v5120_v10 = vsel %vm4404_vm6, %v5119_v57, %v5118_v25  ;;  %v5462_v32 = vpack.c.b16 %v5402_v63, %v5402_v63  ;;  %v864_v46 = vpop.f32.mrf.mxu0 }
 0x1b0   : > { %v4510_v13 = vpack.c.b16 %v4450_v7, %v4450_v7  ;;  %v4902_v17 = vpack.c.b16 %v4842_v0, %v4842_v0  ;;  %v5122_v42 = vsel %vm4407_vm7, %v5121_v37, %v5120_v10  ;;  %v1604_v43 = vcombine.high %v18026_v33, %v18026_v33 }
 0x1b1   : > { %v5182_v26 = vpack.c.b16 %v5122_v42, %v5122_v42  ;;  %5478 = vst [vmem:[#allocation2 + $0x138] sm:$0xf] %v5462_v32  ;;  %5505 = vst [vmem:[#allocation2 + $0xe8] sm:$0xf] %v5462_v32  ;;  %v13744_v53 = vrot.slane %v18023_v15, 9  ;;  %v13745_v1 = vrot.slane %v1603_v56, 9  ;;  %v849_v37 = vadd.f32 %v17966_v23, %v18009_v6 }
 0x1b2   : > { %5532 = vst [vmem:[#allocation2 + $0x98] sm:$0xf] %v5462_v32  ;;  %5559 = vst [vmem:[#allocation2 + $0x48] sm:$0xf] %v5462_v32  ;;  %v13746_v22 = vrot.slane %v18026_v33, 9  ;;  %v13747_v16 = vrot.slane %v1604_v43, 9  ;;  %v870_v28 = vadd.f32 %v17966_v23, %v15808_v36  ;;  %v862_v20 = vadd.f32 %v17966_v23, %v861_v41 }
 0x1b3   : > { %4526 = vst [vmem:[#allocation2 + $0x12c] sm:$0xf] %v4510_v13  ;;  %4581 = vst [vmem:[#allocation2 + $0xdc] sm:$0xf] %v4510_v13  ;;  %v1063_v57 = vmax.f32 %v17975_v54, 0.0  ;;  %v3652_v24 = vmax.f32 %v18023_v15, %v13744_v53  ;;  %v3653_v51 = vmax.f32 %v1603_v56, %v13745_v1  ;;  %v1061_v21 = vmax.f32 %v849_v37, 0.0 }
 0x1b4   : > { %4636 = vst [vmem:[#allocation2 + $0x8c] sm:$0xf] %v4510_v13  ;;  %4691 = vst [vmem:[#allocation2 + $0x3c] sm:$0xf] %v4510_v13  ;;  %v3654_v34 = vmax.f32 %v18026_v33, %v13746_v22  ;;  %v3655_v47 = vmax.f32 %v1604_v43, %v13747_v16  ;;  %v1066_v6 = vmax.f32 %v870_v28, 0.0  ;;  %v1064_v12 = vmax.f32 %v862_v20, 0.0 }
 0x1b5   : > { %4918 = vst [vmem:[#allocation2 + $0x130] sm:$0xf] %v4902_v17  ;;  %4945 = vst [vmem:[#allocation2 + $0xe0] sm:$0xf] %v4902_v17  ;;  %v1639_v8 = vcombine.high %v1063_v57, %v1063_v57  ;;  %v1646_v54 = vrot.slane %v1063_v57, %v17370_v48  ;;  %v18115_v36 = vadd.f32 %v17966_v23, %v15809_v40 }
 0x1b6   : > { %4972 = vst [vmem:[#allocation2 + $0x90] sm:$0xf] %v4902_v17  ;;  %4999 = vst [vmem:[#allocation2 + $0x40] sm:$0xf] %v4902_v17  ;;  %v18118_v44 = vadd.f32 %v17966_v23, %v864_v46  ;;  %v1605_v33 = vcombine.high %v1061_v21, %v1061_v21  ;;  %v1612_v62 = vrot.slane %v1061_v21, %v17370_v48 }
 0x1b7   : > { %5198 = vst [vmem:[#allocation2 + $0x134] sm:$0xf] %v5182_v26  ;;  %5225 = vst [vmem:[#allocation2 + $0xe4] sm:$0xf] %v5182_v26  ;;  %v1653_v15 = vrot.slane %v1639_v8, %v17370_v48  ;;  %v1654_v29 = vcombine.high %v1646_v54, %v1646_v54  ;;  %v13756_v30 = vrot.slane %v1646_v54, 9  ;;  %v1690_v56 = vcombine.high %v1066_v6, %v1066_v6 }
 0x1b8   : > { %5252 = vst [vmem:[#allocation2 + $0x94] sm:$0xf] %v5182_v26  ;;  %5279 = vst [vmem:[#allocation2 + $0x44] sm:$0xf] %v5182_v26  ;;  %v1697_v9 = vrot.slane %v1066_v6, %v17370_v48  ;;  %v1656_v60 = vcombine.high %v1064_v12, %v1064_v12  ;;  %v1619_v35 = vrot.slane %v1605_v33, %v17370_v48  ;;  %v13748_v52 = vrot.slane %v1612_v62, 9 }
 0x1b9   : > { %v1655_v2 = vcombine.high %v1653_v15, %v1653_v15  ;;  %v13757_v27 = vrot.slane %v1654_v29, 9  ;;  %v13758_v41 = vrot.slane %v1653_v15, 9  ;;  %v3664_v38 = vmax.f32 %v1646_v54, %v13756_v30 }
 0x1ba   : > { %v1620_v14 = vcombine.high %v1612_v62, %v1612_v62  ;;  %v1704_v59 = vrot.slane %v1690_v56, %v17370_v48  ;;  %v1621_v55 = vcombine.high %v1619_v35, %v1619_v35  ;;  %v13750_v19 = vrot.slane %v1619_v35, 9  ;;  %v15993_v6 = vld [vmem:[#allocation2 + $0xc8] ss:$100 sps:$4 sm:$0xff]  }
 0x1bb   : > { %v13759_v3 = vrot.slane %v1655_v2, 9  ;;  %v3665_v4 = vmax.f32 %v1654_v29, %v13757_v27  ;;  %v3666_v50 = vmax.f32 %v1653_v15, %v13758_v41  ;;  %v3892_v39 = vmax.f32 %v3652_v24, %v3664_v38 }
 0x1bc   : > { %v15991_v49 = vld [vmem:[#allocation2 + $0xcc] ss:$100 sps:$4 sm:$0xff]   ;;  %v13749_v11 = vrot.slane %v1620_v14, 9  ;;  %v3656_v58 = vmax.f32 %v1612_v62, %v13748_v52  ;;  %v13751_v0 = vrot.slane %v1621_v55, 9  ;;  %v3658_v32 = vmax.f32 %v1619_v35, %v13750_v19  ;;  %v15812_v35 = vpop.f32.mrf.mxu0 }
 0x1bd   : > { %8130 = vmatprep.mubr.bf16.mxu1 %v15991_v49  ;;  %v3667_v25 = vmax.f32 %v1655_v2, %v13759_v3  ;;  %v3893_v63 = vmax.f32 %v3653_v51, %v3665_v4  ;;  %v3894_v40 = vmax.f32 %v3654_v34, %v3666_v50  ;;  %v15088_v7 = vpack.c.bf16 %v3892_v39, %v3892_v39 }
 0x1be   : > { %v3657_v10 = vmax.f32 %v1620_v14, %v13749_v11  ;;  %v1705_v13 = vcombine.high %v1697_v9, %v1697_v9  ;;  %v3659_v53 = vmax.f32 %v1621_v55, %v13751_v0  ;;  %v1706_v1 = vcombine.high %v1704_v59, %v1704_v59  ;;  %8131 = vmatmul.mubr.bf16.gmra.mxu1 %v15993_v6 }
 0x1bf   : > { %v3895_v17 = vmax.f32 %v3655_v47, %v3667_v25  ;;  %v15089_v42 = vpack.c.bf16 %v3893_v63, %v3893_v63  ;;  %v15090_v43 = vpack.c.bf16 %v3894_v40, %v3894_v40  ;;  %v4356_v26 = vunpack.c.l.b16 %v15088_v7 }
 0x1c0   : > { %v13768_v22 = vrot.slane %v1697_v9, 9  ;;  %v13769_v16 = vrot.slane %v1705_v13, 9  ;;  %v13770_v46 = vrot.slane %v1704_v59, 9  ;;  %v13771_v24 = vrot.slane %v1706_v1, 9 }
 0x1c1   : > { %v15091_v57 = vpack.c.bf16 %v3895_v17, %v3895_v17  ;;  %v4357_v37 = vunpack.c.l.b16 %v15089_v42  ;;  %v4358_v28 = vunpack.c.l.b16 %v15090_v43  ;;  %v1663_v20 = vrot.slane %v1064_v12, %v17370_v48 }
 0x1c2   : > { %v18125_v51 = vmax.f32 %v1697_v9, %v13768_v22  ;;  %v18127_v34 = vmax.f32 %v1705_v13, %v13769_v16  ;;  %v18132_v15 = vmax.f32 %v1704_v59, %v13770_v46  ;;  %v18134_v29 = vmax.f32 %v1706_v1, %v13771_v24 }
 0x1c3   : > { %v18130_v8 = vunpack.c.l.b16 %v15091_v57  ;;  %v4451_v47 = vrot.slane %v4357_v37, 7  ;;  %v4453_v54 = vrot.slane %v4358_v28, 6  ;;  %v4843_v21 = vrot.slane %v4358_v28, 7 }
 0x1c4   : > { %v1670_v30 = vrot.slane %v1656_v60, %v17370_v48  ;;  %v1671_v33 = vcombine.high %v1663_v20, %v1663_v20  ;;  %v13760_v38 = vrot.slane %v1663_v20, 9  ;;  %v1067_v50 = vmax.f32 %v18115_v36, 0.0 }
 0x1c5   : > { %v4452_v62 = vsel %vm4389_vm1, %v4451_v47, %v4356_v26  ;;  %v4455_v56 = vrot.slane %v18130_v8, 5  ;;  %v4844_v9 = vsel %vm4389_vm1, %v4843_v21, %v4357_v37  ;;  %v4845_v12 = vrot.slane %v18130_v8, 6 }
 0x1c6   : > { %v4454_v2 = vsel %vm4392_vm2, %v4453_v54, %v4452_v62  ;;  %v5123_v27 = vrot.slane %v18130_v8, 7  ;;  %v1672_v41 = vcombine.high %v1670_v30, %v1670_v30  ;;  %v13761_v52 = vrot.slane %v1671_v33, 9 }
 0x1c7   : > { %v4456_v14 = vsel %vm4395_vm3, %v4455_v56, %v4454_v2  ;;  %v4846_v60 = vsel %vm4392_vm2, %v4845_v12, %v4844_v9  ;;  %v13762_v59 = vrot.slane %v1670_v30, 9  ;;  %v3668_v4 = vmax.f32 %v1663_v20, %v13760_v38 }
 0x1c8   : > { %v5124_v49 = vsel %vm4389_vm1, %v5123_v27, %v4358_v28  ;;  %v13763_v3 = vrot.slane %v1672_v41, 9  ;;  %v3669_v39 = vmax.f32 %v1671_v33, %v13761_v52  ;;  %v1065_v11 = vmax.f32 %v18118_v44, 0.0 }
 0x1c9   : > { %v3670_v55 = vmax.f32 %v1670_v30, %v13762_v59  ;;  %v18149_v19 = vadd.f32 %v17966_v23, %v15812_v35  ;;  %v3896_v63 = vmax.f32 %v3656_v58, %v3668_v4  ;;  %v1707_v40 = vcombine.high %v1067_v50, %v1067_v50 }
 0x1ca   : > { %v3671_v25 = vmax.f32 %v1672_v41, %v13763_v3  ;;  %v1714_v7 = vrot.slane %v1067_v50, %v17370_v48  ;;  %v3897_v0 = vmax.f32 %v3657_v10, %v3669_v39  ;;  %v1673_v17 = vcombine.high %v1065_v11, %v1065_v11 }
 0x1cb   : > { %v3898_v13 = vmax.f32 %v3658_v32, %v3670_v55  ;;  %v18153_v42 = vrot.slane %v1065_v11, %v17370_v48  ;;  %v15092_v36 = vpack.c.bf16 %v3896_v63, %v3896_v63  ;;  %v1721_v26 = vrot.slane %v1707_v40, %v17370_v48 }
 0x1cc   : > { %v3899_v43 = vmax.f32 %v3659_v53, %v3671_v25  ;;  %v1722_v1 = vcombine.high %v1714_v7, %v1714_v7  ;;  %v15093_v44 = vpack.c.bf16 %v3897_v0, %v3897_v0  ;;  %v13772_v16 = vrot.slane %v1714_v7, 9 }
 0x1cd   : > { %v15094_v22 = vpack.c.bf16 %v3898_v13, %v3898_v13  ;;  %v18157_v57 = vrot.slane %v1673_v17, %v17370_v48  ;;  %v4360_v37 = vunpack.c.l.b16 %v15092_v36  ;;  %v1723_v28 = vcombine.high %v1721_v26, %v1721_v26  ;;  %v877_v13 = vpop.f32.mrf.mxu0 }
 0x1ce   : > { %v15095_v58 = vpack.c.bf16 %v3899_v43, %v3899_v43  ;;  %v13773_v10 = vrot.slane %v1722_v1, 9  ;;  %v4361_v32 = vunpack.c.l.b16 %v15093_v44  ;;  %v13774_v24 = vrot.slane %v1721_v26, 9 }
 0x1cf   : > { %v4362_v46 = vunpack.c.l.b16 %v15094_v22  ;;  %v18159_v20 = vmax.f32 %v1714_v7, %v13772_v16  ;;  %v4457_v47 = vrot.slane %v4360_v37, 4  ;;  %v4847_v54 = vrot.slane %v4360_v37, 5 }
 0x1d0   : > { %v18161_v53 = vunpack.c.l.b16 %v15095_v58  ;;  %v5125_v21 = vrot.slane %v4360_v37, 6  ;;  %v4459_v6 = vrot.slane %v4361_v32, 3  ;;  %v4849_v33 = vrot.slane %v4361_v32, 4 }
 0x1d1   : > { %v4461_v30 = vrot.slane %v4362_v46, 2  ;;  %v4851_v62 = vrot.slane %v4362_v46, 3  ;;  %v4458_v56 = vsel %vm4398_vm4, %v4457_v47, %v4456_v14  ;;  %v4848_v12 = vsel %vm4395_vm3, %v4847_v54, %v4846_v60 }
 0x1d2   : > { %v4463_v9 = vrot.slane %v18161_v53, 1  ;;  %v4853_v2 = vrot.slane %v18161_v53, 2  ;;  %v4460_v27 = vsel %vm4401_vm5, %v4459_v6, %v4458_v56  ;;  %v4850_v41 = vsel %vm4398_vm4, %v4849_v33, %v4848_v12 }
 0x1d3   : > { %v5126_v38 = vsel %vm4392_vm2, %v5125_v21, %v5124_v49  ;;  %v5127_v35 = vrot.slane %v4361_v32, 5  ;;  %v4462_v52 = vsel %vm4404_vm6, %v4461_v30, %v4460_v27  ;;  %v5129_v59 = vrot.slane %v4362_v46, 4 }
 0x1d4   : > { %v5131_v3 = vrot.slane %v18161_v53, 3  ;;  %v5403_v4 = vrot.slane %v4360_v37, 7  ;;  %v4464_v14 = vsel %vm4407_vm7, %v4463_v9, %v4462_v52  ;;  %v5405_v60 = vrot.slane %v4361_v32, 6 }
 0x1d5   : > { %v5128_v50 = vsel %vm4395_vm3, %v5127_v35, %v5126_v38  ;;  %v5407_v39 = vrot.slane %v4362_v46, 5  ;;  %v4511_v55 = vpack.c.b16 %v4464_v14, %v4464_v14  ;;  %v5409_v25 = vrot.slane %v18161_v53, 4 }
 0x1d6   : > { %v5404_v11 = vsel %vm4389_vm1, %v5403_v4, %v18130_v8  ;;  %v5683_v49 = vrot.slane %v4361_v32, 7  ;;  %v5685_v40 = vrot.slane %v4362_v46, 6  ;;  %v5687_v7 = vrot.slane %v18161_v53, 5  ;;  %v15813_v53 = vpop.f32.mrf.mxu0 }
 0x1d7   : > { %v5406_v63 = vsel %vm4392_vm2, %v5405_v60, %v5404_v11  ;;  %v13775_v0 = vrot.slane %v1723_v28, 9  ;;  %4527 = vst [vmem:[#allocation2 + $0x190] sm:$0xf] %v4511_v55  ;;  %4582 = vst [vmem:[#allocation2 + $0x140] sm:$0xf] %v4511_v55  ;;  %v18180_v43 = vmax.f32 %v1722_v1, %v13773_v10  ;;  %v18182_v8 = vmax.f32 %v1721_v26, %v13774_v24 }
 0x1d8   : > { %v5684_v17 = vsel %vm4389_vm1, %v5683_v49, %v4360_v37  ;;  %4637 = vst [vmem:[#allocation2 + $0xf0] sm:$0xf] %v4511_v55  ;;  %4692 = vst [vmem:[#allocation2 + $0xa0] sm:$0xf] %v4511_v55  ;;  %v1688_v36 = vcombine.high %v18153_v42, %v18153_v42  ;;  %v1689_v16 = vcombine.high %v18157_v57, %v18157_v57  ;;  %v13764_v58 = vrot.slane %v18153_v42, 9 }
 0x1d9   : > { %4747 = vst [vmem:[#allocation2 + $0x50] sm:$0xf] %v4511_v55  ;;  %v5686_v44 = vsel %vm4392_vm2, %v5685_v40, %v5684_v17  ;;  %v18187_v22 = vmax.f32 %v1723_v28, %v13775_v0  ;;  %v13766_v32 = vrot.slane %v18157_v57, 9  ;;  %v4852_v1 = vsel %vm4401_vm5, %v4851_v62, %v4850_v41 }
 0x1da   : > { %v13765_v37 = vrot.slane %v1688_v36, 9  ;;  %v5130_v26 = vsel %vm4398_vm4, %v5129_v59, %v5128_v50  ;;  %v13767_v10 = vrot.slane %v1689_v16, 9  ;;  %v3672_v46 = vmax.f32 %v18153_v42, %v13764_v58 }
 0x1db   : > { %v4854_v24 = vsel %vm4404_vm6, %v4853_v2, %v4852_v1  ;;  %v5132_v28 = vsel %vm4401_vm5, %v5131_v3, %v5130_v26  ;;  %v3674_v54 = vmax.f32 %v18157_v57, %v13766_v32  ;;  %v5408_v21 = vsel %vm4395_vm3, %v5407_v39, %v5406_v63 }
 0x1dc   : > { %v3673_v47 = vmax.f32 %v1688_v36, %v13765_v37  ;;  %v5688_v6 = vsel %vm4395_vm3, %v5687_v7, %v5686_v44  ;;  %v3675_v30 = vmax.f32 %v1689_v16, %v13767_v10  ;;  %v3900_v33 = vmax.f32 %v18011_v5, %v3672_v46 }
 0x1dd   : > { %v5410_v62 = vsel %vm4398_vm4, %v5409_v25, %v5408_v21  ;;  %v1070_v56 = vmax.f32 %v18149_v19, 0.0  ;;  %v3902_v9 = vmax.f32 %v18017_v61, %v3674_v54  ;;  %v878_v12 = vadd.f32 %v17966_v23, %v877_v13 }
 0x1de   : > { %v3901_v42 = vmax.f32 %v18013_v31, %v3673_v47  ;;  %v889_v2 = vadd.f32 %v17966_v23, %v15813_v53  ;;  %v3903_v57 = vmax.f32 %v18019_v18, %v3675_v30  ;;  %v15156_v27 = vpack.c.bf16 %v3900_v33, %v3900_v33  ;;  %v18221_v53 = vpop.f32.mrf.mxu0 }
 0x1df   : > { %v1758_v41 = vcombine.high %v1070_v56, %v1070_v56  ;;  %v1765_v38 = vrot.slane %v1070_v56, %v17370_v48  ;;  %v15180_v5 = vpack.c.bf16 %v3902_v9, %v3902_v9  ;;  %v1068_v52 = vmax.f32 %v878_v12, 0.0 }
 0x1e0   : > { %v15168_v35 = vpack.c.bf16 %v3901_v42, %v3901_v42  ;;  %v18210_v59 = vmax.f32 %v889_v2, 0.0  ;;  %v4783_v19 = vunpack.c.l.b16 %v15156_v27  ;;  %v15192_v3 = vpack.c.bf16 %v3903_v57, %v3903_v57 }
 0x1e1   : > { %v1772_v31 = vrot.slane %v1758_v41, %v17370_v48  ;;  %v1773_v61 = vcombine.high %v1765_v38, %v1765_v38  ;;  %v5343_v14 = vunpack.c.l.b16 %v15180_v5  ;;  %v13784_v50 = vrot.slane %v1765_v38, 9 }
 0x1e2   : > { %v5063_v4 = vunpack.c.l.b16 %v15168_v35  ;;  %v1724_v60 = vcombine.high %v1068_v52, %v1068_v52  ;;  %v4855_v39 = vrot.slane %v4783_v19, 1  ;;  %v5133_v18 = vrot.slane %v4783_v19, 2  ;;  %v15816_v35 = vpop.f32.mrf.mxu0 }
 0x1e3   : > { %v5411_v55 = vrot.slane %v4783_v19, 3  ;;  %v5623_v11 = vunpack.c.l.b16 %v15192_v3  ;;  %v5415_v63 = vrot.slane %v5343_v14, 1  ;;  %v5689_v40 = vrot.slane %v4783_v19, 4 }
 0x1e4   : > { %v5135_v25 = vrot.slane %v5063_v4, 1  ;;  %v5413_v49 = vrot.slane %v5063_v4, 2  ;;  %v4856_v7 = vsel %vm4407_vm7, %v4855_v39, %v4854_v24  ;;  %v5134_v0 = vsel %vm4404_vm6, %v5133_v18, %v5132_v28 }
 0x1e5   : > { %v5412_v13 = vsel %vm4401_vm5, %v5411_v55, %v5410_v62  ;;  %v5691_v17 = vrot.slane %v5063_v4, 3  ;;  %v4903_v36 = vpack.c.b16 %v4856_v7, %v4856_v7  ;;  %v5690_v58 = vsel %vm4398_vm4, %v5689_v40, %v5688_v6 }
 0x1e6   : > { %v5136_v44 = vsel %vm4407_vm7, %v5135_v25, %v5134_v0  ;;  %v5414_v16 = vsel %vm4404_vm6, %v5413_v49, %v5412_v13  ;;  %v5693_v26 = vrot.slane %v5343_v14, 2  ;;  %v5695_v46 = vrot.slane %v5623_v11, 1  ;;  %v893_v11 = vpop.f32.mrf.mxu0 }
 0x1e7   : > { %v5183_v37 = vpack.c.b16 %v5136_v44, %v5136_v44  ;;  %v5416_v32 = vsel %vm4407_vm7, %v5415_v63, %v5414_v16  ;;  %v5692_v1 = vsel %vm4401_vm5, %v5691_v17, %v5690_v58  ;;  %4919 = vst [vmem:[#allocation2 + $0x194] sm:$0xf] %v4903_v36  ;;  %4946 = vst [vmem:[#allocation2 + $0x144] sm:$0xf] %v4903_v36  ;;  %v13785_v28 = vrot.slane %v1773_v61, 9 }
 0x1e8   : > { %v5463_v10 = vpack.c.b16 %v5416_v32, %v5416_v32  ;;  %4973 = vst [vmem:[#allocation2 + $0xf4] sm:$0xf] %v4903_v36  ;;  %5000 = vst [vmem:[#allocation2 + $0xa4] sm:$0xf] %v4903_v36  ;;  %v1774_v24 = vcombine.high %v1772_v31, %v1772_v31  ;;  %v5694_v47 = vsel %vm4404_vm6, %v5693_v26, %v5692_v1  ;;  %v13786_v54 = vrot.slane %v1772_v31, 9  ;;  %v15817_v26 = vpop.f32.mrf.mxu0 }
 0x1e9   : > { %5027 = vst [vmem:[#allocation2 + $0x54] sm:$0xf] %v4903_v36  ;;  %5199 = vst [vmem:[#allocation2 + $0x198] sm:$0xf] %v5183_v37  ;;  %v3692_v21 = vmax.f32 %v1765_v38, %v13784_v50  ;;  %v1731_v6 = vrot.slane %v1068_v52, %v17370_v48  ;;  %v5696_v30 = vsel %vm4407_vm7, %v5695_v46, %v5694_v47 }
 0x1ea   : > { %5226 = vst [vmem:[#allocation2 + $0x148] sm:$0xf] %v5183_v37  ;;  %5253 = vst [vmem:[#allocation2 + $0xf8] sm:$0xf] %v5183_v37  ;;  %v13787_v33 = vrot.slane %v1774_v24, 9  ;;  %v3693_v62 = vmax.f32 %v1773_v61, %v13785_v28  ;;  %v1738_v56 = vrot.slane %v1724_v60, %v17370_v48  ;;  %v5743_v42 = vpack.c.b16 %v5696_v30, %v5696_v30 }
 0x1eb   : > { %5280 = vst [vmem:[#allocation2 + $0xa8] sm:$0xf] %v5183_v37  ;;  %5307 = vst [vmem:[#allocation2 + $0x58] sm:$0xf] %v5183_v37  ;;  %v3694_v9 = vmax.f32 %v1772_v31, %v13786_v54  ;;  %v3908_v12 = vmax.f32 %v18159_v20, %v3692_v21  ;;  %v1739_v2 = vcombine.high %v1731_v6, %v1731_v6  ;;  %v13776_v38 = vrot.slane %v1731_v6, 9 }
 0x1ec   : > { %5479 = vst [vmem:[#allocation2 + $0x19c] sm:$0xf] %v5463_v10  ;;  %5506 = vst [vmem:[#allocation2 + $0x14c] sm:$0xf] %v5463_v10  ;;  %v3695_v57 = vmax.f32 %v1774_v24, %v13787_v33  ;;  %v3909_v27 = vmax.f32 %v18180_v43, %v3693_v62  ;;  %v1740_v41 = vcombine.high %v1738_v56, %v1738_v56  ;;  %v13778_v3 = vrot.slane %v1738_v56, 9 }
 0x1ed   : > { %5533 = vst [vmem:[#allocation2 + $0xfc] sm:$0xf] %v5463_v10  ;;  %5560 = vst [vmem:[#allocation2 + $0xac] sm:$0xf] %v5463_v10  ;;  %v3910_v5 = vmax.f32 %v18182_v8, %v3694_v9  ;;  %v15100_v52 = vpack.c.bf16 %v3908_v12, %v3908_v12  ;;  %v13777_v19 = vrot.slane %v1739_v2, 9  ;;  %v3684_v4 = vmax.f32 %v1731_v6, %v13776_v38 }
 0x1ee   : > { %5587 = vst [vmem:[#allocation2 + $0x5c] sm:$0xf] %v5463_v10  ;;  %5759 = vst [vmem:[#allocation2 + $0x1a0] sm:$0xf] %v5743_v42  ;;  %v3911_v31 = vmax.f32 %v18187_v22, %v3695_v57  ;;  %v15101_v20 = vpack.c.bf16 %v3909_v27, %v3909_v27  ;;  %v13779_v61 = vrot.slane %v1740_v41, 9  ;;  %v3686_v60 = vmax.f32 %v1738_v56, %v13778_v3 }
 0x1ef   : > { %5786 = vst [vmem:[#allocation2 + $0x150] sm:$0xf] %v5743_v42  ;;  %5813 = vst [vmem:[#allocation2 + $0x100] sm:$0xf] %v5743_v42  ;;  %v15102_v14 = vpack.c.bf16 %v3910_v5, %v3910_v5  ;;  %v18231_v43 = vunpack.c.l.b16 %v15100_v52  ;;  %v18233_v50 = vmax.f32 %v1739_v2, %v13777_v19  ;;  %v1775_v8 = vcombine.high %v18210_v59, %v18210_v59 }
 0x1f0   : > { %5840 = vst [vmem:[#allocation2 + $0xb0] sm:$0xf] %v5743_v42  ;;  %5867 = vst [vmem:[#allocation2 + $0x60] sm:$0xf] %v5743_v42  ;;  %v15103_v39 = vpack.c.bf16 %v3911_v31, %v3911_v31  ;;  %v18235_v18 = vunpack.c.l.b16 %v15101_v20  ;;  %v3687_v55 = vmax.f32 %v1740_v41, %v13779_v61  ;;  %v1782_v21 = vrot.slane %v18210_v59, %v17370_v48  ;;  %v18273_v42 = vld [vmem:[%s22152_s2] ss:$0 sm:$0xff] }
 0x1f1   : > { %v18239_v25 = vunpack.c.l.b16 %v15102_v14  ;;  %v4471_v22 = vrot.slane %v18231_v43, 4  ;;  %v4861_v49 = vrot.slane %v18231_v43, 5  ;;  %v5139_v63 = vrot.slane %v18231_v43, 6 }
 0x1f2   : > { %v18244_v40 = vunpack.c.l.b16 %v15103_v39  ;;  %v4473_v7 = vrot.slane %v18235_v18, 3  ;;  %v4863_v0 = vrot.slane %v18235_v18, 4  ;;  %v5141_v13 = vrot.slane %v18235_v18, 5 }
 0x1f3   : > { %v4475_v17 = vrot.slane %v18239_v25, 2  ;;  %v4865_v36 = vrot.slane %v18239_v25, 3  ;;  %v5143_v44 = vrot.slane %v18239_v25, 4  ;;  %v5417_v16 = vrot.slane %v18231_v43, 7  ;;  %v15996_v33 = vld [vmem:[#allocation2 + $0xe8] ss:$100 sps:$4 sm:$0xff]  }
 0x1f4   : > { %v4477_v58 = vrot.slane %v18244_v40, 1  ;;  %v4867_v37 = vrot.slane %v18244_v40, 2  ;;  %v5145_v32 = vrot.slane %v18244_v40, 3  ;;  %v5419_v1 = vrot.slane %v18235_v18, 6 }
 0x1f5   : > { %v5421_v10 = vrot.slane %v18239_v25, 5  ;;  %v5423_v46 = vrot.slane %v18244_v40, 4  ;;  %v5697_v24 = vrot.slane %v18235_v18, 7  ;;  %v5699_v28 = vrot.slane %v18239_v25, 6 }
 0x1f6   : > { %v15994_v47 = vld [vmem:[#allocation2 + $0xec] ss:$100 sps:$4 sm:$0xff]   ;;  %v5701_v54 = vrot.slane %v18244_v40, 5  ;;  %v1789_v6 = vrot.slane %v1775_v8, %v17370_v48  ;;  %v881_v30 = vadd.f32 %v17966_v23, %v18221_v53  ;;  %v902_v56 = vadd.f32 %v17966_v23, %v15816_v35 }
 0x1f7   : > { %v5698_v62 = vsel %vm4389_vm1, %v5697_v24, %v18231_v43  ;;  %v894_v9 = vadd.f32 %v18273_v42, %v893_v11  ;;  %v18277_v59 = vadd.f32 %v18273_v42, %v15817_v26  ;;  %8390 = vmatprep.mubr.bf16.mxu0 %v15994_v47  ;;  %v1790_v53 = vcombine.high %v1782_v21, %v1782_v21 }
 0x1f8   : > { %v5700_v12 = vsel %vm4392_vm2, %v5699_v28, %v5698_v62  ;;  %v1791_v2 = vcombine.high %v1789_v6, %v1789_v6  ;;  %v13788_v57 = vrot.slane %v1782_v21, 9  ;;  %8391 = vmatmul.mubr.bf16.gmra.mxu0 %v15996_v33  ;;  %v13790_v27 = vrot.slane %v1789_v6, 9 }
 0x1f9   : > { %v5702_v23 = vsel %vm4395_vm3, %v5701_v54, %v5700_v12  ;;  %v1069_v41 = vmax.f32 %v881_v30, 0.0  ;;  %v1074_v38 = vmax.f32 %v902_v56, 0.0  ;;  %v13789_v35 = vrot.slane %v1790_v53, 9 }
 0x1fa   : > { %v13791_v5 = vrot.slane %v1791_v2, 9  ;;  %v3696_v52 = vmax.f32 %v1782_v21, %v13788_v57  ;;  %v18281_v19 = vmax.f32 %v894_v9, 0.0  ;;  %v3698_v3 = vmax.f32 %v1789_v6, %v13790_v27 }
 0x1fb   : > { %v1741_v31 = vcombine.high %v1069_v41, %v1069_v41  ;;  %v1748_v20 = vrot.slane %v1069_v41, %v17370_v48  ;;  %v1826_v61 = vcombine.high %v1074_v38, %v1074_v38  ;;  %v3697_v14 = vmax.f32 %v1790_v53, %v13789_v35 }
 0x1fc   : > { %v3699_v39 = vmax.f32 %v1791_v2, %v13791_v5  ;;  %v3912_v8 = vmax.f32 %v3684_v4, %v3696_v52  ;;  %v18285_v11 = vrot.slane %v1074_v38, %v17370_v48  ;;  %v3914_v26 = vmax.f32 %v3686_v60, %v3698_v3 }
 0x1fd   : > { %v1755_v24 = vrot.slane %v1741_v31, %v17370_v48  ;;  %v1756_v28 = vcombine.high %v1748_v20, %v1748_v20  ;;  %v13780_v47 = vrot.slane %v1748_v20, 9  ;;  %v3913_v54 = vmax.f32 %v18233_v50, %v3697_v14 }
 0x1fe   : > { %v3915_v21 = vmax.f32 %v3687_v55, %v3699_v39  ;;  %v15157_v30 = vpack.c.bf16 %v3912_v8, %v3912_v8  ;;  %v18290_v6 = vrot.slane %v1826_v61, %v17370_v48  ;;  %v15181_v33 = vpack.c.bf16 %v3914_v26, %v3914_v26 }
 0x1ff   : > { %v1757_v62 = vcombine.high %v1755_v24, %v1755_v24  ;;  %v13781_v56 = vrot.slane %v1756_v28, 9  ;;  %v13782_v9 = vrot.slane %v1755_v24, 9  ;;  %v15169_v12 = vpack.c.bf16 %v3913_v54, %v3913_v54 }
 0x200   : > { %v18292_v4 = vunpack.c.l.b16 %v15157_v30  ;;  %v15193_v53 = vpack.c.bf16 %v3915_v21, %v3915_v21  ;;  %v3688_v60 = vmax.f32 %v1748_v20, %v13780_v47  ;;  %v18294_v2 = vunpack.c.l.b16 %v15181_v33 }
 0x201   : > { %v13783_v57 = vrot.slane %v1757_v62, 9  ;;  %v3689_v27 = vmax.f32 %v1756_v28, %v13781_v56  ;;  %v3690_v41 = vmax.f32 %v1755_v24, %v13782_v9  ;;  %v18297_v55 = vunpack.c.l.b16 %v15169_v12 }
 0x202   : > { %v4869_v50 = vrot.slane %v18292_v4, 1  ;;  %v5147_v38 = vrot.slane %v18292_v4, 2  ;;  %v5425_v35 = vrot.slane %v18292_v4, 3  ;;  %v5429_v5 = vrot.slane %v18294_v2, 1 }
 0x203   : > { %v5624_v52 = vunpack.c.l.b16 %v15193_v53  ;;  %v5703_v3 = vrot.slane %v18292_v4, 4  ;;  %v5707_v31 = vrot.slane %v18294_v2, 2  ;;  %v5149_v20 = vrot.slane %v18297_v55, 1 }
 0x204   : > { %v5427_v61 = vrot.slane %v18297_v55, 2  ;;  %v5705_v14 = vrot.slane %v18297_v55, 3  ;;  %v3691_v39 = vmax.f32 %v1757_v62, %v13783_v57  ;;  %v3904_v24 = vmax.f32 %v18125_v51, %v3688_v60 }
 0x205   : > { %v5704_v8 = vsel %vm4398_vm4, %v5703_v3, %v5702_v23  ;;  %v5709_v26 = vrot.slane %v5624_v52, 1  ;;  %v3905_v28 = vmax.f32 %v18127_v34, %v3689_v27  ;;  %v3906_v54 = vmax.f32 %v18132_v15, %v3690_v41 }
 0x206   : > { %v5706_v47 = vsel %vm4401_vm5, %v5705_v14, %v5704_v8  ;;  %v3907_v21 = vmax.f32 %v18134_v29, %v3691_v39  ;;  %v1841_v30 = vcombine.high %v18285_v11, %v18285_v11  ;;  %v15096_v56 = vpack.c.bf16 %v3904_v24, %v3904_v24 }
 0x207   : > { %v5708_v33 = vsel %vm4404_vm6, %v5707_v31, %v5706_v47  ;;  %v15097_v62 = vpack.c.bf16 %v3905_v28, %v3905_v28  ;;  %v1842_v23 = vcombine.high %v18290_v6, %v18290_v6  ;;  %v15098_v9 = vpack.c.bf16 %v3906_v54, %v3906_v54 }
 0x208   : > { %v5710_v51 = vsel %vm4407_vm7, %v5709_v26, %v5708_v33  ;;  %v15099_v34 = vpack.c.bf16 %v3907_v21, %v3907_v21  ;;  %v13800_v12 = vrot.slane %v18285_v11, 9  ;;  %v4364_v15 = vunpack.c.l.b16 %v15096_v56 }
 0x209   : > { %v5744_v53 = vpack.c.b16 %v5710_v51, %v5710_v51  ;;  %v4365_v60 = vunpack.c.l.b16 %v15097_v62  ;;  %v13801_v29 = vrot.slane %v1841_v30, 9  ;;  %v4366_v57 = vunpack.c.l.b16 %v15098_v9 }
 0x20a   : > { %v4367_v27 = vunpack.c.l.b16 %v15099_v34  ;;  %v13802_v41 = vrot.slane %v18290_v6, 9  ;;  %v13803_v52 = vrot.slane %v1842_v23, 9  ;;  %v18322_v31 = vmax.f32 %v18285_v11, %v13800_v12 }
 0x20b   : > { %5760 = vst [vmem:[#allocation2 + $0x204] sm:$0xf] %v5744_v53  ;;  %5787 = vst [vmem:[#allocation2 + $0x1b4] sm:$0xf] %v5744_v53  ;;  %v4465_v3 = vrot.slane %v4365_v60, 7  ;;  %v18324_v14 = vmax.f32 %v1841_v30, %v13801_v29  ;;  %v1792_v39 = vcombine.high %v18281_v19, %v18281_v19  ;;  %v4467_v8 = vrot.slane %v4366_v57, 6 }
 0x20c   : > { %5814 = vst [vmem:[#allocation2 + $0x164] sm:$0xf] %v5744_v53  ;;  %5841 = vst [vmem:[#allocation2 + $0x114] sm:$0xf] %v5744_v53  ;;  %v4469_v26 = vrot.slane %v4367_v27, 5  ;;  %v4857_v24 = vrot.slane %v4366_v57, 7  ;;  %v5418_v21 = vsel %vm4389_vm1, %v5417_v16, %v4367_v27  ;;  %v18333_v33 = vmax.f32 %v18290_v6, %v13802_v41  ;;  %v896_v6 = vpop.f32.mrf.mxu0 }
 0x20d   : > { %5868 = vst [vmem:[#allocation2 + $0xc4] sm:$0xf] %v5744_v53  ;;  %v4859_v28 = vrot.slane %v4367_v27, 6  ;;  %v4466_v47 = vsel %vm4389_vm1, %v4465_v3, %v4364_v15  ;;  %v5137_v54 = vrot.slane %v4367_v27, 7  ;;  %v5420_v56 = vsel %vm4392_vm2, %v5419_v1, %v5418_v21 }
 0x20e   : > { %v4468_v11 = vsel %vm4392_vm2, %v4467_v8, %v4466_v47  ;;  %v4858_v30 = vsel %vm4389_vm1, %v4857_v24, %v4365_v60  ;;  %v18340_v62 = vmax.f32 %v1842_v23, %v13803_v52  ;;  %v5422_v16 = vsel %vm4395_vm3, %v5421_v10, %v5420_v56 }
 0x20f   : > { %v4470_v51 = vsel %vm4395_vm3, %v4469_v26, %v4468_v11  ;;  %v4860_v9 = vsel %vm4392_vm2, %v4859_v28, %v4858_v30  ;;  %v5138_v34 = vsel %vm4389_vm1, %v5137_v54, %v4366_v57  ;;  %v5424_v53 = vsel %vm4398_vm4, %v5423_v46, %v5422_v16  ;;  %v15999_v30 = vld [vmem:[%s22153_s3 + $0xf8] sm:$0xff]  }
 0x210   : > { %v4472_v12 = vsel %vm4398_vm4, %v4471_v22, %v4470_v51  ;;  %v4862_v1 = vsel %vm4395_vm3, %v4861_v49, %v4860_v9  ;;  %v5140_v23 = vsel %vm4392_vm2, %v5139_v63, %v5138_v34  ;;  %v5426_v43 = vsel %vm4401_vm5, %v5425_v35, %v5424_v53  ;;  %v16001_v16 = vld [vmem:[%s22153_s3 + $0xb8] sm:$0xff]   ;;  %15278 = vmatprep.subr.bf16.mxu1 %v15999_v30 }
 0x211   : > { %v4474_v10 = vsel %vm4401_vm5, %v4473_v7, %v4472_v12  ;;  %v4864_v22 = vsel %vm4398_vm4, %v4863_v0, %v4862_v1  ;;  %v5142_v49 = vsel %vm4395_vm3, %v5141_v13, %v5140_v23  ;;  %v5428_v18 = vsel %vm4404_vm6, %v5427_v61, %v5426_v43  ;;  %15279 = vmatpush3.bf16.msra.mxu1 %v16001_v16 }
 0x212   : > { %v4476_v63 = vsel %vm4404_vm6, %v4475_v17, %v4474_v10  ;;  %v4866_v7 = vsel %vm4401_vm5, %v4865_v36, %v4864_v22  ;;  %v5144_v0 = vsel %vm4398_vm4, %v5143_v44, %v5142_v49  ;;  %v5430_v25 = vsel %vm4407_vm7, %v5429_v5, %v5428_v18  ;;  %v15820_v44 = vpop.f32.mrf.mxu0 }
 0x213   : > { %v4478_v13 = vsel %vm4407_vm7, %v4477_v58, %v4476_v63  ;;  %v4868_v17 = vsel %vm4404_vm6, %v4867_v37, %v4866_v7  ;;  %v5146_v36 = vsel %vm4401_vm5, %v5145_v32, %v5144_v0  ;;  %v5464_v61 = vpack.c.b16 %v5430_v25, %v5430_v25 }
 0x214   : > { %v4512_v46 = vpack.c.b16 %v4478_v13, %v4478_v13  ;;  %v4870_v35 = vsel %vm4407_vm7, %v4869_v50, %v4868_v17  ;;  %v5148_v58 = vsel %vm4404_vm6, %v5147_v38, %v5146_v36  ;;  %v1799_v32 = vrot.slane %v18281_v19, %v17370_v48  ;;  %v16002_v36 = vld [vmem:[%s22153_s3 + $0xf0] sm:$0xff]  }
 0x215   : > { %v4904_v37 = vpack.c.b16 %v4870_v35, %v4870_v35  ;;  %v5150_v40 = vsel %vm4407_vm7, %v5149_v20, %v5148_v58  ;;  %v1806_v2 = vrot.slane %v1792_v39, %v17370_v48  ;;  %5480 = vst [vmem:[#allocation2 + $0x200] sm:$0xf] %v5464_v61  ;;  %5507 = vst [vmem:[#allocation2 + $0x1b0] sm:$0xf] %v5464_v61  ;;  %v1075_v4 = vmax.f32 %v18277_v59, 0.0  ;;  %v18412_v39 = vpop.f32.mrf.mxu0  ;;  %v16003_v58 = vld [vmem:[%s22153_s3 + $0xb0] sm:$0xff]  }
 0x216   : > { %v5184_v5 = vpack.c.b16 %v5150_v40, %v5150_v40  ;;  %4528 = vst [vmem:[#allocation2 + $0x1f4] sm:$0xf] %v4512_v46  ;;  %4583 = vst [vmem:[#allocation2 + $0x1a4] sm:$0xf] %v4512_v46  ;;  %v897_v50 = vadd.f32 %v18273_v42, %v896_v6  ;;  %v918_v55 = vadd.f32 %v18273_v42, %v15820_v44  ;;  %v13792_v20 = vrot.slane %v1799_v32, 9 }
 0x217   : > { %4638 = vst [vmem:[#allocation2 + $0x154] sm:$0xf] %v4512_v46  ;;  %4693 = vst [vmem:[#allocation2 + $0x104] sm:$0xf] %v4512_v46  ;;  %v1807_v19 = vcombine.high %v1799_v32, %v1799_v32  ;;  %v1808_v38 = vcombine.high %v1806_v2, %v1806_v2  ;;  %v13794_v15 = vrot.slane %v1806_v2, 9  ;;  %v1843_v60 = vcombine.high %v1075_v4, %v1075_v4  ;;  %v18424_v53 = vpop.f32.mrf.mxu0 }
 0x218   : > { %4748 = vst [vmem:[#allocation2 + $0xb4] sm:$0xf] %v4512_v46  ;;  %5534 = vst [vmem:[#allocation2 + $0x160] sm:$0xf] %v5464_v61  ;;  %v1850_v59 = vrot.slane %v1075_v4, %v17370_v48  ;;  %v1073_v29 = vmax.f32 %v897_v50, 0.0  ;;  %v1078_v57 = vmax.f32 %v918_v55, 0.0  ;;  %v3700_v52 = vmax.f32 %v1799_v32, %v13792_v20  ;;  %15280 = vmatprep.subr.bf16.mxu1 %v16002_v36 }
 0x219   : > { %5561 = vst [vmem:[#allocation2 + $0x110] sm:$0xf] %v5464_v61  ;;  %5588 = vst [vmem:[#allocation2 + $0xc0] sm:$0xf] %v5464_v61  ;;  %v13793_v27 = vrot.slane %v1807_v19, 9  ;;  %v13795_v41 = vrot.slane %v1808_v38, 9  ;;  %v3702_v3 = vmax.f32 %v1806_v2, %v13794_v15  ;;  %v1857_v8 = vrot.slane %v1843_v60, %v17370_v48  ;;  %v912_v2 = vpop.f32.mrf.mxu0  ;;  %15281 = vmatpush3.bf16.msra.mxu1 %v16003_v58 }
 0x21a   : > { %4920 = vst [vmem:[#allocation2 + $0x1f8] sm:$0xf] %v4904_v37  ;;  %4947 = vst [vmem:[#allocation2 + $0x1a8] sm:$0xf] %v4904_v37  ;;  %v1858_v26 = vcombine.high %v1850_v59, %v1850_v59  ;;  %v13804_v24 = vrot.slane %v1850_v59, 9  ;;  %v1809_v28 = vcombine.high %v1073_v29, %v1073_v29  ;;  %v1816_v21 = vrot.slane %v1073_v29, %v17370_v48  ;;  %v16004_v60 = vld [vmem:[%s22153_s3 + $0xe8] sm:$0xff]  }
 0x21b   : > { %4974 = vst [vmem:[#allocation2 + $0x158] sm:$0xf] %v4904_v37  ;;  %5001 = vst [vmem:[#allocation2 + $0x108] sm:$0xf] %v4904_v37  ;;  %v3701_v47 = vmax.f32 %v1807_v19, %v13793_v27  ;;  %v3703_v54 = vmax.f32 %v1808_v38, %v13795_v41  ;;  %v1894_v11 = vcombine.high %v1078_v57, %v1078_v57  ;;  %v13806_v9 = vrot.slane %v1857_v8, 9  ;;  %v16005_v41 = vld [vmem:[%s22153_s3 + $0xa8] sm:$0xff]  }
 0x21c   : > { %5028 = vst [vmem:[#allocation2 + $0xb8] sm:$0xf] %v4904_v37  ;;  %5200 = vst [vmem:[#allocation2 + $0x1fc] sm:$0xf] %v5184_v5  ;;  %v1859_v56 = vcombine.high %v1857_v8, %v1857_v8  ;;  %v13805_v51 = vrot.slane %v1858_v26, 9  ;;  %v3712_v34 = vmax.f32 %v1850_v59, %v13804_v24  ;;  %v1823_v6 = vrot.slane %v1809_v28, %v17370_v48  ;;  %v15824_v24 = vpop.f32.mrf.mxu0  ;;  %v16014_v36 = vld [vmem:[%s22153_s3 + $0x370] sm:$0xff]  }
 0x21d   : > { %5227 = vst [vmem:[#allocation2 + $0x1ac] sm:$0xf] %v5184_v5  ;;  %5254 = vst [vmem:[#allocation2 + $0x15c] sm:$0xf] %v5184_v5  ;;  %v1824_v12 = vcombine.high %v1816_v21, %v1816_v21  ;;  %v13796_v1 = vrot.slane %v1816_v21, 9  ;;  %v1901_v23 = vrot.slane %v1078_v57, %v17370_v48  ;;  %v3714_v49 = vmax.f32 %v1857_v8, %v13806_v9  ;;  %v16013_v58 = vld [vmem:[%s22153_s3 + $0xd8] sm:$0xff]  }
 0x21e   : > { %5281 = vst [vmem:[#allocation2 + $0x10c] sm:$0xf] %v5184_v5  ;;  %5308 = vst [vmem:[#allocation2 + $0xbc] sm:$0xf] %v5184_v5  ;;  %v13807_v10 = vrot.slane %v1859_v56, 9  ;;  %v3713_v22 = vmax.f32 %v1858_v26, %v13805_v51  ;;  %v3916_v43 = vmax.f32 %v3700_v52, %v3712_v34  ;;  %v1825_v0 = vcombine.high %v1823_v6, %v1823_v6  ;;  %v16012_v34 = vld [vmem:[%s22153_s3 + $0x338] sm:$0xff]  }
 0x21f   : > { %v16000_v7 = vld [vmem:[#allocation2 + $0x190] ss:$100 sps:$4 sm:$0xff]   ;;  %v13797_v18 = vrot.slane %v1824_v12, 9  ;;  %v13798_v13 = vrot.slane %v1823_v6, 9  ;;  %v18426_v17 = vmax.f32 %v1816_v21, %v13796_v1  ;;  %v3918_v46 = vmax.f32 %v3702_v3, %v3714_v49  ;;  %15282 = vmatprep.subr.bf16.mxu1 %v16004_v60 }
 0x220   : > { %v3715_v25 = vmax.f32 %v1859_v56, %v13807_v10  ;;  %v3917_v44 = vmax.f32 %v3701_v47, %v3713_v22  ;;  %v15104_v35 = vpack.c.bf16 %v3916_v43, %v3916_v43  ;;  %v13799_v61 = vrot.slane %v1825_v0, 9  ;;  %15283 = vmatpush3.bf16.msra.mxu1 %v16005_v41 }
 0x221   : > { %v15997_v63 = vld [vmem:[#allocation2 + $0x194] ss:$100 sps:$4 sm:$0xff]   ;;  %v18434_v37 = vmax.f32 %v1824_v12, %v13797_v18  ;;  %v18436_v40 = vmax.f32 %v1823_v6, %v13798_v13  ;;  %v1908_v32 = vrot.slane %v1894_v11, %v17370_v48  ;;  %v15106_v50 = vpack.c.bf16 %v3918_v46, %v3918_v46 }
 0x222   : > { %8138 = vmatprep.mubr.bf16.mxu1 %v15997_v63  ;;  %v3919_v5 = vmax.f32 %v3703_v54, %v3715_v25  ;;  %v15105_v4 = vpack.c.bf16 %v3917_v44, %v3917_v44  ;;  %v4372_v55 = vunpack.c.l.b16 %v15104_v35  ;;  %v18439_v19 = vmax.f32 %v1825_v0, %v13799_v61  ;;  %v16010_v11 = vld [vmem:[%s22153_s3 + $0x378] sm:$0xff]   ;;  %v925_v63 = vpop.f32.mrf.mxu0 }
 0x223   : > { %8139 = vmatmul.mubr.bf16.gmra.mxu1 %v16000_v7  ;;  %v1909_v38 = vcombine.high %v1901_v23, %v1901_v23  ;;  %v1910_v20 = vcombine.high %v1908_v32, %v1908_v32  ;;  %v13816_v15 = vrot.slane %v1901_v23, 9  ;;  %v4374_v57 = vunpack.c.l.b16 %v15106_v50  ;;  %15478 = vmatprep.subr.bf16.mxu0 %v16010_v11 }
 0x224   : > { %v15107_v59 = vpack.c.bf16 %v3919_v5, %v3919_v5  ;;  %v4373_v29 = vunpack.c.l.b16 %v15105_v4  ;;  %v13818_v27 = vrot.slane %v1908_v32, 9  ;;  %v910_v26 = vadd.f32 %v18273_v42, %v18412_v39  ;;  %v16008_v39 = vld [vmem:[%s22153_s3 + $0xe0] sm:$0xff]   ;;  %15479 = vmatpush3.bf16.msra.mxu0 %v16012_v34  ;;  %v16015_v4 = vld [vmem:[%s22153_s3 + $0x98] sm:$0xff]  }
 0x225   : > { %v13817_v52 = vrot.slane %v1909_v38, 9  ;;  %v13819_v3 = vrot.slane %v1910_v20, 9  ;;  %v18447_v8 = vmax.f32 %v1901_v23, %v13816_v15  ;;  %v4481_v54 = vrot.slane %v4374_v57, 6  ;;  %v16011_v23 = vld [vmem:[%s22153_s3 + $0xa0] sm:$0xff]   ;;  %15284 = vmatprep.subr.bf16.mxu1 %v16008_v39  ;;  %15480 = vmatprep.subr.bf16.mxu0 %v16014_v36 }
 0x226   : > { %v18451_v28 = vunpack.c.l.b16 %v15107_v59  ;;  %v4479_v47 = vrot.slane %v4373_v29, 7  ;;  %v4871_v21 = vrot.slane %v4374_v57, 7  ;;  %v18458_v56 = vmax.f32 %v1908_v32, %v13818_v27  ;;  %15285 = vmatpush3.bf16.msra.mxu1 %v16011_v23 }
 0x227   : > { %v18456_v30 = vmax.f32 %v1909_v38, %v13817_v52  ;;  %v18460_v51 = vmax.f32 %v1910_v20, %v13819_v3  ;;  %v1076_v9 = vmax.f32 %v910_v26, 0.0  ;;  %v921_v18 = vadd.f32 %v18273_v42, %v18424_v53  ;;  %v16016_v53 = vld [vmem:[%s22153_s3 + $0x330] sm:$0xff]   ;;  %15286 = vmatprep.subr.bf16.mxu1 %v16013_v58 }
 0x228   : > { %v4480_v16 = vsel %vm4389_vm1, %v4479_v47, %v4372_v55  ;;  %v4483_v6 = vrot.slane %v18451_v28, 5  ;;  %v4872_v12 = vsel %vm4389_vm1, %v4871_v21, %v4373_v29  ;;  %v4873_v1 = vrot.slane %v18451_v28, 6  ;;  %15481 = vmatpush3.bf16.msra.mxu0 %v16016_v53  ;;  %v16017_v26 = vld [vmem:[%s22153_s3 + $0xd0] sm:$0xff]  }
 0x229   : > { %v4482_v10 = vsel %vm4392_vm2, %v4481_v54, %v4480_v16  ;;  %v5151_v22 = vrot.slane %v18451_v28, 7  ;;  %v1860_v49 = vcombine.high %v1076_v9, %v1076_v9  ;;  %v1867_v43 = vrot.slane %v1076_v9, %v17370_v48 }
 0x22a   : > { %v18479_v7 = vsel %vm4395_vm3, %v4483_v6, %v4482_v10  ;;  %v18482_v0 = vsel %vm4392_vm2, %v4873_v1, %v4872_v12  ;;  %v913_v13 = vadd.f32 %v18273_v42, %v912_v2  ;;  %v1079_v61 = vmax.f32 %v921_v18, 0.0  ;;  %15287 = vmatpush3.bf16.msra.mxu1 %v16015_v4  ;;  %v16024_v10 = vld [vmem:[%s22153_s3 + $0x360] sm:$0xff]  }
 0x22b   : > { %v18491_v25 = vsel %vm4389_vm1, %v5151_v22, %v4374_v57  ;;  %v1874_v44 = vrot.slane %v1860_v49, %v17370_v48  ;;  %v1875_v46 = vcombine.high %v1867_v43, %v1867_v43  ;;  %v13808_v35 = vrot.slane %v1867_v43, 9  ;;  %v16018_v57 = vld [vmem:[%s22153_s3 + $0x368] sm:$0xff]   ;;  %15288 = vmatprep.subr.bf16.mxu1 %v16017_v26 }
 0x22c   : > { %v1077_v32 = vmax.f32 %v913_v13, 0.0  ;;  %v18501_v2 = vadd.f32 %v18273_v42, %v15824_v24  ;;  %v18504_v5 = vadd.f32 %v18273_v42, %v925_v63  ;;  %v1911_v15 = vcombine.high %v1079_v61, %v1079_v61  ;;  %v16020_v24 = vld [vmem:[%s22153_s3 + $0x328] sm:$0xff]   ;;  %15482 = vmatprep.subr.bf16.mxu0 %v16018_v57 }
 0x22d   : > { %v1876_v50 = vcombine.high %v1874_v44, %v1874_v44  ;;  %v13809_v55 = vrot.slane %v1875_v46, 9  ;;  %v13810_v38 = vrot.slane %v1874_v44, 9  ;;  %v3716_v20 = vmax.f32 %v1867_v43, %v13808_v35  ;;  %15483 = vmatpush3.bf16.msra.mxu0 %v16020_v24 }
 0x22e   : > { %v1918_v60 = vrot.slane %v1079_v61, %v17370_v48  ;;  %v1877_v59 = vcombine.high %v1077_v32, %v1077_v32  ;;  %v18511_v29 = vrot.slane %v1077_v32, %v17370_v48  ;;  %v1925_v47 = vrot.slane %v1911_v15, %v17370_v48  ;;  %15484 = vmatprep.subr.bf16.mxu0 %v16024_v10  ;;  %v15825_v10 = vpop.f32.mrf.mxu0 }
 0x22f   : > { %v13811_v27 = vrot.slane %v1876_v50, 9  ;;  %v3717_v41 = vmax.f32 %v1875_v46, %v13809_v55  ;;  %v3718_v52 = vmax.f32 %v1874_v44, %v13810_v38  ;;  %v3920_v3 = vmax.f32 %v18426_v17, %v3716_v20  ;;  %v16019_v17 = vld [vmem:[%s22153_s3 + $0x90] sm:$0xff]  }
 0x230   : > { %v1926_v54 = vcombine.high %v1918_v60, %v1918_v60  ;;  %v13820_v21 = vrot.slane %v1918_v60, 9  ;;  %v18525_v11 = vrot.slane %v1877_v59, %v17370_v48  ;;  %v1927_v6 = vcombine.high %v1925_v47, %v1925_v47  ;;  %15289 = vmatpush3.bf16.msra.mxu1 %v16019_v17 }
 0x231   : > { %v3719_v9 = vmax.f32 %v1876_v50, %v13811_v27  ;;  %v3921_v39 = vmax.f32 %v18434_v37, %v3717_v41  ;;  %v3922_v34 = vmax.f32 %v18436_v40, %v3718_v52  ;;  %v15108_v16 = vpack.c.bf16 %v3920_v3, %v3920_v3  ;;  %v16023_v40 = vld [vmem:[%s22153_s3 + $0xc8] sm:$0xff]  }
 0x232   : > { %v13821_v12 = vrot.slane %v1926_v54, 9  ;;  %v13822_v1 = vrot.slane %v1925_v47, 9  ;;  %v18532_v23 = vmax.f32 %v1918_v60, %v13820_v21  ;;  %v13823_v63 = vrot.slane %v1927_v6, 9  ;;  %15290 = vmatprep.subr.bf16.mxu1 %v16023_v40  ;;  %v16027_v21 = vld [vmem:[%s22153_s3 + $0x320] sm:$0xff]  }
 0x233   : > { %v3923_v22 = vmax.f32 %v18439_v19, %v3719_v9  ;;  %v15109_v49 = vpack.c.bf16 %v3921_v39, %v3921_v39  ;;  %v15110_v43 = vpack.c.bf16 %v3922_v34, %v3922_v34  ;;  %v4376_v37 = vunpack.c.l.b16 %v15108_v16  ;;  %v16026_v16 = vld [vmem:[%s22153_s3 + $0x88] sm:$0xff]   ;;  %15485 = vmatpush3.bf16.msra.mxu0 %v16027_v21 }
 0x234   : > { %v18541_v18 = vmax.f32 %v1926_v54, %v13821_v12  ;;  %v18543_v13 = vmax.f32 %v1925_v47, %v13822_v1  ;;  %v1892_v36 = vcombine.high %v18511_v29, %v18511_v29  ;;  %v18549_v32 = vmax.f32 %v1927_v6, %v13823_v63  ;;  %15291 = vmatpush3.bf16.msra.mxu1 %v16026_v16  ;;  %v16032_v63 = vld [vmem:[%s22153_s3 + $0x358] sm:$0xff]  }
 0x235   : > { %v15111_v44 = vpack.c.bf16 %v3923_v22, %v3923_v22  ;;  %v4377_v46 = vunpack.c.l.b16 %v15109_v49  ;;  %v18547_v35 = vunpack.c.l.b16 %v15110_v43  ;;  %v4485_v19 = vrot.slane %v4376_v37, 4  ;;  %15486 = vmatprep.subr.bf16.mxu0 %v16032_v63 }
 0x236   : > { %v4875_v58 = vrot.slane %v4376_v37, 5  ;;  %v5153_v53 = vrot.slane %v4376_v37, 6  ;;  %v5431_v61 = vrot.slane %v4376_v37, 7  ;;  %v1893_v1 = vcombine.high %v18525_v11, %v18525_v11 }
 0x237   : > { %v18551_v4 = vunpack.c.l.b16 %v15111_v44  ;;  %v4486_v50 = vsel %vm4398_vm4, %v4485_v19, %v18479_v7  ;;  %v4487_v55 = vrot.slane %v4377_v46, 3  ;;  %v4489_v38 = vrot.slane %v18547_v35, 2  ;;  %v16031_v19 = vld [vmem:[%s22153_s3 + $0xc0] sm:$0xff]  }
 0x238   : > { %v4876_v20 = vsel %vm4395_vm3, %v4875_v58, %v18482_v0  ;;  %v4877_v15 = vrot.slane %v4377_v46, 4  ;;  %v4879_v60 = vrot.slane %v18547_v35, 3  ;;  %v5154_v59 = vsel %vm4392_vm2, %v5153_v53, %v18491_v25  ;;  %v16034_v58 = vld [vmem:[%s22153_s3 + $0x318] sm:$0xff]   ;;  %15292 = vmatprep.subr.bf16.mxu1 %v16031_v19 }
 0x239   : > { %v4488_v57 = vsel %vm4401_vm5, %v4487_v55, %v4486_v50  ;;  %v4491_v27 = vrot.slane %v18551_v4, 1  ;;  %v4881_v41 = vrot.slane %v18551_v4, 2  ;;  %v5155_v52 = vrot.slane %v4377_v46, 5  ;;  %v16033_v55 = vld [vmem:[%s22153_s3 + $0x80] sm:$0xff]   ;;  %15487 = vmatpush3.bf16.msra.mxu0 %v16034_v58 }
 0x23a   : > { %v4490_v7 = vsel %vm4404_vm6, %v4489_v38, %v4488_v57  ;;  %v4878_v3 = vsel %vm4398_vm4, %v4877_v15, %v4876_v20  ;;  %v5157_v26 = vrot.slane %v18547_v35, 4  ;;  %v5159_v0 = vrot.slane %v18551_v4, 3  ;;  %15293 = vmatpush3.bf16.msra.mxu1 %v16033_v55 }
 0x23b   : > { %v4492_v24 = vsel %vm4407_vm7, %v4491_v27, %v4490_v7  ;;  %v5156_v47 = vsel %vm4395_vm3, %v5155_v52, %v5154_v59  ;;  %v5432_v25 = vsel %vm4389_vm1, %v5431_v61, %v18451_v28  ;;  %v5433_v54 = vrot.slane %v4377_v46, 6  ;;  %v928_v59 = vpop.f32.mrf.mxu0 }
 0x23c   : > { %v4513_v17 = vpack.c.b16 %v4492_v24, %v4492_v24  ;;  %v5435_v9 = vrot.slane %v18547_v35, 5  ;;  %v5437_v39 = vrot.slane %v18551_v4, 4  ;;  %v5711_v34 = vrot.slane %v4377_v46, 7 }
 0x23d   : > { %v5434_v6 = vsel %vm4392_vm2, %v5433_v54, %v5432_v25  ;;  %v5713_v12 = vrot.slane %v18547_v35, 6  ;;  %v5715_v28 = vrot.slane %v18551_v4, 5  ;;  %v13812_v49 = vrot.slane %v18511_v29, 9 }
 0x23e   : > { %v5712_v22 = vsel %vm4389_vm1, %v5711_v34, %v4376_v37  ;;  %4529 = vst [vmem:[#allocation2 + $0x258] sm:$0xf] %v4513_v17  ;;  %4584 = vst [vmem:[#allocation2 + $0x208] sm:$0xf] %v4513_v17  ;;  %v13813_v43 = vrot.slane %v1892_v36, 9  ;;  %v13814_v40 = vrot.slane %v18525_v11, 9  ;;  %v4880_v37 = vsel %vm4401_vm5, %v4879_v60, %v4878_v3 }
 0x23f   : > { %4639 = vst [vmem:[#allocation2 + $0x1b8] sm:$0xf] %v4513_v17  ;;  %4694 = vst [vmem:[#allocation2 + $0x168] sm:$0xf] %v4513_v17  ;;  %v5714_v44 = vsel %vm4392_vm2, %v5713_v12, %v5712_v22  ;;  %v13815_v46 = vrot.slane %v1893_v1, 9  ;;  %v5158_v35 = vsel %vm4398_vm4, %v5157_v26, %v5156_v47  ;;  %v3720_v53 = vmax.f32 %v18511_v29, %v13812_v49 }
 0x240   : > { %4749 = vst [vmem:[#allocation2 + $0x118] sm:$0xf] %v4513_v17  ;;  %v3721_v61 = vmax.f32 %v1892_v36, %v13813_v43  ;;  %v3722_v4 = vmax.f32 %v18525_v11, %v13814_v40  ;;  %v4882_v50 = vsel %vm4404_vm6, %v4881_v41, %v4880_v37  ;;  %v5160_v20 = vsel %vm4401_vm5, %v5159_v0, %v5158_v35 }
 0x241   : > { %v3723_v38 = vmax.f32 %v1893_v1, %v13815_v46  ;;  %v5436_v15 = vsel %vm4395_vm3, %v5435_v9, %v5434_v6  ;;  %v5716_v60 = vsel %vm4395_vm3, %v5715_v28, %v5714_v44  ;;  %v3924_v29 = vmax.f32 %v18322_v31, %v3720_v53 }
 0x242   : > { %v3925_v11 = vmax.f32 %v18324_v14, %v3721_v61  ;;  %v3926_v36 = vmax.f32 %v18333_v33, %v3722_v4  ;;  %v5438_v57 = vsel %vm4398_vm4, %v5437_v39, %v5436_v15  ;;  %v1082_v41 = vmax.f32 %v18501_v2, 0.0 }
 0x243   : > { %v3927_v27 = vmax.f32 %v18340_v62, %v3723_v38  ;;  %v1080_v52 = vmax.f32 %v18504_v5, 0.0  ;;  %v18617_v7 = vadd.f32 %v18273_v42, %v15825_v10  ;;  %v15158_v3 = vpack.c.bf16 %v3924_v29, %v3924_v29 }
 0x244   : > { %v15170_v26 = vpack.c.bf16 %v3925_v11, %v3925_v11  ;;  %v15182_v31 = vpack.c.bf16 %v3926_v36, %v3926_v36  ;;  %v18620_v14 = vadd.f32 %v18273_v42, %v928_v59  ;;  %v1962_v0 = vcombine.high %v1082_v41, %v1082_v41 }
 0x245   : > { %v15194_v33 = vpack.c.bf16 %v3927_v27, %v3927_v27  ;;  %v1969_v24 = vrot.slane %v1082_v41, %v17370_v48  ;;  %v1928_v47 = vcombine.high %v1080_v52, %v1080_v52  ;;  %v4785_v62 = vunpack.c.l.b16 %v15158_v3 }
 0x246   : > { %v5065_v25 = vunpack.c.l.b16 %v15170_v26  ;;  %v5345_v2 = vunpack.c.l.b16 %v15182_v31  ;;  %v18624_v5 = vrot.slane %v1080_v52, %v17370_v48  ;;  %v1976_v21 = vrot.slane %v1962_v0, %v17370_v48 }
 0x247   : > { %v5625_v54 = vunpack.c.l.b16 %v15194_v33  ;;  %v1977_v17 = vcombine.high %v1969_v24, %v1969_v24  ;;  %v13832_v9 = vrot.slane %v1969_v24, 9  ;;  %v4883_v39 = vrot.slane %v4785_v62, 1 }
 0x248   : > { %v5161_v34 = vrot.slane %v4785_v62, 2  ;;  %v5163_v42 = vrot.slane %v5065_v25, 1  ;;  %v5439_v16 = vrot.slane %v4785_v62, 3  ;;  %v5441_v6 = vrot.slane %v5065_v25, 2 }
 0x249   : > { %v5443_v12 = vrot.slane %v5345_v2, 1  ;;  %v5717_v28 = vrot.slane %v4785_v62, 4  ;;  %v5719_v1 = vrot.slane %v5065_v25, 3  ;;  %v4884_v10 = vsel %vm4407_vm7, %v4883_v39, %v4882_v50 }
 0x24a   : > { %v5162_v22 = vsel %vm4404_vm6, %v5161_v34, %v5160_v20  ;;  %v5440_v49 = vsel %vm4401_vm5, %v5439_v16, %v5438_v57  ;;  %v5721_v43 = vrot.slane %v5345_v2, 2  ;;  %v4905_v40 = vpack.c.b16 %v4884_v10, %v4884_v10 }
 0x24b   : > { %v5164_v63 = vsel %vm4407_vm7, %v5163_v42, %v5162_v22  ;;  %v5442_v44 = vsel %vm4404_vm6, %v5441_v6, %v5440_v49  ;;  %v5718_v46 = vsel %vm4398_vm4, %v5717_v28, %v5716_v60  ;;  %v5723_v58 = vrot.slane %v5625_v54, 1  ;;  %v18669_v42 = vld [vmem:[%s22152_s2] ss:$0 sm:$0xff] }
 0x24c   : > { %v5185_v37 = vpack.c.b16 %v5164_v63, %v5164_v63  ;;  %v5444_v35 = vsel %vm4407_vm7, %v5443_v12, %v5442_v44  ;;  %v5720_v19 = vsel %vm4401_vm5, %v5719_v1, %v5718_v46  ;;  %4921 = vst [vmem:[#allocation2 + $0x25c] sm:$0xf] %v4905_v40  ;;  %4948 = vst [vmem:[#allocation2 + $0x20c] sm:$0xf] %v4905_v40  ;;  %v13833_v50 = vrot.slane %v1977_v17, 9  ;;  %v16038_v44 = vld [vmem:[%s22153_s3 + $0x310] sm:$0xff]  }
 0x24d   : > { %v5465_v53 = vpack.c.b16 %v5444_v35, %v5444_v35  ;;  %v5722_v61 = vsel %vm4404_vm6, %v5721_v43, %v5720_v19  ;;  %4975 = vst [vmem:[#allocation2 + $0x1bc] sm:$0xf] %v4905_v40  ;;  %5002 = vst [vmem:[#allocation2 + $0x16c] sm:$0xf] %v4905_v40  ;;  %v1978_v4 = vcombine.high %v1976_v21, %v1976_v21  ;;  %v13834_v38 = vrot.slane %v1976_v21, 9 }
 0x24e   : > { %5029 = vst [vmem:[#allocation2 + $0x11c] sm:$0xf] %v4905_v40  ;;  %5201 = vst [vmem:[#allocation2 + $0x260] sm:$0xf] %v5185_v37  ;;  %v5724_v55 = vsel %vm4407_vm7, %v5723_v58, %v5722_v61  ;;  %v3740_v20 = vmax.f32 %v1969_v24, %v13832_v9  ;;  %v1942_v15 = vrot.slane %v1928_v47, %v17370_v48  ;;  %v13824_v41 = vrot.slane %v18624_v5, 9  ;;  %v15828_v9 = vpop.f32.mrf.mxu0 }
 0x24f   : > { %5228 = vst [vmem:[#allocation2 + $0x210] sm:$0xf] %v5185_v37  ;;  %5255 = vst [vmem:[#allocation2 + $0x1c0] sm:$0xf] %v5185_v37  ;;  %v5745_v60 = vpack.c.b16 %v5724_v55, %v5724_v55  ;;  %v13835_v59 = vrot.slane %v1978_v4, 9  ;;  %v3741_v29 = vmax.f32 %v1977_v17, %v13833_v50  ;;  %v1943_v11 = vcombine.high %v18624_v5, %v18624_v5 }
 0x250   : > { %5282 = vst [vmem:[#allocation2 + $0x170] sm:$0xf] %v5185_v37  ;;  %5309 = vst [vmem:[#allocation2 + $0x120] sm:$0xf] %v5185_v37  ;;  %v3742_v36 = vmax.f32 %v1976_v21, %v13834_v38  ;;  %v3932_v57 = vmax.f32 %v18532_v23, %v3740_v20  ;;  %v1944_v27 = vcombine.high %v1942_v15, %v1942_v15  ;;  %v13826_v31 = vrot.slane %v1942_v15, 9  ;;  %v16036_v23 = vld [vmem:[%s22153_s3 + $0x350] sm:$0xff]  }
 0x251   : > { %5481 = vst [vmem:[#allocation2 + $0x264] sm:$0xf] %v5465_v53  ;;  %5508 = vst [vmem:[#allocation2 + $0x214] sm:$0xf] %v5465_v53  ;;  %v3743_v52 = vmax.f32 %v1978_v4, %v13835_v59  ;;  %v3933_v3 = vmax.f32 %v18541_v18, %v3741_v29  ;;  %v13825_v26 = vrot.slane %v1943_v11, 9  ;;  %v18645_v47 = vmax.f32 %v18624_v5, %v13824_v41  ;;  %v16035_v18 = vld [vmem:[%s22153_s3 + $0x178] sm:$0xff]   ;;  %v941_v59 = vpop.f32.mrf.mxu0 }
 0x252   : > { %5535 = vst [vmem:[#allocation2 + $0x1c4] sm:$0xf] %v5465_v53  ;;  %5562 = vst [vmem:[#allocation2 + $0x174] sm:$0xf] %v5465_v53  ;;  %v3934_v33 = vmax.f32 %v18543_v13, %v3742_v36  ;;  %v15116_v0 = vpack.c.bf16 %v3932_v57, %v3932_v57  ;;  %v13827_v24 = vrot.slane %v1944_v27, 9  ;;  %v18653_v54 = vmax.f32 %v1942_v15, %v13826_v31  ;;  %v16045_v29 = vld [vmem:[%s22153_s3 + $0x348] sm:$0xff]  }
 0x253   : > { %5589 = vst [vmem:[#allocation2 + $0x124] sm:$0xf] %v5465_v53  ;;  %5761 = vst [vmem:[#allocation2 + $0x268] sm:$0xf] %v5745_v60  ;;  %v3935_v62 = vmax.f32 %v18549_v32, %v3743_v52  ;;  %v15117_v25 = vpack.c.bf16 %v3933_v3, %v3933_v3  ;;  %v18651_v2 = vmax.f32 %v1943_v11, %v13825_v26  ;;  %v1083_v17 = vmax.f32 %v18617_v7, 0.0  ;;  %v16047_v41 = vld [vmem:[%s22153_s3 + $0x308] sm:$0xff]  }
 0x254   : > { %5788 = vst [vmem:[#allocation2 + $0x218] sm:$0xf] %v5745_v60  ;;  %5815 = vst [vmem:[#allocation2 + $0x1c8] sm:$0xf] %v5745_v60  ;;  %v15118_v13 = vpack.c.bf16 %v3934_v33, %v3934_v33  ;;  %v18658_v21 = vunpack.c.l.b16 %v15116_v0  ;;  %v18660_v5 = vmax.f32 %v1944_v27, %v13827_v24  ;;  %15488 = vmatprep.subr.bf16.mxu0 %v16036_v23  ;;  %v1081_v34 = vmax.f32 %v18620_v14, 0.0 }
 0x255   : > { %5842 = vst [vmem:[#allocation2 + $0x178] sm:$0xf] %v5745_v60  ;;  %5869 = vst [vmem:[#allocation2 + $0x128] sm:$0xf] %v5745_v60  ;;  %v15119_v39 = vpack.c.bf16 %v3935_v62, %v3935_v62  ;;  %v18663_v32 = vunpack.c.l.b16 %v15117_v25  ;;  %v950_v16 = vadd.f32 %v18669_v42, %v15828_v9  ;;  %15318 = vmatprep.subr.bf16.mxu1 %v16035_v18  ;;  %15489 = vmatpush3.bf16.msra.mxu0 %v16038_v44 }
 0x256   : > { %v18672_v6 = vunpack.c.l.b16 %v15118_v13  ;;  %v4499_v12 = vrot.slane %v18658_v21, 4  ;;  %v4889_v7 = vrot.slane %v18658_v21, 5  ;;  %v5167_v28 = vrot.slane %v18658_v21, 6  ;;  %15490 = vmatprep.subr.bf16.mxu0 %v16045_v29 }
 0x257   : > { %v18677_v1 = vunpack.c.l.b16 %v15119_v39  ;;  %v4501_v14 = vrot.slane %v18663_v32, 3  ;;  %v4891_v10 = vrot.slane %v18663_v32, 4  ;;  %v5169_v22 = vrot.slane %v18663_v32, 5 }
 0x258   : > { %v4503_v49 = vrot.slane %v18672_v6, 2  ;;  %v4893_v43 = vrot.slane %v18672_v6, 3  ;;  %v5171_v40 = vrot.slane %v18672_v6, 4  ;;  %v5445_v63 = vrot.slane %v18658_v21, 7  ;;  %v16009_v55 = vld [vmem:[#allocation2 + $0x1b0] ss:$100 sps:$4 sm:$0xff]  }
 0x259   : > { %v4505_v46 = vrot.slane %v18677_v1, 1  ;;  %v4895_v37 = vrot.slane %v18677_v1, 2  ;;  %v5173_v35 = vrot.slane %v18677_v1, 3  ;;  %v5447_v19 = vrot.slane %v18663_v32, 6  ;;  %15491 = vmatpush3.bf16.msra.mxu0 %v16047_v41 }
 0x25a   : > { %v5449_v53 = vrot.slane %v18672_v6, 5  ;;  %v5451_v61 = vrot.slane %v18677_v1, 4  ;;  %v5725_v4 = vrot.slane %v18663_v32, 7  ;;  %v5727_v50 = vrot.slane %v18672_v6, 6 }
 0x25b   : > { %v16006_v58 = vld [vmem:[#allocation2 + $0x1b4] ss:$100 sps:$4 sm:$0xff]   ;;  %v5729_v38 = vrot.slane %v18677_v1, 5  ;;  %v1979_v20 = vcombine.high %v1083_v17, %v1083_v17  ;;  %v1986_v15 = vrot.slane %v1083_v17, %v17370_v48  ;;  %v1945_v60 = vcombine.high %v1081_v34, %v1081_v34 }
 0x25c   : > { %8398 = vmatprep.mubr.bf16.mxu0 %v16006_v58  ;;  %v5726_v11 = vsel %vm4389_vm1, %v5725_v4, %v18658_v21  ;;  %v1952_v36 = vrot.slane %v1081_v34, %v17370_v48  ;;  %v18705_v57 = vmax.f32 %v950_v16, 0.0  ;;  %v18708_v27 = vadd.f32 %v18669_v42, %v941_v59 }
 0x25d   : > { %8399 = vmatmul.mubr.bf16.gmra.mxu0 %v16009_v55  ;;  %v5728_v52 = vsel %vm4392_vm2, %v5727_v50, %v5726_v11  ;;  %v1993_v3 = vrot.slane %v1979_v20, %v17370_v48  ;;  %v1994_v26 = vcombine.high %v1986_v15, %v1986_v15  ;;  %v13836_v31 = vrot.slane %v1986_v15, 9 }
 0x25e   : > { %v5730_v33 = vsel %vm4395_vm3, %v5729_v38, %v5728_v52  ;;  %v1959_v0 = vrot.slane %v1945_v60, %v17370_v48  ;;  %v1960_v24 = vcombine.high %v1952_v36, %v1952_v36  ;;  %v13828_v23 = vrot.slane %v1952_v36, 9 }
 0x25f   : > { %v1995_v62 = vcombine.high %v1993_v3, %v1993_v3  ;;  %v13837_v25 = vrot.slane %v1994_v26, 9  ;;  %v13838_v18 = vrot.slane %v1993_v3, 9  ;;  %v3744_v13 = vmax.f32 %v1986_v15, %v13836_v31 }
 0x260   : > { %v1961_v17 = vcombine.high %v1959_v0, %v1959_v0  ;;  %v13829_v9 = vrot.slane %v1960_v24, 9  ;;  %v13830_v39 = vrot.slane %v1959_v0, 9  ;;  %v3736_v34 = vmax.f32 %v1952_v36, %v13828_v23 }
 0x261   : > { %v13839_v16 = vrot.slane %v1995_v62, 9  ;;  %v3745_v44 = vmax.f32 %v1994_v26, %v13837_v25  ;;  %v3746_v58 = vmax.f32 %v1993_v3, %v13838_v18  ;;  %v3936_v4 = vmax.f32 %v18645_v47, %v3744_v13 }
 0x262   : > { %v13831_v50 = vrot.slane %v1961_v17, 9  ;;  %v3737_v55 = vmax.f32 %v1960_v24, %v13829_v9  ;;  %v3738_v38 = vmax.f32 %v1959_v0, %v13830_v39  ;;  %v3928_v20 = vmax.f32 %v18447_v8, %v3736_v34 }
 0x263   : > { %v3747_v60 = vmax.f32 %v1995_v62, %v13839_v16  ;;  %v3937_v59 = vmax.f32 %v18651_v2, %v3745_v44  ;;  %v3938_v29 = vmax.f32 %v18653_v54, %v3746_v58  ;;  %v15159_v15 = vpack.c.bf16 %v3936_v4, %v3936_v4  ;;  %v16052_v58 = vld [vmem:[%s22153_s3 + $0x340] sm:$0xff]  }
 0x264   : > { %v3739_v11 = vmax.f32 %v1961_v17, %v13831_v50  ;;  %v3929_v41 = vmax.f32 %v18456_v30, %v3737_v55  ;;  %v3930_v36 = vmax.f32 %v18458_v56, %v3738_v38  ;;  %v15112_v52 = vpack.c.bf16 %v3928_v20, %v3928_v20  ;;  %v16055_v20 = vld [vmem:[%s22153_s3 + $0x300] sm:$0xff]   ;;  %15492 = vmatprep.subr.bf16.mxu0 %v16052_v58 }
 0x265   : > { %v3939_v3 = vmax.f32 %v18660_v5, %v3747_v60  ;;  %v18724_v47 = vunpack.c.l.b16 %v15159_v15  ;;  %v15171_v26 = vpack.c.bf16 %v3937_v59, %v3937_v59  ;;  %v15183_v31 = vpack.c.bf16 %v3938_v29, %v3938_v29  ;;  %15493 = vmatpush3.bf16.msra.mxu0 %v16055_v20 }
 0x266   : > { %v3931_v8 = vmax.f32 %v18460_v51, %v3739_v11  ;;  %v15113_v0 = vpack.c.bf16 %v3929_v41, %v3929_v41  ;;  %v15114_v24 = vpack.c.bf16 %v3930_v36, %v3930_v36  ;;  %v4380_v2 = vunpack.c.l.b16 %v15112_v52 }
 0x267   : > { %v4897_v54 = vrot.slane %v18724_v47, 1  ;;  %v18728_v23 = vunpack.c.l.b16 %v15171_v26  ;;  %v5175_v30 = vrot.slane %v18724_v47, 2  ;;  %v18731_v62 = vunpack.c.l.b16 %v15183_v31 }
 0x268   : > { %v5453_v56 = vrot.slane %v18724_v47, 3  ;;  %v15195_v5 = vpack.c.bf16 %v3939_v3, %v3939_v3  ;;  %v5731_v25 = vrot.slane %v18724_v47, 4  ;;  %v15115_v18 = vpack.c.bf16 %v3931_v8, %v3931_v8 }
 0x269   : > { %v5177_v13 = vrot.slane %v18728_v23, 1  ;;  %v5455_v51 = vrot.slane %v18728_v23, 2  ;;  %v5457_v17 = vrot.slane %v18731_v62, 1  ;;  %v5733_v9 = vrot.slane %v18728_v23, 3 }
 0x26a   : > { %v5626_v39 = vunpack.c.l.b16 %v15195_v5  ;;  %v5732_v34 = vsel %vm4398_vm4, %v5731_v25, %v5730_v33  ;;  %v5735_v16 = vrot.slane %v18731_v62, 2  ;;  %v4381_v44 = vunpack.c.l.b16 %v15113_v0 }
 0x26b   : > { %v5734_v4 = vsel %vm4401_vm5, %v5733_v9, %v5732_v34  ;;  %v4382_v50 = vunpack.c.l.b16 %v15114_v24  ;;  %v4383_v55 = vunpack.c.l.b16 %v15115_v18  ;;  %v2030_v38 = vcombine.high %v18705_v57, %v18705_v57  ;;  %v15829_v18 = vpop.f32.mrf.mxu0 }
 0x26c   : > { %v5736_v33 = vsel %vm4404_vm6, %v5735_v16, %v5734_v4  ;;  %v5737_v60 = vrot.slane %v5626_v39, 1  ;;  %v4493_v59 = vrot.slane %v4381_v44, 7  ;;  %v18753_v29 = vrot.slane %v18705_v57, %v17370_v48  ;;  %v16059_v57 = vld [vmem:[%s22153_s3 + $0x478] sm:$0xff]  }
 0x26d   : > { %v4495_v15 = vrot.slane %v4382_v50, 6  ;;  %v4497_v11 = vrot.slane %v4383_v55, 5  ;;  %v4885_v41 = vrot.slane %v4382_v50, 7  ;;  %v4887_v36 = vrot.slane %v4383_v55, 6  ;;  %15558 = vmatprep.subr.bf16.mxu0 %v16059_v57 }
 0x26e   : > { %v5738_v52 = vsel %vm4407_vm7, %v5737_v60, %v5736_v33  ;;  %v4494_v3 = vsel %vm4389_vm1, %v4493_v59, %v4380_v2  ;;  %v5165_v26 = vrot.slane %v4383_v55, 7  ;;  %v5446_v31 = vsel %vm4389_vm1, %v5445_v63, %v4383_v55 }
 0x26f   : > { %v5746_v8 = vpack.c.b16 %v5738_v52, %v5738_v52  ;;  %v4496_v0 = vsel %vm4392_vm2, %v4495_v15, %v4494_v3  ;;  %v4886_v24 = vsel %vm4389_vm1, %v4885_v41, %v4381_v44  ;;  %v5448_v62 = vsel %vm4392_vm2, %v5447_v19, %v5446_v31 }
 0x270   : > { %v4498_v2 = vsel %vm4395_vm3, %v4497_v11, %v4496_v0  ;;  %v4888_v5 = vsel %vm4392_vm2, %v4887_v36, %v4886_v24  ;;  %v5166_v25 = vsel %vm4389_vm1, %v5165_v26, %v4382_v50  ;;  %v5450_v63 = vsel %vm4395_vm3, %v5449_v53, %v5448_v62 }
 0x271   : > { %5762 = vst [vmem:[#allocation2 + $0x2cc] sm:$0xf] %v5746_v8  ;;  %5789 = vst [vmem:[#allocation2 + $0x27c] sm:$0xf] %v5746_v8  ;;  %v4500_v19 = vsel %vm4398_vm4, %v4499_v12, %v4498_v2  ;;  %v4890_v9 = vsel %vm4395_vm3, %v4889_v7, %v4888_v5  ;;  %v5168_v39 = vsel %vm4392_vm2, %v5167_v28, %v5166_v25  ;;  %v13848_v47 = vrot.slane %v18753_v29, 9 }
 0x272   : > { %5816 = vst [vmem:[#allocation2 + $0x22c] sm:$0xf] %v5746_v8  ;;  %5843 = vst [vmem:[#allocation2 + $0x1dc] sm:$0xf] %v5746_v8  ;;  %v5452_v53 = vsel %vm4398_vm4, %v5451_v61, %v5450_v63  ;;  %v4502_v34 = vsel %vm4401_vm5, %v4501_v14, %v4500_v19  ;;  %v4892_v12 = vsel %vm4398_vm4, %v4891_v10, %v4890_v9 }
 0x273   : > { %5870 = vst [vmem:[#allocation2 + $0x18c] sm:$0xf] %v5746_v8  ;;  %v5170_v7 = vsel %vm4395_vm3, %v5169_v22, %v5168_v39  ;;  %v5454_v21 = vsel %vm4401_vm5, %v5453_v56, %v5452_v53  ;;  %v4504_v28 = vsel %vm4404_vm6, %v4503_v49, %v4502_v34  ;;  %v4894_v61 = vsel %vm4401_vm5, %v4893_v43, %v4892_v12  ;;  %v944_v56 = vpop.f32.mrf.mxu0 }
 0x274   : > { %v5172_v14 = vsel %vm4398_vm4, %v5171_v40, %v5170_v7  ;;  %v5456_v10 = vsel %vm4404_vm6, %v5455_v51, %v5454_v21  ;;  %v4506_v32 = vsel %vm4407_vm7, %v4505_v46, %v4504_v28  ;;  %v4896_v22 = vsel %vm4404_vm6, %v4895_v37, %v4894_v61 }
 0x275   : > { %v5174_v49 = vsel %vm4401_vm5, %v5173_v35, %v5172_v14  ;;  %v5458_v43 = vsel %vm4407_vm7, %v5457_v17, %v5456_v10  ;;  %v4514_v6 = vpack.c.b16 %v4506_v32, %v4506_v32  ;;  %v4898_v40 = vsel %vm4407_vm7, %v4897_v54, %v4896_v22  ;;  %v18832_v4 = vpop.f32.mrf.mxu0  ;;  %v16030_v22 = vld [vmem:[#allocation2 + $0xc] ss:$100 sps:$4 sm:$0xff]  }
 0x276   : > { %v5176_v46 = vsel %vm4404_vm6, %v5175_v30, %v5174_v49  ;;  %v5466_v51 = vpack.c.b16 %v5458_v43, %v5458_v43  ;;  %v4906_v16 = vpack.c.b16 %v4898_v40, %v4898_v40  ;;  %v2044_v37 = vrot.slane %v2030_v38, %v17370_v48 }
 0x277   : > { %v5178_v1 = vsel %vm4407_vm7, %v5177_v13, %v5176_v46  ;;  %v2045_v35 = vcombine.high %v18753_v29, %v18753_v29  ;;  %4530 = vst [vmem:[#allocation2 + $0x2bc] sm:$0xf] %v4514_v6  ;;  %4585 = vst [vmem:[#allocation2 + $0x26c] sm:$0xf] %v4514_v6  ;;  %v1084_v54 = vmax.f32 %v18708_v27, 0.0  ;;  %v953_v23 = vadd.f32 %v18669_v42, %v15829_v18  ;;  %v957_v31 = vpop.f32.mrf.mxu0 }
 0x278   : > { %v5186_v17 = vpack.c.b16 %v5178_v1, %v5178_v1  ;;  %4640 = vst [vmem:[#allocation2 + $0x21c] sm:$0xf] %v4514_v6  ;;  %4695 = vst [vmem:[#allocation2 + $0x1cc] sm:$0xf] %v4514_v6  ;;  %v2046_v30 = vcombine.high %v2044_v37, %v2044_v37  ;;  %v13850_v44 = vrot.slane %v2044_v37, 9  ;;  %v945_v58 = vadd.f32 %v18669_v42, %v944_v56 }
 0x279   : > { %4750 = vst [vmem:[#allocation2 + $0x17c] sm:$0xf] %v4514_v6  ;;  %5482 = vst [vmem:[#allocation2 + $0x2c8] sm:$0xf] %v5466_v51  ;;  %v13849_v13 = vrot.slane %v2045_v35, 9  ;;  %v18835_v27 = vmax.f32 %v18753_v29, %v13848_v47  ;;  %v1996_v50 = vcombine.high %v1084_v54, %v1084_v54  ;;  %v2003_v55 = vrot.slane %v1084_v54, %v17370_v48  ;;  %v15833_v28 = vpop.f32.mrf.mxu0 }
 0x27a   : > { %5509 = vst [vmem:[#allocation2 + $0x278] sm:$0xf] %v5466_v51  ;;  %5536 = vst [vmem:[#allocation2 + $0x228] sm:$0xf] %v5466_v51  ;;  %v1087_v38 = vmax.f32 %v953_v23, 0.0  ;;  %v13851_v20 = vrot.slane %v2046_v30, 9  ;;  %v18840_v60 = vmax.f32 %v2044_v37, %v13850_v44 }
 0x27b   : > { %5563 = vst [vmem:[#allocation2 + $0x1d8] sm:$0xf] %v5466_v51  ;;  %5590 = vst [vmem:[#allocation2 + $0x188] sm:$0xf] %v5466_v51  ;;  %v18838_v33 = vmax.f32 %v2045_v35, %v13849_v13  ;;  %v1085_v59 = vmax.f32 %v945_v58, 0.0  ;;  %v2010_v15 = vrot.slane %v1996_v50, %v17370_v48  ;;  %v2011_v11 = vcombine.high %v2003_v55, %v2003_v55  ;;  %v960_v47 = vpop.f32.mrf.mxu0 }
 0x27c   : > { %4922 = vst [vmem:[#allocation2 + $0x2c0] sm:$0xf] %v4906_v16  ;;  %4949 = vst [vmem:[#allocation2 + $0x270] sm:$0xf] %v4906_v16  ;;  %v13840_v41 = vrot.slane %v2003_v55, 9  ;;  %v2047_v36 = vcombine.high %v1087_v38, %v1087_v38  ;;  %v18843_v52 = vmax.f32 %v2046_v30, %v13851_v20  ;;  %v2054_v29 = vrot.slane %v1087_v38, %v17370_v48 }
 0x27d   : > { %4976 = vst [vmem:[#allocation2 + $0x220] sm:$0xf] %v4906_v16  ;;  %5003 = vst [vmem:[#allocation2 + $0x1d0] sm:$0xf] %v4906_v16  ;;  %v2013_v3 = vcombine.high %v1085_v59, %v1085_v59  ;;  %v2020_v26 = vrot.slane %v1085_v59, %v17370_v48  ;;  %v2012_v57 = vcombine.high %v2010_v15, %v2010_v15  ;;  %v13841_v8 = vrot.slane %v2011_v11, 9 }
 0x27e   : > { %5030 = vst [vmem:[#allocation2 + $0x180] sm:$0xf] %v4906_v16  ;;  %5202 = vst [vmem:[#allocation2 + $0x2c4] sm:$0xf] %v5186_v17  ;;  %v13842_v0 = vrot.slane %v2010_v15, 9  ;;  %v3748_v24 = vmax.f32 %v2003_v55, %v13840_v41  ;;  %v2061_v62 = vrot.slane %v2047_v36, %v17370_v48  ;;  %v2062_v2 = vcombine.high %v2054_v29, %v2054_v29  ;;  %v16037_v41 = vld [vmem:[%s22153_s3 + $0x138] sm:$0xff]  }
 0x27f   : > { %5229 = vst [vmem:[#allocation2 + $0x274] sm:$0xf] %v5186_v17  ;;  %5256 = vst [vmem:[#allocation2 + $0x224] sm:$0xf] %v5186_v17  ;;  %v13852_v5 = vrot.slane %v2054_v29, 9  ;;  %v2027_v25 = vrot.slane %v2013_v3, %v17370_v48  ;;  %v13843_v63 = vrot.slane %v2012_v57, 9  ;;  %v3749_v18 = vmax.f32 %v2011_v11, %v13841_v8  ;;  %v15836_v11 = vpop.f32.mrf.mxu0 }
 0x280   : > { %5283 = vst [vmem:[#allocation2 + $0x1d4] sm:$0xf] %v5186_v17  ;;  %5310 = vst [vmem:[#allocation2 + $0x184] sm:$0xf] %v5186_v17  ;;  %v3750_v19 = vmax.f32 %v2010_v15, %v13842_v0  ;;  %v2028_v9 = vcombine.high %v2020_v26, %v2020_v26  ;;  %v16025_v53 = vld [vmem:[#allocation2 + $0x258] ss:$100 sps:$4 sm:$0xff]   ;;  %v2063_v34 = vcombine.high %v2061_v62, %v2061_v62 }
 0x281   : > { %v13853_v12 = vrot.slane %v2062_v2, 9  ;;  %v13854_v7 = vrot.slane %v2061_v62, 9  ;;  %v3760_v21 = vmax.f32 %v2054_v29, %v13852_v5  ;;  %v3751_v61 = vmax.f32 %v2012_v57, %v13843_v63 }
 0x282   : > { %v2029_v14 = vcombine.high %v2027_v25, %v2027_v25  ;;  %v13844_v10 = vrot.slane %v2020_v26, 9  ;;  %v13845_v32 = vrot.slane %v2028_v9, 9  ;;  %v13855_v49 = vrot.slane %v2063_v34, 9 }
 0x283   : > { %v16021_v39 = vld [vmem:[#allocation2 + $0x25c] ss:$100 sps:$4 sm:$0xff]   ;;  %v3761_v43 = vmax.f32 %v2062_v2, %v13853_v12  ;;  %v3762_v56 = vmax.f32 %v2061_v62, %v13854_v7  ;;  %v3940_v6 = vmax.f32 %v3748_v24, %v3760_v21  ;;  %v13846_v40 = vrot.slane %v2027_v25, 9  ;;  %v16039_v62 = vld [vmem:[#allocation2 + $0xd4] ss:$100 sps:$4 sm:$0xff]  }
 0x284   : > { %8146 = vmatprep.mubr.bf16.mxu1 %v16021_v39  ;;  %v13847_v46 = vrot.slane %v2029_v14, 9  ;;  %v18849_v51 = vmax.f32 %v2020_v26, %v13844_v10  ;;  %v18851_v16 = vmax.f32 %v2028_v9, %v13845_v32  ;;  %v3763_v1 = vmax.f32 %v2063_v34, %v13855_v49  ;;  %v16028_v26 = vld [vmem:[#allocation2 + $0x8] ss:$100 sps:$4 sm:$0xff]  }
 0x285   : > { %8147 = vmatmul.mubr.bf16.gmra.mxu1 %v16025_v53  ;;  %v3941_v37 = vmax.f32 %v3749_v18, %v3761_v43  ;;  %v3942_v35 = vmax.f32 %v3750_v19, %v3762_v56  ;;  %v15120_v17 = vpack.c.bf16 %v3940_v6, %v3940_v6  ;;  %v18853_v54 = vmax.f32 %v2027_v25, %v13846_v40  ;;  %v16046_v53 = vld [vmem:[%s22153_s3 + $0x130] sm:$0xff]  }
 0x286   : > { %8187 = vmatprep.mubr.bf16.mxu1 %v16030_v22  ;;  %v18855_v23 = vmax.f32 %v2029_v14, %v13847_v46  ;;  %v966_v30 = vadd.f32 %v18669_v42, %v18832_v4  ;;  %v958_v13 = vadd.f32 %v18669_v42, %v957_v31  ;;  %v3943_v44 = vmax.f32 %v3751_v61, %v3763_v1  ;;  %v16043_v31 = vld [vmem:[%s22153_s3 + $0x170] sm:$0xff]  }
 0x287   : > { %v15121_v58 = vpack.c.bf16 %v3941_v37, %v3941_v37  ;;  %v15122_v50 = vpack.c.bf16 %v3942_v35, %v3942_v35  ;;  %v4555_v55 = vunpack.c.l.b16 %v15120_v17  ;;  %v969_v59 = vadd.f32 %v18669_v42, %v15833_v28  ;;  %v16051_v28 = vld [vmem:[%s22153_s3 + $0x168] sm:$0xff]  }
 0x288   : > { %v1090_v38 = vmax.f32 %v966_v30, 0.0  ;;  %v1088_v20 = vmax.f32 %v958_v13, 0.0  ;;  %v961_v15 = vadd.f32 %v18669_v42, %v960_v47  ;;  %v15123_v36 = vpack.c.bf16 %v3943_v44, %v3943_v44  ;;  %v16054_v37 = vld [vmem:[%s22153_s3 + $0x128] sm:$0xff]   ;;  %v16053_v13 = vld [vmem:[#allocation2 + $0xd0] ss:$100 sps:$4 sm:$0xff]  }
 0x289   : > { %v4556_v29 = vunpack.c.l.b16 %v15121_v58  ;;  %v4557_v4 = vunpack.c.l.b16 %v15122_v50  ;;  %v982_v3 = vadd.f32 %v18669_v42, %v15836_v11  ;;  %v1091_v50 = vmax.f32 %v969_v59, 0.0  ;;  %v16060_v59 = vld [vmem:[%s22153_s3 + $0x120] sm:$0xff]  }
 0x28a   : > { %v2098_v57 = vcombine.high %v1090_v38, %v1090_v38  ;;  %v2105_v8 = vrot.slane %v1090_v38, %v17370_v48  ;;  %v2064_v0 = vcombine.high %v1088_v20, %v1088_v20  ;;  %v2071_v24 = vrot.slane %v1088_v20, %v17370_v48  ;;  %v16058_v38 = vld [vmem:[%s22153_s3 + $0x160] sm:$0xff]  }
 0x28b   : > { %v18871_v2 = vunpack.c.l.b16 %v15123_v36  ;;  %v4563_v5 = vrot.slane %v4556_v29, 7  ;;  %v4565_v25 = vrot.slane %v4557_v4, 6  ;;  %v4927_v63 = vrot.slane %v4557_v4, 7 }
 0x28c   : > { %v2112_v18 = vrot.slane %v2098_v57, %v17370_v48  ;;  %v2113_v19 = vcombine.high %v2105_v8, %v2105_v8  ;;  %v13864_v9 = vrot.slane %v2105_v8, 9  ;;  %v2078_v39 = vrot.slane %v2064_v0, %v17370_v48 }
 0x28d   : > { %8188 = vmatmul.mubr.bf16.vlgmr.msra.gmra.mxu1 %v16028_v26  ;;  %v4564_v34 = vsel %vm4389_vm1, %v4563_v5, %v4555_v55  ;;  %v4567_v12 = vrot.slane %v18871_v2, 5  ;;  %v4928_v7 = vsel %vm4389_vm1, %v4927_v63, %v4556_v29  ;;  %v4929_v21 = vrot.slane %v18871_v2, 6  ;;  %v16056_v29 = vld [vmem:[#allocation2 + $0x19c] ss:$100 sps:$4 sm:$0xff]  }
 0x28e   : > { %15319 = vmatpush3.bf16.msra.mxu1 %v16037_v41  ;;  %8195 = vmatprep.mubr.bf16.mxu1 %v16039_v62  ;;  %v4566_v61 = vsel %vm4392_vm2, %v4565_v25, %v4564_v34  ;;  %v5207_v14 = vrot.slane %v18871_v2, 7  ;;  %v2114_v10 = vcombine.high %v2112_v18, %v2112_v18  ;;  %v13865_v32 = vrot.slane %v2113_v19, 9 }
 0x28f   : > { %15320 = vmatprep.subr.bf16.mxu1 %v16043_v31  ;;  %v18888_v22 = vsel %vm4395_vm3, %v4567_v12, %v4566_v61  ;;  %v18891_v49 = vsel %vm4392_vm2, %v4929_v21, %v4928_v7  ;;  %v13866_v43 = vrot.slane %v2112_v18, 9  ;;  %v18893_v56 = vmax.f32 %v2105_v8, %v13864_v9  ;;  %v16071_v61 = vld [vmem:[%s22153_s3 + $0x150] sm:$0xff]  }
 0x290   : > { %v18896_v6 = vsel %vm4389_vm1, %v5207_v14, %v4557_v4  ;;  %v13867_v40 = vrot.slane %v2114_v10, 9  ;;  %v18898_v46 = vmax.f32 %v2113_v19, %v13865_v32  ;;  %v2079_v1 = vcombine.high %v2071_v24, %v2071_v24 }
 0x291   : > { %v18903_v35 = vmax.f32 %v2112_v18, %v13866_v43  ;;  %v2080_v17 = vcombine.high %v2078_v39, %v2078_v39  ;;  %v13856_v47 = vrot.slane %v2071_v24, 9  ;;  %v13858_v30 = vrot.slane %v2078_v39, 9 }
 0x292   : > { %15321 = vmatpush3.bf16.msra.mxu1 %v16046_v53  ;;  %v18905_v44 = vmax.f32 %v2114_v10, %v13867_v40  ;;  %v13857_v58 = vrot.slane %v2079_v1, 9  ;;  %v1089_v55 = vmax.f32 %v961_v15, 0.0  ;;  %v18910_v36 = vmax.f32 %v982_v3, 0.0  ;;  %v16069_v40 = vld [vmem:[#allocation2 + $0x264] ss:$100 sps:$4 sm:$0xff]  }
 0x293   : > { %15322 = vmatprep.subr.bf16.mxu1 %v16051_v28  ;;  %v13859_v20 = vrot.slane %v2080_v17, 9  ;;  %v3764_v11 = vmax.f32 %v2071_v24, %v13856_v47  ;;  %v3766_v41 = vmax.f32 %v2078_v39, %v13858_v30  ;;  %v2115_v26 = vcombine.high %v1091_v50, %v1091_v50  ;;  %v16064_v24 = vld [vmem:[%s22153_s3 + $0x158] sm:$0xff]  }
 0x294   : > { %v3765_v4 = vmax.f32 %v2079_v1, %v13857_v58  ;;  %v2122_v31 = vrot.slane %v1091_v50, %v17370_v48  ;;  %v2081_v57 = vcombine.high %v1089_v55, %v1089_v55  ;;  %v18919_v3 = vrot.slane %v1089_v55, %v17370_v48  ;;  %v16074_v55 = vld [vmem:[%s22153_s3 + $0x110] sm:$0xff]  }
 0x295   : > { %8196 = vmatmul.mubr.bf16.gmra.mxu1 %v16053_v13  ;;  %v3767_v15 = vmax.f32 %v2080_v17, %v13859_v20  ;;  %v3944_v8 = vmax.f32 %v18849_v51, %v3764_v11  ;;  %v3946_v0 = vmax.f32 %v18853_v54, %v3766_v41  ;;  %v2129_v5 = vrot.slane %v2115_v26, %v17370_v48 }
 0x296   : > { %15323 = vmatpush3.bf16.msra.mxu1 %v16054_v37  ;;  %8203 = vmatprep.mubr.bf16.mxu1 %v16056_v29  ;;  %v3945_v62 = vmax.f32 %v18851_v16, %v3765_v4  ;;  %v2130_v25 = vcombine.high %v2122_v31, %v2122_v31  ;;  %v13868_v63 = vrot.slane %v2122_v31, 9  ;;  %v18928_v54 = vrot.slane %v2081_v57, %v17370_v48  ;;  %v16067_v16 = vld [vmem:[%s22153_s3 + $0x118] sm:$0xff]   ;;  %v16078_v29 = vld [vmem:[%s22153_s3 + $0x148] sm:$0xff]  }
 0x297   : > { %15324 = vmatprep.subr.bf16.mxu1 %v16058_v38  ;;  %v3947_v18 = vmax.f32 %v18855_v23, %v3767_v15  ;;  %v15124_v51 = vpack.c.bf16 %v3944_v8, %v3944_v8  ;;  %v15126_v19 = vpack.c.bf16 %v3946_v0, %v3946_v0  ;;  %v2131_v39 = vcombine.high %v2129_v5, %v2129_v5  ;;  %v16066_v23 = vld [vmem:[#allocation2 + $0x198] ss:$100 sps:$4 sm:$0xff]  }
 0x298   : > { %v15125_v9 = vpack.c.bf16 %v3945_v62, %v3945_v62  ;;  %v13869_v53 = vrot.slane %v2130_v25, 9  ;;  %v13870_v34 = vrot.slane %v2129_v5, 9  ;;  %v18935_v28 = vmax.f32 %v2122_v31, %v13868_v63 }
 0x299   : > { %v15127_v12 = vpack.c.bf16 %v3947_v18, %v3947_v18  ;;  %v4559_v7 = vunpack.c.l.b16 %v15124_v51  ;;  %v18933_v21 = vunpack.c.l.b16 %v15126_v19  ;;  %v13871_v10 = vrot.slane %v2131_v39, 9  ;;  %v16080_v51 = vld [vmem:[#allocation2 + $0x260] ss:$100 sps:$4 sm:$0xff]  }
 0x29a   : > { %15325 = vmatpush3.bf16.msra.mxu1 %v16060_v59  ;;  %v4560_v14 = vunpack.c.l.b16 %v15125_v9  ;;  %v18940_v32 = vmax.f32 %v2130_v25, %v13869_v53  ;;  %v18942_v43 = vmax.f32 %v2129_v5, %v13870_v34  ;;  %v16086_v19 = vld [vmem:[%s22153_s3 + $0x140] sm:$0xff]  }
 0x29b   : > { %15326 = vmatprep.subr.bf16.mxu1 %v16064_v24  ;;  %v18944_v1 = vunpack.c.l.b16 %v15127_v12  ;;  %v4569_v37 = vrot.slane %v4559_v7, 4  ;;  %v4573_v17 = vrot.slane %v18933_v21, 2  ;;  %v4931_v47 = vrot.slane %v4559_v7, 5  ;;  %v16085_v12 = vld [vmem:[#allocation2 + $0x14] ss:$100 sps:$4 sm:$0xff]  }
 0x29c   : > { %v4571_v30 = vrot.slane %v4560_v14, 3  ;;  %v4933_v13 = vrot.slane %v4560_v14, 4  ;;  %v4935_v58 = vrot.slane %v18933_v21, 3  ;;  %v5209_v50 = vrot.slane %v4559_v7, 6 }
 0x29d   : > { %8204 = vmatmul.mubr.bf16.gmra.mxu1 %v16066_v23  ;;  %v4570_v38 = vsel %vm4398_vm4, %v4569_v37, %v18888_v22  ;;  %v4575_v20 = vrot.slane %v18944_v1, 1  ;;  %v4932_v11 = vsel %vm4395_vm3, %v4931_v47, %v18891_v49  ;;  %v4937_v41 = vrot.slane %v18944_v1, 2 }
 0x29e   : > { %15327 = vmatpush3.bf16.msra.mxu1 %v16067_v16  ;;  %8211 = vmatprep.mubr.bf16.mxu1 %v16069_v40  ;;  %v4572_v4 = vsel %vm4401_vm5, %v4571_v30, %v4570_v38  ;;  %v4934_v26 = vsel %vm4398_vm4, %v4933_v13, %v4932_v11  ;;  %v5210_v31 = vsel %vm4392_vm2, %v5209_v50, %v18896_v6  ;;  %v5211_v22 = vrot.slane %v4560_v14, 5  ;;  %v16081_v6 = vld [vmem:[%s22153_s3 + $0x108] sm:$0xff]   ;;  %v973_v40 = vpop.f32.mrf.mxu0  ;;  %v16091_v13 = vld [vmem:[%s22153_s3 + $0x1f8] sm:$0xff]  }
 0x29f   : > { %15328 = vmatprep.subr.bf16.mxu1 %v16071_v61  ;;  %v4574_v57 = vsel %vm4404_vm6, %v4573_v17, %v4572_v4  ;;  %v5213_v59 = vrot.slane %v18933_v21, 4  ;;  %v5215_v49 = vrot.slane %v18944_v1, 3  ;;  %v5487_v15 = vrot.slane %v4559_v7, 7 }
 0x2a0   : > { %v4576_v8 = vsel %vm4407_vm7, %v4575_v20, %v4574_v57  ;;  %v5212_v0 = vsel %vm4395_vm3, %v5211_v22, %v5210_v31  ;;  %v5489_v24 = vrot.slane %v4560_v14, 6  ;;  %v5491_v62 = vrot.slane %v18933_v21, 5  ;;  %v15837_v31 = vpop.f32.mrf.mxu0  ;;  %v16093_v22 = vld [vmem:[%s22153_s3 + $0x1b8] sm:$0xff]  }
 0x2a1   : > { %v4577_v5 = vpack.c.b16 %v4576_v8, %v4576_v8  ;;  %v5488_v25 = vsel %vm4389_vm1, %v5487_v15, %v18871_v2  ;;  %v5493_v63 = vrot.slane %v18944_v1, 4  ;;  %v5767_v18 = vrot.slane %v4560_v14, 7 }
 0x2a2   : > { %15329 = vmatpush3.bf16.msra.mxu1 %v16074_v55  ;;  %v5490_v9 = vsel %vm4392_vm2, %v5489_v24, %v5488_v25  ;;  %v5769_v53 = vrot.slane %v18933_v21, 6  ;;  %v5771_v34 = vrot.slane %v18944_v1, 5  ;;  %v18982_v16 = vmax.f32 %v2131_v39, %v13871_v10  ;;  %v16089_v1 = vld [vmem:[%s22153_s3 + $0x100] sm:$0xff]  }
 0x2a3   : > { %15330 = vmatprep.subr.bf16.mxu1 %v16078_v29  ;;  %v5768_v2 = vsel %vm4389_vm1, %v5767_v18, %v4559_v7  ;;  %4586 = vst [vmem:[#allocation2 + $0x2d0] sm:$0xf] %v4577_v5  ;;  %4641 = vst [vmem:[#allocation2 + $0x280] sm:$0xf] %v4577_v5  ;;  %v2096_v23 = vcombine.high %v18919_v3, %v18919_v3  ;;  %v2097_v61 = vcombine.high %v18928_v54, %v18928_v54 }
 0x2a4   : > { %4696 = vst [vmem:[#allocation2 + $0x230] sm:$0xf] %v4577_v5  ;;  %4751 = vst [vmem:[#allocation2 + $0x1e0] sm:$0xf] %v4577_v5  ;;  %v13860_v14 = vrot.slane %v18919_v3, 9  ;;  %v5770_v21 = vsel %vm4392_vm2, %v5769_v53, %v5768_v2  ;;  %v13862_v39 = vrot.slane %v18928_v54, 9  ;;  %v4936_v10 = vsel %vm4401_vm5, %v4935_v58, %v4934_v26 }
 0x2a5   : > { %8212 = vmatmul.mubr.bf16.gmra.mxu1 %v16080_v51  ;;  %v5214_v7 = vsel %vm4398_vm4, %v5213_v59, %v5212_v0  ;;  %v13861_v37 = vrot.slane %v2096_v23, 9  ;;  %v13863_v17 = vrot.slane %v2097_v61, 9  ;;  %v4938_v30 = vsel %vm4404_vm6, %v4937_v41, %v4936_v10  ;;  %v16102_v51 = vld [vmem:[%s22153_s3 + $0x1b0] sm:$0xff]  }
 0x2a6   : > { %15331 = vmatpush3.bf16.msra.mxu1 %v16081_v6  ;;  %8252 = vmatprep.mubr.bf16.mxu1 %v16085_v12  ;;  %v3768_v47 = vmax.f32 %v18919_v3, %v13860_v14  ;;  %v3770_v58 = vmax.f32 %v18928_v54, %v13862_v39  ;;  %v5216_v50 = vsel %vm4401_vm5, %v5215_v49, %v5214_v7  ;;  %v16083_v49 = vld [vmem:[#allocation2 + $0x10] ss:$100 sps:$4 sm:$0xff]   ;;  %v16107_v12 = vld [vmem:[%s22153_s3 + $0x1e8] sm:$0xff]  }
 0x2a7   : > { %15332 = vmatprep.subr.bf16.mxu1 %v16086_v19  ;;  %v5492_v55 = vsel %vm4395_vm3, %v5491_v62, %v5490_v9  ;;  %v5772_v38 = vsel %vm4395_vm3, %v5771_v34, %v5770_v21  ;;  %v3769_v20 = vmax.f32 %v2096_v23, %v13861_v37  ;;  %v3771_v11 = vmax.f32 %v2097_v61, %v13863_v17  ;;  %v16095_v62 = vld [vmem:[#allocation2 + $0xdc] ss:$100 sps:$4 sm:$0xff]  }
 0x2a8   : > { %v3948_v29 = vmax.f32 %v18835_v27, %v3768_v47  ;;  %v5494_v3 = vsel %vm4398_vm4, %v5493_v63, %v5492_v55  ;;  %v3950_v41 = vmax.f32 %v18840_v60, %v3770_v58  ;;  %v2166_v4 = vcombine.high %v18910_v36, %v18910_v36  ;;  %v16110_v47 = vld [vmem:[%s22153_s3 + $0x1a8] sm:$0xff]  }
 0x2a9   : > { %v2173_v54 = vrot.slane %v18910_v36, %v17370_v48  ;;  %v974_v26 = vadd.f32 %v18669_v42, %v973_v40  ;;  %v3949_v27 = vmax.f32 %v18838_v33, %v3769_v20  ;;  %v3951_v57 = vmax.f32 %v18843_v52, %v3771_v11  ;;  %v16099_v36 = vld [vmem:[%s22153_s3 + $0x1f0] sm:$0xff]  }
 0x2aa   : > { %15333 = vmatpush3.bf16.msra.mxu1 %v16089_v1  ;;  %v15160_v59 = vpack.c.bf16 %v3948_v29, %v3948_v29  ;;  %v19020_v60 = vadd.f32 %v18669_v42, %v15837_v31  ;;  %v15184_v15 = vpack.c.bf16 %v3950_v41, %v3950_v41  ;;  %v2180_v8 = vrot.slane %v2166_v4, %v17370_v48  ;;  %v16112_v31 = vld [vmem:[#allocation2 + $0x1a4] ss:$100 sps:$4 sm:$0xff]  }
 0x2ab   : > { %15358 = vmatprep.subr.bf16.mxu1 %v16091_v13  ;;  %v2181_v0 = vcombine.high %v2173_v54, %v2173_v54  ;;  %v13880_v24 = vrot.slane %v2173_v54, 9  ;;  %v15172_v33 = vpack.c.bf16 %v3949_v27, %v3949_v27  ;;  %v15196_v5 = vpack.c.bf16 %v3951_v57, %v3951_v57 }
 0x2ac   : > { %v4926_v6 = vunpack.c.l.b16 %v15160_v59  ;;  %v19026_v52 = vmax.f32 %v974_v26, 0.0  ;;  %v5486_v42 = vunpack.c.l.b16 %v15184_v15  ;;  %v2182_v25 = vcombine.high %v2180_v8, %v2180_v8 }
 0x2ad   : > { %8253 = vmatmul.mubr.bf16.vlgmr.msra.gmra.mxu1 %v16083_v49  ;;  %v13881_v63 = vrot.slane %v2181_v0, 9  ;;  %v13882_v18 = vrot.slane %v2180_v8, 9  ;;  %v5206_v9 = vunpack.c.l.b16 %v15172_v33  ;;  %v5766_v23 = vunpack.c.l.b16 %v15196_v5  ;;  %v976_v49 = vpop.f32.mrf.mxu0 }
 0x2ae   : > { %15359 = vmatpush3.bf16.msra.mxu1 %v16093_v22  ;;  %8260 = vmatprep.mubr.bf16.mxu1 %v16095_v62  ;;  %v4939_v19 = vrot.slane %v4926_v6, 1  ;;  %v5217_v53 = vrot.slane %v4926_v6, 2  ;;  %v5495_v34 = vrot.slane %v4926_v6, 3  ;;  %v5499_v2 = vrot.slane %v5486_v42, 1 }
 0x2af   : > { %15360 = vmatprep.subr.bf16.mxu1 %v16099_v36  ;;  %v5773_v61 = vrot.slane %v4926_v6, 4  ;;  %v5777_v14 = vrot.slane %v5486_v42, 2  ;;  %v5219_v10 = vrot.slane %v5206_v9, 1  ;;  %v5497_v1 = vrot.slane %v5206_v9, 2  ;;  %v16116_v36 = vld [vmem:[%s22153_s3 + $0x1a0] sm:$0xff]  }
 0x2b0   : > { %v4940_v21 = vsel %vm4407_vm7, %v4939_v19, %v4938_v30  ;;  %v5218_v39 = vsel %vm4404_vm6, %v5217_v53, %v5216_v50  ;;  %v5496_v7 = vsel %vm4401_vm5, %v5495_v34, %v5494_v3  ;;  %v5775_v17 = vrot.slane %v5206_v9, 3  ;;  %v16109_v50 = vld [vmem:[#allocation2 + $0xd8] ss:$100 sps:$4 sm:$0xff]   ;;  %v16114_v3 = vld [vmem:[%s22153_s3 + $0x1e0] sm:$0xff]  }
 0x2b1   : > { %v4941_v40 = vpack.c.b16 %v4940_v21, %v4940_v21  ;;  %v5774_v37 = vsel %vm4398_vm4, %v5773_v61, %v5772_v38  ;;  %v5220_v13 = vsel %vm4407_vm7, %v5219_v10, %v5218_v39  ;;  %v5779_v58 = vrot.slane %v5766_v23, 1  ;;  %v19071_v42 = vld [vmem:[%s22152_s2] ss:$0 sm:$0xff]  ;;  %v16123_v19 = vld [vmem:[%s22153_s3 + $0x198] sm:$0xff]   ;;  %v16127_v23 = vld [vmem:[%s22153_s3 + $0x1d0] sm:$0xff]  }
 0x2b2   : > { %15361 = vmatpush3.bf16.msra.mxu1 %v16102_v51  ;;  %v13883_v55 = vrot.slane %v2182_v25, 9  ;;  %v3788_v30 = vmax.f32 %v2173_v54, %v13880_v24  ;;  %v5221_v20 = vpack.c.b16 %v5220_v13, %v5220_v13  ;;  %v5498_v38 = vsel %vm4404_vm6, %v5497_v1, %v5496_v7  ;;  %v16122_v51 = vld [vmem:[#allocation2 + $0x1a0] ss:$100 sps:$4 sm:$0xff]  }
 0x2b3   : > { %15362 = vmatprep.subr.bf16.mxu1 %v16107_v12  ;;  %4950 = vst [vmem:[#allocation2 + $0x2d4] sm:$0xf] %v4941_v40  ;;  %4977 = vst [vmem:[#allocation2 + $0x284] sm:$0xf] %v4941_v40  ;;  %v5776_v11 = vsel %vm4401_vm5, %v5775_v17, %v5774_v37  ;;  %v3789_v29 = vmax.f32 %v2181_v0, %v13881_v63  ;;  %v5500_v41 = vsel %vm4407_vm7, %v5499_v2, %v5498_v38  ;;  %v16125_v2 = vld [vmem:[#allocation2 + $0x26c] ss:$100 sps:$4 sm:$0xff]  }
 0x2b4   : > { %5004 = vst [vmem:[#allocation2 + $0x234] sm:$0xf] %v4941_v40  ;;  %5031 = vst [vmem:[#allocation2 + $0x1e4] sm:$0xf] %v4941_v40  ;;  %v5778_v4 = vsel %vm4404_vm6, %v5777_v14, %v5776_v11  ;;  %v3790_v54 = vmax.f32 %v2180_v8, %v13882_v18  ;;  %v3791_v26 = vmax.f32 %v2182_v25, %v13883_v55 }
 0x2b5   : > { %8261 = vmatmul.mubr.bf16.gmra.mxu1 %v16109_v50  ;;  %5230 = vst [vmem:[#allocation2 + $0x2d8] sm:$0xf] %v5221_v20  ;;  %5257 = vst [vmem:[#allocation2 + $0x288] sm:$0xf] %v5221_v20  ;;  %v5501_v22 = vpack.c.b16 %v5500_v41, %v5500_v41  ;;  %v5780_v27 = vsel %vm4407_vm7, %v5779_v58, %v5778_v4  ;;  %v3956_v57 = vmax.f32 %v18935_v28, %v3788_v30  ;;  %v16120_v28 = vld [vmem:[%s22153_s3 + $0x1d8] sm:$0xff]   ;;  %v16130_v58 = vld [vmem:[%s22153_s3 + $0x190] sm:$0xff]  }
 0x2b6   : > { %5284 = vst [vmem:[#allocation2 + $0x238] sm:$0xf] %v5221_v20  ;;  %5311 = vst [vmem:[#allocation2 + $0x1e8] sm:$0xf] %v5221_v20  ;;  %v3957_v59 = vmax.f32 %v18940_v32, %v3789_v29  ;;  %15363 = vmatpush3.bf16.msra.mxu1 %v16110_v47  ;;  %v5781_v15 = vpack.c.b16 %v5780_v27, %v5780_v27  ;;  %v3958_v8 = vmax.f32 %v18942_v43, %v3790_v54  ;;  %v16135_v41 = vld [vmem:[%s22153_s3 + $0x1c8] sm:$0xff]  }
 0x2b7   : > { %v3959_v0 = vmax.f32 %v18982_v16, %v3791_v26  ;;  %v2132_v24 = vcombine.high %v19026_v52, %v19026_v52  ;;  %8268 = vmatprep.mubr.bf16.mxu1 %v16112_v31  ;;  %5510 = vst [vmem:[#allocation2 + $0x2dc] sm:$0xf] %v5501_v22  ;;  %5537 = vst [vmem:[#allocation2 + $0x28c] sm:$0xf] %v5501_v22  ;;  %v15132_v32 = vpack.c.bf16 %v3956_v57, %v3956_v57 }
 0x2b8   : > { %5564 = vst [vmem:[#allocation2 + $0x23c] sm:$0xf] %v5501_v22  ;;  %5591 = vst [vmem:[#allocation2 + $0x1ec] sm:$0xf] %v5501_v22  ;;  %v15133_v62 = vpack.c.bf16 %v3957_v59, %v3957_v59  ;;  %v2139_v6 = vrot.slane %v19026_v52, %v17370_v48  ;;  %v19065_v43 = vmax.f32 %v19020_v60, 0.0  ;;  %15364 = vmatprep.subr.bf16.mxu1 %v16114_v3  ;;  %v15840_v22 = vpop.f32.mrf.mxu0 }
 0x2b9   : > { %5790 = vst [vmem:[#allocation2 + $0x2e0] sm:$0xf] %v5781_v15  ;;  %5817 = vst [vmem:[#allocation2 + $0x290] sm:$0xf] %v5781_v15  ;;  %v15134_v16 = vpack.c.bf16 %v3958_v8, %v3958_v8  ;;  %v15135_v33 = vpack.c.bf16 %v3959_v0, %v3959_v0  ;;  %v2146_v5 = vrot.slane %v2132_v24, %v17370_v48  ;;  %v19074_v52 = vunpack.c.l.b16 %v15132_v32  ;;  %v16050_v8 = vld [vmem:[#allocation2 + $0x34] ss:$100 sps:$4 sm:$0xff]  }
 0x2ba   : > { %5844 = vst [vmem:[#allocation2 + $0x240] sm:$0xf] %v5781_v15  ;;  %5871 = vst [vmem:[#allocation2 + $0x1f0] sm:$0xf] %v5781_v15  ;;  %v977_v25 = vadd.f32 %v19071_v42, %v976_v49  ;;  %v19076_v60 = vunpack.c.l.b16 %v15133_v62  ;;  %v2147_v63 = vcombine.high %v2139_v6, %v2139_v6  ;;  %v13872_v18 = vrot.slane %v2139_v6, 9  ;;  %15365 = vmatpush3.bf16.msra.mxu1 %v16116_v36  ;;  %v16138_v0 = vld [vmem:[%s22153_s3 + $0x188] sm:$0xff]  }
 0x2bb   : > { %v19081_v9 = vunpack.c.l.b16 %v15134_v16  ;;  %v19083_v53 = vunpack.c.l.b16 %v15135_v33  ;;  %v2148_v34 = vcombine.high %v2146_v5, %v2146_v5  ;;  %v13874_v12 = vrot.slane %v2146_v5, 9  ;;  %15366 = vmatprep.subr.bf16.mxu1 %v16120_v28 }
 0x2bc   : > { %v4625_v61 = vrot.slane %v19074_v52, 4  ;;  %v4627_v14 = vrot.slane %v19076_v60, 3  ;;  %v4959_v21 = vrot.slane %v19074_v52, 5  ;;  %v4961_v39 = vrot.slane %v19076_v60, 4 }
 0x2bd   : > { %v4629_v10 = vrot.slane %v19081_v9, 2  ;;  %v4631_v7 = vrot.slane %v19083_v53, 1  ;;  %v4963_v40 = vrot.slane %v19081_v9, 3  ;;  %v4965_v1 = vrot.slane %v19083_v53, 2  ;;  %8269 = vmatmul.mubr.bf16.gmra.mxu1 %v16122_v51 }
 0x2be   : > { %v5237_v37 = vrot.slane %v19074_v52, 6  ;;  %v5239_v17 = vrot.slane %v19076_v60, 5  ;;  %v5241_v47 = vrot.slane %v19081_v9, 4  ;;  %v5243_v13 = vrot.slane %v19083_v53, 3  ;;  %15367 = vmatpush3.bf16.msra.mxu1 %v16123_v19  ;;  %8276 = vmatprep.mubr.bf16.mxu1 %v16125_v2  ;;  %v16044_v57 = vld [vmem:[#allocation2 + $0x278] ss:$100 sps:$4 sm:$0xff]  }
 0x2bf   : > { %v5515_v55 = vrot.slane %v19074_v52, 7  ;;  %v5517_v30 = vrot.slane %v19076_v60, 6  ;;  %v5519_v50 = vrot.slane %v19081_v9, 5  ;;  %v5521_v20 = vrot.slane %v19083_v53, 4  ;;  %15368 = vmatprep.subr.bf16.mxu1 %v16127_v23 }
 0x2c0   : > { %v5795_v38 = vrot.slane %v19076_v60, 7  ;;  %v5797_v11 = vrot.slane %v19081_v9, 6  ;;  %v5799_v29 = vrot.slane %v19083_v53, 5  ;;  %v13873_v3 = vrot.slane %v2147_v63, 9  ;;  %v16041_v27 = vld [vmem:[#allocation2 + $0x27c] ss:$100 sps:$4 sm:$0xff]  }
 0x2c1   : > { %v13875_v4 = vrot.slane %v2148_v34, 9  ;;  %v3780_v54 = vmax.f32 %v2139_v6, %v13872_v18  ;;  %v3782_v26 = vmax.f32 %v2146_v5, %v13874_v12  ;;  %v2183_v31 = vcombine.high %v19065_v43, %v19065_v43  ;;  %8406 = vmatprep.mubr.bf16.mxu0 %v16041_v27  ;;  %v16137_v6 = vld [vmem:[#allocation2 + $0x268] ss:$100 sps:$4 sm:$0xff]   ;;  %v989_v12 = vpop.f32.mrf.mxu0  ;;  %v16172_v60 = vld [vmem:[%s22153_s3 + $0x2a0] sm:$0xff]  }
 0x2c2   : > { %v5796_v59 = vsel %vm4389_vm1, %v5795_v38, %v19074_v52  ;;  %v3781_v49 = vmax.f32 %v2147_v63, %v13873_v3  ;;  %v2190_v36 = vrot.slane %v19065_v43, %v17370_v48  ;;  %v1093_v15 = vmax.f32 %v977_v25, 0.0  ;;  %15369 = vmatpush3.bf16.msra.mxu1 %v16130_v58  ;;  %v16143_v43 = vld [vmem:[%s22153_s3 + $0x1c0] sm:$0xff]   ;;  %8407 = vmatmul.mubr.bf16.gmra.mxu0 %v16044_v57  ;;  %v16092_v52 = vld [vmem:[%s22153_s3 + $0x450] sm:$0xff]  }
 0x2c3   : > { %v5798_v24 = vsel %vm4392_vm2, %v5797_v11, %v5796_v59  ;;  %v3783_v28 = vmax.f32 %v2148_v34, %v13875_v4  ;;  %v2197_v32 = vrot.slane %v2183_v31, %v17370_v48  ;;  %v998_v62 = vadd.f32 %v19071_v42, %v15840_v22  ;;  %15370 = vmatprep.subr.bf16.mxu1 %v16135_v41  ;;  %v16142_v63 = vld [vmem:[#allocation2 + $0x1c] ss:$100 sps:$4 sm:$0xff]  }
 0x2c4   : > { %v2198_v16 = vcombine.high %v2190_v36, %v2190_v36  ;;  %v13884_v33 = vrot.slane %v2190_v36, 9  ;;  %v19129_v5 = vsel %vm4395_vm3, %v5799_v29, %v5798_v24  ;;  %v2149_v25 = vcombine.high %v1093_v15, %v1093_v15  ;;  %8512 = vmatprep.mubr.bf16.mxu0 %v16050_v8  ;;  %v16145_v11 = vld [vmem:[%s22153_s3 + $0x180] sm:$0xff]   ;;  %v16150_v31 = vld [vmem:[%s22153_s3 + $0x2f8] sm:$0xff]  }
 0x2c5   : > { %v2199_v18 = vcombine.high %v2197_v32, %v2197_v32  ;;  %v13886_v51 = vrot.slane %v2197_v32, 9  ;;  %v2156_v19 = vrot.slane %v1093_v15, %v17370_v48  ;;  %v19132_v34 = vmax.f32 %v998_v62, 0.0  ;;  %8277 = vmatmul.mubr.bf16.gmra.mxu1 %v16137_v6  ;;  %v16063_v24 = vld [vmem:[%s22153_s3 + $0x438] sm:$0xff]  }
 0x2c6   : > { %v13885_v2 = vrot.slane %v2198_v16, 9  ;;  %v3792_v23 = vmax.f32 %v2190_v36, %v13884_v33  ;;  %v2163_v58 = vrot.slane %v2149_v25, %v17370_v48  ;;  %v19136_v38 = vadd.f32 %v19071_v42, %v989_v12  ;;  %15371 = vmatpush3.bf16.msra.mxu1 %v16138_v0  ;;  %8317 = vmatprep.mubr.bf16.mxu1 %v16142_v63  ;;  %v16048_v33 = vld [vmem:[#allocation2 + $0x30] ss:$100 sps:$4 sm:$0xff]  }
 0x2c7   : > { %v13887_v29 = vrot.slane %v2199_v18, 9  ;;  %v3794_v3 = vmax.f32 %v2197_v32, %v13886_v51  ;;  %v2164_v41 = vcombine.high %v2156_v19, %v2156_v19  ;;  %v13876_v4 = vrot.slane %v2156_v19, 9  ;;  %15372 = vmatprep.subr.bf16.mxu1 %v16143_v43 }
 0x2c8   : > { %v3793_v22 = vmax.f32 %v2198_v16, %v13885_v2  ;;  %v3960_v27 = vmax.f32 %v3780_v54, %v3792_v23  ;;  %v2165_v57 = vcombine.high %v2163_v58, %v2163_v58  ;;  %v13878_v59 = vrot.slane %v2163_v58, 9  ;;  %v16065_v16 = vld [vmem:[%s22153_s3 + $0x470] sm:$0xff]   ;;  %v16140_v23 = vld [vmem:[#allocation2 + $0x18] ss:$100 sps:$4 sm:$0xff]  }
 0x2c9   : > { %v3795_v36 = vmax.f32 %v2199_v18, %v13887_v29  ;;  %v3962_v15 = vmax.f32 %v3782_v26, %v3794_v3  ;;  %v13877_v8 = vrot.slane %v2164_v41, 9  ;;  %v3784_v0 = vmax.f32 %v2156_v19, %v13876_v4  ;;  %v16061_v18 = vld [vmem:[#allocation2 + $0xfc] ss:$100 sps:$4 sm:$0xff]   ;;  %v16068_v3 = vld [vmem:[%s22153_s3 + $0x430] sm:$0xff]  }
 0x2ca   : > { %v3961_v32 = vmax.f32 %v3781_v49, %v3793_v22  ;;  %v15161_v62 = vpack.c.bf16 %v3960_v27, %v3960_v27  ;;  %v13879_v6 = vrot.slane %v2165_v57, 9  ;;  %v3786_v43 = vmax.f32 %v2163_v58, %v13878_v59  ;;  %15373 = vmatpush3.bf16.msra.mxu1 %v16145_v11  ;;  %v16152_v49 = vld [vmem:[%s22153_s3 + $0x2b8] sm:$0xff]   ;;  %8513 = vmatmul.mubr.bf16.vlgmr.msra.gmra.mxu0 %v16048_v33 }
 0x2cb   : > { %v3963_v54 = vmax.f32 %v3783_v28, %v3795_v36  ;;  %v15185_v25 = vpack.c.bf16 %v3962_v15, %v3962_v15  ;;  %v3785_v63 = vmax.f32 %v2164_v41, %v13877_v8  ;;  %v3952_v26 = vmax.f32 %v18893_v56, %v3784_v0  ;;  %15438 = vmatprep.subr.bf16.mxu1 %v16150_v31  ;;  %v16156_v28 = vld [vmem:[%s22153_s3 + $0x2f0] sm:$0xff]   ;;  %v16154_v41 = vld [vmem:[#allocation2 + $0xe4] ss:$100 sps:$4 sm:$0xff]  }
 0x2cc   : > { %v19154_v51 = vunpack.c.l.b16 %v15161_v62  ;;  %v15173_v19 = vpack.c.bf16 %v3961_v32, %v3961_v32  ;;  %v3787_v12 = vmax.f32 %v2165_v57, %v13879_v6  ;;  %v3954_v2 = vmax.f32 %v18903_v35, %v3786_v43  ;;  %8520 = vmatprep.mubr.bf16.mxu0 %v16061_v18  ;;  %15559 = vmatpush3.bf16.msra.mxu0 %v16063_v24  ;;  %v16158_v15 = vld [vmem:[%s22153_s3 + $0x2b0] sm:$0xff]   ;;  %v16163_v62 = vld [vmem:[%s22153_s3 + $0x2e8] sm:$0xff]   ;;  %v16072_v18 = vld [vmem:[#allocation2 + $0xf8] ss:$100 sps:$4 sm:$0xff]  }
 0x2cd   : > { %v19160_v58 = vunpack.c.l.b16 %v15185_v25  ;;  %v15197_v56 = vpack.c.bf16 %v3963_v54, %v3963_v54  ;;  %v3953_v11 = vmax.f32 %v18898_v46, %v3785_v63  ;;  %v15128_v29 = vpack.c.bf16 %v3952_v26, %v3952_v26  ;;  %15560 = vmatprep.subr.bf16.mxu0 %v16065_v16  ;;  %v16073_v46 = vld [vmem:[%s22153_s3 + $0x468] sm:$0xff]   ;;  %8318 = vmatmul.mubr.bf16.vlgmr.msra.gmra.mxu1 %v16140_v23 }
 0x2ce   : > { %v4967_v35 = vrot.slane %v19154_v51, 1  ;;  %v19167_v4 = vunpack.c.l.b16 %v15173_v19  ;;  %v5245_v31 = vrot.slane %v19154_v51, 2  ;;  %v5523_v22 = vrot.slane %v19154_v51, 3  ;;  %15439 = vmatpush3.bf16.msra.mxu1 %v16152_v49  ;;  %8325 = vmatprep.mubr.bf16.mxu1 %v16154_v41  ;;  %v16077_v54 = vld [vmem:[%s22153_s3 + $0x428] sm:$0xff]   ;;  %v16165_v41 = vld [vmem:[#allocation2 + $0xe0] ss:$100 sps:$4 sm:$0xff]  }
 0x2cf   : > { %v5527_v27 = vrot.slane %v19160_v58, 1  ;;  %v5794_v57 = vunpack.c.l.b16 %v15197_v56  ;;  %v5801_v59 = vrot.slane %v19154_v51, 4  ;;  %v5805_v36 = vrot.slane %v19160_v58, 2  ;;  %15440 = vmatprep.subr.bf16.mxu1 %v16156_v28  ;;  %v16075_v23 = vld [vmem:[#allocation2 + $0x1c4] ss:$100 sps:$4 sm:$0xff]   ;;  %v16094_v58 = vld [vmem:[%s22153_s3 + $0x410] sm:$0xff]  }
 0x2d0   : > { %v5247_v8 = vrot.slane %v19167_v4, 1  ;;  %v5525_v0 = vrot.slane %v19167_v4, 2  ;;  %v5803_v24 = vrot.slane %v19167_v4, 3  ;;  %v3955_v32 = vmax.f32 %v18905_v44, %v3787_v12  ;;  %15561 = vmatpush3.bf16.msra.mxu0 %v16068_v3  ;;  %v16166_v28 = vld [vmem:[%s22153_s3 + $0x2a8] sm:$0xff]   ;;  %v16179_v4 = vld [vmem:[%s22153_s3 + $0x298] sm:$0xff]  }
 0x2d1   : > { %v5802_v6 = vsel %vm4398_vm4, %v5801_v59, %v19129_v5  ;;  %v5807_v43 = vrot.slane %v5794_v57, 1  ;;  %v15129_v33 = vpack.c.bf16 %v3953_v11, %v3953_v11  ;;  %v15130_v16 = vpack.c.bf16 %v3954_v2, %v3954_v2  ;;  %15562 = vmatprep.subr.bf16.mxu0 %v16073_v46  ;;  %v16079_v5 = vld [vmem:[%s22153_s3 + $0x460] sm:$0xff]   ;;  %v16178_v51 = vld [vmem:[#allocation2 + $0x1a8] ss:$100 sps:$4 sm:$0xff]  }
 0x2d2   : > { %v5804_v25 = vsel %vm4401_vm5, %v5803_v24, %v5802_v6  ;;  %v15131_v63 = vpack.c.bf16 %v3955_v32, %v3955_v32  ;;  %v4611_v44 = vunpack.c.l.b16 %v15128_v29  ;;  %v2234_v26 = vcombine.high %v19132_v34, %v19132_v34  ;;  %15441 = vmatpush3.bf16.msra.mxu1 %v16158_v15  ;;  %8521 = vmatmul.mubr.bf16.gmra.mxu0 %v16072_v18  ;;  %v16168_v6 = vld [vmem:[#allocation2 + $0x1ac] ss:$100 sps:$4 sm:$0xff]  }
 0x2d3   : > { %v5806_v49 = vsel %vm4404_vm6, %v5805_v36, %v5804_v25  ;;  %v4612_v19 = vunpack.c.l.b16 %v15129_v33  ;;  %v4613_v12 = vunpack.c.l.b16 %v15130_v16  ;;  %v19201_v2 = vrot.slane %v19132_v34, %v17370_v48  ;;  %15442 = vmatprep.subr.bf16.mxu1 %v16163_v62  ;;  %8528 = vmatprep.mubr.bf16.mxu0 %v16075_v23  ;;  %v16082_v36 = vld [vmem:[%s22153_s3 + $0x420] sm:$0xff]   ;;  %v16088_v62 = vld [vmem:[%s22153_s3 + $0x458] sm:$0xff]  }
 0x2d4   : > { %v5808_v56 = vsel %vm4407_vm7, %v5807_v43, %v5806_v49  ;;  %v4614_v11 = vunpack.c.l.b16 %v15131_v63  ;;  %v19208_v29 = vrot.slane %v2234_v26, %v17370_v48  ;;  %v19211_v3 = vmax.f32 %v19136_v38, 0.0  ;;  %15563 = vmatpush3.bf16.msra.mxu0 %v16077_v54  ;;  %v19231_v54 = vpop.f32.mrf.mxu0  ;;  %v16170_v25 = vld [vmem:[%s22153_s3 + $0x2e0] sm:$0xff]  }
 0x2d5   : > { %v5809_v34 = vpack.c.b16 %v5808_v56, %v5808_v56  ;;  %v4619_v46 = vrot.slane %v4612_v19, 7  ;;  %v4621_v57 = vrot.slane %v4613_v12, 6  ;;  %v4955_v59 = vrot.slane %v4613_v12, 7  ;;  %15564 = vmatprep.subr.bf16.mxu0 %v16079_v5  ;;  %8326 = vmatmul.mubr.bf16.gmra.mxu1 %v16165_v41  ;;  %v16087_v23 = vld [vmem:[#allocation2 + $0x1c0] ss:$100 sps:$4 sm:$0xff]   ;;  %v16176_v56 = vld [vmem:[%s22153_s3 + $0x2d8] sm:$0xff]  }
 0x2d6   : > { %v4623_v15 = vrot.slane %v4614_v11, 5  ;;  %v4957_v24 = vrot.slane %v4614_v11, 6  ;;  %v5235_v32 = vrot.slane %v4614_v11, 7  ;;  %v5516_v38 = vsel %vm4389_vm1, %v5515_v55, %v4614_v11  ;;  %15443 = vmatpush3.bf16.msra.mxu1 %v16166_v28  ;;  %8333 = vmatprep.mubr.bf16.mxu1 %v16168_v6  ;;  %v992_v28 = vpop.f32.mrf.mxu0 }
 0x2d7   : > { %5818 = vst [vmem:[#allocation2 + $0x2f4] sm:$0xf] %v5809_v34  ;;  %5845 = vst [vmem:[#allocation2 + $0x2a4] sm:$0xf] %v5809_v34  ;;  %v4620_v43 = vsel %vm4389_vm1, %v4619_v46, %v4611_v44  ;;  %v4956_v33 = vsel %vm4389_vm1, %v4955_v59, %v4612_v19  ;;  %v5518_v16 = vsel %vm4392_vm2, %v5517_v30, %v5516_v38  ;;  %15444 = vmatprep.subr.bf16.mxu1 %v16170_v25  ;;  %v16180_v59 = vld [vmem:[#allocation2 + $0x274] ss:$100 sps:$4 sm:$0xff]  }
 0x2d8   : > { %5872 = vst [vmem:[#allocation2 + $0x254] sm:$0xf] %v5809_v34  ;;  %v19229_v55 = vcombine.high %v19201_v2, %v19201_v2  ;;  %v4622_v63 = vsel %vm4392_vm2, %v4621_v57, %v4620_v43  ;;  %v4958_v44 = vsel %vm4392_vm2, %v4957_v24, %v4956_v33  ;;  %v5236_v26 = vsel %vm4389_vm1, %v5235_v32, %v4613_v12  ;;  %v15844_v41 = vpop.f32.mrf.mxu0  ;;  %v16108_v43 = vld [vmem:[%s22153_s3 + $0x440] sm:$0xff]  }
 0x2d9   : > { %v5520_v30 = vsel %vm4395_vm3, %v5519_v50, %v5518_v16  ;;  %v4624_v18 = vsel %vm4395_vm3, %v4623_v15, %v4622_v63  ;;  %v4960_v5 = vsel %vm4395_vm3, %v4959_v21, %v4958_v44  ;;  %v5238_v49 = vsel %vm4392_vm2, %v5237_v37, %v5236_v26  ;;  %15565 = vmatpush3.bf16.msra.mxu0 %v16082_v36  ;;  %v16090_v50 = vld [vmem:[%s22153_s3 + $0x418] sm:$0xff]   ;;  %v16182_v36 = vld [vmem:[%s22153_s3 + $0x2d0] sm:$0xff]  }
 0x2da   : > { %v5522_v19 = vsel %vm4398_vm4, %v5521_v20, %v5520_v30  ;;  %v4626_v12 = vsel %vm4398_vm4, %v4625_v61, %v4624_v18  ;;  %v4962_v21 = vsel %vm4398_vm4, %v4961_v39, %v4960_v5  ;;  %v5240_v37 = vsel %vm4395_vm3, %v5239_v17, %v5238_v49  ;;  %15566 = vmatprep.subr.bf16.mxu0 %v16088_v62  ;;  %v1005_v63 = vpop.f32.mrf.mxu0  ;;  %v16184_v44 = vld [vmem:[%s22153_s3 + $0x290] sm:$0xff]  }
 0x2db   : > { %v5524_v20 = vsel %vm4401_vm5, %v5523_v22, %v5522_v19  ;;  %v4628_v61 = vsel %vm4401_vm5, %v4627_v14, %v4626_v12  ;;  %v4964_v39 = vsel %vm4401_vm5, %v4963_v40, %v4962_v21  ;;  %v5242_v17 = vsel %vm4398_vm4, %v5241_v47, %v5240_v37  ;;  %8529 = vmatmul.mubr.bf16.gmra.mxu0 %v16087_v23  ;;  %v16194_v21 = vld [vmem:[#allocation2 + $0x2c] ss:$100 sps:$4 sm:$0xff]  }
 0x2dc   : > { %v5526_v22 = vsel %vm4404_vm6, %v5525_v0, %v5524_v20  ;;  %v4630_v14 = vsel %vm4404_vm6, %v4629_v10, %v4628_v61  ;;  %v4966_v40 = vsel %vm4404_vm6, %v4965_v1, %v4964_v39  ;;  %v5244_v47 = vsel %vm4401_vm5, %v5243_v13, %v5242_v17  ;;  %15445 = vmatpush3.bf16.msra.mxu1 %v16172_v60  ;;  %v16115_v61 = vld [vmem:[%s22153_s3 + $0x578] sm:$0xff]   ;;  %v16190_v39 = vld [vmem:[#allocation2 + $0x270] ss:$100 sps:$4 sm:$0xff]  }
 0x2dd   : > { %v5528_v0 = vsel %vm4407_vm7, %v5527_v27, %v5526_v22  ;;  %v4632_v9 = vsel %vm4407_vm7, %v4631_v7, %v4630_v14  ;;  %v4968_v10 = vsel %vm4407_vm7, %v4967_v35, %v4966_v40  ;;  %v5246_v1 = vsel %vm4404_vm6, %v5245_v31, %v5244_v47  ;;  %15567 = vmatpush3.bf16.msra.mxu0 %v16090_v50  ;;  %v16101_v7 = vld [vmem:[%s22153_s3 + $0x448] sm:$0xff]   ;;  %v16195_v40 = vld [vmem:[%s22153_s3 + $0x2c0] sm:$0xff]  }
 0x2de   : > { %v5529_v13 = vpack.c.b16 %v5528_v0, %v5528_v0  ;;  %v4633_v27 = vpack.c.b16 %v4632_v9, %v4632_v9  ;;  %v4969_v11 = vpack.c.b16 %v4968_v10, %v4968_v10  ;;  %v5248_v53 = vsel %vm4407_vm7, %v5247_v8, %v5246_v1  ;;  %15568 = vmatprep.subr.bf16.mxu0 %v16092_v52  ;;  %v16191_v14 = vld [vmem:[%s22153_s3 + $0x288] sm:$0xff]  }
 0x2df   : > { %v5249_v35 = vpack.c.b16 %v5248_v53, %v5248_v53  ;;  %v13896_v31 = vrot.slane %v19201_v2, 9  ;;  %v13897_v8 = vrot.slane %v19229_v55, 9  ;;  %v2200_v34 = vcombine.high %v19211_v3, %v19211_v3  ;;  %15446 = vmatprep.subr.bf16.mxu1 %v16176_v56  ;;  %8334 = vmatmul.mubr.bf16.gmra.mxu1 %v16178_v51 }
 0x2e0   : > { %5538 = vst [vmem:[#allocation2 + $0x2f0] sm:$0xf] %v5529_v13  ;;  %5565 = vst [vmem:[#allocation2 + $0x2a0] sm:$0xf] %v5529_v13  ;;  %v2207_v46 = vrot.slane %v19211_v3, %v17370_v48  ;;  %v1001_v57 = vadd.f32 %v19071_v42, %v19231_v54  ;;  %v19334_v15 = vcombine.high %v19208_v29, %v19208_v29  ;;  %v16103_v3 = vld [vmem:[%s22153_s3 + $0x408] sm:$0xff]   ;;  %v13898_v32 = vrot.slane %v19208_v29, 9 }
 0x2e1   : > { %5592 = vst [vmem:[#allocation2 + $0x250] sm:$0xf] %v5529_v13  ;;  %4642 = vst [vmem:[#allocation2 + $0x2e4] sm:$0xf] %v4633_v27  ;;  %v993_v24 = vadd.f32 %v19071_v42, %v992_v28  ;;  %15569 = vmatpush3.bf16.msra.mxu0 %v16094_v58  ;;  %v2214_v38 = vrot.slane %v2200_v34, %v17370_v48  ;;  %8341 = vmatprep.mubr.bf16.mxu1 %v16180_v59 }
 0x2e2   : > { %4697 = vst [vmem:[#allocation2 + $0x294] sm:$0xf] %v4633_v27  ;;  %4752 = vst [vmem:[#allocation2 + $0x244] sm:$0xf] %v4633_v27  ;;  %v2215_v62 = vcombine.high %v2207_v46, %v2207_v46  ;;  %v13888_v6 = vrot.slane %v2207_v46, 9  ;;  %15570 = vmatprep.subr.bf16.mxu0 %v16101_v7  ;;  %v19346_v33 = vmax.f32 %v19201_v2, %v13896_v31  ;;  %v1099_v16 = vmax.f32 %v1001_v57, 0.0 }
 0x2e3   : > { %4978 = vst [vmem:[#allocation2 + $0x2e8] sm:$0xf] %v4969_v11  ;;  %5005 = vst [vmem:[#allocation2 + $0x298] sm:$0xf] %v4969_v11  ;;  %v1097_v54 = vmax.f32 %v993_v24, 0.0  ;;  %v1014_v25 = vadd.f32 %v19071_v42, %v15844_v41  ;;  %15447 = vmatpush3.bf16.msra.mxu1 %v16179_v4  ;;  %v19353_v26 = vmax.f32 %v19229_v55, %v13897_v8  ;;  %v13890_v5 = vrot.slane %v2214_v38, 9 }
 0x2e4   : > { %5032 = vst [vmem:[#allocation2 + $0x248] sm:$0xf] %v4969_v11  ;;  %5258 = vst [vmem:[#allocation2 + $0x2ec] sm:$0xf] %v5249_v35  ;;  %v2216_v30 = vcombine.high %v2214_v38, %v2214_v38  ;;  %v13889_v18 = vrot.slane %v2215_v62, 9  ;;  %15448 = vmatprep.subr.bf16.mxu1 %v16182_v36  ;;  %v16188_v2 = vld [vmem:[%s22153_s3 + $0x2c8] sm:$0xff]   ;;  %v2251_v49 = vcombine.high %v1099_v16, %v1099_v16 }
 0x2e5   : > { %5285 = vst [vmem:[#allocation2 + $0x29c] sm:$0xf] %v5249_v35  ;;  %5312 = vst [vmem:[#allocation2 + $0x24c] sm:$0xf] %v5249_v35  ;;  %v2258_v19 = vrot.slane %v1099_v16, %v17370_v48  ;;  %v2217_v50 = vcombine.high %v1097_v54, %v1097_v54  ;;  %v19360_v12 = vrot.slane %v1097_v54, %v17370_v48  ;;  %15571 = vmatpush3.bf16.msra.mxu0 %v16103_v3  ;;  %v16111_v55 = vld [vmem:[%s22153_s3 + $0x400] sm:$0xff]   ;;  %v16198_v3 = vld [vmem:[%s22153_s3 + $0x3f8] sm:$0xff]  }
 0x2e6   : > { %v13891_v37 = vrot.slane %v2216_v30, 9  ;;  %v3796_v20 = vmax.f32 %v2207_v46, %v13888_v6  ;;  %v1102_v23 = vmax.f32 %v1014_v25, 0.0  ;;  %v19366_v52 = vadd.f32 %v19071_v42, %v1005_v63  ;;  %15572 = vmatprep.subr.bf16.mxu0 %v16108_v43  ;;  %v16106_v31 = vld [vmem:[#allocation2 + $0x44] ss:$100 sps:$4 sm:$0xff]  }
 0x2e7   : > { %v2265_v17 = vrot.slane %v2251_v49, %v17370_v48  ;;  %v2266_v22 = vcombine.high %v2258_v19, %v2258_v19  ;;  %v13900_v28 = vrot.slane %v2258_v19, 9  ;;  %v2231_v60 = vrot.slane %v2217_v50, %v17370_v48  ;;  %15449 = vmatpush3.bf16.msra.mxu1 %v16184_v44  ;;  %v16097_v10 = vld [vmem:[#allocation2 + $0x28c] ss:$100 sps:$4 sm:$0xff]   ;;  %v16197_v46 = vld [vmem:[%s22153_s3 + $0x280] sm:$0xff]  }
 0x2e8   : > { %v13899_v47 = vrot.slane %v19334_v15, 9  ;;  %v3797_v0 = vmax.f32 %v2215_v62, %v13889_v18  ;;  %v3798_v56 = vmax.f32 %v2214_v38, %v13890_v5  ;;  %v2232_v9 = vcombine.high %v19360_v12, %v19360_v12  ;;  %15450 = vmatprep.subr.bf16.mxu1 %v16188_v2  ;;  %8342 = vmatmul.mubr.bf16.gmra.mxu1 %v16190_v39  ;;  %v16192_v50 = vld [vmem:[#allocation2 + $0x28] ss:$100 sps:$4 sm:$0xff]  }
 0x2e9   : > { %v2267_v13 = vcombine.high %v2265_v17, %v2265_v17  ;;  %v13901_v58 = vrot.slane %v2266_v22, 9  ;;  %v13902_v27 = vrot.slane %v2265_v17, 9  ;;  %v3808_v11 = vmax.f32 %v2258_v19, %v13900_v28  ;;  %15573 = vmatpush3.bf16.msra.mxu0 %v16111_v55  ;;  %8447 = vmatprep.mubr.bf16.mxu1 %v16194_v21  ;;  %v16119_v19 = vld [vmem:[%s22153_s3 + $0x538] sm:$0xff]  }
 0x2ea   : > { %v3799_v53 = vmax.f32 %v2216_v30, %v13891_v37  ;;  %v2233_v7 = vcombine.high %v2231_v60, %v2231_v60  ;;  %v13892_v51 = vrot.slane %v19360_v12, 9  ;;  %v2302_v35 = vcombine.high %v1102_v23, %v1102_v23  ;;  %8536 = vmatprep.mubr.bf16.mxu0 %v16097_v10  ;;  %15638 = vmatprep.subr.bf16.mxu0 %v16115_v61  ;;  %v16121_v61 = vld [vmem:[%s22153_s3 + $0x570] sm:$0xff]  }
 0x2eb   : > { %v16100_v1 = vld [vmem:[#allocation2 + $0x288] ss:$100 sps:$4 sm:$0xff]   ;;  %v13903_v41 = vrot.slane %v2267_v13, 9  ;;  %v3809_v4 = vmax.f32 %v2266_v22, %v13901_v58  ;;  %v3810_v8 = vmax.f32 %v2265_v17, %v13902_v27  ;;  %v3964_v34 = vmax.f32 %v3796_v20, %v3808_v11  ;;  %15451 = vmatpush3.bf16.msra.mxu1 %v16191_v14  ;;  %v15845_v20 = vpop.f32.mrf.mxu0  ;;  %v16124_v27 = vld [vmem:[%s22153_s3 + $0x530] sm:$0xff]  }
 0x2ec   : > { %8537 = vmatmul.mubr.bf16.gmra.mxu0 %v16100_v1  ;;  %v13893_v57 = vrot.slane %v2232_v9, 9  ;;  %v13894_v59 = vrot.slane %v2231_v60, 9  ;;  %v13895_v36 = vrot.slane %v2233_v7, 9  ;;  %v19387_v24 = vrot.slane %v1102_v23, %v17370_v48  ;;  %15452 = vmatprep.subr.bf16.mxu1 %v16195_v40  ;;  %v16104_v23 = vld [vmem:[#allocation2 + $0x40] ss:$100 sps:$4 sm:$0xff]   ;;  %v16210_v11 = vld [vmem:[%s22153_s3 + $0x3e8] sm:$0xff]  }
 0x2ed   : > { %8642 = vmatprep.mubr.bf16.mxu0 %v16106_v31  ;;  %v3811_v38 = vmax.f32 %v2267_v13, %v13903_v41  ;;  %v3965_v62 = vmax.f32 %v3797_v0, %v3809_v4  ;;  %v3966_v6 = vmax.f32 %v3798_v56, %v3810_v8  ;;  %v15136_v43 = vpack.c.bf16 %v3964_v34, %v3964_v34  ;;  %v16201_v56 = vld [vmem:[#allocation2 + $0xf4] ss:$100 sps:$4 sm:$0xff]   ;;  %v16129_v31 = vld [vmem:[%s22153_s3 + $0x568] sm:$0xff]  }
 0x2ee   : > { %v19395_v16 = vmax.f32 %v19208_v29, %v13898_v32  ;;  %v19398_v54 = vmax.f32 %v19334_v15, %v13899_v47  ;;  %v19401_v25 = vrot.slane %v2302_v35, %v17370_v48  ;;  %v19405_v63 = vcombine.high %v19387_v24, %v19387_v24  ;;  %v16200_v29 = vld [vmem:[%s22153_s3 + $0x3b8] sm:$0xff]  }
 0x2ef   : > { %v3967_v44 = vmax.f32 %v3799_v53, %v3811_v38  ;;  %v15137_v30 = vpack.c.bf16 %v3965_v62, %v3965_v62  ;;  %v15138_v18 = vpack.c.bf16 %v3966_v6, %v3966_v6  ;;  %v19408_v5 = vmax.f32 %v19360_v12, %v13892_v51  ;;  %15453 = vmatpush3.bf16.msra.mxu1 %v16197_v46  ;;  %v1008_v46 = vpop.f32.mrf.mxu0  ;;  %v16213_v38 = vld [vmem:[%s22153_s3 + $0x3a8] sm:$0xff]  }
 0x2f0   : > { %v4667_v15 = vunpack.c.l.b16 %v15136_v43  ;;  %v19413_v32 = vmax.f32 %v2232_v9, %v13893_v57  ;;  %v19415_v2 = vmax.f32 %v2231_v60, %v13894_v59  ;;  %v19417_v49 = vmax.f32 %v2233_v7, %v13895_v36  ;;  %15518 = vmatprep.subr.bf16.mxu1 %v16198_v3  ;;  %v16117_v60 = vld [vmem:[#allocation2 + $0x10c] ss:$100 sps:$4 sm:$0xff]  }
 0x2f1   : > { %v15139_v12 = vpack.c.bf16 %v3967_v44, %v3967_v44  ;;  %v4668_v55 = vunpack.c.l.b16 %v15137_v30  ;;  %v19422_v21 = vunpack.c.l.b16 %v15138_v18  ;;  %v1100_v37 = vmax.f32 %v19366_v52, 0.0  ;;  %v16206_v52 = vld [vmem:[%s22153_s3 + $0x3f0] sm:$0xff]   ;;  %v16134_v30 = vld [vmem:[%s22153_s3 + $0x528] sm:$0xff]  }
 0x2f2   : > { %v19430_v39 = vcombine.high %v19401_v25, %v19401_v25  ;;  %v13912_v17 = vrot.slane %v19387_v24, 9  ;;  %v13913_v22 = vrot.slane %v19405_v63, 9  ;;  %v1017_v28 = vadd.f32 %v19071_v42, %v15845_v20  ;;  %8448 = vmatmul.mubr.bf16.vlgmr.msra.gmra.mxu1 %v16192_v50  ;;  %v16208_v9 = vld [vmem:[%s22153_s3 + $0x3b0] sm:$0xff]  }
 0x2f3   : > { %v19438_v14 = vunpack.c.l.b16 %v15139_v12  ;;  %v4675_v40 = vrot.slane %v4668_v55, 7  ;;  %v4677_v47 = vrot.slane %v19422_v21, 6  ;;  %v4983_v0 = vrot.slane %v19422_v21, 7  ;;  %15519 = vmatpush3.bf16.msra.mxu1 %v16200_v29  ;;  %8455 = vmatprep.mubr.bf16.mxu1 %v16201_v56  ;;  %v16212_v18 = vld [vmem:[#allocation2 + $0xf0] ss:$100 sps:$4 sm:$0xff]   ;;  %v15848_v12 = vpop.f32.mrf.mxu0 }
 0x2f4   : > { %8643 = vmatmul.mubr.bf16.vlgmr.msra.gmra.mxu0 %v16104_v23  ;;  %v13914_v10 = vrot.slane %v19401_v25, 9  ;;  %v2268_v1 = vcombine.high %v1100_v37, %v1100_v37  ;;  %v2275_v13 = vrot.slane %v1100_v37, %v17370_v48  ;;  %v1103_v58 = vmax.f32 %v1017_v28, 0.0  ;;  %15520 = vmatprep.subr.bf16.mxu1 %v16206_v52  ;;  %v16136_v37 = vld [vmem:[%s22153_s3 + $0x560] sm:$0xff]  }
 0x2f5   : > { %8650 = vmatprep.mubr.bf16.mxu0 %v16117_v60  ;;  %15639 = vmatpush3.bf16.msra.mxu0 %v16119_v19  ;;  %v4676_v53 = vsel %vm4389_vm1, %v4675_v40, %v4667_v15  ;;  %v4679_v7 = vrot.slane %v19438_v14, 5  ;;  %v4984_v51 = vsel %vm4389_vm1, %v4983_v0, %v4668_v55  ;;  %v4985_v35 = vrot.slane %v19438_v14, 6  ;;  %v16128_v55 = vld [vmem:[#allocation2 + $0x108] ss:$100 sps:$4 sm:$0xff]   ;;  %v16133_v60 = vld [vmem:[#allocation2 + $0x1d4] ss:$100 sps:$4 sm:$0xff]  }
 0x2f6   : > { %15640 = vmatprep.subr.bf16.mxu0 %v16121_v61  ;;  %v4678_v41 = vsel %vm4392_vm2, %v4677_v47, %v4676_v53  ;;  %v13915_v4 = vrot.slane %v19430_v39, 9  ;;  %v2282_v8 = vrot.slane %v2268_v1, %v17370_v48  ;;  %v2283_v34 = vcombine.high %v2275_v13, %v2275_v13  ;;  %v16216_v52 = vld [vmem:[%s22153_s3 + $0x3e0] sm:$0xff]  }
 0x2f7   : > { %v19464_v57 = vsel %vm4395_vm3, %v4679_v7, %v4678_v41  ;;  %v5263_v59 = vrot.slane %v19438_v14, 7  ;;  %v13904_v36 = vrot.slane %v2275_v13, 9  ;;  %v2319_v3 = vcombine.high %v1103_v58, %v1103_v58  ;;  %15521 = vmatpush3.bf16.msra.mxu1 %v16208_v9  ;;  %v16214_v9 = vld [vmem:[#allocation2 + $0x1bc] ss:$100 sps:$4 sm:$0xff]  }
 0x2f8   : > { %v19471_v62 = vsel %vm4392_vm2, %v4985_v35, %v4984_v51  ;;  %v2284_v6 = vcombine.high %v2282_v8, %v2282_v8  ;;  %v13905_v43 = vrot.slane %v2283_v34, 9  ;;  %v13906_v44 = vrot.slane %v2282_v8, 9  ;;  %15522 = vmatprep.subr.bf16.mxu1 %v16210_v11  ;;  %v16218_v1 = vld [vmem:[%s22153_s3 + $0x3a0] sm:$0xff]   ;;  %v16220_v11 = vld [vmem:[%s22153_s3 + $0x3d8] sm:$0xff]  }
 0x2f9   : > { %15641 = vmatpush3.bf16.msra.mxu0 %v16124_v27  ;;  %v3812_v29 = vmax.f32 %v2275_v13, %v13904_v36  ;;  %v2326_v15 = vrot.slane %v1103_v58, %v17370_v48  ;;  %v2333_v19 = vrot.slane %v2319_v3, %v17370_v48  ;;  %v1009_v50 = vadd.f32 %v19071_v42, %v1008_v46  ;;  %v16222_v36 = vld [vmem:[%s22153_s3 + $0x398] sm:$0xff]  }
 0x2fa   : > { %15642 = vmatprep.subr.bf16.mxu0 %v16129_v31  ;;  %v13907_v20 = vrot.slane %v2284_v6, 9  ;;  %v3813_v23 = vmax.f32 %v2283_v34, %v13905_v43  ;;  %v3814_v61 = vmax.f32 %v2282_v8, %v13906_v44  ;;  %v1030_v28 = vadd.f32 %v19071_v42, %v15848_v12  ;;  %8456 = vmatmul.mubr.bf16.gmra.mxu1 %v16212_v18  ;;  %v16131_v43 = vld [vmem:[#allocation2 + $0x1d0] ss:$100 sps:$4 sm:$0xff]   ;;  %v16149_v44 = vld [vmem:[%s22153_s3 + $0x518] sm:$0xff]  }
 0x2fb   : > { %v3968_v40 = vmax.f32 %v19408_v5, %v3812_v29  ;;  %v2334_v47 = vcombine.high %v2326_v15, %v2326_v15  ;;  %v19487_v0 = vcombine.high %v2333_v19, %v2333_v19  ;;  %v13916_v56 = vrot.slane %v2326_v15, 9  ;;  %15523 = vmatpush3.bf16.msra.mxu1 %v16213_v38  ;;  %v16139_v5 = vld [vmem:[%s22153_s3 + $0x520] sm:$0xff]   ;;  %8463 = vmatprep.mubr.bf16.mxu1 %v16214_v9  ;;  %v16225_v12 = vld [vmem:[%s22153_s3 + $0x3d0] sm:$0xff]  }
 0x2fc   : > { %8651 = vmatmul.mubr.bf16.gmra.mxu0 %v16128_v55  ;;  %v3815_v42 = vmax.f32 %v2284_v6, %v13907_v20  ;;  %v3969_v13 = vmax.f32 %v19413_v32, %v3813_v23  ;;  %v3970_v58 = vmax.f32 %v19415_v2, %v3814_v61  ;;  %v13918_v27 = vrot.slane %v2333_v19, 9  ;;  %v16144_v2 = vld [vmem:[%s22153_s3 + $0x558] sm:$0xff]   ;;  %15524 = vmatprep.subr.bf16.mxu1 %v16216_v52  ;;  %v16223_v61 = vld [vmem:[#allocation2 + $0x284] ss:$100 sps:$4 sm:$0xff]  }
 0x2fd   : > { %8658 = vmatprep.mubr.bf16.mxu0 %v16133_v60  ;;  %15643 = vmatpush3.bf16.msra.mxu0 %v16134_v30  ;;  %v5264_v53 = vsel %vm4389_vm1, %v5263_v59, %v19422_v21  ;;  %v15140_v7 = vpack.c.bf16 %v3968_v40, %v3968_v40  ;;  %v13917_v51 = vrot.slane %v2334_v47, 9  ;;  %v13919_v32 = vrot.slane %v19487_v0, 9  ;;  %v16221_v30 = vld [vmem:[#allocation2 + $0x1b8] ss:$100 sps:$4 sm:$0xff]  }
 0x2fe   : > { %15644 = vmatprep.subr.bf16.mxu0 %v16136_v37  ;;  %v3971_v35 = vmax.f32 %v19417_v49, %v3815_v42  ;;  %v15141_v31 = vpack.c.bf16 %v3969_v13, %v3969_v13  ;;  %v15142_v41 = vpack.c.bf16 %v3970_v58, %v3970_v58  ;;  %v19507_v8 = vmax.f32 %v2326_v15, %v13916_v56  ;;  %v16227_v42 = vld [vmem:[%s22153_s3 + $0x3c8] sm:$0xff]  }
 0x2ff   : > { %v19509_v34 = vunpack.c.l.b16 %v15140_v7  ;;  %v19511_v21 = vmax.f32 %v2334_v47, %v13917_v51  ;;  %v19513_v46 = vmax.f32 %v2333_v19, %v13918_v27  ;;  %v19515_v59 = vmax.f32 %v1009_v50, 0.0  ;;  %15525 = vmatpush3.bf16.msra.mxu1 %v16218_v1  ;;  %v16151_v50 = vld [vmem:[%s22153_s3 + $0x550] sm:$0xff]  }
 0x300   : > { %v15143_v3 = vpack.c.bf16 %v3971_v35, %v3971_v35  ;;  %v19520_v49 = vunpack.c.l.b16 %v15141_v31  ;;  %v19522_v38 = vunpack.c.l.b16 %v15142_v41  ;;  %v19524_v6 = vmax.f32 %v1030_v28, 0.0  ;;  %15526 = vmatprep.subr.bf16.mxu1 %v16220_v11  ;;  %v16226_v47 = vld [vmem:[%s22153_s3 + $0x390] sm:$0xff]   ;;  %v16157_v11 = vld [vmem:[%s22153_s3 + $0x548] sm:$0xff]  }
 0x301   : > { %15645 = vmatpush3.bf16.msra.mxu0 %v16139_v5  ;;  %v4681_v18 = vrot.slane %v19509_v34, 4  ;;  %v4987_v29 = vrot.slane %v19509_v34, 5  ;;  %v5265_v15 = vrot.slane %v19509_v34, 6  ;;  %v5543_v19 = vrot.slane %v19509_v34, 7 }
 0x302   : > { %15646 = vmatprep.subr.bf16.mxu0 %v16144_v2  ;;  %v19539_v55 = vunpack.c.l.b16 %v15143_v3  ;;  %v4683_v37 = vrot.slane %v19520_v49, 3  ;;  %v4685_v20 = vrot.slane %v19522_v38, 2  ;;  %v4989_v23 = vrot.slane %v19520_v49, 4  ;;  %8464 = vmatmul.mubr.bf16.gmra.mxu1 %v16221_v30  ;;  %v16229_v3 = vld [vmem:[%s22153_s3 + $0x388] sm:$0xff]  }
 0x303   : > { %v4682_v28 = vsel %vm4398_vm4, %v4681_v18, %v19464_v57  ;;  %v4988_v60 = vsel %vm4395_vm3, %v4987_v29, %v19471_v62  ;;  %v4991_v52 = vrot.slane %v19522_v38, 3  ;;  %v5266_v40 = vsel %vm4392_vm2, %v5265_v15, %v5264_v53  ;;  %15527 = vmatpush3.bf16.msra.mxu1 %v16222_v36  ;;  %v16153_v62 = vld [vmem:[%s22153_s3 + $0x510] sm:$0xff]   ;;  %8471 = vmatprep.mubr.bf16.mxu1 %v16223_v61  ;;  %v16159_v18 = vld [vmem:[%s22153_s3 + $0x508] sm:$0xff]   ;;  %v16233_v29 = vld [vmem:[%s22153_s3 + $0x3c0] sm:$0xff]  }
 0x304   : > { %8659 = vmatmul.mubr.bf16.gmra.mxu0 %v16131_v43  ;;  %v4684_v56 = vsel %vm4401_vm5, %v4683_v37, %v4682_v28  ;;  %v4687_v9 = vrot.slane %v19539_v55, 1  ;;  %v4990_v1 = vsel %vm4398_vm4, %v4989_v23, %v4988_v60  ;;  %v4993_v57 = vrot.slane %v19539_v55, 2  ;;  %15528 = vmatprep.subr.bf16.mxu1 %v16225_v12  ;;  %v16164_v12 = vld [vmem:[%s22153_s3 + $0x540] sm:$0xff]  }
 0x305   : > { %15647 = vmatpush3.bf16.msra.mxu0 %v16149_v44  ;;  %v4686_v13 = vsel %vm4404_vm6, %v4685_v20, %v4684_v56  ;;  %v5267_v58 = vrot.slane %v19520_v49, 5  ;;  %v5269_v27 = vrot.slane %v19522_v38, 4  ;;  %v5271_v5 = vrot.slane %v19539_v55, 3  ;;  %v16167_v56 = vld [vmem:[%s22153_s3 + $0x500] sm:$0xff]  }
 0x306   : > { %15648 = vmatprep.subr.bf16.mxu0 %v16151_v50  ;;  %v4688_v53 = vsel %vm4407_vm7, %v4687_v9, %v4686_v13  ;;  %v5544_v7 = vsel %vm4389_vm1, %v5543_v19, %v19438_v14  ;;  %v5545_v51 = vrot.slane %v19520_v49, 6  ;;  %v5547_v2 = vrot.slane %v19522_v38, 5  ;;  %v16235_v9 = vld [vmem:[%s22153_s3 + $0x4f8] sm:$0xff]   ;;  %v1021_v13 = vpop.f32.mrf.mxu0 }
 0x307   : > { %v4689_v35 = vpack.c.b16 %v4688_v53, %v4688_v53  ;;  %v5268_v31 = vsel %vm4395_vm3, %v5267_v58, %v5266_v40  ;;  %v5549_v41 = vrot.slane %v19539_v55, 4  ;;  %v5823_v36 = vrot.slane %v19520_v49, 7  ;;  %15529 = vmatpush3.bf16.msra.mxu1 %v16226_v47  ;;  %v16228_v49 = vld [vmem:[#allocation2 + $0x280] ss:$100 sps:$4 sm:$0xff]   ;;  %v19635_v58 = vld [vmem:[%s22153_s3 + $0x638] sm:$0xff]  }
 0x308   : > { %v5546_v43 = vsel %vm4392_vm2, %v5545_v51, %v5544_v7  ;;  %v5825_v14 = vrot.slane %v19522_v38, 6  ;;  %v5827_v44 = vrot.slane %v19539_v55, 5  ;;  %v2285_v30 = vcombine.high %v19515_v59, %v19515_v59  ;;  %15530 = vmatprep.subr.bf16.mxu1 %v16227_v42  ;;  %v16232_v55 = vld [vmem:[#allocation2 + $0x3c] ss:$100 sps:$4 sm:$0xff]  }
 0x309   : > { %15649 = vmatpush3.bf16.msra.mxu0 %v16153_v62  ;;  %4698 = vst [vmem:[#allocation2 + $0x2f8] sm:$0xf] %v4689_v35  ;;  %4753 = vst [vmem:[#allocation2 + $0x2a8] sm:$0xf] %v4689_v35  ;;  %v5824_v38 = vsel %vm4389_vm1, %v5823_v36, %v19509_v34  ;;  %v2292_v15 = vrot.slane %v19515_v59, %v17370_v48  ;;  %v4992_v19 = vsel %vm4401_vm5, %v4991_v52, %v4990_v1  ;;  %v19641_v53 = vld [vmem:[%s22152_s2] ss:$0 sm:$0xff] }
 0x30a   : > { %v5270_v50 = vsel %vm4398_vm4, %v5269_v27, %v5268_v31  ;;  %15650 = vmatprep.subr.bf16.mxu0 %v16157_v11  ;;  %v5826_v37 = vsel %vm4392_vm2, %v5825_v14, %v5824_v38  ;;  %v19605_v20 = vmax.f32 %v19487_v0, %v13919_v32  ;;  %v2299_v34 = vrot.slane %v2285_v30, %v17370_v48  ;;  %v16234_v0 = vld [vmem:[%s22153_s3 + $0x380] sm:$0xff]   ;;  %v16236_v31 = vld [vmem:[%s22153_s3 + $0x4b8] sm:$0xff]  }
 0x30b   : > { %v19609_v59 = vsel %vm4404_vm6, %v4993_v57, %v4992_v19  ;;  %8472 = vmatmul.mubr.bf16.gmra.mxu1 %v16228_v49  ;;  %v2300_v23 = vcombine.high %v2292_v15, %v2292_v15  ;;  %v13908_v61 = vrot.slane %v2292_v15, 9  ;;  %v19612_v28 = vsel %vm4401_vm5, %v5271_v5, %v5270_v50  ;;  %v16230_v14 = vld [vmem:[#allocation2 + $0x38] ss:$100 sps:$4 sm:$0xff]  }
 0x30c   : > { %v5548_v60 = vsel %vm4395_vm3, %v5547_v2, %v5546_v43  ;;  %15531 = vmatpush3.bf16.msra.mxu1 %v16229_v3  ;;  %8577 = vmatprep.mubr.bf16.mxu1 %v16232_v55  ;;  %v2301_v32 = vcombine.high %v2299_v34, %v2299_v34  ;;  %v13910_v52 = vrot.slane %v2299_v34, 9  ;;  %v19619_v40 = vsel %vm4395_vm3, %v5827_v44, %v5826_v37  ;;  %v16239_v44 = vld [vmem:[%s22153_s3 + $0x4f0] sm:$0xff]  }
 0x30d   : > { %v2370_v47 = vcombine.high %v19524_v6, %v19524_v6  ;;  %15651 = vmatpush3.bf16.msra.mxu0 %v16159_v18  ;;  %15532 = vmatprep.subr.bf16.mxu1 %v16233_v29  ;;  %v13909_v1 = vrot.slane %v2300_v23, 9  ;;  %v3816_v57 = vmax.f32 %v2292_v15, %v13908_v61  ;;  %v5550_v62 = vsel %vm4398_vm4, %v5549_v41, %v5548_v60  ;;  %v16237_v29 = vld [vmem:[#allocation2 + $0x104] ss:$100 sps:$4 sm:$0xff]   ;;  %v19662_v60 = vpop.f32.mrf.mxu0 }
 0x30e   : > { %v2377_v42 = vrot.slane %v19524_v6, %v17370_v48  ;;  %15652 = vmatprep.subr.bf16.mxu0 %v16164_v12  ;;  %v13911_v27 = vrot.slane %v2301_v32, 9  ;;  %v3818_v5 = vmax.f32 %v2299_v34, %v13910_v52  ;;  %v19644_v7 = vadd.f32 %v19641_v53, %v1021_v13 }
 0x30f   : > { %v2384_v11 = vrot.slane %v2370_v47, %v17370_v48  ;;  %v3817_v6 = vmax.f32 %v2300_v23, %v13909_v1  ;;  %v3972_v51 = vmax.f32 %v19346_v33, %v3816_v57 }
 0x310   : > { %v2385_v2 = vcombine.high %v2377_v42, %v2377_v42  ;;  %v13928_v35 = vrot.slane %v2377_v42, 9  ;;  %15533 = vmatpush3.bf16.msra.mxu1 %v16234_v0  ;;  %v3819_v41 = vmax.f32 %v2301_v32, %v13911_v27  ;;  %v3974_v36 = vmax.f32 %v19395_v16, %v3818_v5  ;;  %v16242_v0 = vld [vmem:[%s22153_s3 + $0x4e8] sm:$0xff]  }
 0x311   : > { %v2386_v3 = vcombine.high %v2384_v11, %v2384_v11  ;;  %v13930_v43 = vrot.slane %v2384_v11, 9  ;;  %15653 = vmatpush3.bf16.msra.mxu0 %v16167_v56  ;;  %15598 = vmatprep.subr.bf16.mxu1 %v16235_v9  ;;  %v3973_v33 = vmax.f32 %v19353_v26, %v3817_v6  ;;  %v15162_v30 = vpack.c.bf16 %v3972_v51, %v3972_v51  ;;  %v16240_v26 = vld [vmem:[%s22153_s3 + $0x4b0] sm:$0xff]   ;;  %v16244_v5 = vld [vmem:[%s22153_s3 + $0x4a8] sm:$0xff]  }
 0x312   : > { %v13929_v18 = vrot.slane %v2385_v2, 9  ;;  %v3836_v49 = vmax.f32 %v2377_v42, %v13928_v35  ;;  %15850 = vmatprep.subr.bf16.mxu0 %v19635_v58  ;;  %v3975_v38 = vmax.f32 %v19398_v54, %v3819_v41  ;;  %v15186_v16 = vpack.c.bf16 %v3974_v36, %v3974_v36  ;;  %v19677_v35 = vpop.f32.mrf.mxu0 }
 0x313   : > { %v13931_v15 = vrot.slane %v2386_v3, 9  ;;  %v3838_v19 = vmax.f32 %v2384_v11, %v13930_v43  ;;  %8578 = vmatmul.mubr.bf16.vlgmr.msra.gmra.mxu1 %v16230_v14  ;;  %v4982_v50 = vunpack.c.l.b16 %v15162_v30  ;;  %v15174_v12 = vpack.c.bf16 %v3973_v33, %v3973_v33  ;;  %v16245_v30 = vld [vmem:[#allocation2 + $0x1cc] ss:$100 sps:$4 sm:$0xff]  }
 0x314   : > { %v3837_v55 = vmax.f32 %v2385_v2, %v13929_v18  ;;  %v3980_v37 = vmax.f32 %v19507_v8, %v3836_v49  ;;  %15599 = vmatpush3.bf16.msra.mxu1 %v16236_v31  ;;  %8585 = vmatprep.mubr.bf16.mxu1 %v16237_v29  ;;  %v5542_v34 = vunpack.c.l.b16 %v15186_v16  ;;  %v15198_v23 = vpack.c.bf16 %v3975_v38, %v3975_v38  ;;  %v19689_v33 = vpop.f32.mrf.mxu0  ;;  %v16248_v29 = vld [vmem:[%s22153_s3 + $0x4a0] sm:$0xff]  }
 0x315   : > { %v3839_v61 = vmax.f32 %v2386_v3, %v13931_v15  ;;  %v3982_v54 = vmax.f32 %v19513_v46, %v3838_v19  ;;  %15600 = vmatprep.subr.bf16.mxu1 %v16239_v44  ;;  %v4995_v32 = vrot.slane %v4982_v50, 1  ;;  %v5262_v8 = vunpack.c.l.b16 %v15174_v12  ;;  %v19685_v3 = vpop.f32.mrf.mxu1 }
 0x316   : > { %v5273_v52 = vrot.slane %v4982_v50, 2  ;;  %v5551_v47 = vrot.slane %v4982_v50, 3  ;;  %v5555_v56 = vrot.slane %v5542_v34, 1  ;;  %v5822_v9 = vunpack.c.l.b16 %v15198_v23  ;;  %v19710_v23 = vpop.f32.mrf.mxu0 }
 0x317   : > { %v5829_v1 = vrot.slane %v4982_v50, 4  ;;  %v5833_v57 = vrot.slane %v5542_v34, 2  ;;  %v4996_v42 = vsel %vm4407_vm7, %v4995_v32, %v19609_v59  ;;  %v5275_v13 = vrot.slane %v5262_v8, 1  ;;  %v16243_v59 = vld [vmem:[#allocation2 + $0x100] ss:$100 sps:$4 sm:$0xff]   ;;  %v16249_v50 = vld [vmem:[%s22153_s3 + $0x4d8] sm:$0xff]  }
 0x318   : > { %v5274_v46 = vsel %vm4404_vm6, %v5273_v52, %v19612_v28  ;;  %v5552_v27 = vsel %vm4401_vm5, %v5551_v47, %v5550_v62  ;;  %15601 = vmatpush3.bf16.msra.mxu1 %v16240_v26  ;;  %v4997_v11 = vpack.c.b16 %v4996_v42, %v4996_v42  ;;  %v5553_v6 = vrot.slane %v5262_v8, 2  ;;  %v16247_v28 = vld [vmem:[%s22153_s3 + $0x4e0] sm:$0xff]   ;;  %v19706_v26 = vpop.f32.mrf.mxu1  ;;  %v16251_v52 = vld [vmem:[%s22153_s3 + $0x498] sm:$0xff]   ;;  %v19753_v42 = vpop.f32.mrf.mxu0 }
 0x319   : > { %v5830_v51 = vsel %vm4398_vm4, %v5829_v1, %v19619_v40  ;;  %v5831_v2 = vrot.slane %v5262_v8, 3  ;;  %15602 = vmatprep.subr.bf16.mxu1 %v16242_v0  ;;  %v5276_v62 = vsel %vm4407_vm7, %v5275_v13, %v5274_v46  ;;  %v5835_v31 = vrot.slane %v5822_v9, 1  ;;  %v16250_v8 = vld [vmem:[#allocation2 + $0x1c8] ss:$100 sps:$4 sm:$0xff]  }
 0x31a   : > { %v3981_v41 = vmax.f32 %v19511_v21, %v3837_v55  ;;  %v3983_v36 = vmax.f32 %v19605_v20, %v3839_v61  ;;  %5006 = vst [vmem:[#allocation2 + $0x2fc] sm:$0xf] %v4997_v11  ;;  %5033 = vst [vmem:[#allocation2 + $0x2ac] sm:$0xf] %v4997_v11  ;;  %v5277_v40 = vpack.c.b16 %v5276_v62, %v5276_v62  ;;  %v1104_v0 = vmax.f32 %v19644_v7, 0.0 }
 0x31b   : > { %v5554_v43 = vsel %vm4404_vm6, %v5553_v6, %v5552_v27  ;;  %v5832_v14 = vsel %vm4401_vm5, %v5831_v2, %v5830_v51  ;;  %v15148_v44 = vpack.c.bf16 %v3980_v37, %v3980_v37  ;;  %8586 = vmatmul.mubr.bf16.gmra.mxu1 %v16243_v59  ;;  %v15150_v20 = vpack.c.bf16 %v3982_v54, %v3982_v54  ;;  %v16252_v7 = vld [vmem:[#allocation2 + $0x294] ss:$100 sps:$4 sm:$0xff]  }
 0x31c   : > { %v5556_v18 = vsel %vm4407_vm7, %v5555_v56, %v5554_v43  ;;  %v5834_v21 = vsel %vm4404_vm6, %v5833_v57, %v5832_v14  ;;  %v15149_v49 = vpack.c.bf16 %v3981_v41, %v3981_v41  ;;  %15603 = vmatpush3.bf16.msra.mxu1 %v16244_v5  ;;  %5286 = vst [vmem:[#allocation2 + $0x300] sm:$0xf] %v5277_v40  ;;  %5313 = vst [vmem:[#allocation2 + $0x2b0] sm:$0xf] %v5277_v40  ;;  %v16255_v6 = vld [vmem:[%s22153_s3 + $0x490] sm:$0xff]  }
 0x31d   : > { %v5557_v38 = vpack.c.b16 %v5556_v18, %v5556_v18  ;;  %v5836_v16 = vsel %vm4407_vm7, %v5835_v31, %v5834_v21  ;;  %v15151_v15 = vpack.c.bf16 %v3983_v36, %v3983_v36  ;;  %v19697_v19 = vunpack.c.l.b16 %v15148_v44  ;;  %8593 = vmatprep.mubr.bf16.mxu1 %v16245_v30  ;;  %15604 = vmatprep.subr.bf16.mxu1 %v16247_v28  ;;  %v16162_v40 = vld [vmem:[#allocation2 + $0x54] ss:$100 sps:$4 sm:$0xff]   ;;  %v19777_v21 = vpop.f32.mrf.mxu0 }
 0x31e   : > { %v5837_v12 = vpack.c.b16 %v5836_v16, %v5836_v16  ;;  %v19702_v55 = vunpack.c.l.b16 %v15149_v49  ;;  %v19704_v37 = vunpack.c.l.b16 %v15150_v20  ;;  %v19715_v61 = vmax.f32 %v19387_v24, %v13912_v17 }
 0x31f   : > { %5566 = vst [vmem:[#allocation2 + $0x304] sm:$0xf] %v5557_v38  ;;  %5593 = vst [vmem:[#allocation2 + $0x2b4] sm:$0xf] %v5557_v38  ;;  %v19708_v34 = vunpack.c.l.b16 %v15151_v15  ;;  %v19720_v54 = vmax.f32 %v19405_v63, %v13913_v22  ;;  %v1033_v32 = vadd.f32 %v19641_v53, %v19662_v60  ;;  %v19731_v24 = vmax.f32 %v19401_v25, %v13914_v10  ;;  %v16254_v60 = vld [vmem:[%s22153_s3 + $0x4d0] sm:$0xff]   ;;  %v16258_v15 = vld [vmem:[%s22153_s3 + $0x488] sm:$0xff]  }
 0x320   : > { %5846 = vst [vmem:[#allocation2 + $0x308] sm:$0xf] %v5837_v12  ;;  %5873 = vst [vmem:[#allocation2 + $0x2b8] sm:$0xf] %v5837_v12  ;;  %15605 = vmatpush3.bf16.msra.mxu1 %v16248_v29  ;;  %v19736_v63 = vmax.f32 %v19430_v39, %v13915_v4  ;;  %v4737_v17 = vrot.slane %v19697_v19, 4  ;;  %v5015_v22 = vrot.slane %v19697_v19, 5  ;;  %v19747_v39 = vpop.f32.mrf.mxu1  ;;  %v2336_v46 = vcombine.high %v1104_v0, %v1104_v0 }
 0x321   : > { %15606 = vmatprep.subr.bf16.mxu1 %v16249_v50  ;;  %v4739_v47 = vrot.slane %v19702_v55, 3  ;;  %v4741_v25 = vrot.slane %v19704_v37, 2  ;;  %v5017_v10 = vrot.slane %v19702_v55, 4  ;;  %v5293_v56 = vrot.slane %v19697_v19, 6  ;;  %v16146_v62 = vld [vmem:[#allocation2 + $0x298] ss:$100 sps:$4 sm:$0xff]  }
 0x322   : > { %v5851_v1 = vrot.slane %v19702_v55, 7  ;;  %v5853_v57 = vrot.slane %v19704_v37, 6  ;;  %v2343_v13 = vrot.slane %v1104_v0, %v17370_v48  ;;  %v1107_v27 = vmax.f32 %v1033_v32, 0.0  ;;  %v19771_v43 = vpop.f32.mrf.mxu1 }
 0x323   : > { %8594 = vmatmul.mubr.bf16.gmra.mxu1 %v16250_v8  ;;  %v1025_v5 = vadd.f32 %v19641_v53, %v19677_v35  ;;  %v16148_v11 = vld [vmem:[#allocation2 + $0x29c] ss:$100 sps:$4 sm:$0xff]   ;;  %v5295_v2 = vrot.slane %v19702_v55, 5  ;;  %v16256_v53 = vld [vmem:[%s22153_s3 + $0x4c8] sm:$0xff]   ;;  %v5855_v35 = vrot.slane %v19708_v34, 5  ;;  %v2350_v31 = vrot.slane %v2336_v46, %v17370_v48  ;;  %v19785_v8 = vpop.f32.mrf.mxu0 }
 0x324   : > { %15607 = vmatpush3.bf16.msra.mxu1 %v16251_v52  ;;  %8601 = vmatprep.mubr.bf16.mxu1 %v16252_v7  ;;  %v5852_v28 = vsel %vm4389_vm1, %v5851_v1, %v19697_v19  ;;  %v2351_v41 = vcombine.high %v2343_v13, %v2343_v13  ;;  %v13920_v36 = vrot.slane %v2343_v13, 9  ;;  %v2387_v44 = vcombine.high %v1107_v27, %v1107_v27  ;;  %v19779_v16 = vpop.f32.mrf.mxu1  ;;  %v16257_v52 = vld [vmem:[#allocation2 + $0x290] ss:$100 sps:$4 sm:$0xff]   ;;  %v16262_v7 = vld [vmem:[%s22153_s3 + $0x4c0] sm:$0xff]  }
 0x325   : > { %15608 = vmatprep.subr.bf16.mxu1 %v16254_v60  ;;  %8666 = vmatprep.mubr.bf16.mxu0 %v16148_v11  ;;  %v19774_v14 = vsel %vm4392_vm2, %v5853_v57, %v5852_v28  ;;  %v2394_v30 = vrot.slane %v1107_v27, %v17370_v48  ;;  %v1105_v18 = vmax.f32 %v1025_v5, 0.0  ;;  %v2352_v49 = vcombine.high %v2350_v31, %v2350_v31 }
 0x326   : > { %8667 = vmatmul.mubr.bf16.gmra.mxu0 %v16146_v62  ;;  %v13921_v20 = vrot.slane %v2351_v41, 9  ;;  %v13922_v29 = vrot.slane %v2350_v31, 9  ;;  %v3828_v38 = vmax.f32 %v2343_v13, %v13920_v36  ;;  %v2401_v50 = vrot.slane %v2387_v44, %v17370_v48  ;;  %v16261_v13 = vld [vmem:[#allocation2 + $0x4c] ss:$100 sps:$4 sm:$0xff]  }
 0x327   : > { %8772 = vmatprep.mubr.bf16.mxu0 %v16162_v40  ;;  %v2402_v12 = vcombine.high %v2394_v30, %v2394_v30  ;;  %v13932_v0 = vrot.slane %v2394_v30, 9  ;;  %v2353_v32 = vcombine.high %v1105_v18, %v1105_v18  ;;  %v13923_v60 = vrot.slane %v2352_v49, 9  ;;  %v19792_v40 = vpop.f32.mrf.mxu1 }
 0x328   : > { %15609 = vmatpush3.bf16.msra.mxu1 %v16255_v6  ;;  %v3829_v1 = vmax.f32 %v2351_v41, %v13921_v20  ;;  %v3830_v57 = vmax.f32 %v2350_v31, %v13922_v29  ;;  %v2360_v46 = vrot.slane %v1105_v18, %v17370_v48  ;;  %v2403_v27 = vcombine.high %v2401_v50, %v2401_v50  ;;  %v16160_v18 = vld [vmem:[#allocation2 + $0x50] ss:$100 sps:$4 sm:$0xff]  }
 0x329   : > { %15610 = vmatprep.subr.bf16.mxu1 %v16256_v53  ;;  %v13933_v5 = vrot.slane %v2402_v12, 9  ;;  %v13934_v11 = vrot.slane %v2401_v50, 9  ;;  %v3840_v6 = vmax.f32 %v2394_v30, %v13932_v0  ;;  %v3831_v28 = vmax.f32 %v2352_v49, %v13923_v60  ;;  %v16177_v29 = vld [vmem:[%s22153_s3 + $0x630] sm:$0xff]   ;;  %v19797_v30 = vpop.f32.mrf.mxu0  ;;  %v16263_v49 = vld [vmem:[%s22153_s3 + $0x480] sm:$0xff]   ;;  %v19807_v4 = vpop.f32.mrf.mxu1 }
 0x32a   : > { %v2367_v62 = vrot.slane %v2353_v32, %v17370_v48  ;;  %v2368_v53 = vcombine.high %v2360_v46, %v2360_v46  ;;  %v13924_v36 = vrot.slane %v2360_v46, 9  ;;  %v13935_v44 = vrot.slane %v2403_v27, 9  ;;  %v16175_v60 = vld [vmem:[#allocation2 + $0x11c] ss:$100 sps:$4 sm:$0xff]  }
 0x32b   : > { %8602 = vmatmul.mubr.bf16.gmra.mxu1 %v16257_v52  ;;  %v3841_v41 = vmax.f32 %v2402_v12, %v13933_v5  ;;  %v3842_v31 = vmax.f32 %v2401_v50, %v13934_v11  ;;  %v3984_v20 = vmax.f32 %v3828_v38, %v3840_v6  ;;  %v16264_v38 = vld [vmem:[%s22153_s3 + $0x5f8] sm:$0xff]  }
 0x32c   : > { %15611 = vmatpush3.bf16.msra.mxu1 %v16258_v15  ;;  %8707 = vmatprep.mubr.bf16.mxu1 %v16261_v13  ;;  %v2369_v0 = vcombine.high %v2367_v62, %v2367_v62  ;;  %v13925_v32 = vrot.slane %v2368_v53, 9  ;;  %v13926_v15 = vrot.slane %v2367_v62, 9  ;;  %v3832_v52 = vmax.f32 %v2360_v46, %v13924_v36  ;;  %v16185_v46 = vld [vmem:[#allocation2 + $0x1e0] ss:$100 sps:$4 sm:$0xff]  }
 0x32d   : > { %15612 = vmatprep.subr.bf16.mxu1 %v16262_v7  ;;  %v3843_v50 = vmax.f32 %v2403_v27, %v13935_v44  ;;  %v3985_v12 = vmax.f32 %v3829_v1, %v3841_v41  ;;  %v3986_v13 = vmax.f32 %v3830_v57, %v3842_v31  ;;  %v15163_v5 = vpack.c.bf16 %v3984_v20, %v3984_v20  ;;  %v16183_v1 = vld [vmem:[%s22153_s3 + $0x628] sm:$0xff]   ;;  %v19813_v57 = vpop.f32.mrf.mxu0  ;;  %v16268_v44 = vld [vmem:[%s22153_s3 + $0x5f0] sm:$0xff]  }
 0x32e   : > { %8773 = vmatmul.mubr.bf16.vlgmr.msra.gmra.mxu0 %v16160_v18  ;;  %v13927_v11 = vrot.slane %v2369_v0, 9  ;;  %v3833_v7 = vmax.f32 %v2368_v53, %v13925_v32  ;;  %v3834_v6 = vmax.f32 %v2367_v62, %v13926_v15  ;;  %v3976_v51 = vmax.f32 %v19715_v61, %v3832_v52  ;;  %v16265_v61 = vld [vmem:[%s22153_s3 + $0x5b8] sm:$0xff]   ;;  %v16259_v53 = vld [vmem:[#allocation2 + $0x48] ss:$100 sps:$4 sm:$0xff]   ;;  %v19836_v52 = vpop.f32.mrf.mxu1 }
 0x32f   : > { %8780 = vmatprep.mubr.bf16.mxu0 %v16175_v60  ;;  %15851 = vmatpush3.bf16.msra.mxu0 %v19635_v58  ;;  %v3987_v36 = vmax.f32 %v3831_v28, %v3843_v50  ;;  %v15175_v59 = vpack.c.bf16 %v3985_v12, %v3985_v12  ;;  %v15187_v9 = vpack.c.bf16 %v3986_v13, %v3986_v13  ;;  %v5571_v58 = vrot.slane %v19697_v19, 7  ;;  %v16173_v15 = vld [vmem:[#allocation2 + $0x118] ss:$100 sps:$4 sm:$0xff]   ;;  %v16187_v13 = vld [vmem:[#allocation2 + $0x1e4] ss:$100 sps:$4 sm:$0xff]  }
 0x330   : > { %15852 = vmatprep.subr.bf16.mxu0 %v16177_v29  ;;  %15613 = vmatpush3.bf16.msra.mxu1 %v16263_v49  ;;  %v19819_v27 = vunpack.c.l.b16 %v15163_v5  ;;  %v3835_v62 = vmax.f32 %v2369_v0, %v13927_v11  ;;  %v3977_v28 = vmax.f32 %v19720_v54, %v3833_v7  ;;  %v5856_v20 = vsel %vm4395_vm3, %v5855_v35, %v19774_v14  ;;  %v16269_v14 = vld [vmem:[%s22153_s3 + $0x5b0] sm:$0xff]   ;;  %v19852_v5 = vpop.f32.mrf.mxu1  ;;  %v16270_v11 = vld [vmem:[%s22153_s3 + $0x5e8] sm:$0xff]  }
 0x331   : > { %15678 = vmatprep.subr.bf16.mxu1 %v16264_v38  ;;  %v19825_v41 = vunpack.c.l.b16 %v15175_v59  ;;  %v19827_v31 = vunpack.c.l.b16 %v15187_v9  ;;  %v3978_v18 = vmax.f32 %v19731_v24, %v3834_v6  ;;  %v15199_v49 = vpack.c.bf16 %v3987_v36, %v3987_v36  ;;  %v16266_v9 = vld [vmem:[#allocation2 + $0x114] ss:$100 sps:$4 sm:$0xff]  }
 0x332   : > { %v5857_v54 = vrot.slane %v19819_v27, 4  ;;  %v3979_v0 = vmax.f32 %v19736_v63, %v3835_v62  ;;  %v15144_v32 = vpack.c.bf16 %v3976_v51, %v3976_v51  ;;  %v5573_v59 = vrot.slane %v19702_v55, 6  ;;  %v16189_v63 = vld [vmem:[%s22153_s3 + $0x620] sm:$0xff]   ;;  %v19845_v51 = vpop.f32.mrf.mxu0 }
 0x333   : > { %15853 = vmatpush3.bf16.msra.mxu0 %v16177_v29  ;;  %8708 = vmatmul.mubr.bf16.vlgmr.msra.gmra.mxu1 %v16259_v53  ;;  %v5575_v60 = vrot.slane %v19704_v37, 5  ;;  %v5577_v35 = vrot.slane %v19708_v34, 4  ;;  %v5859_v24 = vrot.slane %v19825_v41, 3  ;;  %v5850_v29 = vunpack.c.l.b16 %v15199_v49 }
 0x334   : > { %15854 = vmatprep.subr.bf16.mxu0 %v16183_v1  ;;  %15679 = vmatpush3.bf16.msra.mxu1 %v16265_v61  ;;  %v5858_v38 = vsel %vm4398_vm4, %v5857_v54, %v5856_v20  ;;  %v5861_v50 = vrot.slane %v19827_v31, 2  ;;  %v15145_v12 = vpack.c.bf16 %v3977_v28, %v3977_v28  ;;  %v15146_v36 = vpack.c.bf16 %v3978_v18, %v3978_v18  ;;  %v19859_v62 = vpop.f32.mrf.mxu0  ;;  %v16196_v18 = vld [vmem:[%s22153_s3 + $0x618] sm:$0xff]  }
 0x335   : > { %8715 = vmatprep.mubr.bf16.mxu1 %v16266_v9  ;;  %15680 = vmatprep.subr.bf16.mxu1 %v16268_v44  ;;  %v5860_v6 = vsel %vm4401_vm5, %v5859_v24, %v5858_v38  ;;  %v15147_v61 = vpack.c.bf16 %v3979_v0, %v3979_v0  ;;  %v5863_v53 = vrot.slane %v5850_v29, 1  ;;  %v4723_v20 = vunpack.c.l.b16 %v15144_v32  ;;  %v16271_v29 = vld [vmem:[#allocation2 + $0x110] ss:$100 sps:$4 sm:$0xff]   ;;  %v16272_v38 = vld [vmem:[%s22153_s3 + $0x5a8] sm:$0xff]  }
 0x336   : > { %8781 = vmatmul.mubr.bf16.gmra.mxu0 %v16173_v15  ;;  %v5862_v28 = vsel %vm4404_vm6, %v5861_v50, %v5860_v6  ;;  %v4724_v49 = vunpack.c.l.b16 %v15145_v12  ;;  %v5579_v54 = vrot.slane %v19819_v27, 3  ;;  %v4725_v9 = vunpack.c.l.b16 %v15146_v36 }
 0x337   : > { %8788 = vmatprep.mubr.bf16.mxu0 %v16187_v13  ;;  %15855 = vmatpush3.bf16.msra.mxu0 %v16183_v1  ;;  %v4726_v7 = vunpack.c.l.b16 %v15147_v61  ;;  %v5581_v15 = vrot.slane %v19825_v41, 2  ;;  %v5864_v32 = vsel %vm4407_vm7, %v5863_v53, %v5862_v28  ;;  %v19870_v1 = vpop.f32.mrf.mxu1 }
 0x338   : > { %15856 = vmatprep.subr.bf16.mxu0 %v16189_v63  ;;  %15681 = vmatpush3.bf16.msra.mxu1 %v16269_v14  ;;  %v4731_v24 = vrot.slane %v4724_v49, 7  ;;  %v5865_v50 = vpack.c.b16 %v5864_v32, %v5864_v32  ;;  %v4733_v12 = vrot.slane %v4725_v9, 6  ;;  %v5011_v6 = vrot.slane %v4725_v9, 7  ;;  %v19875_v14 = vpop.f32.mrf.mxu0 }
 0x339   : > { %15682 = vmatprep.subr.bf16.mxu1 %v16270_v11  ;;  %v4735_v13 = vrot.slane %v4726_v7, 5  ;;  %v5013_v61 = vrot.slane %v4726_v7, 6  ;;  %v5291_v0 = vrot.slane %v4726_v7, 7  ;;  %v5572_v28 = vsel %vm4389_vm1, %v5571_v58, %v4726_v7  ;;  %v15269_v7 = vpop.f32.mrf.mxu1 }
 0x33a   : > { %v4732_v36 = vsel %vm4389_vm1, %v4731_v24, %v4723_v20  ;;  %v5583_v11 = vrot.slane %v19827_v31, 1  ;;  %5874 = vst [vmem:[#allocation2 + $0x31c] sm:$0xf] %v5865_v50  ;;  %v5012_v32 = vsel %vm4389_vm1, %v5011_v6, %v4724_v49  ;;  %v5574_v44 = vsel %vm4392_vm2, %v5573_v59, %v5572_v28  ;;  %v16199_v20 = vld [vmem:[%s22153_s3 + $0x610] sm:$0xff]   ;;  %v16276_v6 = vld [vmem:[%s22153_s3 + $0x5a0] sm:$0xff]  }
 0x33b   : > { %15857 = vmatpush3.bf16.msra.mxu0 %v16189_v63  ;;  %8716 = vmatmul.mubr.bf16.gmra.mxu1 %v16271_v29  ;;  %v4734_v53 = vsel %vm4392_vm2, %v4733_v12, %v4732_v36  ;;  %v5014_v58 = vsel %vm4392_vm2, %v5013_v61, %v5012_v32  ;;  %v5292_v63 = vsel %vm4389_vm1, %v5291_v0, %v4725_v9  ;;  %v22162_v0 = vrot.slane %v19704_v37, 3 }
 0x33c   : > { %15858 = vmatprep.subr.bf16.mxu0 %v16196_v18  ;;  %v4736_v24 = vsel %vm4395_vm3, %v4735_v13, %v4734_v53  ;;  %v5576_v31 = vsel %vm4395_vm3, %v5575_v60, %v5574_v44  ;;  %15683 = vmatpush3.bf16.msra.mxu1 %v16272_v38  ;;  %v5016_v49 = vsel %vm4395_vm3, %v5015_v22, %v5014_v58  ;;  %v16275_v60 = vld [vmem:[%s22153_s3 + $0x5e0] sm:$0xff]   ;;  %v15429_v44 = vpop.f32.mrf.mxu0  ;;  %v22163_v38 = vrot.slane %v19704_v37, 4 }
 0x33d   : > { %v4738_v59 = vsel %vm4398_vm4, %v4737_v17, %v4736_v24  ;;  %v5294_v29 = vsel %vm4392_vm2, %v5293_v56, %v5292_v63  ;;  %v5578_v9 = vsel %vm4398_vm4, %v5577_v35, %v5576_v31  ;;  %v5018_v19 = vsel %vm4398_vm4, %v5017_v10, %v5016_v49  ;;  %15684 = vmatprep.subr.bf16.mxu1 %v16275_v60 }
 0x33e   : > { %8789 = vmatmul.mubr.bf16.gmra.mxu0 %v16185_v46  ;;  %v4740_v17 = vsel %vm4401_vm5, %v4739_v47, %v4738_v59  ;;  %v5296_v22 = vsel %vm4395_vm3, %v5295_v2, %v5294_v29  ;;  %v5580_v56 = vsel %vm4401_vm5, %v5579_v54, %v5578_v9  ;;  %v16273_v46 = vld [vmem:[#allocation2 + $0x1dc] ss:$100 sps:$4 sm:$0xff]   ;;  %v5020_v47 = vsel %vm4401_vm5, %v22162_v0, %v5018_v19  ;;  %v16207_v2 = vld [vmem:[%s22153_s3 + $0x608] sm:$0xff]   ;;  %v15430_v24 = vpop.f32.mrf.mxu0 }
 0x33f   : > { %15859 = vmatpush3.bf16.msra.mxu0 %v16196_v18  ;;  %v4742_v35 = vsel %vm4404_vm6, %v4741_v25, %v4740_v17  ;;  %v5298_v10 = vsel %vm4398_vm4, %v22163_v38, %v5296_v22  ;;  %v5582_v55 = vsel %vm4404_vm6, %v5581_v15, %v5580_v56  ;;  %v22164_v54 = vrot.slane %v19708_v34, 1  ;;  %v15270_v15 = vpop.f32.mrf.mxu1  ;;  %8723 = vmatprep.mubr.bf16.mxu1 %v16273_v46  ;;  %v16278_v29 = vld [vmem:[#allocation2 + $0x1d8] ss:$100 sps:$4 sm:$0xff]   ;;  %v19963_v9 = vld [vmem:[%s22154_s4] ss:$0 sm:$0xff]  ;;  %v16282_v22 = vld [vmem:[%s22153_s3 + $0x5d0] sm:$0xff]  }
 0x340   : > { %15860 = vmatprep.subr.bf16.mxu0 %v16199_v20  ;;  %v22165_v25 = vrot.slane %v19708_v34, 2  ;;  %v22166_v12 = vrot.slane %v19708_v34, 3  ;;  %v5584_v13 = vsel %vm4407_vm7, %v5583_v11, %v5582_v55  ;;  %v22167_v61 = vrot.slane %v19819_v27, 1  ;;  %v16277_v11 = vld [vmem:[%s22153_s3 + $0x5d8] sm:$0xff]   ;;  %15685 = vmatpush3.bf16.msra.mxu1 %v16276_v6  ;;  %v16280_v17 = vld [vmem:[#allocation2 + $0x2a4] ss:$100 sps:$4 sm:$0xff]  }
 0x341   : > { %v4744_v18 = vsel %vm4407_vm7, %v22164_v54, %v4742_v35  ;;  %v22168_v53 = vrot.slane %v19819_v27, 2  ;;  %v5585_v34 = vpack.c.b16 %v5584_v13, %v5584_v13  ;;  %v22169_v63 = vrot.slane %v19825_v41, 1  ;;  %v16211_v27 = vld [vmem:[%s22153_s3 + $0x600] sm:$0xff]   ;;  %15686 = vmatprep.subr.bf16.mxu1 %v16277_v11  ;;  %v16284_v46 = vld [vmem:[%s22153_s3 + $0x5c8] sm:$0xff]  }
 0x342   : > { %v5022_v50 = vsel %vm4404_vm6, %v22165_v25, %v5020_v47  ;;  %v5300_v37 = vsel %vm4401_vm5, %v22166_v12, %v5298_v10  ;;  %v4745_v36 = vpack.c.b16 %v4744_v18, %v4744_v18  ;;  %v15271_v49 = vadd.f32 %v15270_v15, %v15269_v7  ;;  %v16285_v55 = vld [vmem:[#allocation2 + $0x2a0] ss:$100 sps:$4 sm:$0xff]  }
 0x343   : > { %v5024_v28 = vsel %vm4407_vm7, %v22167_v61, %v5022_v50  ;;  %v5302_v32 = vsel %vm4404_vm6, %v22168_v53, %v5300_v37  ;;  %15861 = vmatpush3.bf16.msra.mxu0 %v16199_v20  ;;  %5594 = vst [vmem:[#allocation2 + $0x318] sm:$0xf] %v5585_v34  ;;  %v19967_v41 = vadd.f32 %v19875_v14, %v19859_v62  ;;  %v16279_v20 = vld [vmem:[%s22153_s3 + $0x598] sm:$0xff]   ;;  %v16209_v18 = vld [vmem:[#allocation2 + $0x60] ss:$100 sps:$4 sm:$0xff]  }
 0x344   : > { %v5025_v58 = vpack.c.b16 %v5024_v28, %v5024_v28  ;;  %v5304_v31 = vsel %vm4407_vm7, %v22169_v63, %v5302_v32  ;;  %4754 = vst [vmem:[#allocation2 + $0x30c] sm:$0xf] %v4745_v36  ;;  %15862 = vmatprep.subr.bf16.mxu0 %v16207_v2  ;;  %v19972_v60 = vadd.f32 %v15430_v24, %v15429_v44  ;;  %v16283_v44 = vld [vmem:[%s22153_s3 + $0x590] sm:$0xff]   ;;  %v16289_v25 = vld [vmem:[#allocation2 + $0x5c] ss:$100 sps:$4 sm:$0xff]  }
 0x345   : > { %v5305_v59 = vpack.c.b16 %v5304_v31, %v5304_v31  ;;  %v15272_v7 = vpop.f32.mrf.mxu1  ;;  %v19975_v19 = vadd.f32 %v15271_v49, %v19963_v9  ;;  %8724 = vmatmul.mubr.bf16.gmra.mxu1 %v16278_v29  ;;  %v16290_v50 = vld [vmem:[%s22153_s3 + $0x5c0] sm:$0xff]   ;;  %v16217_v61 = vld [vmem:[#allocation2 + $0x128] ss:$100 sps:$4 sm:$0xff]   ;;  %v16219_v53 = vld [vmem:[#allocation2 + $0x1f0] ss:$100 sps:$4 sm:$0xff]  }
 0x346   : > { %5034 = vst [vmem:[#allocation2 + $0x310] sm:$0xf] %v5025_v58  ;;  %8731 = vmatprep.mubr.bf16.mxu1 %v16280_v17  ;;  %15687 = vmatpush3.bf16.msra.mxu1 %v16279_v20  ;;  %v16291_v15 = vld [vmem:[%s22153_s3 + $0x580] sm:$0xff]   ;;  %v16287_v32 = vld [vmem:[#allocation2 + $0x58] ss:$100 sps:$4 sm:$0xff]  }
 0x347   : > { %5314 = vst [vmem:[#allocation2 + $0x314] sm:$0xf] %v5305_v59  ;;  %15863 = vmatpush3.bf16.msra.mxu0 %v16207_v2  ;;  %v15273_v62 = vpop.f32.mrf.mxu1  ;;  %15688 = vmatprep.subr.bf16.mxu1 %v16282_v22  ;;  %v16286_v2 = vld [vmem:[%s22153_s3 + $0x588] sm:$0xff]   ;;  %v16241_v63 = vld [vmem:[#allocation2 + $0x2b8] ss:$100 sps:$4 sm:$0xff]   ;;  %v15268_v59 = vadd.f32 %v19870_v1, %v19852_v5 }
 0x348   : > { %15864 = vmatprep.subr.bf16.mxu0 %v16211_v27  ;;  %v15274_v14 = vadd.f32 %v15273_v62, %v15272_v7  ;;  %v16294_v34 = vld [vmem:[#allocation2 + $0x124] ss:$100 sps:$4 sm:$0xff]   ;;  %v16297_v29 = vld [vmem:[#allocation2 + $0x1ec] ss:$100 sps:$4 sm:$0xff]  }
 0x349   : > { %v15275_v56 = vpop.f32.mrf.mxu1  ;;  %v16292_v49 = vld [vmem:[#allocation2 + $0x120] ss:$100 sps:$4 sm:$0xff]   ;;  %v8141_v17 = vadd.f32 %v15268_v59, %v19963_v9 }
 0x34a   : > { %v19987_v35 = vadd.f32 %v15274_v14, %v19963_v9  ;;  %15689 = vmatpush3.bf16.msra.mxu1 %v16283_v44 }
 0x34b   : > { %15865 = vmatpush3.bf16.msra.mxu0 %v16211_v27  ;;  %v15276_v0 = vpop.f32.mrf.mxu1  ;;  %v16203_v47 = vld [vmem:[#allocation2 + $0x2a8] ss:$100 sps:$4 sm:$0xff]   ;;  %15690 = vmatprep.subr.bf16.mxu1 %v16284_v46 }
 0x34c   : > { %v15277_v10 = vadd.f32 %v15276_v0, %v15275_v56  ;;  %v16295_v46 = vld [vmem:[#allocation2 + $0x1e8] ss:$100 sps:$4 sm:$0xff]  }
 0x34d   : > { %v16205_v38 = vld [vmem:[#allocation2 + $0x2ac] ss:$100 sps:$4 sm:$0xff]   ;;  %v15294_v54 = vpop.f32.mrf.mxu1  ;;  %8732 = vmatmul.mubr.bf16.gmra.mxu1 %v16285_v55 }
 0x34e   : > { %8796 = vmatprep.mubr.bf16.mxu0 %v16205_v38  ;;  %v8152_v12 = vadd.f32 %v15277_v10, %v19963_v9  ;;  %8837 = vmatprep.mubr.bf16.mxu1 %v16289_v25  ;;  %v15256_v10 = vadd.f32 %v19706_v26, %v19685_v3  ;;  %v15262_v26 = vadd.f32 %v19792_v40, %v19779_v16 }
 0x34f   : > { %8797 = vmatmul.mubr.bf16.gmra.mxu0 %v16203_v47  ;;  %v15295_v37 = vpop.f32.mrf.mxu1  ;;  %15691 = vmatpush3.bf16.msra.mxu1 %v16286_v2  ;;  %v16300_v47 = vld [vmem:[#allocation2 + $0x2b4] ss:$100 sps:$4 sm:$0xff]  }
 0x350   : > { %15866 = vmatprep.mubr.bf16.mxu0 %v16209_v18  ;;  %v15296_v13 = vadd.f32 %v15295_v37, %v15294_v54  ;;  %15692 = vmatprep.subr.bf16.mxu1 %v16290_v50  ;;  %v8125_v25 = vadd.f32 %v15256_v10, %v19963_v9  ;;  %v15259_v50 = vadd.f32 %v19771_v43, %v19747_v39 }
 0x351   : > { %v15297_v6 = vpop.f32.mrf.mxu1  ;;  %v8133_v39 = vadd.f32 %v15262_v26, %v19963_v9  ;;  %v15265_v43 = vadd.f32 %v19836_v52, %v19807_v4 }
 0x352   : > { %v8128_v3 = vadd.f32 %v15259_v50, %v19963_v9 }
 0x353   : > { %v15298_v36 = vpop.f32.mrf.mxu1  ;;  %15693 = vmatpush3.bf16.msra.mxu1 %v16291_v15 }
 0x355   : > { %v15300_v28 = vpop.f32.mrf.mxu1 }
 0x356   : > { %8838 = vmatmul.mubr.bf16.vlgmr.msra.gmra.mxu1 %v16287_v32 }
 0x357   : > { %15867 = vmatmul.mubr.bf16.vlgmr.msra.gmra.mxu0 %v16217_v61  ;;  %v15301_v11 = vpop.f32.mrf.mxu1  ;;  %8845 = vmatprep.mubr.bf16.mxu1 %v16294_v34  ;;  %v8190_v61 = vadd.f32 %v15296_v13, %v8125_v25 }
 0x358   : > { %15870 = vmatprep.mubr.bf16.mxu0 %v16219_v53  ;;  %v15302_v24 = vadd.f32 %v15301_v11, %v15300_v28  ;;  %v15299_v28 = vadd.f32 %v15298_v36, %v15297_v6 }
 0x359   : > { %v15303_v58 = vpop.f32.mrf.mxu1 }
 0x35a   : > { %v8193_v11 = vadd.f32 %v15299_v28, %v8128_v3  ;;  %v8198_v6 = vadd.f32 %v15302_v24, %v8133_v39 }
 0x35b   : > { %v15304_v31 = vpop.f32.mrf.mxu1 }
 0x35c   : > { %v15305_v36 = vadd.f32 %v15304_v31, %v15303_v58 }
 0x35d   : > { %v15306_v27 = vpop.f32.mrf.mxu1 }
 0x35e   : > { %8846 = vmatmul.mubr.bf16.gmra.mxu1 %v16292_v49 }
 0x35f   : > { %15871 = vmatmul.mubr.bf16.gmra.mxu0 %v16241_v63  ;;  %v15307_v20 = vpop.f32.mrf.mxu1  ;;  %8853 = vmatprep.mubr.bf16.mxu1 %v16297_v29  ;;  %v8136_v29 = vadd.f32 %v15265_v43, %v19963_v9 }
 0x360   : > { %v15308_v7 = vadd.f32 %v15307_v20, %v15306_v27 }
 0x361   : > { %v15309_v22 = vpop.f32.mrf.mxu1  ;;  %v8201_v40 = vadd.f32 %v15305_v36, %v8136_v29 }
 0x362   : > { %v8206_v62 = vadd.f32 %v15308_v7, %v8141_v17 }
 0x363   : > { %v15310_v14 = vpop.f32.mrf.mxu1 }
 0x364   : > { %v15311_v44 = vadd.f32 %v15310_v14, %v15309_v22 }
 0x365   : > { %v15312_v56 = vpop.f32.mrf.mxu1 }
 0x366   : > { %v8209_v0 = vadd.f32 %v15311_v44, %v19975_v19  ;;  %8854 = vmatmul.mubr.bf16.gmra.mxu1 %v16295_v46  ;;  %v16298_v19 = vld [vmem:[#allocation2 + $0x2b0] ss:$100 sps:$4 sm:$0xff]  }
 0x367   : > { %v15313_v5 = vpop.f32.mrf.mxu1  ;;  %8861 = vmatprep.mubr.bf16.mxu1 %v16300_v47 }
 0x368   : > { %v15314_v1 = vadd.f32 %v15313_v5, %v15312_v56 }
 0x369   : > { %v15315_v38 = vpop.f32.mrf.mxu1 }
 0x36a   : > { %v8214_v55 = vadd.f32 %v15314_v1, %v19987_v35 }
 0x36b   : > { %v15316_v2 = vpop.f32.mrf.mxu1 }
 0x36c   : > { %v15317_v54 = vadd.f32 %v15316_v2, %v15315_v38 }
 0x36d   : > { %v15334_v18 = vpop.f32.mrf.mxu1 }
 0x36e   : > { %v8217_v37 = vadd.f32 %v15317_v54, %v8152_v12  ;;  %8862 = vmatmul.mubr.bf16.gmra.mxu1 %v16298_v19 }
 0x36f   : > { %v15335_v15 = vpop.f32.mrf.mxu1 }
 0x370   : > { %v15336_v53 = vadd.f32 %v15335_v15, %v15334_v18 }
 0x371   : > { %v15337_v32 = vpop.f32.mrf.mxu1 }
 0x372   : > { %v8255_v35 = vadd.f32 %v15336_v53, %v8190_v61 }
 0x373   : > { %v15338_v34 = vpop.f32.mrf.mxu1 }
 0x374   : > { %v15339_v63 = vadd.f32 %v15338_v34, %v15337_v32 }
 0x375   : > { %v15340_v59 = vpop.f32.mrf.mxu1 }
 0x376   : > { %v8258_v12 = vadd.f32 %v15339_v63, %v8193_v11 }
 0x377   : > { %v15341_v13 = vpop.f32.mrf.mxu1 }
 0x378   : > { %v15342_v27 = vadd.f32 %v15341_v13, %v15340_v59 }
 0x379   : > { %v15343_v49 = vpop.f32.mrf.mxu1 }
 0x37a   : > { %v8263_v20 = vadd.f32 %v15342_v27, %v8198_v6 }
 0x37b   : > { %v15344_v16 = vpop.f32.mrf.mxu1 }
 0x37c   : > { %v15345_v17 = vadd.f32 %v15344_v16, %v15343_v49 }
 0x37d   : > { %v15346_v7 = vpop.f32.mrf.mxu1 }
 0x37e   : > { %v8266_v22 = vadd.f32 %v15345_v17, %v8201_v40 }
 0x37f   : > { %v15347_v14 = vpop.f32.mrf.mxu1 }
 0x380   : > { %v15348_v44 = vadd.f32 %v15347_v14, %v15346_v7 }
 0x381   : > { %v15349_v56 = vpop.f32.mrf.mxu1 }
 0x382   : > { %v8271_v46 = vadd.f32 %v15348_v44, %v8206_v62  ;;  %v15432_v4 = vpop.f32.mrf.mxu0  ;;  %v15425_v44 = vadd.f32 %v19845_v51, %v19813_v57  ;;  %v16303_v57 = vld [vmem:[%s22155_s5 + $0xe4] ss:$16 sps:$4 sm:$0xff]   ;;  %v16304_v51 = vld [vmem:[%s22155_s5 + $0x2e0] ss:$16 sps:$4 sm:$0xff]  }
 0x383   : > { %v15350_v47 = vpop.f32.mrf.mxu1  ;;  %12498 = vmatprep.subr.bf16.mxu1 %v16303_v57 }
 0x384   : > { %v15351_v52 = vadd.f32 %v15350_v47, %v15349_v56  ;;  %v15433_v24 = vpop.f32.mrf.mxu0 }
 0x385   : > { %v15352_v5 = vpop.f32.mrf.mxu1  ;;  %v20018_v31 = vadd.f32 %v15433_v24, %v15432_v4 }
 0x386   : > { %v20016_v58 = vadd.f32 %v15351_v52, %v8209_v0  ;;  %v15435_v1 = vpop.f32.mrf.mxu0 }
 0x387   : > { %v15353_v9 = vpop.f32.mrf.mxu1 }
 0x388   : > { %v15354_v38 = vadd.f32 %v15353_v9, %v15352_v5  ;;  %v15436_v2 = vpop.f32.mrf.mxu0 }
 0x389   : > { %v15355_v10 = vpop.f32.mrf.mxu1  ;;  %v20022_v18 = vadd.f32 %v15436_v2, %v15435_v1  ;;  %v16306_v2 = vld [vmem:[%s22155_s5 + $0x2e4] ss:$16 sps:$4 sm:$0xff]  }
 0x38a   : > { %v20020_v54 = vadd.f32 %v15354_v38, %v8214_v55  ;;  %v15494_v62 = vpop.f32.mrf.mxu0  ;;  %12539 = vmatprep.subr.bf16.mxu0 %v16306_v2 }
 0x38b   : > { %v15356_v25 = vpop.f32.mrf.mxu1  ;;  %12540 = vmatpush1.bf16.msra.mxu0 %v16304_v51  ;;  %v16336_v51 = vld [vmem:[%s22155_s5 + $0x244] ss:$16 sps:$4 sm:$0xff]  }
 0x38c   : > { %v15357_v50 = vadd.f32 %v15356_v25, %v15355_v10  ;;  %v15495_v19 = vpop.f32.mrf.mxu0  ;;  %v16301_v10 = vld [vmem:[%s22155_s5 + $0xe0] ss:$16 sps:$4 sm:$0xff]  }
 0x38d   : > { %v15374_v61 = vpop.f32.mrf.mxu1  ;;  %v20026_v0 = vadd.f32 %v15495_v19, %v15494_v62  ;;  %12499 = vmatpush1.bf16.msra.mxu1 %v16301_v10 }
 0x38e   : > { %v20024_v15 = vadd.f32 %v15357_v50, %v8217_v37  ;;  %v15497_v28 = vpop.f32.mrf.mxu0  ;;  %v16312_v50 = vld [vmem:[%s22155_s5 + $0x2c4] ss:$16 sps:$4 sm:$0xff]  }
 0x38f   : > { %v15375_v53 = vpop.f32.mrf.mxu1  ;;  %12541 = vmatprep.subr.bf16.mxu0 %v16312_v50 }
 0x390   : > { %v15376_v32 = vadd.f32 %v15375_v53, %v15374_v61  ;;  %v15498_v3 = vpop.f32.mrf.mxu0  ;;  %v16307_v61 = vld [vmem:[%s22155_s5 + $0xc0] ss:$16 sps:$4 sm:$0xff]   ;;  %v16315_v53 = vld [vmem:[%s22155_s5 + $0xa4] ss:$16 sps:$4 sm:$0xff]  }
 0x391   : > { %v15377_v26 = vpop.f32.mrf.mxu1  ;;  %v20028_v34 = vadd.f32 %v15498_v3, %v15497_v28  ;;  %v16318_v3 = vld [vmem:[%s22155_s5 + $0x2a4] ss:$16 sps:$4 sm:$0xff]  }
 0x392   : > { %v20030_v55 = vadd.f32 %v15376_v32, %v8255_v35  ;;  %v15500_v11 = vpop.f32.mrf.mxu0 }
 0x393   : > { %v15378_v63 = vpop.f32.mrf.mxu1 }
 0x394   : > { %v15379_v59 = vadd.f32 %v15378_v63, %v15377_v26  ;;  %v15501_v39 = vpop.f32.mrf.mxu0 }
 0x395   : > { %v15380_v43 = vpop.f32.mrf.mxu1  ;;  %v20032_v13 = vadd.f32 %v15501_v39, %v15500_v11 }
 0x396   : > { %v20034_v37 = vadd.f32 %v15379_v59, %v8258_v12  ;;  %v15503_v6 = vpop.f32.mrf.mxu0  ;;  %v16313_v59 = vld [vmem:[%s22155_s5 + $0xa0] ss:$16 sps:$4 sm:$0xff]  }
 0x397   : > { %v15381_v36 = vpop.f32.mrf.mxu1 }
 0x398   : > { %v15382_v27 = vadd.f32 %v15381_v36, %v15380_v43  ;;  %v15504_v49 = vpop.f32.mrf.mxu0 }
 0x399   : > { %v15383_v29 = vpop.f32.mrf.mxu1  ;;  %v20036_v16 = vadd.f32 %v15504_v49, %v15503_v6  ;;  %v16316_v6 = vld [vmem:[%s22155_s5 + $0x2a0] ss:$16 sps:$4 sm:$0xff]   ;;  %v16324_v49 = vld [vmem:[%s22155_s5 + $0x284] ss:$16 sps:$4 sm:$0xff]  }
 0x39a   : > { %v20038_v40 = vadd.f32 %v15382_v27, %v8263_v20 }
 0x39b   : > { %v15506_v35 = vpop.f32.mrf.mxu0  ;;  %v15384_v17 = vpop.f32.mrf.mxu1 }
 0x39c   : > { %v15385_v7 = vadd.f32 %v15384_v17, %v15383_v29  ;;  %v16319_v17 = vld [vmem:[%s22155_s5 + $0x80] ss:$16 sps:$4 sm:$0xff]  }
 0x39d   : > { %v15507_v14 = vpop.f32.mrf.mxu0 }
 0x39e   : > { %v20042_v56 = vadd.f32 %v15507_v14, %v15506_v35  ;;  %v8331_v12 = vadd.f32 %v15385_v7, %v8266_v22 }
 0x39f   : > { %v15509_v47 = vpop.f32.mrf.mxu0  ;;  %v15386_v4 = vpop.f32.mrf.mxu1 }
 0x3a0   : > { %v20044_v52 = vadd.f32 %v15425_v44, %v8331_v12  ;;  %v16322_v44 = vld [vmem:[%s22155_s5 + $0x280] ss:$16 sps:$4 sm:$0xff]   ;;  %v16327_v12 = vld [vmem:[%s22155_s5 + $0x64] ss:$16 sps:$4 sm:$0xff]  }
 0x3a1   : > { %v15510_v5 = vpop.f32.mrf.mxu0  ;;  %v15387_v24 = vpop.f32.mrf.mxu1 }
 0x3a2   : > { %v20046_v9 = vadd.f32 %v15510_v5, %v15509_v47  ;;  %v15388_v20 = vadd.f32 %v15387_v24, %v15386_v4  ;;  %v16330_v4 = vld [vmem:[%s22155_s5 + $0x264] ss:$16 sps:$4 sm:$0xff]  }
 0x3a3   : > { %v15389_v1 = vpop.f32.mrf.mxu1 }
 0x3a4   : > { %v8336_v38 = vadd.f32 %v15388_v20, %v8271_v46  ;;  %v16309_v46 = vld [vmem:[%s22155_s5 + $0xc4] ss:$16 sps:$4 sm:$0xff]  }
 0x3a5   : > { %v15390_v22 = vpop.f32.mrf.mxu1  ;;  %12500 = vmatprep.subr.bf16.mxu1 %v16309_v46 }
 0x3a6   : > { %v15391_v25 = vadd.f32 %v15390_v22, %v15389_v1  ;;  %v20064_v62 = vadd.f32 %v19967_v41, %v8336_v38  ;;  %v16310_v41 = vld [vmem:[%s22155_s5 + $0x2c0] ss:$16 sps:$4 sm:$0xff]   ;;  %12501 = vmatpush1.bf16.msra.mxu1 %v16307_v61 }
 0x3a7   : > { %12542 = vmatpush1.bf16.msra.mxu0 %v16310_v41  ;;  %12502 = vmatprep.subr.bf16.mxu1 %v16315_v53  ;;  %v16325_v1 = vld [vmem:[%s22155_s5 + $0x60] ss:$16 sps:$4 sm:$0xff]  }
 0x3a8   : > { %v15392_v19 = vpop.f32.mrf.mxu1  ;;  %v8339_v28 = vadd.f32 %v15391_v25, %v20016_v58  ;;  %12543 = vmatprep.subr.bf16.mxu0 %v16318_v3  ;;  %v16331_v25 = vld [vmem:[%s22155_s5 + $0x40] ss:$16 sps:$4 sm:$0xff]  }
 0x3aa   : > { %v15393_v32 = vpop.f32.mrf.mxu1  ;;  %v20083_v58 = vadd.f32 %v19972_v60, %v8339_v28  ;;  %v16321_v60 = vld [vmem:[%s22155_s5 + $0x84] ss:$16 sps:$4 sm:$0xff]   ;;  %12503 = vmatpush1.bf16.msra.mxu1 %v16313_v59 }
 0x3ab   : > { %v15394_v11 = vadd.f32 %v15393_v32, %v15392_v19  ;;  %12544 = vmatpush1.bf16.msra.mxu0 %v16316_v6  ;;  %12504 = vmatprep.subr.bf16.mxu1 %v16321_v60 }
 0x3ac   : > { %v15512_v26 = vpop.f32.mrf.mxu0  ;;  %v15395_v63 = vpop.f32.mrf.mxu1  ;;  %12545 = vmatprep.subr.bf16.mxu0 %v16324_v49 }
 0x3ad   : > { %v8344_v43 = vadd.f32 %v15394_v11, %v20020_v54 }
 0x3ae   : > { %v15513_v39 = vpop.f32.mrf.mxu0  ;;  %v15396_v27 = vpop.f32.mrf.mxu1  ;;  %12505 = vmatpush1.bf16.msra.mxu1 %v16319_v17  ;;  %v16346_v17 = vld [vmem:[%s22155_s5 + $0x200] ss:$16 sps:$4 sm:$0xff]  }
 0x3af   : > { %v20095_v36 = vadd.f32 %v15513_v39, %v15512_v26  ;;  %v15397_v54 = vadd.f32 %v15396_v27, %v15395_v63  ;;  %v20101_v35 = vadd.f32 %v20018_v31, %v8344_v43  ;;  %12546 = vmatpush1.bf16.msra.mxu0 %v16322_v44  ;;  %12506 = vmatprep.subr.bf16.mxu1 %v16327_v12  ;;  %v16337_v26 = vld [vmem:[%s22155_s5 + $0x20] ss:$16 sps:$4 sm:$0xff]   ;;  %v16354_v44 = vld [vmem:[%s22155_s5 + $0x3e4] ss:$16 sps:$4 sm:$0xff]  }
 0x3b0   : > { %v15515_v29 = vpop.f32.mrf.mxu0  ;;  %12547 = vmatprep.subr.bf16.mxu0 %v16330_v4  ;;  %v16343_v27 = vld [vmem:[%s22155_s5] ss:$16 sps:$4 sm:$0xff]  }
 0x3b1   : > { %v8347_v14 = vadd.f32 %v15397_v54, %v20024_v15  ;;  %v15416_v15 = vadd.f32 %v19710_v23, %v19689_v33  ;;  %v16328_v33 = vld [vmem:[%s22155_s5 + $0x260] ss:$16 sps:$4 sm:$0xff]   ;;  %v16333_v23 = vld [vmem:[%s22155_s5 + $0x44] ss:$16 sps:$4 sm:$0xff]  }
 0x3b2   : > { %v15516_v7 = vpop.f32.mrf.mxu0  ;;  %v15454_v47 = vpop.f32.mrf.mxu1  ;;  %12507 = vmatpush1.bf16.msra.mxu1 %v16325_v1  ;;  %v16349_v4 = vld [vmem:[%s22155_s5 + $0x1e0] ss:$16 sps:$4 sm:$0xff]  }
 0x3b3   : > { %v20113_v31 = vadd.f32 %v15516_v7, %v15515_v29  ;;  %v20123_v24 = vadd.f32 %v20022_v18, %v8347_v14  ;;  %v8385_v10 = vadd.f32 %v15416_v15, %v20030_v55  ;;  %v15419_v55 = vadd.f32 %v19777_v21, %v19753_v42  ;;  %12548 = vmatpush1.bf16.msra.mxu0 %v16328_v33  ;;  %v16334_v42 = vld [vmem:[%s22155_s5 + $0x240] ss:$16 sps:$4 sm:$0xff]   ;;  %v16339_v21 = vld [vmem:[%s22155_s5 + $0x24] ss:$16 sps:$4 sm:$0xff]  }
 0x3b4   : > { %v20120_v5 = vpop.f32.mrf.mxu0  ;;  %v15455_v20 = vpop.f32.mrf.mxu1  ;;  %12508 = vmatprep.subr.bf16.mxu1 %v16333_v23  ;;  %12549 = vmatprep.subr.bf16.mxu0 %v16336_v51  ;;  %v16351_v7 = vld [vmem:[%s22155_s5 + $0x1e4] ss:$16 sps:$4 sm:$0xff]  }
 0x3b5   : > { %v15456_v57 = vadd.f32 %v15455_v20, %v15454_v47  ;;  %v8388_v19 = vadd.f32 %v15419_v55, %v20034_v37  ;;  %v16342_v37 = vld [vmem:[%s22155_s5 + $0x224] ss:$16 sps:$4 sm:$0xff]   ;;  %v16355_v55 = vld [vmem:[%s22155_s5 + $0x1c0] ss:$16 sps:$4 sm:$0xff]  }
 0x3b6   : > { %v20128_v38 = vpop.f32.mrf.mxu0  ;;  %v15457_v18 = vpop.f32.mrf.mxu1  ;;  %12509 = vmatpush1.bf16.msra.mxu1 %v16331_v25  ;;  %v16360_v23 = vld [vmem:[%s22155_s5 + $0x3c4] ss:$16 sps:$4 sm:$0xff]  }
 0x3b7   : > { %v8450_v2 = vadd.f32 %v15456_v57, %v8385_v10  ;;  %12550 = vmatpush1.bf16.msra.mxu0 %v16334_v42  ;;  %12510 = vmatprep.subr.bf16.mxu1 %v16339_v21  ;;  %v16352_v10 = vld [vmem:[%s22155_s5 + $0x3e0] ss:$16 sps:$4 sm:$0xff]   ;;  %v16366_v21 = vld [vmem:[%s22155_s5 + $0x3a4] ss:$16 sps:$4 sm:$0xff]  }
 0x3b8   : > { %v20142_v22 = vpop.f32.mrf.mxu0  ;;  %v15458_v46 = vpop.f32.mrf.mxu1  ;;  %12551 = vmatprep.subr.bf16.mxu0 %v16342_v37  ;;  %v16361_v37 = vld [vmem:[%s22155_s5 + $0x1a0] ss:$16 sps:$4 sm:$0xff]  }
 0x3b9   : > { %v15459_v61 = vadd.f32 %v15458_v46, %v15457_v18  ;;  %v20151_v28 = vadd.f32 %v20026_v0, %v8450_v2  ;;  %v15422_v0 = vadd.f32 %v19797_v30, %v19785_v8  ;;  %v16340_v8 = vld [vmem:[%s22155_s5 + $0x220] ss:$16 sps:$4 sm:$0xff]   ;;  %v16345_v30 = vld [vmem:[%s22155_s5 + $0x4] ss:$16 sps:$4 sm:$0xff]  }
 0x3ba   : > { %v20147_v50 = vpop.f32.mrf.mxu0  ;;  %v15460_v41 = vpop.f32.mrf.mxu1  ;;  %12511 = vmatpush1.bf16.msra.mxu1 %v16337_v26 }
 0x3bb   : > { %v8453_v32 = vadd.f32 %v15459_v61, %v8388_v19  ;;  %v8393_v63 = vadd.f32 %v15422_v0, %v20038_v40  ;;  %v16348_v40 = vld [vmem:[%s22155_s5 + $0x204] ss:$16 sps:$4 sm:$0xff]   ;;  %12552 = vmatpush1.bf16.msra.mxu0 %v16340_v8  ;;  %12512 = vmatprep.subr.bf16.mxu1 %v16345_v30  ;;  %v16358_v19 = vld [vmem:[%s22155_s5 + $0x3c0] ss:$16 sps:$4 sm:$0xff]  }
 0x3bc   : > { %v20164_v53 = vpop.f32.mrf.mxu0  ;;  %v15461_v3 = vpop.f32.mrf.mxu1  ;;  %12553 = vmatprep.subr.bf16.mxu0 %v16348_v40  ;;  %v16367_v8 = vld [vmem:[%s22155_s5 + $0x180] ss:$16 sps:$4 sm:$0xff]  }
 0x3bd   : > { %v15462_v59 = vadd.f32 %v15461_v3, %v15460_v41  ;;  %v20173_v39 = vadd.f32 %v20028_v34, %v8453_v32  ;;  %v16364_v3 = vld [vmem:[%s22155_s5 + $0x3a0] ss:$16 sps:$4 sm:$0xff]  }
 0x3be   : > { %v20169_v11 = vpop.f32.mrf.mxu0  ;;  %v15463_v43 = vpop.f32.mrf.mxu1  ;;  %12513 = vmatpush1.bf16.msra.mxu1 %v16343_v27  ;;  %v16370_v40 = vld [vmem:[%s22155_s5 + $0x380] ss:$16 sps:$4 sm:$0xff]  }
 0x3bf   : > { %v8458_v34 = vadd.f32 %v15462_v59, %v8393_v63  ;;  %12554 = vmatpush1.bf16.msra.mxu0 %v16346_v17  ;;  %12514 = vmatprep.subr.bf16.mxu1 %v16351_v7  ;;  %v16372_v63 = vld [vmem:[%s22155_s5 + $0x384] ss:$16 sps:$4 sm:$0xff]   ;;  %v16376_v7 = vld [vmem:[%s22155_s5 + $0x360] ss:$16 sps:$4 sm:$0xff]  }
 0x3c0   : > { %v20184_v6 = vpop.f32.mrf.mxu0  ;;  %v15464_v60 = vpop.f32.mrf.mxu1  ;;  %12555 = vmatprep.subr.bf16.mxu0 %v16354_v44  ;;  %v16384_v44 = vld [vmem:[%s22155_s5 + $0x344] ss:$16 sps:$4 sm:$0xff]  }
 0x3c1   : > { %v15465_v29 = vadd.f32 %v15464_v60, %v15463_v43  ;;  %v20192_v54 = vadd.f32 %v20032_v13, %v8458_v34  ;;  %v16378_v60 = vld [vmem:[%s22155_s5 + $0x364] ss:$16 sps:$4 sm:$0xff]  }
 0x3c2   : > { %v20189_v49 = vpop.f32.mrf.mxu0  ;;  %v15466_v14 = vpop.f32.mrf.mxu1  ;;  %12515 = vmatpush2.bf16.msra.mxu1 %v16349_v4 }
 0x3c3   : > { %v8461_v13 = vadd.f32 %v15465_v29, %v20044_v52  ;;  %v16357_v52 = vld [vmem:[%s22155_s5 + $0x1c4] ss:$16 sps:$4 sm:$0xff]   ;;  %12556 = vmatpush2.bf16.msra.mxu0 %v16352_v10  ;;  %v16373_v29 = vld [vmem:[%s22155_s5 + $0x160] ss:$16 sps:$4 sm:$0xff]  }
 0x3c4   : > { %v15586_v12 = vpop.f32.mrf.mxu0  ;;  %v15467_v47 = vpop.f32.mrf.mxu1  ;;  %12516 = vmatprep.subr.bf16.mxu1 %v16357_v52  ;;  %12557 = vmatprep.subr.bf16.mxu0 %v16360_v23  ;;  %v16385_v10 = vld [vmem:[%s22155_s5 + $0x120] ss:$16 sps:$4 sm:$0xff]  }
 0x3c5   : > { %v15468_v20 = vadd.f32 %v15467_v47, %v15466_v14  ;;  %v20208_v1 = vadd.f32 %v20036_v16, %v8461_v13  ;;  %v16382_v13 = vld [vmem:[%s22155_s5 + $0x340] ss:$16 sps:$4 sm:$0xff]   ;;  %v16387_v47 = vld [vmem:[%s22155_s5 + $0x124] ss:$16 sps:$4 sm:$0xff]  }
 0x3c6   : > { %v15587_v15 = vpop.f32.mrf.mxu0  ;;  %v15469_v33 = vpop.f32.mrf.mxu1  ;;  %12517 = vmatpush2.bf16.msra.mxu1 %v16355_v55  ;;  %v16388_v52 = vld [vmem:[%s22155_s5 + $0x320] ss:$16 sps:$4 sm:$0xff]  }
 0x3c7   : > { %v20216_v57 = vadd.f32 %v15587_v15, %v15586_v12  ;;  %v8466_v18 = vadd.f32 %v15468_v20, %v20064_v62  ;;  %v16363_v62 = vld [vmem:[%s22155_s5 + $0x1a4] ss:$16 sps:$4 sm:$0xff]   ;;  %12558 = vmatpush2.bf16.msra.mxu0 %v16358_v19  ;;  %v16394_v55 = vld [vmem:[%s22155_s5 + $0x300] ss:$16 sps:$4 sm:$0xff]  }
 0x3c8   : > { %v15589_v16 = vpop.f32.mrf.mxu0  ;;  %v15470_v51 = vpop.f32.mrf.mxu1  ;;  %12518 = vmatprep.subr.bf16.mxu1 %v16363_v62  ;;  %12559 = vmatprep.subr.bf16.mxu0 %v16366_v21  ;;  %v16390_v15 = vld [vmem:[%s22155_s5 + $0x324] ss:$16 sps:$4 sm:$0xff]  }
 0x3c9   : > { %v15471_v46 = vadd.f32 %v15470_v51, %v15469_v33  ;;  %v20226_v25 = vadd.f32 %v20042_v56, %v8466_v18  ;;  %v16393_v33 = vld [vmem:[%s22155_s5 + $0x104] ss:$16 sps:$4 sm:$0xff]   ;;  %v16391_v51 = vld [vmem:[%s22155_s5 + $0x100] ss:$16 sps:$4 sm:$0xff]  }
 0x3ca   : > { %v15590_v2 = vpop.f32.mrf.mxu0  ;;  %12519 = vmatpush2.bf16.msra.mxu1 %v16361_v37  ;;  %v16402_v19 = vld [vmem:[%s22155_s5 + $0x6e4] ss:$16 sps:$4 sm:$0xff]  }
 0x3cb   : > { %v20234_v61 = vadd.f32 %v15590_v2, %v15589_v16  ;;  %v15472_v42 = vpop.f32.mrf.mxu1  ;;  %v8469_v56 = vadd.f32 %v15471_v46, %v20083_v58  ;;  %v16369_v58 = vld [vmem:[%s22155_s5 + $0x184] ss:$16 sps:$4 sm:$0xff]   ;;  %12560 = vmatpush2.bf16.msra.mxu0 %v16364_v3 }
 0x3cc   : > { %12520 = vmatprep.subr.bf16.mxu1 %v16369_v58  ;;  %12561 = vmatprep.subr.bf16.mxu0 %v16372_v63  ;;  %v16396_v16 = vld [vmem:[%s22155_s5 + $0x304] ss:$16 sps:$4 sm:$0xff]  }
 0x3cd   : > { %v15473_v41 = vpop.f32.mrf.mxu1  ;;  %v20244_v32 = vadd.f32 %v20046_v9, %v8469_v56  ;;  %v16399_v2 = vld [vmem:[%s22155_s5 + $0x4e4] ss:$16 sps:$4 sm:$0xff]  }
 0x3ce   : > { %v15474_v0 = vadd.f32 %v15473_v41, %v15472_v42  ;;  %12521 = vmatpush2.bf16.msra.mxu1 %v16367_v8 }
 0x3cf   : > { %v15475_v26 = vpop.f32.mrf.mxu1  ;;  %12562 = vmatpush2.bf16.msra.mxu0 %v16370_v40 }
 0x3d0   : > { %v8474_v59 = vadd.f32 %v15474_v0, %v20101_v35  ;;  %v16375_v35 = vld [vmem:[%s22155_s5 + $0x164] ss:$16 sps:$4 sm:$0xff]   ;;  %12563 = vmatprep.subr.bf16.mxu0 %v16378_v60 }
 0x3d1   : > { %v15476_v9 = vpop.f32.mrf.mxu1  ;;  %12522 = vmatprep.subr.bf16.mxu1 %v16375_v35 }
 0x3d2   : > { %v15477_v30 = vadd.f32 %v15476_v9, %v15475_v26  ;;  %v20260_v43 = vadd.f32 %v20095_v36, %v8474_v59  ;;  %12523 = vmatpush2.bf16.msra.mxu1 %v16373_v29 }
 0x3d3   : > { %v20268_v34 = vpop.f32.mrf.mxu1  ;;  %12564 = vmatpush2.bf16.msra.mxu0 %v16376_v7 }
 0x3d4   : > { %v8477_v36 = vadd.f32 %v15477_v30, %v20123_v24  ;;  %v16381_v24 = vld [vmem:[%s22155_s5 + $0x144] ss:$16 sps:$4 sm:$0xff]   ;;  %12565 = vmatprep.subr.bf16.mxu0 %v16384_v44 }
 0x3d5   : > { %v20274_v27 = vpop.f32.mrf.mxu1  ;;  %12524 = vmatprep.subr.bf16.mxu1 %v16381_v24 }
 0x3d6   : > { %v20280_v17 = vadd.f32 %v20113_v31, %v8477_v36  ;;  %v16379_v31 = vld [vmem:[%s22155_s5 + $0x140] ss:$16 sps:$4 sm:$0xff]  }
 0x3d7   : > { %v20288_v14 = vpop.f32.mrf.mxu1  ;;  %12525 = vmatpush2.bf16.msra.mxu1 %v16379_v31  ;;  %12566 = vmatpush2.bf16.msra.mxu0 %v16382_v13 }
 0x3d8   : > { %12526 = vmatprep.subr.bf16.mxu1 %v16387_v47  ;;  %12567 = vmatprep.subr.bf16.mxu0 %v16390_v15 }
 0x3d9   : > { %v20293_v12 = vpop.f32.mrf.mxu1 }
 0x3db   : > { %v20304_v4 = vpop.f32.mrf.mxu1  ;;  %12527 = vmatpush2.bf16.msra.mxu1 %v16385_v10  ;;  %12568 = vmatpush2.bf16.msra.mxu0 %v16388_v52 }
 0x3dc   : > { %12528 = vmatprep.subr.bf16.mxu1 %v16393_v33  ;;  %12569 = vmatprep.subr.bf16.mxu0 %v16396_v16 }
 0x3dd   : > { %v20309_v20 = vpop.f32.mrf.mxu1 }
 0x3df   : > { %v20320_v23 = vpop.f32.mrf.mxu1  ;;  %12529 = vmatpush2.bf16.msra.mxu1 %v16391_v51  ;;  %12570 = vmatpush2.bf16.msra.mxu0 %v16394_v55 }
 0x3e0   : > { %12580 = vmatprep.subr.bf16.mxu1 %v16399_v2  ;;  %12621 = vmatprep.subr.bf16.mxu0 %v16402_v19 }
 0x3e1   : > { %v20325_v18 = vpop.f32.mrf.mxu1 }
 0x3e3   : > { %v15546_v46 = vpop.f32.mrf.mxu1 }
 0x3e5   : > { %v15547_v62 = vpop.f32.mrf.mxu1 }
 0x3e6   : > { %v15548_v42 = vadd.f32 %v15547_v62, %v15546_v46  ;;  %v15592_v21 = vpop.f32.mrf.mxu0 }
 0x3e7   : > { %v15549_v56 = vpop.f32.mrf.mxu1 }
 0x3e8   : > { %v8596_v41 = vadd.f32 %v15548_v42, %v20226_v25  ;;  %v15593_v37 = vpop.f32.mrf.mxu0 }
 0x3e9   : > { %v15550_v0 = vpop.f32.mrf.mxu1  ;;  %v15594_v3 = vadd.f32 %v15593_v37, %v15592_v21 }
 0x3ea   : > { %v15551_v58 = vadd.f32 %v15550_v0, %v15549_v56  ;;  %v8661_v26 = vadd.f32 %v20216_v57, %v8596_v41  ;;  %v15595_v63 = vpop.f32.mrf.mxu0 }
 0x3eb   : > { %v15552_v59 = vpop.f32.mrf.mxu1 }
 0x3ec   : > { %v8599_v9 = vadd.f32 %v15551_v58, %v20244_v32  ;;  %v15596_v8 = vpop.f32.mrf.mxu0 }
 0x3ed   : > { %v15553_v30 = vpop.f32.mrf.mxu1  ;;  %v15597_v40 = vadd.f32 %v15596_v8, %v15595_v63 }
 0x3ee   : > { %v15554_v35 = vadd.f32 %v15553_v30, %v15552_v59  ;;  %v8664_v60 = vadd.f32 %v20234_v61, %v8599_v9  ;;  %v20343_v36 = vpop.f32.mrf.mxu0  ;;  %v15536_v9 = vadd.f32 %v20274_v27, %v20268_v34  ;;  %v15576_v34 = vadd.f32 %v20128_v38, %v20120_v5 }
 0x3ef   : > { %v15555_v29 = vpop.f32.mrf.mxu1 }
 0x3f0   : > { %v8604_v25 = vadd.f32 %v15554_v35, %v20260_v43  ;;  %v20346_v7 = vpop.f32.mrf.mxu0 }
 0x3f1   : > { %v15556_v24 = vpop.f32.mrf.mxu1 }
 0x3f2   : > { %v15557_v44 = vadd.f32 %v15556_v24, %v15555_v29  ;;  %v8669_v57 = vadd.f32 %v15594_v3, %v8604_v25  ;;  %v20348_v31 = vpop.f32.mrf.mxu0  ;;  %v8580_v24 = vadd.f32 %v15536_v9, %v20151_v28 }
 0x3f3   : > { %v15614_v13 = vpop.f32.mrf.mxu1 }
 0x3f4   : > { %v8607_v32 = vadd.f32 %v15557_v44, %v20280_v17  ;;  %v20351_v47 = vpop.f32.mrf.mxu0  ;;  %v15539_v44 = vadd.f32 %v20293_v12, %v20288_v14  ;;  %v15542_v14 = vadd.f32 %v20309_v20, %v20304_v4  ;;  %v15545_v4 = vadd.f32 %v20325_v18, %v20320_v23 }
 0x3f5   : > { %v15615_v15 = vpop.f32.mrf.mxu1 }
 0x3f6   : > { %v8672_v10 = vadd.f32 %v15597_v40, %v8607_v32  ;;  %v20353_v61 = vpop.f32.mrf.mxu0  ;;  %v8588_v9 = vadd.f32 %v15542_v14, %v20192_v54  ;;  %v8591_v54 = vadd.f32 %v15545_v4, %v20208_v1 }
 0x3f7   : > { %v15617_v52 = vpop.f32.mrf.mxu1 }
 0x3f8   : > { %v20355_v33 = vpop.f32.mrf.mxu0 }
 0x3f9   : > { %v15618_v43 = vpop.f32.mrf.mxu1 }
 0x3fa   : > { %v20357_v16 = vpop.f32.mrf.mxu0 }
 0x3fb   : > { %v15620_v51 = vpop.f32.mrf.mxu1 }
 0x3fc   : > { %v20359_v55 = vpop.f32.mrf.mxu0 }
 0x3fd   : > { %v15621_v2 = vpop.f32.mrf.mxu1 }
 0x3fe   : > { %v15666_v46 = vpop.f32.mrf.mxu0 }
 0x3ff   : > { %v20361_v19 = vpop.f32.mrf.mxu1 }
 0x400   : > { %v15667_v17 = vpop.f32.mrf.mxu0 }
 0x401   : > { %v15668_v62 = vadd.f32 %v15667_v17, %v15666_v46  ;;  %v20363_v21 = vpop.f32.mrf.mxu1 }
 0x402   : > { %v15669_v42 = vpop.f32.mrf.mxu0 }
 0x404   : > { %v15670_v56 = vpop.f32.mrf.mxu0 }
 0x405   : > { %v15671_v41 = vadd.f32 %v15670_v56, %v15669_v42  ;;  %v15626_v37 = vpop.f32.mrf.mxu1 }
 0x407   : > { %v15627_v0 = vpop.f32.mrf.mxu1 }
 0x408   : > { %v15628_v3 = vadd.f32 %v15627_v0, %v15626_v37  ;;  %v8583_v37 = vadd.f32 %v15539_v44, %v20173_v39  ;;  %v8645_v0 = vadd.f32 %v15576_v34, %v8580_v24  ;;  %v15656_v39 = vadd.f32 %v20346_v7, %v20343_v36 }
 0x409   : > { %v15629_v58 = vpop.f32.mrf.mxu1  ;;  %v15659_v36 = vadd.f32 %v20351_v47, %v20348_v31  ;;  %v15585_v44 = vadd.f32 %v20189_v49, %v20184_v6  ;;  %v15662_v31 = vadd.f32 %v20355_v33, %v20353_v61  ;;  %v15665_v61 = vadd.f32 %v20359_v55, %v20357_v16 }
 0x40a   : > { %v8726_v63 = vadd.f32 %v15628_v3, %v8661_v26 }
 0x40b   : > { %v15630_v59 = vpop.f32.mrf.mxu1  ;;  %v8656_v1 = vadd.f32 %v15585_v44, %v8591_v54 }
 0x40c   : > { %v15631_v8 = vadd.f32 %v15630_v59, %v15629_v58  ;;  %v20367_v30 = vadd.f32 %v15668_v62, %v8726_v63  ;;  %v15616_v62 = vadd.f32 %v15615_v15, %v15614_v13  ;;  %v15579_v58 = vadd.f32 %v20147_v50, %v20142_v22 }
 0x40d   : > { %v15632_v29 = vpop.f32.mrf.mxu1  ;;  %v15619_v13 = vadd.f32 %v15618_v43, %v15617_v52  ;;  %v15622_v52 = vadd.f32 %v15621_v2, %v15620_v51 }
 0x40e   : > { %v8729_v35 = vadd.f32 %v15631_v8, %v8664_v60  ;;  %v8710_v38 = vadd.f32 %v15616_v62, %v8645_v0  ;;  %v8648_v63 = vadd.f32 %v15579_v58, %v8583_v37 }
 0x40f   : > { %v15672_v40 = vpop.f32.mrf.mxu0  ;;  %v15633_v32 = vpop.f32.mrf.mxu1 }
 0x410   : > { %v20372_v46 = vadd.f32 %v15671_v41, %v8729_v35  ;;  %v15634_v17 = vadd.f32 %v15633_v32, %v15632_v29  ;;  %v8775_v22 = vadd.f32 %v15656_v39, %v8710_v38  ;;  %v20407_v39 = vsub.s32 0, %v17366_v45 }
 0x411   : > { %v15673_v25 = vpop.f32.mrf.mxu0  ;;  %v15635_v42 = vpop.f32.mrf.mxu1 }
 0x412   : > { %v15674_v26 = vadd.f32 %v15673_v25, %v15672_v40  ;;  %v8734_v56 = vadd.f32 %v15634_v17, %v8669_v57  ;;  %v8713_v40 = vadd.f32 %v15619_v13, %v8648_v63 }
 0x413   : > { %v15675_v27 = vpop.f32.mrf.mxu0  ;;  %v15636_v28 = vpop.f32.mrf.mxu1 }
 0x414   : > { %v15637_v12 = vadd.f32 %v15636_v28, %v15635_v42  ;;  %v20379_v41 = vadd.f32 %v15674_v26, %v8734_v56  ;;  %v8778_v25 = vadd.f32 %v15659_v36, %v8713_v40 }
 0x415   : > { %v15676_v60 = vpop.f32.mrf.mxu0 }
 0x416   : > { %v15677_v3 = vadd.f32 %v15676_v60, %v15675_v27  ;;  %v8737_v15 = vadd.f32 %v15637_v12, %v8672_v10  ;;  %v15694_v57 = vpop.f32.mrf.mxu1  ;;  %v15582_v10 = vadd.f32 %v20169_v11, %v20164_v53  ;;  %v15625_v53 = vadd.f32 %v20363_v21, %v20361_v19 }
 0x417   : > { %v15868_v5 = vpop.f32.mrf.mxu0 }
 0x418   : > { %v15695_v20 = vpop.f32.mrf.mxu1  ;;  %v20388_v8 = vadd.f32 %v15677_v3, %v8737_v15  ;;  %v8653_v29 = vadd.f32 %v15582_v10, %v8588_v9  ;;  %v8721_v42 = vadd.f32 %v15625_v53, %v8656_v1 }
 0x419   : > { %v8904_v59 = vpop.f32.mrf.mxu0  ;;  %v15696_v50 = vadd.f32 %v15695_v20, %v15694_v57 }
 0x41a   : > { %v15697_v43 = vpop.f32.mrf.mxu1  ;;  %v8718_v32 = vadd.f32 %v15622_v52, %v8653_v29  ;;  %v8786_v63 = vadd.f32 %v15665_v61, %v8721_v42 }
 0x41b   : > { %v8840_v7 = vadd.f32 %v15696_v50, %v8775_v22  ;;  %v15869_v35 = vpop.f32.mrf.mxu0 }
 0x41c   : > { %v15698_v23 = vpop.f32.mrf.mxu1  ;;  %v8783_v6 = vadd.f32 %v15662_v31, %v8718_v32 }
 0x41d   : > { %v8905_v18 = vadd.f32 %v8904_v59, %v8840_v7  ;;  %v15699_v24 = vadd.f32 %v15698_v23, %v15697_v43  ;;  %v8907_v47 = vpop.f32.mrf.mxu0 }
 0x41e   : > { %v15700_v11 = vpop.f32.mrf.mxu1 }
 0x41f   : > { %v8935_v51 = vmax.f32 %v8905_v18, 0.0  ;;  %v8843_v2 = vadd.f32 %v15699_v24, %v8778_v25  ;;  %v20410_v10 = vpop.f32.mrf.mxu0 }
 0x420   : > { %v15701_v26 = vpop.f32.mrf.mxu1 }
 0x421   : > { %v8951_v17 = vcombine.high %v8935_v51, %v8935_v51  ;;  %v8958_v34 = vrot.slane %v8935_v51, %v17370_v48  ;;  %v8908_v27 = vadd.f32 %v8907_v47, %v8843_v2  ;;  %v15702_v62 = vadd.f32 %v15701_v26, %v15700_v11  ;;  %v8920_v47 = vpop.f32.mrf.mxu0 }
 0x422   : > { %v15703_v49 = vpop.f32.mrf.mxu1 }
 0x423   : > { %v8965_v56 = vrot.slane %v8951_v17, %v17370_v48  ;;  %v8966_v19 = vcombine.high %v8958_v34, %v8958_v34  ;;  %v14381_v21 = vrot.slane %v8958_v34, 9  ;;  %v8936_v60 = vmax.f32 %v8908_v27, 0.0 }
 0x424   : > { %v8848_v37 = vadd.f32 %v15702_v62, %v8783_v6  ;;  %v15704_v0 = vpop.f32.mrf.mxu1 }
 0x425   : > { %v8967_v33 = vcombine.high %v8965_v56, %v8965_v56  ;;  %v14382_v28 = vrot.slane %v8966_v19, 9  ;;  %v14383_v3 = vrot.slane %v8965_v56, 9  ;;  %v8968_v14 = vcombine.high %v8936_v60, %v8936_v60 }
 0x426   : > { %v8975_v12 = vrot.slane %v8936_v60, %v17370_v48  ;;  %v8913_v58 = vadd.f32 %v15868_v5, %v8848_v37  ;;  %v15705_v38 = vadd.f32 %v15704_v0, %v15703_v49  ;;  %v15706_v13 = vpop.f32.mrf.mxu1  ;;  %v9215_v57 = vmax.f32 %v8958_v34, %v14381_v21 }
 0x427   : > { %v14384_v15 = vrot.slane %v8967_v33, 9  ;;  %v8982_v59 = vrot.slane %v8968_v14, %v17370_v48  ;;  %v9216_v20 = vmax.f32 %v8966_v19, %v14382_v28  ;;  %v9217_v40 = vmax.f32 %v8965_v56, %v14383_v3 }
 0x428   : > { %v8983_v9 = vcombine.high %v8975_v12, %v8975_v12  ;;  %v14385_v4 = vrot.slane %v8975_v12, 9  ;;  %v8937_v16 = vmax.f32 %v8913_v58, 0.0  ;;  %v15707_v55 = vpop.f32.mrf.mxu1  ;;  %v8851_v22 = vadd.f32 %v15705_v38, %v8786_v63 }
 0x429   : > { %v15708_v50 = vadd.f32 %v15707_v55, %v15706_v13  ;;  %v8984_v5 = vcombine.high %v8982_v59, %v8982_v59  ;;  %v14387_v43 = vrot.slane %v8982_v59, 9  ;;  %v20412_v54 = vmax.f32 %v8967_v33, %v14384_v15 }
 0x42a   : > { %v14386_v52 = vrot.slane %v8983_v9, 9  ;;  %v9219_v36 = vmax.f32 %v8975_v12, %v14385_v4  ;;  %v15709_v7 = vpop.f32.mrf.mxu1  ;;  %v8985_v29 = vcombine.high %v8937_v16, %v8937_v16  ;;  %v8992_v23 = vrot.slane %v8937_v16, %v17370_v48 }
 0x42b   : > { %v8916_v18 = vadd.f32 %v15869_v35, %v8851_v22  ;;  %v14388_v25 = vrot.slane %v8984_v5, 9  ;;  %v9221_v44 = vmax.f32 %v8982_v59, %v14387_v43  ;;  %v8856_v34 = vadd.f32 %v15708_v50, %v20367_v30  ;;  %v15873_v30 = vpop.f32.mrf.mxu0 }
 0x42c   : > { %v9220_v24 = vmax.f32 %v8983_v9, %v14386_v52  ;;  %v9247_v32 = vmax.f32 %v9215_v57, %v9219_v36  ;;  %v15710_v53 = vpop.f32.mrf.mxu1  ;;  %v8999_v11 = vrot.slane %v8985_v29, %v17370_v48  ;;  %v9000_v51 = vcombine.high %v8992_v23, %v8992_v23 }
 0x42d   : > { %v14389_v2 = vrot.slane %v8992_v23, 9  ;;  %v8938_v31 = vmax.f32 %v8916_v18, 0.0  ;;  %v9222_v1 = vmax.f32 %v8984_v5, %v14388_v25  ;;  %v9249_v17 = vmax.f32 %v9217_v40, %v9221_v44  ;;  %v8923_v40 = vpop.f32.mrf.mxu0 }
 0x42e   : > { %v9248_v26 = vmax.f32 %v9216_v20, %v9220_v24  ;;  %v15712_v27 = vpop.f32.mrf.mxu1  ;;  %v9001_v62 = vcombine.high %v8999_v11, %v8999_v11  ;;  %v14390_v42 = vrot.slane %v9000_v51, 9  ;;  %v14391_v35 = vrot.slane %v8999_v11, 9 }
 0x42f   : > { %v9250_v6 = vmax.f32 %v20412_v54, %v9222_v1  ;;  %v9282_v49 = vrot.slane %v9247_v32, %v20407_v39  ;;  %v9223_v56 = vmax.f32 %v8992_v23, %v14389_v2  ;;  %v9002_v19 = vcombine.high %v8938_v31, %v8938_v31 }
 0x430   : > { %v15713_v21 = vpop.f32.mrf.mxu1  ;;  %v9286_v60 = vrot.slane %v9248_v26, %v20407_v39  ;;  %v20421_v37 = vrot.slane %v9249_v17, %v20407_v39  ;;  %v14392_v0 = vrot.slane %v9001_v62, 9  ;;  %v9009_v61 = vrot.slane %v8938_v31, %v17370_v48 }
 0x431   : > { %v9016_v33 = vrot.slane %v9002_v19, %v17370_v48  ;;  %v8921_v28 = vadd.f32 %v8920_v47, %v8856_v34  ;;  %v15711_v3 = vadd.f32 %v15710_v53, %v15709_v7  ;;  %v15714_v14 = vadd.f32 %v15713_v21, %v15712_v27 }
 0x432   : > { %v15715_v12 = vpop.f32.mrf.mxu1  ;;  %v20425_v58 = vmax.f32 %v9000_v51, %v14390_v42  ;;  %v9225_v38 = vmax.f32 %v8999_v11, %v14391_v35  ;;  %v9017_v13 = vcombine.high %v9009_v61, %v9009_v61  ;;  %v14393_v15 = vrot.slane %v9009_v61, 9 }
 0x433   : > { %v9018_v57 = vcombine.high %v9016_v33, %v9016_v33  ;;  %v14395_v63 = vrot.slane %v9016_v33, 9  ;;  %v8939_v59 = vmax.f32 %v8921_v28, 0.0  ;;  %v8859_v9 = vadd.f32 %v15711_v3, %v20372_v46 }
 0x434   : > { %v20428_v4 = vmax.f32 %v9001_v62, %v14392_v0  ;;  %v14394_v16 = vrot.slane %v9017_v13, 9  ;;  %v9227_v55 = vmax.f32 %v9009_v61, %v14393_v15  ;;  %v8864_v20 = vadd.f32 %v15714_v14, %v20379_v41  ;;  %v15716_v43 = vpop.f32.mrf.mxu1 }
 0x435   : > { %v14396_v22 = vrot.slane %v9018_v57, 9  ;;  %v9229_v50 = vmax.f32 %v9016_v33, %v14395_v63  ;;  %v9019_v5 = vcombine.high %v8939_v59, %v8939_v59  ;;  %v9026_v52 = vrot.slane %v8939_v59, %v17370_v48 }
 0x436   : > { %v9228_v36 = vmax.f32 %v9017_v13, %v14394_v16  ;;  %v9251_v7 = vmax.f32 %v9223_v56, %v9227_v55  ;;  %v8924_v54 = vadd.f32 %v8923_v40, %v8859_v9  ;;  %v8929_v29 = vadd.f32 %v20410_v10, %v8864_v20 }
 0x437   : > { %v20433_v23 = vmax.f32 %v9018_v57, %v14396_v22  ;;  %v9253_v46 = vmax.f32 %v9225_v38, %v9229_v50  ;;  %v9033_v18 = vrot.slane %v9019_v5, %v17370_v48  ;;  %v9034_v25 = vcombine.high %v9026_v52, %v9026_v52 }
 0x438   : > { %v9252_v41 = vmax.f32 %v20425_v58, %v9228_v36  ;;  %v14397_v24 = vrot.slane %v9026_v52, 9  ;;  %v8940_v44 = vmax.f32 %v8924_v54, 0.0  ;;  %v15717_v32 = vadd.f32 %v15716_v43, %v15715_v12 }
 0x439   : > { %v9254_v53 = vmax.f32 %v20428_v4, %v20433_v23  ;;  %v9035_v11 = vcombine.high %v9033_v18, %v9033_v18  ;;  %v14398_v51 = vrot.slane %v9034_v25, 9  ;;  %v9294_v2 = vrot.slane %v9250_v6, %v20407_v39 }
 0x43a   : > { %v9298_v10 = vrot.slane %v9251_v7, %v20407_v39  ;;  %v20442_v31 = vrot.slane %v9253_v46, %v20407_v39  ;;  %v14399_v47 = vrot.slane %v9033_v18, 9  ;;  %v9036_v1 = vcombine.high %v8940_v44, %v8940_v44 }
 0x43b   : > { %v14400_v26 = vrot.slane %v9035_v11, 9  ;;  %v9231_v17 = vmax.f32 %v9026_v52, %v14397_v24  ;;  %v9043_v34 = vrot.slane %v8940_v44, %v17370_v48  ;;  %v8941_v27 = vmax.f32 %v8929_v29, 0.0 }
 0x43c   : > { %v9232_v62 = vmax.f32 %v9034_v25, %v14398_v51  ;;  %v9050_v42 = vrot.slane %v9036_v1, %v17370_v48  ;;  %v8867_v35 = vadd.f32 %v15717_v32, %v20388_v8  ;;  %v9343_v56 = vsel %vm4389_vm1, %v9286_v60, %v9282_v49  ;;  %v16397_v1 = vld [vmem:[%s22155_s5 + $0x4e0] ss:$16 sps:$4 sm:$0xff]   ;;  %v17074_v25 = vld [vmem:[%s22157_s7 + $0x28] sm:$0xff]  }
 0x43d   : > { %v9233_v6 = vmax.f32 %v9033_v18, %v14399_v47  ;;  %v9051_v19 = vcombine.high %v9043_v34, %v9043_v34  ;;  %v14401_v21 = vrot.slane %v9043_v34, 9  ;;  %v9053_v0 = vcombine.high %v8941_v27, %v8941_v27 }
 0x43e   : > { %v9052_v61 = vcombine.high %v9050_v42, %v9050_v42  ;;  %v14403_v33 = vrot.slane %v9050_v42, 9  ;;  %v9060_v28 = vrot.slane %v8941_v27, %v17370_v48  ;;  %v8932_v3 = vadd.f32 %v15873_v30, %v8867_v35 }
 0x43f   : > { %v14402_v14 = vrot.slane %v9051_v19, 9  ;;  %v9235_v12 = vmax.f32 %v9043_v34, %v14401_v21  ;;  %v9067_v58 = vrot.slane %v9053_v0, %v17370_v48  ;;  %v9344_v38 = vsel %vm4392_vm2, %v20421_v37, %v9343_v56  ;;  %v16408_v56 = vld [vmem:[%s22155_s5 + $0x6c4] ss:$16 sps:$4 sm:$0xff]  }
 0x440   : > { %v14404_v8 = vrot.slane %v9052_v61, 9  ;;  %v9237_v13 = vmax.f32 %v9050_v42, %v14403_v33  ;;  %v9068_v49 = vcombine.high %v9060_v28, %v9060_v28  ;;  %v14405_v60 = vrot.slane %v9060_v28, 9 }
 0x441   : > { %v9236_v15 = vmax.f32 %v9051_v19, %v14402_v14  ;;  %v9255_v57 = vmax.f32 %v9231_v17, %v9235_v12  ;;  %v9069_v63 = vcombine.high %v9067_v58, %v9067_v58  ;;  %v14407_v59 = vrot.slane %v9067_v58, 9  ;;  %v16411_v14 = vld [vmem:[%s22155_s5 + $0x4a4] ss:$16 sps:$4 sm:$0xff]  }
 0x442   : > { %v9234_v9 = vmax.f32 %v9035_v11, %v14400_v26  ;;  %v9238_v4 = vmax.f32 %v9052_v61, %v14404_v8  ;;  %v9257_v16 = vmax.f32 %v9233_v6, %v9237_v13  ;;  %v14406_v55 = vrot.slane %v9068_v49, 9 }
 0x443   : > { %v9302_v30 = vrot.slane %v9252_v41, %v20407_v39  ;;  %v9256_v20 = vmax.f32 %v9232_v62, %v9236_v15  ;;  %v9314_v40 = vrot.slane %v9255_v57, %v20407_v39  ;;  %v20454_v22 = vmax.f32 %v9060_v28, %v14405_v60  ;;  %v16403_v28 = vld [vmem:[%s22155_s5 + $0x4c0] ss:$16 sps:$4 sm:$0xff]   ;;  %v16414_v60 = vld [vmem:[%s22155_s5 + $0x6a4] ss:$16 sps:$4 sm:$0xff]  }
 0x444   : > { %v9258_v37 = vmax.f32 %v9234_v9, %v9238_v4  ;;  %v14408_v50 = vrot.slane %v9069_v63, 9  ;;  %v20456_v5 = vmax.f32 %v9067_v58, %v14407_v59  ;;  %v8942_v52 = vmax.f32 %v8932_v3, 0.0  ;;  %v16406_v3 = vld [vmem:[%s22155_s5 + $0x6c0] ss:$16 sps:$4 sm:$0xff]  }
 0x445   : > { %v9318_v43 = vrot.slane %v9256_v20, %v20407_v39  ;;  %v9322_v36 = vrot.slane %v9257_v16, %v20407_v39  ;;  %v9240_v7 = vmax.f32 %v9068_v49, %v14406_v55  ;;  %v9345_v54 = vsel %vm4395_vm3, %v9294_v2, %v9344_v38  ;;  %v16409_v55 = vld [vmem:[%s22155_s5 + $0x4a0] ss:$16 sps:$4 sm:$0xff]   ;;  %v16417_v20 = vld [vmem:[%s22155_s5 + $0x484] ss:$16 sps:$4 sm:$0xff]  }
 0x446   : > { %v9070_v29 = vcombine.high %v8942_v52, %v8942_v52  ;;  %v9077_v23 = vrot.slane %v8942_v52, %v17370_v48  ;;  %v9361_v46 = vrot.slane %v9345_v54, 1  ;;  %v9363_v18 = vrot.slane %v9345_v54, 2 }
 0x447   : > { %v20468_v41 = vpack.c.bf16 %v9345_v54, %v9345_v54  ;;  %v9365_v24 = vrot.slane %v9345_v54, 3  ;;  %v9310_v44 = vrot.slane %v9254_v53, %v20407_v39  ;;  %v9346_v32 = vsel %vm4389_vm1, %v9302_v30, %v9298_v10  ;;  %v16400_v53 = vld [vmem:[%s22155_s5 + $0x6e0] ss:$16 sps:$4 sm:$0xff]  }
 0x448   : > { %v9084_v11 = vrot.slane %v9070_v29, %v17370_v48  ;;  %v9085_v51 = vcombine.high %v9077_v23, %v9077_v23  ;;  %v14409_v2 = vrot.slane %v9077_v23, 9  ;;  %v20473_v47 = vpack.c.bf16 %v9361_v46, %v9361_v46  ;;  %v16405_v48 = vld [vmem:[%s22155_s5 + $0x4c4] ss:$16 sps:$4 sm:$0xff]   ;;  %v16412_v30 = vld [vmem:[%s22155_s5 + $0x6a0] ss:$16 sps:$4 sm:$0xff]  }
 0x449   : > { %v20478_v26 = vpack.c.bf16 %v9363_v18, %v9363_v18  ;;  %v20480_v17 = vpack.c.bf16 %v9365_v24, %v9365_v24  ;;  %v9347_v10 = vsel %vm4392_vm2, %v20442_v31, %v9346_v32  ;;  %v9349_v34 = vsel %vm4389_vm1, %v9318_v43, %v9314_v40  ;;  %v16420_v40 = vld [vmem:[%s22155_s5 + $0x684] ss:$16 sps:$4 sm:$0xff]   ;;  %v16418_v43 = vld [vmem:[%s22155_s5 + $0x680] ss:$16 sps:$4 sm:$0xff]  }
 0x44a   : > { %v9086_v27 = vcombine.high %v9084_v11, %v9084_v11  ;;  %v14410_v62 = vrot.slane %v9085_v51, 9  ;;  %v14411_v42 = vrot.slane %v9084_v11, 9  ;;  %v9243_v35 = vmax.f32 %v9077_v23, %v14409_v2  ;;  %14927 = vmatprep.mubr.msk.bf16.mxu1 %vm20464_vm9, %v20473_v47  ;;  %v16421_v54 = vld [vmem:[%s22155_s5 + $0x460] ss:$16 sps:$4 sm:$0xff]   ;;  %v16429_v23 = vld [vmem:[%s22155_s5 + $0x444] ss:$16 sps:$4 sm:$0xff]  }
 0x44b   : > { %14933 = vmatprep.mubr.msk.bf16.mxu0 %vm20464_vm9, %v20480_v17  ;;  %14930 = vmatmul.mubr.msk.bf16.vlgmr.msra.gmra.mxu1 %vm20464_vm9, %v20468_v41  ;;  %v20504_v31 = vsel %vm4395_vm3, %v9310_v44, %v9347_v10  ;;  %v9326_v6 = vrot.slane %v9258_v37, %v20407_v39  ;;  %v9350_v19 = vsel %vm4392_vm2, %v9322_v36, %v9349_v34  ;;  %v16423_v36 = vld [vmem:[%s22155_s5 + $0x464] ss:$16 sps:$4 sm:$0xff]   ;;  %v16424_v29 = vld [vmem:[%s22155_s5 + $0x660] ss:$16 sps:$4 sm:$0xff]  }
 0x44c   : > { %v14412_v21 = vrot.slane %v9086_v27, 9  ;;  %v9244_v0 = vmax.f32 %v9085_v51, %v14410_v62  ;;  %v9245_v61 = vmax.f32 %v9084_v11, %v14411_v42  ;;  %v9259_v33 = vmax.f32 %v20454_v22, %v9243_v35  ;;  %14936 = vmatmul.mubr.msk.bf16.vlgmr.msra.gmra.mxu0 %vm20464_vm9, %v20478_v26  ;;  %12581 = vmatpush1.bf16.msra.mxu1 %v16397_v1  ;;  %v16432_v46 = vld [vmem:[%s22155_s5 + $0x644] ss:$16 sps:$4 sm:$0xff]   ;;  %v16427_v18 = vld [vmem:[%s22155_s5 + $0x440] ss:$16 sps:$4 sm:$0xff]  }
 0x44d   : > { %12622 = vmatpush1.bf16.msra.mxu0 %v16400_v53  ;;  %12582 = vmatprep.subr.bf16.mxu1 %v16405_v48  ;;  %v9368_v12 = vrot.slane %v20504_v31, 1  ;;  %v9372_v58 = vrot.slane %v20504_v31, 3  ;;  %v9242_v38 = vmax.f32 %v9069_v63, %v14408_v50  ;;  %v20532_v59 = vsel %vm4395_vm3, %v9326_v6, %v9350_v19  ;;  %v16430_v24 = vld [vmem:[%s22155_s5 + $0x640] ss:$16 sps:$4 sm:$0xff]   ;;  %v16435_v44 = vld [vmem:[%s22155_s5 + $0x424] ss:$16 sps:$4 sm:$0xff]  }
 0x44e   : > { %v9246_v8 = vmax.f32 %v9086_v27, %v14412_v21  ;;  %v9260_v13 = vmax.f32 %v9240_v7, %v9244_v0  ;;  %v9261_v49 = vmax.f32 %v20456_v5, %v9245_v61  ;;  %12623 = vmatprep.subr.bf16.mxu0 %v16408_v56  ;;  %v9330_v4 = vrot.slane %v9259_v33, %v20407_v39  ;;  %v16415_v5 = vld [vmem:[%s22155_s5 + $0x480] ss:$16 sps:$4 sm:$0xff]   ;;  %v16426_v7 = vld [vmem:[%s22155_s5 + $0x664] ss:$16 sps:$4 sm:$0xff]  }
 0x44f   : > { %v20527_v15 = vpack.c.bf16 %v9368_v12, %v9368_v12  ;;  %v20529_v57 = vpack.c.bf16 %v9372_v58, %v9372_v58  ;;  %v16438_v32 = vld [vmem:[%s22155_s5 + $0x624] ss:$16 sps:$4 sm:$0xff]   ;;  %v16433_v11 = vld [vmem:[%s22155_s5 + $0x420] ss:$16 sps:$4 sm:$0xff]  }
 0x450   : > { %v9262_v9 = vmax.f32 %v9242_v38, %v9246_v8  ;;  %v9334_v63 = vrot.slane %v9260_v13, %v20407_v39  ;;  %v9338_v16 = vrot.slane %v9261_v49, %v20407_v39  ;;  %12583 = vmatpush1.bf16.msra.mxu1 %v16403_v28  ;;  %v16436_v51 = vld [vmem:[%s22155_s5 + $0x620] ss:$16 sps:$4 sm:$0xff]   ;;  %v16441_v2 = vld [vmem:[%s22155_s5 + $0x404] ss:$16 sps:$4 sm:$0xff]  }
 0x451   : > { %12624 = vmatpush1.bf16.msra.mxu0 %v16406_v3  ;;  %12584 = vmatprep.subr.bf16.mxu1 %v16411_v14  ;;  %v16444_v1 = vld [vmem:[%s22155_s5 + $0x604] ss:$16 sps:$4 sm:$0xff]   ;;  %v16439_v53 = vld [vmem:[%s22155_s5 + $0x400] ss:$16 sps:$4 sm:$0xff]  }
 0x452   : > { %14939 = vmatprep.mubr.msk.bf16.mxu1 %vm20464_vm9, %v20527_v15  ;;  %12625 = vmatprep.subr.bf16.mxu0 %v16414_v60  ;;  %v9342_v22 = vrot.slane %v9262_v9, %v20407_v39  ;;  %v9352_v37 = vsel %vm4389_vm1, %v9334_v63, %v9330_v4  ;;  %v16442_v48 = vld [vmem:[%s22155_s5 + $0x600] ss:$16 sps:$4 sm:$0xff]   ;;  %v16447_v10 = vld [vmem:[%s22155_s5 + $0x5e4] ss:$16 sps:$4 sm:$0xff]  }
 0x453   : > { %14945 = vmatprep.mubr.msk.bf16.mxu0 %vm20464_vm9, %v20529_v57  ;;  %v9353_v50 = vsel %vm4392_vm2, %v9338_v16, %v9352_v37  ;;  %v16450_v34 = vld [vmem:[%s22155_s5 + $0x7e4] ss:$16 sps:$4 sm:$0xff]   ;;  %v16445_v27 = vld [vmem:[%s22155_s5 + $0x5e0] ss:$16 sps:$4 sm:$0xff]  }
 0x454   : > { %12585 = vmatpush1.bf16.msra.mxu1 %v16409_v55  ;;  %v20562_v52 = vsel %vm4395_vm3, %v9342_v22, %v9353_v50  ;;  %v16448_v62 = vld [vmem:[%s22155_s5 + $0x7e0] ss:$16 sps:$4 sm:$0xff]   ;;  %v16453_v42 = vld [vmem:[%s22155_s5 + $0x5c4] ss:$16 sps:$4 sm:$0xff]   ;;  %v9370_v50 = vrot.slane %v20504_v31, 2 }
 0x455   : > { %12626 = vmatpush1.bf16.msra.mxu0 %v16412_v30  ;;  %12586 = vmatprep.subr.bf16.mxu1 %v16417_v20  ;;  %v16456_v35 = vld [vmem:[%s22155_s5 + $0x7c4] ss:$16 sps:$4 sm:$0xff]   ;;  %v16451_v56 = vld [vmem:[%s22155_s5 + $0x5c0] ss:$16 sps:$4 sm:$0xff]  }
 0x456   : > { %12627 = vmatprep.subr.bf16.mxu0 %v16420_v40  ;;  %v16454_v6 = vld [vmem:[%s22155_s5 + $0x7c0] ss:$16 sps:$4 sm:$0xff]   ;;  %v16459_v19 = vld [vmem:[%s22155_s5 + $0x5a4] ss:$16 sps:$4 sm:$0xff]  }
 0x457   : > { %v16462_v21 = vld [vmem:[%s22155_s5 + $0x7a4] ss:$16 sps:$4 sm:$0xff]   ;;  %v16457_v0 = vld [vmem:[%s22155_s5 + $0x5a0] ss:$16 sps:$4 sm:$0xff]  }
 0x458   : > { %12587 = vmatpush1.bf16.msra.mxu1 %v16415_v5  ;;  %v16460_v61 = vld [vmem:[%s22155_s5 + $0x7a0] ss:$16 sps:$4 sm:$0xff]   ;;  %v16465_v33 = vld [vmem:[%s22155_s5 + $0x584] ss:$16 sps:$4 sm:$0xff]  }
 0x459   : > { %12628 = vmatpush1.bf16.msra.mxu0 %v16418_v43  ;;  %12588 = vmatprep.subr.bf16.mxu1 %v16423_v36  ;;  %v16468_v28 = vld [vmem:[%s22155_s5 + $0x784] ss:$16 sps:$4 sm:$0xff]   ;;  %v16463_v3 = vld [vmem:[%s22155_s5 + $0x580] ss:$16 sps:$4 sm:$0xff]   ;;  %v9375_v43 = vrot.slane %v20532_v59, 1 }
 0x45a   : > { %12629 = vmatprep.subr.bf16.mxu0 %v16426_v7  ;;  %v16466_v14 = vld [vmem:[%s22155_s5 + $0x780] ss:$16 sps:$4 sm:$0xff]   ;;  %v16471_v12 = vld [vmem:[%s22155_s5 + $0x564] ss:$16 sps:$4 sm:$0xff]   ;;  %v9379_v7 = vrot.slane %v20532_v59, 3 }
 0x45b   : > { %v16474_v58 = vld [vmem:[%s22155_s5 + $0x764] ss:$16 sps:$4 sm:$0xff]   ;;  %v16469_v38 = vld [vmem:[%s22155_s5 + $0x560] ss:$16 sps:$4 sm:$0xff]  }
 0x45c   : > { %12589 = vmatpush1.bf16.msra.mxu1 %v16421_v54  ;;  %v16472_v8 = vld [vmem:[%s22155_s5 + $0x760] ss:$16 sps:$4 sm:$0xff]   ;;  %v16477_v13 = vld [vmem:[%s22155_s5 + $0x544] ss:$16 sps:$4 sm:$0xff]   ;;  %v20725_v54 = vpack.c.bf16 %v20504_v31, %v20504_v31 }
 0x45d   : > { %12630 = vmatpush1.bf16.msra.mxu0 %v16424_v29  ;;  %12590 = vmatprep.subr.bf16.mxu1 %v16429_v23  ;;  %v16480_v49 = vld [vmem:[%s22155_s5 + $0x744] ss:$16 sps:$4 sm:$0xff]   ;;  %v16475_v60 = vld [vmem:[%s22155_s5 + $0x540] ss:$16 sps:$4 sm:$0xff]   ;;  %v20730_v23 = vpack.c.bf16 %v9370_v50, %v9370_v50 }
 0x45e   : > { %12631 = vmatprep.subr.bf16.mxu0 %v16432_v46  ;;  %v16478_v9 = vld [vmem:[%s22155_s5 + $0x740] ss:$16 sps:$4 sm:$0xff]   ;;  %v16483_v4 = vld [vmem:[%s22155_s5 + $0x524] ss:$16 sps:$4 sm:$0xff]  }
 0x45f   : > { %v16486_v63 = vld [vmem:[%s22155_s5 + $0x724] ss:$16 sps:$4 sm:$0xff]   ;;  %v16481_v16 = vld [vmem:[%s22155_s5 + $0x520] ss:$16 sps:$4 sm:$0xff]  }
 0x460   : > { %12591 = vmatpush1.bf16.msra.mxu1 %v16427_v18  ;;  %v16484_v55 = vld [vmem:[%s22155_s5 + $0x720] ss:$16 sps:$4 sm:$0xff]   ;;  %v16489_v30 = vld [vmem:[%s22155_s5 + $0x504] ss:$16 sps:$4 sm:$0xff]   ;;  %v20738_v18 = vpack.c.bf16 %v9375_v43, %v9375_v43 }
 0x461   : > { %12632 = vmatpush1.bf16.msra.mxu0 %v16430_v24  ;;  %12592 = vmatprep.subr.bf16.mxu1 %v16435_v44  ;;  %v16492_v20 = vld [vmem:[%s22155_s5 + $0x704] ss:$16 sps:$4 sm:$0xff]   ;;  %v16487_v40 = vld [vmem:[%s22155_s5 + $0x500] ss:$16 sps:$4 sm:$0xff]   ;;  %v20746_v24 = vpack.c.bf16 %v9379_v7, %v9379_v7 }
 0x462   : > { %12633 = vmatprep.subr.bf16.mxu0 %v16438_v32  ;;  %v16490_v22 = vld [vmem:[%s22155_s5 + $0x700] ss:$16 sps:$4 sm:$0xff]   ;;  %v16495_v37 = vld [vmem:[%s22155_s5 + $0x8e4] ss:$16 sps:$4 sm:$0xff]  }
 0x463   : > { %v16498_v5 = vld [vmem:[%s22155_s5 + $0xae4] ss:$16 sps:$4 sm:$0xff]   ;;  %v16493_v36 = vld [vmem:[%s22155_s5 + $0x8e0] ss:$16 sps:$4 sm:$0xff]  }
 0x464   : > { %12593 = vmatpush1.bf16.msra.mxu1 %v16433_v11  ;;  %v16496_v29 = vld [vmem:[%s22155_s5 + $0xae0] ss:$16 sps:$4 sm:$0xff]   ;;  %v16501_v46 = vld [vmem:[%s22155_s5 + $0x8c4] ss:$16 sps:$4 sm:$0xff]  }
 0x465   : > { %12634 = vmatpush1.bf16.msra.mxu0 %v16436_v51  ;;  %12594 = vmatprep.subr.bf16.mxu1 %v16441_v2  ;;  %v16504_v31 = vld [vmem:[%s22155_s5 + $0xac4] ss:$16 sps:$4 sm:$0xff]   ;;  %v16499_v44 = vld [vmem:[%s22155_s5 + $0x8c0] ss:$16 sps:$4 sm:$0xff]  }
 0x466   : > { %12635 = vmatprep.subr.bf16.mxu0 %v16444_v1  ;;  %v16502_v32 = vld [vmem:[%s22155_s5 + $0xac0] ss:$16 sps:$4 sm:$0xff]   ;;  %v16507_v11 = vld [vmem:[%s22155_s5 + $0x8a4] ss:$16 sps:$4 sm:$0xff]  }
 0x467   : > { %v16510_v51 = vld [vmem:[%s22155_s5 + $0xaa4] ss:$16 sps:$4 sm:$0xff]   ;;  %v16505_v2 = vld [vmem:[%s22155_s5 + $0x8a0] ss:$16 sps:$4 sm:$0xff]  }
 0x468   : > { %12595 = vmatpush1.bf16.msra.mxu1 %v16439_v53  ;;  %v16508_v1 = vld [vmem:[%s22155_s5 + $0xaa0] ss:$16 sps:$4 sm:$0xff]   ;;  %v16513_v53 = vld [vmem:[%s22155_s5 + $0x884] ss:$16 sps:$4 sm:$0xff]  }
 0x469   : > { %12636 = vmatpush1.bf16.msra.mxu0 %v16442_v48  ;;  %12596 = vmatprep.subr.bf16.mxu1 %v16447_v10  ;;  %v16516_v48 = vld [vmem:[%s22155_s5 + $0xa84] ss:$16 sps:$4 sm:$0xff]   ;;  %v16511_v10 = vld [vmem:[%s22155_s5 + $0x880] ss:$16 sps:$4 sm:$0xff]  }
 0x46a   : > { %12637 = vmatprep.subr.bf16.mxu0 %v16450_v34  ;;  %v16514_v34 = vld [vmem:[%s22155_s5 + $0xa80] ss:$16 sps:$4 sm:$0xff]   ;;  %v16570_v43 = vld [vmem:[%s22155_s5 + $0xb64] ss:$16 sps:$4 sm:$0xff]  }
 0x46b   : > { %v16562_v50 = vld [vmem:[%s22155_s5 + $0xb80] ss:$16 sps:$4 sm:$0xff]  }
 0x46c   : > { %12597 = vmatpush2.bf16.msra.mxu1 %v16445_v27  ;;  %v16519_v27 = vld [vmem:[%s22155_s5 + $0x864] ss:$16 sps:$4 sm:$0xff]   ;;  %v16568_v7 = vld [vmem:[%s22155_s5 + $0xb60] ss:$16 sps:$4 sm:$0xff]  }
 0x46d   : > { %12638 = vmatpush2.bf16.msra.mxu0 %v16448_v62  ;;  %12598 = vmatprep.subr.bf16.mxu1 %v16453_v42  ;;  %v16522_v62 = vld [vmem:[%s22155_s5 + $0xa64] ss:$16 sps:$4 sm:$0xff]   ;;  %v16517_v42 = vld [vmem:[%s22155_s5 + $0x860] ss:$16 sps:$4 sm:$0xff]  }
 0x46e   : > { %12639 = vmatprep.subr.bf16.mxu0 %v16456_v35  ;;  %v16520_v35 = vld [vmem:[%s22155_s5 + $0xa60] ss:$16 sps:$4 sm:$0xff]  }
 0x470   : > { %12599 = vmatpush2.bf16.msra.mxu1 %v16451_v56  ;;  %v16525_v56 = vld [vmem:[%s22155_s5 + $0x844] ss:$16 sps:$4 sm:$0xff]  }
 0x471   : > { %12640 = vmatpush2.bf16.msra.mxu0 %v16454_v6  ;;  %12600 = vmatprep.subr.bf16.mxu1 %v16459_v19  ;;  %v16528_v6 = vld [vmem:[%s22155_s5 + $0xa44] ss:$16 sps:$4 sm:$0xff]   ;;  %v16523_v19 = vld [vmem:[%s22155_s5 + $0x840] ss:$16 sps:$4 sm:$0xff]  }
 0x472   : > { %12641 = vmatprep.subr.bf16.mxu0 %v16462_v21  ;;  %v16526_v21 = vld [vmem:[%s22155_s5 + $0xa40] ss:$16 sps:$4 sm:$0xff]  }
 0x474   : > { %12601 = vmatpush2.bf16.msra.mxu1 %v16457_v0  ;;  %v16531_v0 = vld [vmem:[%s22155_s5 + $0x824] ss:$16 sps:$4 sm:$0xff]  }
 0x475   : > { %12642 = vmatpush2.bf16.msra.mxu0 %v16460_v61  ;;  %12602 = vmatprep.subr.bf16.mxu1 %v16465_v33  ;;  %v16534_v61 = vld [vmem:[%s22155_s5 + $0xa24] ss:$16 sps:$4 sm:$0xff]   ;;  %v16529_v33 = vld [vmem:[%s22155_s5 + $0x820] ss:$16 sps:$4 sm:$0xff]  }
 0x476   : > { %12643 = vmatprep.subr.bf16.mxu0 %v16468_v28  ;;  %v16532_v28 = vld [vmem:[%s22155_s5 + $0xa20] ss:$16 sps:$4 sm:$0xff]  }
 0x478   : > { %12603 = vmatpush2.bf16.msra.mxu1 %v16463_v3  ;;  %v16537_v3 = vld [vmem:[%s22155_s5 + $0x804] ss:$16 sps:$4 sm:$0xff]  }
 0x479   : > { %12644 = vmatpush2.bf16.msra.mxu0 %v16466_v14  ;;  %12604 = vmatprep.subr.bf16.mxu1 %v16471_v12  ;;  %v16540_v14 = vld [vmem:[%s22155_s5 + $0xa04] ss:$16 sps:$4 sm:$0xff]   ;;  %v16535_v12 = vld [vmem:[%s22155_s5 + $0x800] ss:$16 sps:$4 sm:$0xff]  }
 0x47a   : > { %12645 = vmatprep.subr.bf16.mxu0 %v16474_v58  ;;  %v16538_v58 = vld [vmem:[%s22155_s5 + $0xa00] ss:$16 sps:$4 sm:$0xff]  }
 0x47c   : > { %12605 = vmatpush2.bf16.msra.mxu1 %v16469_v38  ;;  %v16543_v38 = vld [vmem:[%s22155_s5 + $0x9e4] ss:$16 sps:$4 sm:$0xff]  }
 0x47d   : > { %12646 = vmatpush2.bf16.msra.mxu0 %v16472_v8  ;;  %12606 = vmatprep.subr.bf16.mxu1 %v16477_v13  ;;  %v16546_v8 = vld [vmem:[%s22155_s5 + $0xbe4] ss:$16 sps:$4 sm:$0xff]   ;;  %v16541_v13 = vld [vmem:[%s22155_s5 + $0x9e0] ss:$16 sps:$4 sm:$0xff]  }
 0x47e   : > { %12647 = vmatprep.subr.bf16.mxu0 %v16480_v49  ;;  %v16544_v49 = vld [vmem:[%s22155_s5 + $0xbe0] ss:$16 sps:$4 sm:$0xff]  }
 0x480   : > { %12607 = vmatpush2.bf16.msra.mxu1 %v16475_v60  ;;  %v16549_v60 = vld [vmem:[%s22155_s5 + $0x9c4] ss:$16 sps:$4 sm:$0xff]  }
 0x481   : > { %12648 = vmatpush2.bf16.msra.mxu0 %v16478_v9  ;;  %12608 = vmatprep.subr.bf16.mxu1 %v16483_v4  ;;  %v16552_v9 = vld [vmem:[%s22155_s5 + $0xbc4] ss:$16 sps:$4 sm:$0xff]   ;;  %v16547_v4 = vld [vmem:[%s22155_s5 + $0x9c0] ss:$16 sps:$4 sm:$0xff]  }
 0x482   : > { %12649 = vmatprep.subr.bf16.mxu0 %v16486_v63  ;;  %v16550_v63 = vld [vmem:[%s22155_s5 + $0xbc0] ss:$16 sps:$4 sm:$0xff]  }
 0x484   : > { %12609 = vmatpush2.bf16.msra.mxu1 %v16481_v16  ;;  %v16555_v16 = vld [vmem:[%s22155_s5 + $0x9a4] ss:$16 sps:$4 sm:$0xff]  }
 0x485   : > { %12650 = vmatpush2.bf16.msra.mxu0 %v16484_v55  ;;  %12610 = vmatprep.subr.bf16.mxu1 %v16489_v30  ;;  %v16558_v55 = vld [vmem:[%s22155_s5 + $0xba4] ss:$16 sps:$4 sm:$0xff]   ;;  %v16553_v30 = vld [vmem:[%s22155_s5 + $0x9a0] ss:$16 sps:$4 sm:$0xff]  }
 0x486   : > { %12651 = vmatprep.subr.bf16.mxu0 %v16492_v20  ;;  %v16556_v20 = vld [vmem:[%s22155_s5 + $0xba0] ss:$16 sps:$4 sm:$0xff]  }
 0x488   : > { %12611 = vmatpush2.bf16.msra.mxu1 %v16487_v40  ;;  %v16561_v40 = vld [vmem:[%s22155_s5 + $0x984] ss:$16 sps:$4 sm:$0xff]  }
 0x489   : > { %12652 = vmatpush2.bf16.msra.mxu0 %v16490_v22  ;;  %12662 = vmatprep.subr.bf16.mxu1 %v16495_v37  ;;  %v16564_v22 = vld [vmem:[%s22155_s5 + $0xb84] ss:$16 sps:$4 sm:$0xff]   ;;  %v16559_v37 = vld [vmem:[%s22155_s5 + $0x980] ss:$16 sps:$4 sm:$0xff]  }
 0x48a   : > { %12703 = vmatprep.subr.bf16.mxu0 %v16498_v5  ;;  %v16567_v5 = vld [vmem:[%s22155_s5 + $0x964] ss:$16 sps:$4 sm:$0xff]  }
 0x48b   : > { %14942 = vmatmul.mubr.msk.bf16.vlgmr.msra.gmra.mxu1 %vm20464_vm9, %v20725_v54 }
 0x48c   : > { %14948 = vmatmul.mubr.msk.bf16.vlgmr.msra.gmra.mxu0 %vm20464_vm9, %v20730_v23  ;;  %12663 = vmatpush1.bf16.msra.mxu1 %v16493_v36  ;;  %v16565_v36 = vld [vmem:[%s22155_s5 + $0x960] ss:$16 sps:$4 sm:$0xff]  }
 0x48d   : > { %14951 = vmatprep.mubr.msk.bf16.mxu1 %vm20464_vm9, %v20738_v18  ;;  %12704 = vmatpush1.bf16.msra.mxu0 %v16496_v29  ;;  %v16573_v29 = vld [vmem:[%s22155_s5 + $0x944] ss:$16 sps:$4 sm:$0xff]  }
 0x48e   : > { %14957 = vmatprep.mubr.msk.bf16.mxu0 %vm20464_vm9, %v20746_v24  ;;  %12664 = vmatprep.subr.bf16.mxu1 %v16501_v46  ;;  %v16576_v46 = vld [vmem:[%s22155_s5 + $0xb44] ss:$16 sps:$4 sm:$0xff]  }
 0x48f   : > { %12705 = vmatprep.subr.bf16.mxu0 %v16504_v31  ;;  %v16571_v31 = vld [vmem:[%s22155_s5 + $0x940] ss:$16 sps:$4 sm:$0xff]  }
 0x490   : > { %12665 = vmatpush1.bf16.msra.mxu1 %v16499_v44  ;;  %v16574_v44 = vld [vmem:[%s22155_s5 + $0xb40] ss:$16 sps:$4 sm:$0xff]  }
 0x491   : > { %12706 = vmatpush1.bf16.msra.mxu0 %v16502_v32  ;;  %12666 = vmatprep.subr.bf16.mxu1 %v16507_v11  ;;  %v16579_v32 = vld [vmem:[%s22155_s5 + $0x924] ss:$16 sps:$4 sm:$0xff]  }
 0x492   : > { %12707 = vmatprep.subr.bf16.mxu0 %v16510_v51  ;;  %v16582_v11 = vld [vmem:[%s22155_s5 + $0xb24] ss:$16 sps:$4 sm:$0xff]   ;;  %v16577_v51 = vld [vmem:[%s22155_s5 + $0x920] ss:$16 sps:$4 sm:$0xff]  }
 0x494   : > { %12667 = vmatpush1.bf16.msra.mxu1 %v16505_v2  ;;  %v16580_v2 = vld [vmem:[%s22155_s5 + $0xb20] ss:$16 sps:$4 sm:$0xff]  }
 0x495   : > { %12708 = vmatpush1.bf16.msra.mxu0 %v16508_v1  ;;  %12668 = vmatprep.subr.bf16.mxu1 %v16513_v53  ;;  %v16585_v1 = vld [vmem:[%s22155_s5 + $0x904] ss:$16 sps:$4 sm:$0xff]  }
 0x496   : > { %12709 = vmatprep.subr.bf16.mxu0 %v16516_v48  ;;  %v16588_v53 = vld [vmem:[%s22155_s5 + $0xb04] ss:$16 sps:$4 sm:$0xff]   ;;  %v16583_v48 = vld [vmem:[%s22155_s5 + $0x900] ss:$16 sps:$4 sm:$0xff]  }
 0x498   : > { %12669 = vmatpush1.bf16.msra.mxu1 %v16511_v10  ;;  %v16586_v10 = vld [vmem:[%s22155_s5 + $0xb00] ss:$16 sps:$4 sm:$0xff]  }
 0x499   : > { %12710 = vmatpush1.bf16.msra.mxu0 %v16514_v34  ;;  %12670 = vmatprep.subr.bf16.mxu1 %v16519_v27  ;;  %v16591_v34 = vld [vmem:[%s22155_s5 + $0xce4] ss:$16 sps:$4 sm:$0xff]   ;;  %v9377_v27 = vrot.slane %v20532_v59, 2 }
 0x49a   : > { %12711 = vmatprep.subr.bf16.mxu0 %v16522_v62  ;;  %v16594_v62 = vld [vmem:[%s22155_s5 + $0xee4] ss:$16 sps:$4 sm:$0xff]  }
 0x49c   : > { %12671 = vmatpush1.bf16.msra.mxu1 %v16517_v42  ;;  %v9382_v42 = vrot.slane %v20562_v52, 1 }
 0x49d   : > { %12712 = vmatpush1.bf16.msra.mxu0 %v16520_v35  ;;  %12672 = vmatprep.subr.bf16.mxu1 %v16525_v56  ;;  %v16589_v35 = vld [vmem:[%s22155_s5 + $0xce0] ss:$16 sps:$4 sm:$0xff]   ;;  %v9386_v56 = vrot.slane %v20562_v52, 3 }
 0x49e   : > { %12713 = vmatprep.subr.bf16.mxu0 %v16528_v6  ;;  %v20942_v6 = vpack.c.bf16 %v20532_v59, %v20532_v59  ;;  %v16600_v59 = vld [vmem:[%s22155_s5 + $0xec4] ss:$16 sps:$4 sm:$0xff]  }
 0x4a0   : > { %12673 = vmatpush1.bf16.msra.mxu1 %v16523_v19  ;;  %v16592_v19 = vld [vmem:[%s22155_s5 + $0xee0] ss:$16 sps:$4 sm:$0xff]  }
 0x4a1   : > { %12714 = vmatpush1.bf16.msra.mxu0 %v16526_v21  ;;  %12674 = vmatprep.subr.bf16.mxu1 %v16531_v0  ;;  %v20947_v21 = vpack.c.bf16 %v9377_v27, %v9377_v27  ;;  %v16597_v0 = vld [vmem:[%s22155_s5 + $0xcc4] ss:$16 sps:$4 sm:$0xff]  }
 0x4a2   : > { %12715 = vmatprep.subr.bf16.mxu0 %v16534_v61  ;;  %v20955_v61 = vpack.c.bf16 %v9382_v42, %v9382_v42  ;;  %v16657_v27 = vld [vmem:[%s22155_s5 + $0xd84] ss:$16 sps:$4 sm:$0xff]   ;;  %v16655_v42 = vld [vmem:[%s22155_s5 + $0xd80] ss:$16 sps:$4 sm:$0xff]  }
 0x4a4   : > { %12675 = vmatpush1.bf16.msra.mxu1 %v16529_v33  ;;  %v20963_v33 = vpack.c.bf16 %v9386_v56, %v9386_v56  ;;  %v16663_v56 = vld [vmem:[%s22155_s5 + $0xd64] ss:$16 sps:$4 sm:$0xff]  }
 0x4a5   : > { %12716 = vmatpush1.bf16.msra.mxu0 %v16532_v28  ;;  %12676 = vmatprep.subr.bf16.mxu1 %v16537_v3  ;;  %v16595_v28 = vld [vmem:[%s22155_s5 + $0xcc0] ss:$16 sps:$4 sm:$0xff]  }
 0x4a6   : > { %12717 = vmatprep.subr.bf16.mxu0 %v16540_v14  ;;  %v16598_v3 = vld [vmem:[%s22155_s5 + $0xec0] ss:$16 sps:$4 sm:$0xff]   ;;  %v16603_v14 = vld [vmem:[%s22155_s5 + $0xca4] ss:$16 sps:$4 sm:$0xff]  }
 0x4a8   : > { %12677 = vmatpush1.bf16.msra.mxu1 %v16535_v12  ;;  %v16606_v12 = vld [vmem:[%s22155_s5 + $0xea4] ss:$16 sps:$4 sm:$0xff]  }
 0x4a9   : > { %12718 = vmatpush1.bf16.msra.mxu0 %v16538_v58  ;;  %12678 = vmatprep.subr.bf16.mxu1 %v16543_v38  ;;  %v16601_v58 = vld [vmem:[%s22155_s5 + $0xca0] ss:$16 sps:$4 sm:$0xff]  }
 0x4aa   : > { %12719 = vmatprep.subr.bf16.mxu0 %v16546_v8  ;;  %v16604_v38 = vld [vmem:[%s22155_s5 + $0xea0] ss:$16 sps:$4 sm:$0xff]   ;;  %v16609_v8 = vld [vmem:[%s22155_s5 + $0xc84] ss:$16 sps:$4 sm:$0xff]  }
 0x4ac   : > { %12679 = vmatpush2.bf16.msra.mxu1 %v16541_v13  ;;  %v16612_v13 = vld [vmem:[%s22155_s5 + $0xe84] ss:$16 sps:$4 sm:$0xff]  }
 0x4ad   : > { %12720 = vmatpush2.bf16.msra.mxu0 %v16544_v49  ;;  %12680 = vmatprep.subr.bf16.mxu1 %v16549_v60  ;;  %v16607_v49 = vld [vmem:[%s22155_s5 + $0xc80] ss:$16 sps:$4 sm:$0xff]  }
 0x4ae   : > { %12721 = vmatprep.subr.bf16.mxu0 %v16552_v9  ;;  %v16610_v60 = vld [vmem:[%s22155_s5 + $0xe80] ss:$16 sps:$4 sm:$0xff]   ;;  %v16615_v9 = vld [vmem:[%s22155_s5 + $0xc64] ss:$16 sps:$4 sm:$0xff]  }
 0x4b0   : > { %12681 = vmatpush2.bf16.msra.mxu1 %v16547_v4  ;;  %v16618_v4 = vld [vmem:[%s22155_s5 + $0xe64] ss:$16 sps:$4 sm:$0xff]  }
 0x4b1   : > { %12722 = vmatpush2.bf16.msra.mxu0 %v16550_v63  ;;  %12682 = vmatprep.subr.bf16.mxu1 %v16555_v16  ;;  %v16613_v63 = vld [vmem:[%s22155_s5 + $0xc60] ss:$16 sps:$4 sm:$0xff]  }
 0x4b2   : > { %12723 = vmatprep.subr.bf16.mxu0 %v16558_v55  ;;  %v16616_v16 = vld [vmem:[%s22155_s5 + $0xe60] ss:$16 sps:$4 sm:$0xff]   ;;  %v16621_v55 = vld [vmem:[%s22155_s5 + $0xc44] ss:$16 sps:$4 sm:$0xff]  }
 0x4b4   : > { %12683 = vmatpush2.bf16.msra.mxu1 %v16553_v30  ;;  %v16624_v30 = vld [vmem:[%s22155_s5 + $0xe44] ss:$16 sps:$4 sm:$0xff]  }
 0x4b5   : > { %12724 = vmatpush2.bf16.msra.mxu0 %v16556_v20  ;;  %12684 = vmatprep.subr.bf16.mxu1 %v16561_v40  ;;  %v16619_v20 = vld [vmem:[%s22155_s5 + $0xc40] ss:$16 sps:$4 sm:$0xff]  }
 0x4b6   : > { %12725 = vmatprep.subr.bf16.mxu0 %v16564_v22  ;;  %v16622_v40 = vld [vmem:[%s22155_s5 + $0xe40] ss:$16 sps:$4 sm:$0xff]   ;;  %v16627_v22 = vld [vmem:[%s22155_s5 + $0xc24] ss:$16 sps:$4 sm:$0xff]  }
 0x4b8   : > { %12685 = vmatpush2.bf16.msra.mxu1 %v16559_v37  ;;  %v16630_v37 = vld [vmem:[%s22155_s5 + $0xe24] ss:$16 sps:$4 sm:$0xff]  }
 0x4b9   : > { %12726 = vmatpush2.bf16.msra.mxu0 %v16562_v50  ;;  %12686 = vmatprep.subr.bf16.mxu1 %v16567_v5  ;;  %v16625_v50 = vld [vmem:[%s22155_s5 + $0xc20] ss:$16 sps:$4 sm:$0xff]  }
 0x4ba   : > { %12727 = vmatprep.subr.bf16.mxu0 %v16570_v43  ;;  %v16628_v5 = vld [vmem:[%s22155_s5 + $0xe20] ss:$16 sps:$4 sm:$0xff]   ;;  %v16633_v43 = vld [vmem:[%s22155_s5 + $0xc04] ss:$16 sps:$4 sm:$0xff]  }
 0x4bc   : > { %12687 = vmatpush2.bf16.msra.mxu1 %v16565_v36  ;;  %v16636_v36 = vld [vmem:[%s22155_s5 + $0xe04] ss:$16 sps:$4 sm:$0xff]  }
 0x4bd   : > { %12728 = vmatpush2.bf16.msra.mxu0 %v16568_v7  ;;  %12688 = vmatprep.subr.bf16.mxu1 %v16573_v29  ;;  %v16631_v7 = vld [vmem:[%s22155_s5 + $0xc00] ss:$16 sps:$4 sm:$0xff]  }
 0x4be   : > { %12729 = vmatprep.subr.bf16.mxu0 %v16576_v46  ;;  %v16634_v29 = vld [vmem:[%s22155_s5 + $0xe00] ss:$16 sps:$4 sm:$0xff]   ;;  %v16639_v46 = vld [vmem:[%s22155_s5 + $0xde4] ss:$16 sps:$4 sm:$0xff]  }
 0x4c0   : > { %12689 = vmatpush2.bf16.msra.mxu1 %v16571_v31  ;;  %v16642_v31 = vld [vmem:[%s22155_s5 + $0xfe4] ss:$16 sps:$4 sm:$0xff]  }
 0x4c1   : > { %12730 = vmatpush2.bf16.msra.mxu0 %v16574_v44  ;;  %12690 = vmatprep.subr.bf16.mxu1 %v16579_v32  ;;  %v16637_v44 = vld [vmem:[%s22155_s5 + $0xde0] ss:$16 sps:$4 sm:$0xff]  }
 0x4c2   : > { %12731 = vmatprep.subr.bf16.mxu0 %v16582_v11  ;;  %v16640_v32 = vld [vmem:[%s22155_s5 + $0xfe0] ss:$16 sps:$4 sm:$0xff]   ;;  %v16645_v11 = vld [vmem:[%s22155_s5 + $0xdc4] ss:$16 sps:$4 sm:$0xff]  }
 0x4c4   : > { %12691 = vmatpush2.bf16.msra.mxu1 %v16577_v51  ;;  %v16648_v51 = vld [vmem:[%s22155_s5 + $0xfc4] ss:$16 sps:$4 sm:$0xff]  }
 0x4c5   : > { %12732 = vmatpush2.bf16.msra.mxu0 %v16580_v2  ;;  %12692 = vmatprep.subr.bf16.mxu1 %v16585_v1  ;;  %v16643_v2 = vld [vmem:[%s22155_s5 + $0xdc0] ss:$16 sps:$4 sm:$0xff]  }
 0x4c6   : > { %12733 = vmatprep.subr.bf16.mxu0 %v16588_v53  ;;  %v16646_v1 = vld [vmem:[%s22155_s5 + $0xfc0] ss:$16 sps:$4 sm:$0xff]   ;;  %v16651_v53 = vld [vmem:[%s22155_s5 + $0xda4] ss:$16 sps:$4 sm:$0xff]  }
 0x4c8   : > { %12693 = vmatpush2.bf16.msra.mxu1 %v16583_v48  ;;  %v16654_v48 = vld [vmem:[%s22155_s5 + $0xfa4] ss:$16 sps:$4 sm:$0xff]  }
 0x4c9   : > { %12734 = vmatpush2.bf16.msra.mxu0 %v16586_v10  ;;  %12744 = vmatprep.subr.bf16.mxu1 %v16591_v34  ;;  %v16649_v10 = vld [vmem:[%s22155_s5 + $0xda0] ss:$16 sps:$4 sm:$0xff]  }
 0x4ca   : > { %12785 = vmatprep.subr.bf16.mxu0 %v16594_v62  ;;  %v16652_v34 = vld [vmem:[%s22155_s5 + $0xfa0] ss:$16 sps:$4 sm:$0xff]   ;;  %v16660_v62 = vld [vmem:[%s22155_s5 + $0xf84] ss:$16 sps:$4 sm:$0xff]  }
 0x4cb   : > { %14954 = vmatmul.mubr.msk.bf16.vlgmr.msra.gmra.mxu1 %vm20464_vm9, %v20942_v6 }
 0x4cc   : > { %14960 = vmatmul.mubr.msk.bf16.vlgmr.msra.gmra.mxu0 %vm20464_vm9, %v20947_v21  ;;  %12745 = vmatpush1.bf16.msra.mxu1 %v16589_v35  ;;  %v16658_v35 = vld [vmem:[%s22155_s5 + $0xf80] ss:$16 sps:$4 sm:$0xff]  }
 0x4cd   : > { %14963 = vmatprep.mubr.msk.bf16.mxu1 %vm20464_vm9, %v20955_v61  ;;  %12786 = vmatpush1.bf16.msra.mxu0 %v16592_v19  ;;  %v16666_v19 = vld [vmem:[%s22155_s5 + $0xf64] ss:$16 sps:$4 sm:$0xff]  }
 0x4ce   : > { %14969 = vmatprep.mubr.msk.bf16.mxu0 %vm20464_vm9, %v20963_v33  ;;  %12746 = vmatprep.subr.bf16.mxu1 %v16597_v0  ;;  %v16661_v0 = vld [vmem:[%s22155_s5 + $0xd60] ss:$16 sps:$4 sm:$0xff]  }
 0x4cf   : > { %12787 = vmatprep.subr.bf16.mxu0 %v16600_v59  ;;  %v16664_v59 = vld [vmem:[%s22155_s5 + $0xf60] ss:$16 sps:$4 sm:$0xff]  }
 0x4d0   : > { %12747 = vmatpush1.bf16.msra.mxu1 %v16595_v28  ;;  %v16669_v28 = vld [vmem:[%s22155_s5 + $0xd44] ss:$16 sps:$4 sm:$0xff]  }
 0x4d1   : > { %12788 = vmatpush1.bf16.msra.mxu0 %v16598_v3  ;;  %12748 = vmatprep.subr.bf16.mxu1 %v16603_v14  ;;  %v16672_v3 = vld [vmem:[%s22155_s5 + $0xf44] ss:$16 sps:$4 sm:$0xff]   ;;  %v16667_v14 = vld [vmem:[%s22155_s5 + $0xd40] ss:$16 sps:$4 sm:$0xff]  }
 0x4d2   : > { %12789 = vmatprep.subr.bf16.mxu0 %v16606_v12  ;;  %v16670_v12 = vld [vmem:[%s22155_s5 + $0xf40] ss:$16 sps:$4 sm:$0xff]  }
 0x4d4   : > { %12749 = vmatpush1.bf16.msra.mxu1 %v16601_v58  ;;  %v16675_v58 = vld [vmem:[%s22155_s5 + $0xd24] ss:$16 sps:$4 sm:$0xff]  }
 0x4d5   : > { %12790 = vmatpush1.bf16.msra.mxu0 %v16604_v38  ;;  %12750 = vmatprep.subr.bf16.mxu1 %v16609_v8  ;;  %v16678_v38 = vld [vmem:[%s22155_s5 + $0xf24] ss:$16 sps:$4 sm:$0xff]   ;;  %v16673_v8 = vld [vmem:[%s22155_s5 + $0xd20] ss:$16 sps:$4 sm:$0xff]  }
 0x4d6   : > { %12791 = vmatprep.subr.bf16.mxu0 %v16612_v13  ;;  %v16676_v13 = vld [vmem:[%s22155_s5 + $0xf20] ss:$16 sps:$4 sm:$0xff]  }
 0x4d8   : > { %12751 = vmatpush1.bf16.msra.mxu1 %v16607_v49  ;;  %v16681_v49 = vld [vmem:[%s22155_s5 + $0xd04] ss:$16 sps:$4 sm:$0xff]  }
 0x4d9   : > { %12792 = vmatpush1.bf16.msra.mxu0 %v16610_v60  ;;  %12752 = vmatprep.subr.bf16.mxu1 %v16615_v9  ;;  %v16684_v60 = vld [vmem:[%s22155_s5 + $0xf04] ss:$16 sps:$4 sm:$0xff]   ;;  %v16679_v9 = vld [vmem:[%s22155_s5 + $0xd00] ss:$16 sps:$4 sm:$0xff]  }
 0x4da   : > { %12793 = vmatprep.subr.bf16.mxu0 %v16618_v4  ;;  %v16682_v4 = vld [vmem:[%s22155_s5 + $0xf00] ss:$16 sps:$4 sm:$0xff]  }
 0x4dc   : > { %12753 = vmatpush1.bf16.msra.mxu1 %v16613_v63  ;;  %v16687_v63 = vld [vmem:[%s22155_s5 + $0xec] ss:$16 sps:$4 sm:$0xff]  }
 0x4dd   : > { %12794 = vmatpush1.bf16.msra.mxu0 %v16616_v16  ;;  %12754 = vmatprep.subr.bf16.mxu1 %v16621_v55  ;;  %v9916_v16 = vld [vmem:[%s22156_s6] sm:$0xf]  ;;  %v9384_v55 = vrot.slane %v20562_v52, 2 }
 0x4de   : > { %12795 = vmatprep.subr.bf16.mxu0 %v16624_v30  ;;  %v16690_v30 = vld [vmem:[%s22155_s5 + $0x2ec] ss:$16 sps:$4 sm:$0xff]  }
 0x4e0   : > { %12755 = vmatpush1.bf16.msra.mxu1 %v16619_v20  ;;  %v12484_v20 = vsub.s32 1, %v17366_v45 }
 0x4e1   : > { %12796 = vmatpush1.bf16.msra.mxu0 %v16622_v40  ;;  %12756 = vmatprep.subr.bf16.mxu1 %v16627_v22  ;;  %v16685_v40 = vld [vmem:[%s22155_s5 + $0xe8] ss:$16 sps:$4 sm:$0xff]   ;;  %v12481_v22 = vrot.slane %v9916_v16, %v20407_v39 }
 0x4e2   : > { %12797 = vmatprep.subr.bf16.mxu0 %v16630_v37  ;;  %v21162_v37 = vpack.c.bf16 %v20562_v52, %v20562_v52  ;;  %v16696_v52 = vld [vmem:[%s22155_s5 + $0x2cc] ss:$16 sps:$4 sm:$0xff]  }
 0x4e4   : > { %12757 = vmatpush1.bf16.msra.mxu1 %v16625_v50  ;;  %v16688_v50 = vld [vmem:[%s22155_s5 + $0x2e8] ss:$16 sps:$4 sm:$0xff]  }
 0x4e5   : > { %12798 = vmatpush1.bf16.msra.mxu0 %v16628_v5  ;;  %12758 = vmatprep.subr.bf16.mxu1 %v16633_v43  ;;  %v21167_v5 = vpack.c.bf16 %v9384_v55, %v9384_v55  ;;  %v12485_v43 = vrot.slane %v9916_v16, %v12484_v20  ;;  %v16735_v16 = vld [vmem:[%s22155_s5 + $0x1ec] ss:$16 sps:$4 sm:$0xff]   ;;  %v16736_v20 = vld [vmem:[%s22155_s5 + $0x3e8] ss:$16 sps:$4 sm:$0xff]  }
 0x4e6   : > { %12799 = vmatprep.subr.bf16.mxu0 %v16636_v36  ;;  %v16693_v36 = vld [vmem:[%s22155_s5 + $0xcc] ss:$16 sps:$4 sm:$0xff]  }
 0x4e7   : > { %v16738_v55 = vld [vmem:[%s22155_s5 + $0x3ec] ss:$16 sps:$4 sm:$0xff]  }
 0x4e8   : > { %12759 = vmatpush1.bf16.msra.mxu1 %v16631_v7 }
 0x4e9   : > { %12800 = vmatpush1.bf16.msra.mxu0 %v16634_v29  ;;  %12760 = vmatprep.subr.bf16.mxu1 %v16639_v46  ;;  %v16691_v46 = vld [vmem:[%s22155_s5 + $0xc8] ss:$16 sps:$4 sm:$0xff]  }
 0x4ea   : > { %12801 = vmatprep.subr.bf16.mxu0 %v16642_v31 }
 0x4ec   : > { %12761 = vmatpush2.bf16.msra.mxu1 %v16637_v44  ;;  %v16694_v44 = vld [vmem:[%s22155_s5 + $0x2c8] ss:$16 sps:$4 sm:$0xff]  }
 0x4ed   : > { %12802 = vmatpush2.bf16.msra.mxu0 %v16640_v32  ;;  %12762 = vmatprep.subr.bf16.mxu1 %v16645_v11  ;;  %v16699_v32 = vld [vmem:[%s22155_s5 + $0xac] ss:$16 sps:$4 sm:$0xff]  }
 0x4ee   : > { %12803 = vmatprep.subr.bf16.mxu0 %v16648_v51 }
 0x4f0   : > { %12763 = vmatpush2.bf16.msra.mxu1 %v16643_v2 }
 0x4f1   : > { %12804 = vmatpush2.bf16.msra.mxu0 %v16646_v1  ;;  %12764 = vmatprep.subr.bf16.mxu1 %v16651_v53 }
 0x4f2   : > { %12805 = vmatprep.subr.bf16.mxu0 %v16654_v48 }
 0x4f4   : > { %12765 = vmatpush2.bf16.msra.mxu1 %v16649_v10  ;;  %v16697_v10 = vld [vmem:[%s22155_s5 + $0xa8] ss:$16 sps:$4 sm:$0xff]  }
 0x4f5   : > { %12806 = vmatpush2.bf16.msra.mxu0 %v16652_v34  ;;  %12766 = vmatprep.subr.bf16.mxu1 %v16657_v27  ;;  %v16705_v27 = vld [vmem:[%s22155_s5 + $0x8c] ss:$16 sps:$4 sm:$0xff]  }
 0x4f6   : > { %12807 = vmatprep.subr.bf16.mxu0 %v16660_v62 }
 0x4f8   : > { %12767 = vmatpush2.bf16.msra.mxu1 %v16655_v42  ;;  %v16708_v42 = vld [vmem:[%s22155_s5 + $0x28c] ss:$16 sps:$4 sm:$0xff]  }
 0x4f9   : > { %12808 = vmatpush2.bf16.msra.mxu0 %v16658_v35  ;;  %12768 = vmatprep.subr.bf16.mxu1 %v16663_v56  ;;  %v16703_v35 = vld [vmem:[%s22155_s5 + $0x88] ss:$16 sps:$4 sm:$0xff]  }
 0x4fa   : > { %12809 = vmatprep.subr.bf16.mxu0 %v16666_v19  ;;  %v16706_v56 = vld [vmem:[%s22155_s5 + $0x288] ss:$16 sps:$4 sm:$0xff]   ;;  %v16711_v19 = vld [vmem:[%s22155_s5 + $0x6c] ss:$16 sps:$4 sm:$0xff]  }
 0x4fc   : > { %12769 = vmatpush2.bf16.msra.mxu1 %v16661_v0  ;;  %v16714_v0 = vld [vmem:[%s22155_s5 + $0x26c] ss:$16 sps:$4 sm:$0xff]  }
 0x4fd   : > { %12810 = vmatpush2.bf16.msra.mxu0 %v16664_v59  ;;  %12770 = vmatprep.subr.bf16.mxu1 %v16669_v28  ;;  %v16709_v59 = vld [vmem:[%s22155_s5 + $0x68] ss:$16 sps:$4 sm:$0xff]  }
 0x4fe   : > { %12811 = vmatprep.subr.bf16.mxu0 %v16672_v3  ;;  %v16712_v28 = vld [vmem:[%s22155_s5 + $0x268] ss:$16 sps:$4 sm:$0xff]   ;;  %v16717_v3 = vld [vmem:[%s22155_s5 + $0x4c] ss:$16 sps:$4 sm:$0xff]  }
 0x500   : > { %12771 = vmatpush2.bf16.msra.mxu1 %v16667_v14  ;;  %v16720_v14 = vld [vmem:[%s22155_s5 + $0x24c] ss:$16 sps:$4 sm:$0xff]  }
 0x501   : > { %12812 = vmatpush2.bf16.msra.mxu0 %v16670_v12  ;;  %12772 = vmatprep.subr.bf16.mxu1 %v16675_v58  ;;  %v16715_v12 = vld [vmem:[%s22155_s5 + $0x48] ss:$16 sps:$4 sm:$0xff]  }
 0x502   : > { %12813 = vmatprep.subr.bf16.mxu0 %v16678_v38  ;;  %v16718_v58 = vld [vmem:[%s22155_s5 + $0x248] ss:$16 sps:$4 sm:$0xff]   ;;  %v16723_v38 = vld [vmem:[%s22155_s5 + $0x2c] ss:$16 sps:$4 sm:$0xff]  }
 0x504   : > { %12773 = vmatpush2.bf16.msra.mxu1 %v16673_v8  ;;  %v16726_v8 = vld [vmem:[%s22155_s5 + $0x22c] ss:$16 sps:$4 sm:$0xff]  }
 0x505   : > { %12814 = vmatpush2.bf16.msra.mxu0 %v16676_v13  ;;  %12774 = vmatprep.subr.bf16.mxu1 %v16681_v49  ;;  %v16721_v13 = vld [vmem:[%s22155_s5 + $0x28] ss:$16 sps:$4 sm:$0xff]  }
 0x506   : > { %12815 = vmatprep.subr.bf16.mxu0 %v16684_v60  ;;  %v16724_v49 = vld [vmem:[%s22155_s5 + $0x228] ss:$16 sps:$4 sm:$0xff]   ;;  %v16729_v60 = vld [vmem:[%s22155_s5 + $0xc] ss:$16 sps:$4 sm:$0xff]  }
 0x508   : > { %12775 = vmatpush2.bf16.msra.mxu1 %v16679_v9  ;;  %v16732_v9 = vld [vmem:[%s22155_s5 + $0x20c] ss:$16 sps:$4 sm:$0xff]  }
 0x509   : > { %12816 = vmatpush2.bf16.msra.mxu0 %v16682_v4  ;;  %12826 = vmatprep.subr.bf16.mxu1 %v16687_v63  ;;  %v16727_v4 = vld [vmem:[%s22155_s5 + $0x8] ss:$16 sps:$4 sm:$0xff]  }
 0x50a   : > { %12867 = vmatprep.subr.bf16.mxu0 %v16690_v30  ;;  %v16730_v63 = vld [vmem:[%s22155_s5 + $0x208] ss:$16 sps:$4 sm:$0xff]  }
 0x50b   : > { %14966 = vmatmul.mubr.msk.bf16.vlgmr.msra.gmra.mxu1 %vm20464_vm9, %v21162_v37  ;;  %v12532_v39 = vpop.f32.mrf.mxu1  ;;  %v16733_v30 = vld [vmem:[%s22155_s5 + $0x1e8] ss:$16 sps:$4 sm:$0xff]  }
 0x50c   : > { %14972 = vmatmul.mubr.msk.bf16.vlgmr.msra.gmra.mxu0 %vm20464_vm9, %v21167_v5  ;;  %v12533_v7 = vadd.f32 %v12532_v39, %v12481_v22  ;;  %v12573_v29 = vpop.f32.mrf.mxu0  ;;  %12827 = vmatpush1.bf16.msra.mxu1 %v16685_v40  ;;  %v16741_v40 = vld [vmem:[%s22155_s5 + $0x1cc] ss:$16 sps:$4 sm:$0xff]  }
 0x50d   : > { %14975 = vmatprep.mubr.msk.bf16.mxu1 %vm20464_vm9, %v20473_v47  ;;  %12868 = vmatpush1.bf16.msra.mxu0 %v16688_v50  ;;  %v12534_v31 = vpop.f32.mrf.mxu1  ;;  %v16702_v47 = vld [vmem:[%s22155_s5 + $0x2ac] ss:$16 sps:$4 sm:$0xff]   ;;  %v16739_v50 = vld [vmem:[%s22155_s5 + $0x1c8] ss:$16 sps:$4 sm:$0xff]  }
 0x50e   : > { %v21193_v11 = vadd.f32 %v12573_v29, %v12533_v7  ;;  %14981 = vmatprep.mubr.msk.bf16.mxu0 %vm20464_vm9, %v20480_v17  ;;  %v12535_v51 = vadd.f32 %v12534_v31, %v12485_v43  ;;  %v12575_v2 = vpop.f32.mrf.mxu0  ;;  %12828 = vmatprep.subr.bf16.mxu1 %v16693_v36  ;;  %v16700_v17 = vld [vmem:[%s22155_s5 + $0x2a8] ss:$16 sps:$4 sm:$0xff]   ;;  %v16744_v22 = vld [vmem:[%s22155_s5 + $0x3cc] ss:$16 sps:$4 sm:$0xff]  }
 0x50f   : > { %12869 = vmatprep.subr.bf16.mxu0 %v16696_v52  ;;  %v12536_v1 = vpop.f32.mrf.mxu1  ;;  %v16742_v43 = vld [vmem:[%s22155_s5 + $0x3c8] ss:$16 sps:$4 sm:$0xff]   ;;  %v16747_v36 = vld [vmem:[%s22155_s5 + $0x1ac] ss:$16 sps:$4 sm:$0xff]  }
 0x510   : > { %v21201_v53 = vadd.f32 %v12575_v2, %v12535_v51  ;;  %v12577_v48 = vpop.f32.mrf.mxu0  ;;  %12829 = vmatpush1.bf16.msra.mxu1 %v16691_v46  ;;  %v16750_v39 = vld [vmem:[%s22155_s5 + $0x3ac] ss:$16 sps:$4 sm:$0xff]   ;;  %v16745_v52 = vld [vmem:[%s22155_s5 + $0x1a8] ss:$16 sps:$4 sm:$0xff]  }
 0x511   : > { %12870 = vmatpush1.bf16.msra.mxu0 %v16694_v44  ;;  %v12537_v34 = vpop.f32.mrf.mxu1  ;;  %12830 = vmatprep.subr.bf16.mxu1 %v16699_v32  ;;  %v16748_v7 = vld [vmem:[%s22155_s5 + $0x3a8] ss:$16 sps:$4 sm:$0xff]   ;;  %v16753_v29 = vld [vmem:[%s22155_s5 + $0x18c] ss:$16 sps:$4 sm:$0xff]  }
 0x512   : > { %v12578_v62 = vpop.f32.mrf.mxu0  ;;  %12871 = vmatprep.subr.bf16.mxu0 %v16702_v47  ;;  %v16756_v46 = vld [vmem:[%s22155_s5 + $0x38c] ss:$16 sps:$4 sm:$0xff]   ;;  %v16751_v31 = vld [vmem:[%s22155_s5 + $0x188] ss:$16 sps:$4 sm:$0xff]  }
 0x513   : > { %v16754_v44 = vld [vmem:[%s22155_s5 + $0x388] ss:$16 sps:$4 sm:$0xff]   ;;  %v16759_v32 = vld [vmem:[%s22155_s5 + $0x16c] ss:$16 sps:$4 sm:$0xff]  }
 0x514   : > { %12831 = vmatpush1.bf16.msra.mxu1 %v16697_v10  ;;  %v16762_v51 = vld [vmem:[%s22155_s5 + $0x36c] ss:$16 sps:$4 sm:$0xff]   ;;  %v16757_v2 = vld [vmem:[%s22155_s5 + $0x168] ss:$16 sps:$4 sm:$0xff]  }
 0x515   : > { %12872 = vmatpush1.bf16.msra.mxu0 %v16700_v17  ;;  %12832 = vmatprep.subr.bf16.mxu1 %v16705_v27  ;;  %v16760_v47 = vld [vmem:[%s22155_s5 + $0x368] ss:$16 sps:$4 sm:$0xff]   ;;  %v16765_v1 = vld [vmem:[%s22155_s5 + $0x14c] ss:$16 sps:$4 sm:$0xff]  }
 0x516   : > { %12873 = vmatprep.subr.bf16.mxu0 %v16708_v42  ;;  %v16768_v48 = vld [vmem:[%s22155_s5 + $0x34c] ss:$16 sps:$4 sm:$0xff]   ;;  %v16763_v10 = vld [vmem:[%s22155_s5 + $0x148] ss:$16 sps:$4 sm:$0xff]  }
 0x517   : > { %v16766_v34 = vld [vmem:[%s22155_s5 + $0x348] ss:$16 sps:$4 sm:$0xff]   ;;  %v16771_v17 = vld [vmem:[%s22155_s5 + $0x12c] ss:$16 sps:$4 sm:$0xff]  }
 0x518   : > { %12833 = vmatpush1.bf16.msra.mxu1 %v16703_v35  ;;  %v16774_v27 = vld [vmem:[%s22155_s5 + $0x32c] ss:$16 sps:$4 sm:$0xff]   ;;  %v16769_v62 = vld [vmem:[%s22155_s5 + $0x128] ss:$16 sps:$4 sm:$0xff]  }
 0x519   : > { %12874 = vmatpush1.bf16.msra.mxu0 %v16706_v56  ;;  %12834 = vmatprep.subr.bf16.mxu1 %v16711_v19  ;;  %v16772_v42 = vld [vmem:[%s22155_s5 + $0x328] ss:$16 sps:$4 sm:$0xff]   ;;  %v16777_v35 = vld [vmem:[%s22155_s5 + $0x10c] ss:$16 sps:$4 sm:$0xff]  }
 0x51a   : > { %12875 = vmatprep.subr.bf16.mxu0 %v16714_v0  ;;  %v16780_v56 = vld [vmem:[%s22155_s5 + $0x30c] ss:$16 sps:$4 sm:$0xff]   ;;  %v16775_v19 = vld [vmem:[%s22155_s5 + $0x108] ss:$16 sps:$4 sm:$0xff]  }
 0x51b   : > { %v16778_v0 = vld [vmem:[%s22155_s5 + $0x308] ss:$16 sps:$4 sm:$0xff]  }
 0x51c   : > { %12835 = vmatpush1.bf16.msra.mxu1 %v16709_v59  ;;  %v16783_v59 = vld [vmem:[%s22155_s5 + $0x4ec] ss:$16 sps:$4 sm:$0xff]  }
 0x51d   : > { %12876 = vmatpush1.bf16.msra.mxu0 %v16712_v28  ;;  %12836 = vmatprep.subr.bf16.mxu1 %v16717_v3  ;;  %v16786_v28 = vld [vmem:[%s22155_s5 + $0x6ec] ss:$16 sps:$4 sm:$0xff]   ;;  %v16781_v3 = vld [vmem:[%s22155_s5 + $0x4e8] ss:$16 sps:$4 sm:$0xff]  }
 0x51e   : > { %12877 = vmatprep.subr.bf16.mxu0 %v16720_v14  ;;  %v16784_v14 = vld [vmem:[%s22155_s5 + $0x6e8] ss:$16 sps:$4 sm:$0xff]  }
 0x520   : > { %12837 = vmatpush1.bf16.msra.mxu1 %v16715_v12  ;;  %v16789_v12 = vld [vmem:[%s22155_s5 + $0x4cc] ss:$16 sps:$4 sm:$0xff]  }
 0x521   : > { %12878 = vmatpush1.bf16.msra.mxu0 %v16718_v58  ;;  %12838 = vmatprep.subr.bf16.mxu1 %v16723_v38  ;;  %v16792_v38 = vld [vmem:[%s22155_s5 + $0x6cc] ss:$16 sps:$4 sm:$0xff]  }
 0x522   : > { %12879 = vmatprep.subr.bf16.mxu0 %v16726_v8 }
 0x524   : > { %12839 = vmatpush1.bf16.msra.mxu1 %v16721_v13 }
 0x525   : > { %12880 = vmatpush1.bf16.msra.mxu0 %v16724_v49  ;;  %12840 = vmatprep.subr.bf16.mxu1 %v16729_v60  ;;  %v16787_v49 = vld [vmem:[%s22155_s5 + $0x4c8] ss:$16 sps:$4 sm:$0xff]   ;;  %v16795_v60 = vld [vmem:[%s22155_s5 + $0x4ac] ss:$16 sps:$4 sm:$0xff]  }
 0x526   : > { %12881 = vmatprep.subr.bf16.mxu0 %v16732_v9 }
 0x528   : > { %12841 = vmatpush1.bf16.msra.mxu1 %v16727_v4 }
 0x529   : > { %12882 = vmatpush1.bf16.msra.mxu0 %v16730_v63  ;;  %12842 = vmatprep.subr.bf16.mxu1 %v16735_v16 }
 0x52a   : > { %12883 = vmatprep.subr.bf16.mxu0 %v16738_v55 }
 0x52c   : > { %12843 = vmatpush2.bf16.msra.mxu1 %v16733_v30  ;;  %v16793_v30 = vld [vmem:[%s22155_s5 + $0x4a8] ss:$16 sps:$4 sm:$0xff]  }
 0x52d   : > { %12884 = vmatpush2.bf16.msra.mxu0 %v16736_v20  ;;  %12844 = vmatprep.subr.bf16.mxu1 %v16741_v40  ;;  %v16801_v20 = vld [vmem:[%s22155_s5 + $0x48c] ss:$16 sps:$4 sm:$0xff]  }
 0x52e   : > { %12885 = vmatprep.subr.bf16.mxu0 %v16744_v22  ;;  %v16804_v22 = vld [vmem:[%s22155_s5 + $0x68c] ss:$16 sps:$4 sm:$0xff]  }
 0x530   : > { %12845 = vmatpush2.bf16.msra.mxu1 %v16739_v50  ;;  %v16799_v50 = vld [vmem:[%s22155_s5 + $0x488] ss:$16 sps:$4 sm:$0xff]  }
 0x531   : > { %12886 = vmatpush2.bf16.msra.mxu0 %v16742_v43  ;;  %12846 = vmatprep.subr.bf16.mxu1 %v16747_v36  ;;  %v16802_v43 = vld [vmem:[%s22155_s5 + $0x688] ss:$16 sps:$4 sm:$0xff]   ;;  %v16807_v36 = vld [vmem:[%s22155_s5 + $0x46c] ss:$16 sps:$4 sm:$0xff]  }
 0x532   : > { %12887 = vmatprep.subr.bf16.mxu0 %v16750_v39  ;;  %v16810_v39 = vld [vmem:[%s22155_s5 + $0x66c] ss:$16 sps:$4 sm:$0xff]  }
 0x534   : > { %12847 = vmatpush2.bf16.msra.mxu1 %v16745_v52  ;;  %v16805_v52 = vld [vmem:[%s22155_s5 + $0x468] ss:$16 sps:$4 sm:$0xff]  }
 0x535   : > { %12888 = vmatpush2.bf16.msra.mxu0 %v16748_v7  ;;  %12848 = vmatprep.subr.bf16.mxu1 %v16753_v29  ;;  %v16808_v7 = vld [vmem:[%s22155_s5 + $0x668] ss:$16 sps:$4 sm:$0xff]   ;;  %v16813_v29 = vld [vmem:[%s22155_s5 + $0x44c] ss:$16 sps:$4 sm:$0xff]  }
 0x536   : > { %12889 = vmatprep.subr.bf16.mxu0 %v16756_v46  ;;  %v16816_v46 = vld [vmem:[%s22155_s5 + $0x64c] ss:$16 sps:$4 sm:$0xff]  }
 0x538   : > { %12849 = vmatpush2.bf16.msra.mxu1 %v16751_v31  ;;  %v16811_v31 = vld [vmem:[%s22155_s5 + $0x448] ss:$16 sps:$4 sm:$0xff]  }
 0x539   : > { %12890 = vmatpush2.bf16.msra.mxu0 %v16754_v44  ;;  %12850 = vmatprep.subr.bf16.mxu1 %v16759_v32  ;;  %v16814_v44 = vld [vmem:[%s22155_s5 + $0x648] ss:$16 sps:$4 sm:$0xff]   ;;  %v16819_v32 = vld [vmem:[%s22155_s5 + $0x42c] ss:$16 sps:$4 sm:$0xff]  }
 0x53a   : > { %12891 = vmatprep.subr.bf16.mxu0 %v16762_v51  ;;  %v16822_v51 = vld [vmem:[%s22155_s5 + $0x62c] ss:$16 sps:$4 sm:$0xff]  }
 0x53c   : > { %12851 = vmatpush2.bf16.msra.mxu1 %v16757_v2  ;;  %v16817_v2 = vld [vmem:[%s22155_s5 + $0x428] ss:$16 sps:$4 sm:$0xff]  }
 0x53d   : > { %12892 = vmatpush2.bf16.msra.mxu0 %v16760_v47  ;;  %12852 = vmatprep.subr.bf16.mxu1 %v16765_v1  ;;  %v16820_v47 = vld [vmem:[%s22155_s5 + $0x628] ss:$16 sps:$4 sm:$0xff]   ;;  %v16825_v1 = vld [vmem:[%s22155_s5 + $0x40c] ss:$16 sps:$4 sm:$0xff]  }
 0x53e   : > { %12893 = vmatprep.subr.bf16.mxu0 %v16768_v48  ;;  %v16828_v48 = vld [vmem:[%s22155_s5 + $0x60c] ss:$16 sps:$4 sm:$0xff]  }
 0x540   : > { %12853 = vmatpush2.bf16.msra.mxu1 %v16763_v10  ;;  %v16823_v10 = vld [vmem:[%s22155_s5 + $0x408] ss:$16 sps:$4 sm:$0xff]  }
 0x541   : > { %12894 = vmatpush2.bf16.msra.mxu0 %v16766_v34  ;;  %12854 = vmatprep.subr.bf16.mxu1 %v16771_v17  ;;  %v16826_v34 = vld [vmem:[%s22155_s5 + $0x608] ss:$16 sps:$4 sm:$0xff]   ;;  %v16831_v17 = vld [vmem:[%s22155_s5 + $0x5ec] ss:$16 sps:$4 sm:$0xff]  }
 0x542   : > { %12895 = vmatprep.subr.bf16.mxu0 %v16774_v27  ;;  %v16834_v27 = vld [vmem:[%s22155_s5 + $0x7ec] ss:$16 sps:$4 sm:$0xff]  }
 0x544   : > { %12855 = vmatpush2.bf16.msra.mxu1 %v16769_v62  ;;  %v16829_v62 = vld [vmem:[%s22155_s5 + $0x5e8] ss:$16 sps:$4 sm:$0xff]  }
 0x545   : > { %12896 = vmatpush2.bf16.msra.mxu0 %v16772_v42  ;;  %12856 = vmatprep.subr.bf16.mxu1 %v16777_v35  ;;  %v16832_v42 = vld [vmem:[%s22155_s5 + $0x7e8] ss:$16 sps:$4 sm:$0xff]   ;;  %v16837_v35 = vld [vmem:[%s22155_s5 + $0x5cc] ss:$16 sps:$4 sm:$0xff]  }
 0x546   : > { %12897 = vmatprep.subr.bf16.mxu0 %v16780_v56  ;;  %v16840_v56 = vld [vmem:[%s22155_s5 + $0x7cc] ss:$16 sps:$4 sm:$0xff]  }
 0x548   : > { %12857 = vmatpush2.bf16.msra.mxu1 %v16775_v19  ;;  %v16835_v19 = vld [vmem:[%s22155_s5 + $0x5c8] ss:$16 sps:$4 sm:$0xff]  }
 0x549   : > { %12898 = vmatpush2.bf16.msra.mxu0 %v16778_v0  ;;  %12908 = vmatprep.subr.bf16.mxu1 %v16783_v59  ;;  %v16838_v0 = vld [vmem:[%s22155_s5 + $0x7c8] ss:$16 sps:$4 sm:$0xff]   ;;  %v16843_v59 = vld [vmem:[%s22155_s5 + $0x5ac] ss:$16 sps:$4 sm:$0xff]  }
 0x54a   : > { %12949 = vmatprep.subr.bf16.mxu0 %v16786_v28  ;;  %v16846_v28 = vld [vmem:[%s22155_s5 + $0x7ac] ss:$16 sps:$4 sm:$0xff]  }
 0x54b   : > { %v12614_v58 = vpop.f32.mrf.mxu1  ;;  %14978 = vmatmul.mubr.msk.bf16.vlgmr.msra.gmra.mxu1 %vm20464_vm9, %v20468_v41 }
 0x54c   : > { %v12615_v8 = vadd.f32 %v12614_v58, %v21193_v11  ;;  %v12655_v13 = vpop.f32.mrf.mxu0  ;;  %14984 = vmatmul.mubr.msk.bf16.vlgmr.msra.gmra.mxu0 %vm20464_vm9, %v20478_v26  ;;  %12909 = vmatpush1.bf16.msra.mxu1 %v16781_v3  ;;  %v16790_v11 = vld [vmem:[%s22155_s5 + $0x6c8] ss:$16 sps:$4 sm:$0xff]   ;;  %v16852_v58 = vld [vmem:[%s22155_s5 + $0x78c] ss:$16 sps:$4 sm:$0xff]  }
 0x54d   : > { %14987 = vmatprep.mubr.msk.bf16.mxu1 %vm20464_vm9, %v20527_v15  ;;  %12950 = vmatpush1.bf16.msra.mxu0 %v16784_v14  ;;  %v12616_v41 = vpop.f32.mrf.mxu1  ;;  %v16798_v15 = vld [vmem:[%s22155_s5 + $0x6ac] ss:$16 sps:$4 sm:$0xff]   ;;  %v16841_v3 = vld [vmem:[%s22155_s5 + $0x5a8] ss:$16 sps:$4 sm:$0xff]  }
 0x54e   : > { %v21402_v26 = vadd.f32 %v12655_v13, %v12615_v8  ;;  %14993 = vmatprep.mubr.msk.bf16.mxu0 %vm20464_vm9, %v20529_v57  ;;  %v12617_v9 = vadd.f32 %v12616_v41, %v21201_v53  ;;  %v12657_v4 = vpop.f32.mrf.mxu0  ;;  %12910 = vmatprep.subr.bf16.mxu1 %v16789_v12  ;;  %v16796_v53 = vld [vmem:[%s22155_s5 + $0x6a8] ss:$16 sps:$4 sm:$0xff]   ;;  %v16849_v12 = vld [vmem:[%s22155_s5 + $0x58c] ss:$16 sps:$4 sm:$0xff]  }
 0x54f   : > { %v12618_v63 = vpop.f32.mrf.mxu1  ;;  %12951 = vmatprep.subr.bf16.mxu0 %v16792_v38  ;;  %v16844_v14 = vld [vmem:[%s22155_s5 + $0x7a8] ss:$16 sps:$4 sm:$0xff]   ;;  %v16855_v13 = vld [vmem:[%s22155_s5 + $0x56c] ss:$16 sps:$4 sm:$0xff]  }
 0x550   : > { %v21411_v16 = vadd.f32 %v12657_v4, %v12617_v9  ;;  %v12659_v55 = vpop.f32.mrf.mxu0  ;;  %12911 = vmatpush1.bf16.msra.mxu1 %v16787_v49  ;;  %v16847_v38 = vld [vmem:[%s22155_s5 + $0x588] ss:$16 sps:$4 sm:$0xff]   ;;  %v16858_v49 = vld [vmem:[%s22155_s5 + $0x76c] ss:$16 sps:$4 sm:$0xff]  }
 0x551   : > { %12952 = vmatpush1.bf16.msra.mxu0 %v16790_v11  ;;  %v12619_v57 = vpop.f32.mrf.mxu1  ;;  %12912 = vmatprep.subr.bf16.mxu1 %v16795_v60  ;;  %v16850_v8 = vld [vmem:[%s22155_s5 + $0x788] ss:$16 sps:$4 sm:$0xff]   ;;  %v16861_v60 = vld [vmem:[%s22155_s5 + $0x54c] ss:$16 sps:$4 sm:$0xff]  }
 0x552   : > { %v12660_v40 = vpop.f32.mrf.mxu0  ;;  %12953 = vmatprep.subr.bf16.mxu0 %v16798_v15  ;;  %v16853_v41 = vld [vmem:[%s22155_s5 + $0x568] ss:$16 sps:$4 sm:$0xff]   ;;  %v16864_v9 = vld [vmem:[%s22155_s5 + $0x74c] ss:$16 sps:$4 sm:$0xff]  }
 0x553   : > { %v16856_v11 = vld [vmem:[%s22155_s5 + $0x768] ss:$16 sps:$4 sm:$0xff]   ;;  %v16867_v63 = vld [vmem:[%s22155_s5 + $0x52c] ss:$16 sps:$4 sm:$0xff]  }
 0x554   : > { %12913 = vmatpush1.bf16.msra.mxu1 %v16793_v30  ;;  %v16859_v4 = vld [vmem:[%s22155_s5 + $0x548] ss:$16 sps:$4 sm:$0xff]   ;;  %v16870_v55 = vld [vmem:[%s22155_s5 + $0x72c] ss:$16 sps:$4 sm:$0xff]  }
 0x555   : > { %12954 = vmatpush1.bf16.msra.mxu0 %v16796_v53  ;;  %12914 = vmatprep.subr.bf16.mxu1 %v16801_v20  ;;  %v16862_v15 = vld [vmem:[%s22155_s5 + $0x748] ss:$16 sps:$4 sm:$0xff]   ;;  %v16873_v53 = vld [vmem:[%s22155_s5 + $0x50c] ss:$16 sps:$4 sm:$0xff]  }
 0x556   : > { %12955 = vmatprep.subr.bf16.mxu0 %v16804_v22  ;;  %v16865_v30 = vld [vmem:[%s22155_s5 + $0x528] ss:$16 sps:$4 sm:$0xff]   ;;  %v16876_v20 = vld [vmem:[%s22155_s5 + $0x70c] ss:$16 sps:$4 sm:$0xff]  }
 0x557   : > { %v16868_v57 = vld [vmem:[%s22155_s5 + $0x728] ss:$16 sps:$4 sm:$0xff]  }
 0x558   : > { %12915 = vmatpush1.bf16.msra.mxu1 %v16799_v50  ;;  %v16871_v40 = vld [vmem:[%s22155_s5 + $0x508] ss:$16 sps:$4 sm:$0xff]   ;;  %v16879_v50 = vld [vmem:[%s22155_s5 + $0x8ec] ss:$16 sps:$4 sm:$0xff]  }
 0x559   : > { %12956 = vmatpush1.bf16.msra.mxu0 %v16802_v43  ;;  %12916 = vmatprep.subr.bf16.mxu1 %v16807_v36  ;;  %v16874_v22 = vld [vmem:[%s22155_s5 + $0x708] ss:$16 sps:$4 sm:$0xff]   ;;  %v16882_v43 = vld [vmem:[%s22155_s5 + $0xaec] ss:$16 sps:$4 sm:$0xff]  }
 0x55a   : > { %12957 = vmatprep.subr.bf16.mxu0 %v16810_v39  ;;  %v16877_v36 = vld [vmem:[%s22155_s5 + $0x8e8] ss:$16 sps:$4 sm:$0xff]  }
 0x55b   : > { %v16880_v39 = vld [vmem:[%s22155_s5 + $0xae8] ss:$16 sps:$4 sm:$0xff]  }
 0x55c   : > { %12917 = vmatpush1.bf16.msra.mxu1 %v16805_v52  ;;  %v16885_v52 = vld [vmem:[%s22155_s5 + $0x8cc] ss:$16 sps:$4 sm:$0xff]  }
 0x55d   : > { %12958 = vmatpush1.bf16.msra.mxu0 %v16808_v7  ;;  %12918 = vmatprep.subr.bf16.mxu1 %v16813_v29  ;;  %v16888_v29 = vld [vmem:[%s22155_s5 + $0xacc] ss:$16 sps:$4 sm:$0xff]  }
 0x55e   : > { %12959 = vmatprep.subr.bf16.mxu0 %v16816_v46 }
 0x560   : > { %12919 = vmatpush1.bf16.msra.mxu1 %v16811_v31 }
 0x561   : > { %12960 = vmatpush1.bf16.msra.mxu0 %v16814_v44  ;;  %12920 = vmatprep.subr.bf16.mxu1 %v16819_v32  ;;  %v16883_v44 = vld [vmem:[%s22155_s5 + $0x8c8] ss:$16 sps:$4 sm:$0xff]   ;;  %v16891_v32 = vld [vmem:[%s22155_s5 + $0x8ac] ss:$16 sps:$4 sm:$0xff]  }
 0x562   : > { %12961 = vmatprep.subr.bf16.mxu0 %v16822_v51 }
 0x564   : > { %12921 = vmatpush1.bf16.msra.mxu1 %v16817_v2 }
 0x565   : > { %12962 = vmatpush1.bf16.msra.mxu0 %v16820_v47  ;;  %12922 = vmatprep.subr.bf16.mxu1 %v16825_v1 }
 0x566   : > { %12963 = vmatprep.subr.bf16.mxu0 %v16828_v48 }
 0x568   : > { %12923 = vmatpush1.bf16.msra.mxu1 %v16823_v10  ;;  %v16889_v10 = vld [vmem:[%s22155_s5 + $0x8a8] ss:$16 sps:$4 sm:$0xff]  }
 0x569   : > { %12964 = vmatpush1.bf16.msra.mxu0 %v16826_v34  ;;  %12924 = vmatprep.subr.bf16.mxu1 %v16831_v17  ;;  %v16897_v34 = vld [vmem:[%s22155_s5 + $0x88c] ss:$16 sps:$4 sm:$0xff]  }
 0x56a   : > { %12965 = vmatprep.subr.bf16.mxu0 %v16834_v27  ;;  %v16900_v27 = vld [vmem:[%s22155_s5 + $0xa8c] ss:$16 sps:$4 sm:$0xff]  }
 0x56c   : > { %12925 = vmatpush2.bf16.msra.mxu1 %v16829_v62  ;;  %v16895_v62 = vld [vmem:[%s22155_s5 + $0x888] ss:$16 sps:$4 sm:$0xff]  }
 0x56d   : > { %12966 = vmatpush2.bf16.msra.mxu0 %v16832_v42  ;;  %12926 = vmatprep.subr.bf16.mxu1 %v16837_v35  ;;  %v16898_v42 = vld [vmem:[%s22155_s5 + $0xa88] ss:$16 sps:$4 sm:$0xff]   ;;  %v16903_v35 = vld [vmem:[%s22155_s5 + $0x86c] ss:$16 sps:$4 sm:$0xff]  }
 0x56e   : > { %12967 = vmatprep.subr.bf16.mxu0 %v16840_v56  ;;  %v16906_v56 = vld [vmem:[%s22155_s5 + $0xa6c] ss:$16 sps:$4 sm:$0xff]  }
 0x570   : > { %12927 = vmatpush2.bf16.msra.mxu1 %v16835_v19  ;;  %v16901_v19 = vld [vmem:[%s22155_s5 + $0x868] ss:$16 sps:$4 sm:$0xff]  }
 0x571   : > { %12968 = vmatpush2.bf16.msra.mxu0 %v16838_v0  ;;  %12928 = vmatprep.subr.bf16.mxu1 %v16843_v59  ;;  %v16904_v0 = vld [vmem:[%s22155_s5 + $0xa68] ss:$16 sps:$4 sm:$0xff]   ;;  %v16909_v59 = vld [vmem:[%s22155_s5 + $0x84c] ss:$16 sps:$4 sm:$0xff]  }
 0x572   : > { %12969 = vmatprep.subr.bf16.mxu0 %v16846_v28  ;;  %v16912_v28 = vld [vmem:[%s22155_s5 + $0xa4c] ss:$16 sps:$4 sm:$0xff]  }
 0x574   : > { %12929 = vmatpush2.bf16.msra.mxu1 %v16841_v3  ;;  %v16907_v3 = vld [vmem:[%s22155_s5 + $0x848] ss:$16 sps:$4 sm:$0xff]  }
 0x575   : > { %12970 = vmatpush2.bf16.msra.mxu0 %v16844_v14  ;;  %12930 = vmatprep.subr.bf16.mxu1 %v16849_v12  ;;  %v16910_v14 = vld [vmem:[%s22155_s5 + $0xa48] ss:$16 sps:$4 sm:$0xff]   ;;  %v16915_v12 = vld [vmem:[%s22155_s5 + $0x82c] ss:$16 sps:$4 sm:$0xff]  }
 0x576   : > { %12971 = vmatprep.subr.bf16.mxu0 %v16852_v58  ;;  %v16918_v58 = vld [vmem:[%s22155_s5 + $0xa2c] ss:$16 sps:$4 sm:$0xff]  }
 0x578   : > { %12931 = vmatpush2.bf16.msra.mxu1 %v16847_v38  ;;  %v16913_v38 = vld [vmem:[%s22155_s5 + $0x828] ss:$16 sps:$4 sm:$0xff]  }
 0x579   : > { %12972 = vmatpush2.bf16.msra.mxu0 %v16850_v8  ;;  %12932 = vmatprep.subr.bf16.mxu1 %v16855_v13  ;;  %v16916_v8 = vld [vmem:[%s22155_s5 + $0xa28] ss:$16 sps:$4 sm:$0xff]   ;;  %v16921_v13 = vld [vmem:[%s22155_s5 + $0x80c] ss:$16 sps:$4 sm:$0xff]  }
 0x57a   : > { %12973 = vmatprep.subr.bf16.mxu0 %v16858_v49  ;;  %v16924_v49 = vld [vmem:[%s22155_s5 + $0xa0c] ss:$16 sps:$4 sm:$0xff]  }
 0x57c   : > { %12933 = vmatpush2.bf16.msra.mxu1 %v16853_v41  ;;  %v16919_v41 = vld [vmem:[%s22155_s5 + $0x808] ss:$16 sps:$4 sm:$0xff]  }
 0x57d   : > { %12974 = vmatpush2.bf16.msra.mxu0 %v16856_v11  ;;  %12934 = vmatprep.subr.bf16.mxu1 %v16861_v60  ;;  %v16922_v11 = vld [vmem:[%s22155_s5 + $0xa08] ss:$16 sps:$4 sm:$0xff]   ;;  %v16927_v60 = vld [vmem:[%s22155_s5 + $0x9ec] ss:$16 sps:$4 sm:$0xff]  }
 0x57e   : > { %12975 = vmatprep.subr.bf16.mxu0 %v16864_v9  ;;  %v16930_v9 = vld [vmem:[%s22155_s5 + $0xbec] ss:$16 sps:$4 sm:$0xff]  }
 0x580   : > { %12935 = vmatpush2.bf16.msra.mxu1 %v16859_v4  ;;  %v16925_v4 = vld [vmem:[%s22155_s5 + $0x9e8] ss:$16 sps:$4 sm:$0xff]  }
 0x581   : > { %12976 = vmatpush2.bf16.msra.mxu0 %v16862_v15  ;;  %12936 = vmatprep.subr.bf16.mxu1 %v16867_v63  ;;  %v16928_v15 = vld [vmem:[%s22155_s5 + $0xbe8] ss:$16 sps:$4 sm:$0xff]   ;;  %v16933_v63 = vld [vmem:[%s22155_s5 + $0x9cc] ss:$16 sps:$4 sm:$0xff]  }
 0x582   : > { %12977 = vmatprep.subr.bf16.mxu0 %v16870_v55  ;;  %v16936_v55 = vld [vmem:[%s22155_s5 + $0xbcc] ss:$16 sps:$4 sm:$0xff]  }
 0x584   : > { %12937 = vmatpush2.bf16.msra.mxu1 %v16865_v30  ;;  %v16931_v30 = vld [vmem:[%s22155_s5 + $0x9c8] ss:$16 sps:$4 sm:$0xff]  }
 0x585   : > { %12978 = vmatpush2.bf16.msra.mxu0 %v16868_v57  ;;  %12938 = vmatprep.subr.bf16.mxu1 %v16873_v53  ;;  %v16934_v57 = vld [vmem:[%s22155_s5 + $0xbc8] ss:$16 sps:$4 sm:$0xff]   ;;  %v16939_v53 = vld [vmem:[%s22155_s5 + $0x9ac] ss:$16 sps:$4 sm:$0xff]  }
 0x586   : > { %12979 = vmatprep.subr.bf16.mxu0 %v16876_v20  ;;  %v16942_v20 = vld [vmem:[%s22155_s5 + $0xbac] ss:$16 sps:$4 sm:$0xff]  }
 0x588   : > { %12939 = vmatpush2.bf16.msra.mxu1 %v16871_v40  ;;  %v16937_v40 = vld [vmem:[%s22155_s5 + $0x9a8] ss:$16 sps:$4 sm:$0xff]  }
 0x589   : > { %12980 = vmatpush2.bf16.msra.mxu0 %v16874_v22  ;;  %12990 = vmatprep.subr.bf16.mxu1 %v16879_v50  ;;  %v16940_v22 = vld [vmem:[%s22155_s5 + $0xba8] ss:$16 sps:$4 sm:$0xff]   ;;  %v16945_v50 = vld [vmem:[%s22155_s5 + $0x98c] ss:$16 sps:$4 sm:$0xff]  }
 0x58a   : > { %13031 = vmatprep.subr.bf16.mxu0 %v16882_v43  ;;  %v16948_v43 = vld [vmem:[%s22155_s5 + $0xb8c] ss:$16 sps:$4 sm:$0xff]  }
 0x58b   : > { %v12696_v7 = vpop.f32.mrf.mxu1  ;;  %14990 = vmatmul.mubr.msk.bf16.vlgmr.msra.gmra.mxu1 %vm20464_vm9, %v20725_v54 }
 0x58c   : > { %v12697_v46 = vadd.f32 %v12696_v7, %v21402_v26  ;;  %v12737_v31 = vpop.f32.mrf.mxu0  ;;  %14996 = vmatmul.mubr.msk.bf16.vlgmr.msra.gmra.mxu0 %vm20464_vm9, %v20730_v23  ;;  %12991 = vmatpush1.bf16.msra.mxu1 %v16877_v36  ;;  %v16886_v26 = vld [vmem:[%s22155_s5 + $0xac8] ss:$16 sps:$4 sm:$0xff]   ;;  %v16954_v7 = vld [vmem:[%s22155_s5 + $0xb6c] ss:$16 sps:$4 sm:$0xff]  }
 0x58d   : > { %14999 = vmatprep.mubr.msk.bf16.mxu1 %vm20464_vm9, %v20738_v18  ;;  %13032 = vmatpush1.bf16.msra.mxu0 %v16880_v39  ;;  %v12698_v54 = vpop.f32.mrf.mxu1  ;;  %v16894_v18 = vld [vmem:[%s22155_s5 + $0xaac] ss:$16 sps:$4 sm:$0xff]   ;;  %v16943_v36 = vld [vmem:[%s22155_s5 + $0x988] ss:$16 sps:$4 sm:$0xff]  }
 0x58e   : > { %v21612_v23 = vadd.f32 %v12737_v31, %v12697_v46  ;;  %15005 = vmatprep.mubr.msk.bf16.mxu0 %vm20464_vm9, %v20746_v24  ;;  %v12699_v51 = vadd.f32 %v12698_v54, %v21411_v16  ;;  %v12739_v2 = vpop.f32.mrf.mxu0  ;;  %12992 = vmatprep.subr.bf16.mxu1 %v16885_v52  ;;  %v16892_v16 = vld [vmem:[%s22155_s5 + $0xaa8] ss:$16 sps:$4 sm:$0xff]   ;;  %v16951_v52 = vld [vmem:[%s22155_s5 + $0x96c] ss:$16 sps:$4 sm:$0xff]  }
 0x58f   : > { %v12700_v47 = vpop.f32.mrf.mxu1  ;;  %13033 = vmatprep.subr.bf16.mxu0 %v16888_v29  ;;  %v16946_v39 = vld [vmem:[%s22155_s5 + $0xb88] ss:$16 sps:$4 sm:$0xff]   ;;  %v16957_v31 = vld [vmem:[%s22155_s5 + $0x94c] ss:$16 sps:$4 sm:$0xff]  }
 0x590   : > { %v21621_v1 = vadd.f32 %v12739_v2, %v12699_v51  ;;  %v12741_v48 = vpop.f32.mrf.mxu0  ;;  %12993 = vmatpush1.bf16.msra.mxu1 %v16883_v44  ;;  %v16949_v29 = vld [vmem:[%s22155_s5 + $0x968] ss:$16 sps:$4 sm:$0xff]   ;;  %v16960_v44 = vld [vmem:[%s22155_s5 + $0xb4c] ss:$16 sps:$4 sm:$0xff]  }
 0x591   : > { %13034 = vmatpush1.bf16.msra.mxu0 %v16886_v26  ;;  %v12701_v24 = vpop.f32.mrf.mxu1  ;;  %12994 = vmatprep.subr.bf16.mxu1 %v16891_v32  ;;  %v16952_v46 = vld [vmem:[%s22155_s5 + $0xb68] ss:$16 sps:$4 sm:$0xff]   ;;  %v16963_v32 = vld [vmem:[%s22155_s5 + $0x92c] ss:$16 sps:$4 sm:$0xff]  }
 0x592   : > { %v12742_v17 = vpop.f32.mrf.mxu0  ;;  %13035 = vmatprep.subr.bf16.mxu0 %v16894_v18  ;;  %v16955_v54 = vld [vmem:[%s22155_s5 + $0x948] ss:$16 sps:$4 sm:$0xff]   ;;  %v16966_v51 = vld [vmem:[%s22155_s5 + $0xb2c] ss:$16 sps:$4 sm:$0xff]  }
 0x593   : > { %v16958_v26 = vld [vmem:[%s22155_s5 + $0xb48] ss:$16 sps:$4 sm:$0xff]   ;;  %v16969_v47 = vld [vmem:[%s22155_s5 + $0x90c] ss:$16 sps:$4 sm:$0xff]  }
 0x594   : > { %12995 = vmatpush1.bf16.msra.mxu1 %v16889_v10  ;;  %v16961_v2 = vld [vmem:[%s22155_s5 + $0x928] ss:$16 sps:$4 sm:$0xff]   ;;  %v16972_v48 = vld [vmem:[%s22155_s5 + $0xb0c] ss:$16 sps:$4 sm:$0xff]  }
 0x595   : > { %13036 = vmatpush1.bf16.msra.mxu0 %v16892_v16  ;;  %12996 = vmatprep.subr.bf16.mxu1 %v16897_v34  ;;  %v16964_v18 = vld [vmem:[%s22155_s5 + $0xb28] ss:$16 sps:$4 sm:$0xff]   ;;  %v16975_v16 = vld [vmem:[%s22155_s5 + $0xcec] ss:$16 sps:$4 sm:$0xff]  }
 0x596   : > { %13037 = vmatprep.subr.bf16.mxu0 %v16900_v27  ;;  %v16967_v10 = vld [vmem:[%s22155_s5 + $0x908] ss:$16 sps:$4 sm:$0xff]   ;;  %v16978_v34 = vld [vmem:[%s22155_s5 + $0xeec] ss:$16 sps:$4 sm:$0xff]  }
 0x597   : > { %v16970_v24 = vld [vmem:[%s22155_s5 + $0xb08] ss:$16 sps:$4 sm:$0xff]  }
 0x598   : > { %12997 = vmatpush1.bf16.msra.mxu1 %v16895_v62  ;;  %v16973_v17 = vld [vmem:[%s22155_s5 + $0xce8] ss:$16 sps:$4 sm:$0xff]   ;;  %v16981_v62 = vld [vmem:[%s22155_s5 + $0xccc] ss:$16 sps:$4 sm:$0xff]  }
 0x599   : > { %13038 = vmatpush1.bf16.msra.mxu0 %v16898_v42  ;;  %12998 = vmatprep.subr.bf16.mxu1 %v16903_v35  ;;  %v16976_v27 = vld [vmem:[%s22155_s5 + $0xee8] ss:$16 sps:$4 sm:$0xff]   ;;  %v16984_v35 = vld [vmem:[%s22155_s5 + $0xecc] ss:$16 sps:$4 sm:$0xff]  }
 0x59a   : > { %13039 = vmatprep.subr.bf16.mxu0 %v16906_v56 }
 0x59c   : > { %12999 = vmatpush1.bf16.msra.mxu1 %v16901_v19 }
 0x59d   : > { %13040 = vmatpush1.bf16.msra.mxu0 %v16904_v0  ;;  %13000 = vmatprep.subr.bf16.mxu1 %v16909_v59  ;;  %v16979_v0 = vld [vmem:[%s22155_s5 + $0xcc8] ss:$16 sps:$4 sm:$0xff]  }
 0x59e   : > { %13041 = vmatprep.subr.bf16.mxu0 %v16912_v28 }
 0x5a0   : > { %13001 = vmatpush1.bf16.msra.mxu1 %v16907_v3 }
 0x5a1   : > { %13042 = vmatpush1.bf16.msra.mxu0 %v16910_v14  ;;  %13002 = vmatprep.subr.bf16.mxu1 %v16915_v12  ;;  %v16985_v12 = vld [vmem:[%s22155_s5 + $0xca8] ss:$16 sps:$4 sm:$0xff]  }
 0x5a2   : > { %13043 = vmatprep.subr.bf16.mxu0 %v16918_v58 }
 0x5a4   : > { %13003 = vmatpush1.bf16.msra.mxu1 %v16913_v38  ;;  %v16993_v38 = vld [vmem:[%s22155_s5 + $0xc8c] ss:$16 sps:$4 sm:$0xff]  }
 0x5a5   : > { %13044 = vmatpush1.bf16.msra.mxu0 %v16916_v8  ;;  %13004 = vmatprep.subr.bf16.mxu1 %v16921_v13  ;;  %v16996_v13 = vld [vmem:[%s22155_s5 + $0xe8c] ss:$16 sps:$4 sm:$0xff]  }
 0x5a6   : > { %13045 = vmatprep.subr.bf16.mxu0 %v16924_v49  ;;  %v16991_v49 = vld [vmem:[%s22155_s5 + $0xc88] ss:$16 sps:$4 sm:$0xff]  }
 0x5a8   : > { %13005 = vmatpush1.bf16.msra.mxu1 %v16919_v41  ;;  %v16994_v41 = vld [vmem:[%s22155_s5 + $0xe88] ss:$16 sps:$4 sm:$0xff]  }
 0x5a9   : > { %13046 = vmatpush1.bf16.msra.mxu0 %v16922_v11  ;;  %13006 = vmatprep.subr.bf16.mxu1 %v16927_v60  ;;  %v16999_v11 = vld [vmem:[%s22155_s5 + $0xc6c] ss:$16 sps:$4 sm:$0xff]  }
 0x5aa   : > { %13047 = vmatprep.subr.bf16.mxu0 %v16930_v9  ;;  %v17002_v60 = vld [vmem:[%s22155_s5 + $0xe6c] ss:$16 sps:$4 sm:$0xff]   ;;  %v16997_v9 = vld [vmem:[%s22155_s5 + $0xc68] ss:$16 sps:$4 sm:$0xff]  }
 0x5ac   : > { %13007 = vmatpush2.bf16.msra.mxu1 %v16925_v4  ;;  %v17000_v4 = vld [vmem:[%s22155_s5 + $0xe68] ss:$16 sps:$4 sm:$0xff]  }
 0x5ad   : > { %13048 = vmatpush2.bf16.msra.mxu0 %v16928_v15  ;;  %13008 = vmatprep.subr.bf16.mxu1 %v16933_v63  ;;  %v17005_v15 = vld [vmem:[%s22155_s5 + $0xc4c] ss:$16 sps:$4 sm:$0xff]  }
 0x5ae   : > { %13049 = vmatprep.subr.bf16.mxu0 %v16936_v55  ;;  %v17008_v63 = vld [vmem:[%s22155_s5 + $0xe4c] ss:$16 sps:$4 sm:$0xff]   ;;  %v17003_v55 = vld [vmem:[%s22155_s5 + $0xc48] ss:$16 sps:$4 sm:$0xff]  }
 0x5b0   : > { %13009 = vmatpush2.bf16.msra.mxu1 %v16931_v30  ;;  %v17006_v30 = vld [vmem:[%s22155_s5 + $0xe48] ss:$16 sps:$4 sm:$0xff]  }
 0x5b1   : > { %13050 = vmatpush2.bf16.msra.mxu0 %v16934_v57  ;;  %13010 = vmatprep.subr.bf16.mxu1 %v16939_v53  ;;  %v17011_v57 = vld [vmem:[%s22155_s5 + $0xc2c] ss:$16 sps:$4 sm:$0xff]  }
 0x5b2   : > { %13051 = vmatprep.subr.bf16.mxu0 %v16942_v20  ;;  %v17014_v53 = vld [vmem:[%s22155_s5 + $0xe2c] ss:$16 sps:$4 sm:$0xff]   ;;  %v17009_v20 = vld [vmem:[%s22155_s5 + $0xc28] ss:$16 sps:$4 sm:$0xff]  }
 0x5b4   : > { %13011 = vmatpush2.bf16.msra.mxu1 %v16937_v40  ;;  %v17012_v40 = vld [vmem:[%s22155_s5 + $0xe28] ss:$16 sps:$4 sm:$0xff]  }
 0x5b5   : > { %13052 = vmatpush2.bf16.msra.mxu0 %v16940_v22  ;;  %13012 = vmatprep.subr.bf16.mxu1 %v16945_v50  ;;  %v17017_v22 = vld [vmem:[%s22155_s5 + $0xc0c] ss:$16 sps:$4 sm:$0xff]  }
 0x5b6   : > { %13053 = vmatprep.subr.bf16.mxu0 %v16948_v43  ;;  %v17020_v50 = vld [vmem:[%s22155_s5 + $0xe0c] ss:$16 sps:$4 sm:$0xff]   ;;  %v17015_v43 = vld [vmem:[%s22155_s5 + $0xc08] ss:$16 sps:$4 sm:$0xff]  }
 0x5b8   : > { %13013 = vmatpush2.bf16.msra.mxu1 %v16943_v36  ;;  %v17018_v36 = vld [vmem:[%s22155_s5 + $0xe08] ss:$16 sps:$4 sm:$0xff]  }
 0x5b9   : > { %13054 = vmatpush2.bf16.msra.mxu0 %v16946_v39  ;;  %13014 = vmatprep.subr.bf16.mxu1 %v16951_v52  ;;  %v17023_v39 = vld [vmem:[%s22155_s5 + $0xdec] ss:$16 sps:$4 sm:$0xff]  }
 0x5ba   : > { %13055 = vmatprep.subr.bf16.mxu0 %v16954_v7  ;;  %v17026_v52 = vld [vmem:[%s22155_s5 + $0xfec] ss:$16 sps:$4 sm:$0xff]   ;;  %v17021_v7 = vld [vmem:[%s22155_s5 + $0xde8] ss:$16 sps:$4 sm:$0xff]  }
 0x5bc   : > { %13015 = vmatpush2.bf16.msra.mxu1 %v16949_v29  ;;  %v17024_v29 = vld [vmem:[%s22155_s5 + $0xfe8] ss:$16 sps:$4 sm:$0xff]  }
 0x5bd   : > { %13056 = vmatpush2.bf16.msra.mxu0 %v16952_v46  ;;  %13016 = vmatprep.subr.bf16.mxu1 %v16957_v31  ;;  %v17029_v46 = vld [vmem:[%s22155_s5 + $0xdcc] ss:$16 sps:$4 sm:$0xff]  }
 0x5be   : > { %13057 = vmatprep.subr.bf16.mxu0 %v16960_v44  ;;  %v17032_v31 = vld [vmem:[%s22155_s5 + $0xfcc] ss:$16 sps:$4 sm:$0xff]   ;;  %v17027_v44 = vld [vmem:[%s22155_s5 + $0xdc8] ss:$16 sps:$4 sm:$0xff]  }
 0x5c0   : > { %13017 = vmatpush2.bf16.msra.mxu1 %v16955_v54  ;;  %v17030_v54 = vld [vmem:[%s22155_s5 + $0xfc8] ss:$16 sps:$4 sm:$0xff]  }
 0x5c1   : > { %13058 = vmatpush2.bf16.msra.mxu0 %v16958_v26  ;;  %13018 = vmatprep.subr.bf16.mxu1 %v16963_v32  ;;  %v17035_v26 = vld [vmem:[%s22155_s5 + $0xdac] ss:$16 sps:$4 sm:$0xff]  }
 0x5c2   : > { %13059 = vmatprep.subr.bf16.mxu0 %v16966_v51  ;;  %v17038_v32 = vld [vmem:[%s22155_s5 + $0xfac] ss:$16 sps:$4 sm:$0xff]   ;;  %v17033_v51 = vld [vmem:[%s22155_s5 + $0xda8] ss:$16 sps:$4 sm:$0xff]  }
 0x5c4   : > { %13019 = vmatpush2.bf16.msra.mxu1 %v16961_v2  ;;  %v17036_v2 = vld [vmem:[%s22155_s5 + $0xfa8] ss:$16 sps:$4 sm:$0xff]  }
 0x5c5   : > { %13060 = vmatpush2.bf16.msra.mxu0 %v16964_v18  ;;  %13020 = vmatprep.subr.bf16.mxu1 %v16969_v47  ;;  %v17041_v18 = vld [vmem:[%s22155_s5 + $0xd8c] ss:$16 sps:$4 sm:$0xff]  }
 0x5c6   : > { %13061 = vmatprep.subr.bf16.mxu0 %v16972_v48  ;;  %v17044_v47 = vld [vmem:[%s22155_s5 + $0xf8c] ss:$16 sps:$4 sm:$0xff]   ;;  %v17039_v48 = vld [vmem:[%s22155_s5 + $0xd88] ss:$16 sps:$4 sm:$0xff]  }
 0x5c8   : > { %13021 = vmatpush2.bf16.msra.mxu1 %v16967_v10  ;;  %v17042_v10 = vld [vmem:[%s22155_s5 + $0xf88] ss:$16 sps:$4 sm:$0xff]  }
 0x5c9   : > { %13062 = vmatpush2.bf16.msra.mxu0 %v16970_v24  ;;  %13072 = vmatprep.subr.bf16.mxu1 %v16975_v16  ;;  %v17047_v24 = vld [vmem:[%s22155_s5 + $0xd6c] ss:$16 sps:$4 sm:$0xff]  }
 0x5ca   : > { %13113 = vmatprep.subr.bf16.mxu0 %v16978_v34  ;;  %v17050_v16 = vld [vmem:[%s22155_s5 + $0xf6c] ss:$16 sps:$4 sm:$0xff]   ;;  %v17045_v34 = vld [vmem:[%s22155_s5 + $0xd68] ss:$16 sps:$4 sm:$0xff]  }
 0x5cb   : > { %v12778_v42 = vpop.f32.mrf.mxu1  ;;  %15002 = vmatmul.mubr.msk.bf16.vlgmr.msra.gmra.mxu1 %vm20464_vm9, %v20942_v6 }
 0x5cc   : > { %v12779_v56 = vadd.f32 %v12778_v42, %v21612_v23  ;;  %v12819_v19 = vpop.f32.mrf.mxu0  ;;  %15008 = vmatmul.mubr.msk.bf16.vlgmr.msra.gmra.mxu0 %vm20464_vm9, %v20947_v21  ;;  %13073 = vmatpush1.bf16.msra.mxu1 %v16973_v17  ;;  %v16982_v23 = vld [vmem:[%s22155_s5 + $0xec8] ss:$16 sps:$4 sm:$0xff]   ;;  %v16987_v21 = vld [vmem:[%s22155_s5 + $0xcac] ss:$16 sps:$4 sm:$0xff]  }
 0x5cd   : > { %15011 = vmatprep.mubr.msk.bf16.mxu1 %vm20464_vm9, %v20955_v61  ;;  %13114 = vmatpush1.bf16.msra.mxu0 %v16976_v27  ;;  %v21816_v6 = vpop.f32.mrf.mxu1  ;;  %v16990_v61 = vld [vmem:[%s22155_s5 + $0xeac] ss:$16 sps:$4 sm:$0xff]   ;;  %v17048_v17 = vld [vmem:[%s22155_s5 + $0xf68] ss:$16 sps:$4 sm:$0xff]  }
 0x5ce   : > { %v21824_v59 = vadd.f32 %v12819_v19, %v12779_v56  ;;  %15017 = vmatprep.mubr.msk.bf16.mxu0 %vm20464_vm9, %v20963_v33  ;;  %v21829_v28 = vpop.f32.mrf.mxu0  ;;  %13074 = vmatprep.subr.bf16.mxu1 %v16981_v62  ;;  %v16988_v33 = vld [vmem:[%s22155_s5 + $0xea8] ss:$16 sps:$4 sm:$0xff]   ;;  %v17053_v27 = vld [vmem:[%s22155_s5 + $0xd4c] ss:$16 sps:$4 sm:$0xff]  }
 0x5cf   : > { %v12782_v3 = vpop.f32.mrf.mxu1  ;;  %13115 = vmatprep.subr.bf16.mxu0 %v16984_v35  ;;  %v17056_v62 = vld [vmem:[%s22155_s5 + $0xf4c] ss:$16 sps:$4 sm:$0xff]   ;;  %v17051_v42 = vld [vmem:[%s22155_s5 + $0xd48] ss:$16 sps:$4 sm:$0xff]  }
 0x5d0   : > { %v12823_v14 = vpop.f32.mrf.mxu0  ;;  %13075 = vmatpush1.bf16.msra.mxu1 %v16979_v0  ;;  %v17054_v35 = vld [vmem:[%s22155_s5 + $0xf48] ss:$16 sps:$4 sm:$0xff]   ;;  %v17059_v56 = vld [vmem:[%s22155_s5 + $0xd2c] ss:$16 sps:$4 sm:$0xff]   ;;  %v12781_v0 = vadd.f32 %v21816_v6, %v21621_v1 }
 0x5d1   : > { %13116 = vmatpush1.bf16.msra.mxu0 %v16982_v23  ;;  %v12783_v58 = vpop.f32.mrf.mxu1  ;;  %13076 = vmatprep.subr.bf16.mxu1 %v16987_v21  ;;  %v17062_v19 = vld [vmem:[%s22155_s5 + $0xf2c] ss:$16 sps:$4 sm:$0xff]   ;;  %v17057_v23 = vld [vmem:[%s22155_s5 + $0xd28] ss:$16 sps:$4 sm:$0xff]   ;;  %v12488_v14 = vsub.s32 2, %v17366_v45 }
 0x5d2   : > { %v12824_v8 = vpop.f32.mrf.mxu0  ;;  %13117 = vmatprep.subr.bf16.mxu0 %v16990_v61  ;;  %v17060_v21 = vld [vmem:[%s22155_s5 + $0xf28] ss:$16 sps:$4 sm:$0xff]   ;;  %v17065_v61 = vld [vmem:[%s22155_s5 + $0xd0c] ss:$16 sps:$4 sm:$0xff]   ;;  %v12822_v6 = vadd.f32 %v21829_v28, %v12781_v0  ;;  %v12492_v28 = vsub.s32 3, %v17366_v45 }
 0x5d3   : > { %v17068_v1 = vld [vmem:[%s22155_s5 + $0xf0c] ss:$16 sps:$4 sm:$0xff]   ;;  %v17063_v3 = vld [vmem:[%s22155_s5 + $0xd08] ss:$16 sps:$4 sm:$0xff]  }
 0x5d4   : > { %13077 = vmatpush1.bf16.msra.mxu1 %v16985_v12  ;;  %v17066_v12 = vld [vmem:[%s22155_s5 + $0xf08] ss:$16 sps:$4 sm:$0xff]  }
 0x5d5   : > { %13118 = vmatpush1.bf16.msra.mxu0 %v16988_v33  ;;  %13078 = vmatprep.subr.bf16.mxu1 %v16993_v38  ;;  %v17069_v58 = vld [vmem:[%s22157_s7 + $0x78] sm:$0xff]   ;;  %v13155_v33 = vmax.f32 %v12822_v6, 0.0  ;;  %v17107_v38 = vld [vmem:[%s22156_s6] sm:$0xf]  ;;  %v17097_v6 = vld [vmem:[%s22157_s7 + $0xc8] sm:$0xff]  }
 0x5d6   : > { %13119 = vmatprep.subr.bf16.mxu0 %v16996_v13  ;;  %v12489_v8 = vrot.slane %v17107_v38, %v12488_v14  ;;  %v17070_v13 = vld [vmem:[%s22157_s7 + $0x38] sm:$0xff]   ;;  %v17099_v14 = vld [vmem:[%s22157_s7 + $0xc0] sm:$0xff]  }
 0x5d8   : > { %13079 = vmatpush1.bf16.msra.mxu1 %v16991_v49  ;;  %v17071_v49 = vld [vmem:[%s22157_s7 + $0x70] sm:$0xff]  }
 0x5d9   : > { %13120 = vmatpush1.bf16.msra.mxu0 %v16994_v41  ;;  %13080 = vmatprep.subr.bf16.mxu1 %v16999_v11  ;;  %v12493_v41 = vrot.slane %v17107_v38, %v12492_v28  ;;  %v13159_v11 = vpack.c.bf16 %v13155_v33, %v13155_v33 }
 0x5da   : > { %13121 = vmatprep.subr.bf16.mxu0 %v17002_v60 }
 0x5dc   : > { %13081 = vmatpush1.bf16.msra.mxu1 %v16997_v9 }
 0x5dd   : > { %13122 = vmatpush1.bf16.msra.mxu0 %v17000_v4  ;;  %13082 = vmatprep.subr.bf16.mxu1 %v17005_v15  ;;  %v17072_v4 = vld [vmem:[%s22157_s7 + $0x30] sm:$0xff]  }
 0x5de   : > { %13123 = vmatprep.subr.bf16.mxu0 %v17008_v63  ;;  %v17073_v63 = vld [vmem:[%s22157_s7 + $0x68] sm:$0xff]  }
 0x5e0   : > { %13083 = vmatpush1.bf16.msra.mxu1 %v17003_v55 }
 0x5e1   : > { %13124 = vmatpush1.bf16.msra.mxu0 %v17006_v30  ;;  %13084 = vmatprep.subr.bf16.mxu1 %v17011_v57 }
 0x5e2   : > { %13125 = vmatprep.subr.bf16.mxu0 %v17014_v53 }
 0x5e4   : > { %13085 = vmatpush1.bf16.msra.mxu1 %v17009_v20 }
 0x5e5   : > { %13126 = vmatpush1.bf16.msra.mxu0 %v17012_v40  ;;  %13086 = vmatprep.subr.bf16.mxu1 %v17017_v22  ;;  %v17075_v40 = vld [vmem:[%s22157_s7 + $0x60] sm:$0xff]  }
 0x5e6   : > { %13127 = vmatprep.subr.bf16.mxu0 %v17020_v50  ;;  %v17085_v50 = vld [vmem:[%s22157_s7 + $0xf8] sm:$0xff]  }
 0x5e8   : > { %13087 = vmatpush1.bf16.msra.mxu1 %v17015_v43  ;;  %v17086_v43 = vld [vmem:[%s22157_s7 + $0xb8] sm:$0xff]  }
 0x5e9   : > { %13128 = vmatpush1.bf16.msra.mxu0 %v17018_v36  ;;  %13088 = vmatprep.subr.bf16.mxu1 %v17023_v39  ;;  %v17087_v36 = vld [vmem:[%s22157_s7 + $0xf0] sm:$0xff]   ;;  %v17076_v39 = vld [vmem:[%s22157_s7 + $0x20] sm:$0xff]  }
 0x5ea   : > { %13129 = vmatprep.subr.bf16.mxu0 %v17026_v52  ;;  %v17077_v52 = vld [vmem:[%s22157_s7 + $0x58] sm:$0xff]  }
 0x5ec   : > { %13089 = vmatpush2.bf16.msra.mxu1 %v17021_v7  ;;  %v17088_v7 = vld [vmem:[%s22157_s7 + $0xb0] sm:$0xff]  }
 0x5ed   : > { %13130 = vmatpush2.bf16.msra.mxu0 %v17024_v29  ;;  %13090 = vmatprep.subr.bf16.mxu1 %v17029_v46  ;;  %v17089_v29 = vld [vmem:[%s22157_s7 + $0xe8] sm:$0xff]   ;;  %v17078_v46 = vld [vmem:[%s22157_s7 + $0x18] sm:$0xff]  }
 0x5ee   : > { %13131 = vmatprep.subr.bf16.mxu0 %v17032_v31  ;;  %v17079_v31 = vld [vmem:[%s22157_s7 + $0x50] sm:$0xff]  }
 0x5f0   : > { %13091 = vmatpush2.bf16.msra.mxu1 %v17027_v44  ;;  %v17090_v44 = vld [vmem:[%s22157_s7 + $0xa8] sm:$0xff]  }
 0x5f1   : > { %13132 = vmatpush2.bf16.msra.mxu0 %v17030_v54  ;;  %13092 = vmatprep.subr.bf16.mxu1 %v17035_v26  ;;  %v17091_v54 = vld [vmem:[%s22157_s7 + $0xe0] sm:$0xff]   ;;  %v17080_v26 = vld [vmem:[%s22157_s7 + $0x10] sm:$0xff]  }
 0x5f2   : > { %13133 = vmatprep.subr.bf16.mxu0 %v17038_v32  ;;  %v17081_v32 = vld [vmem:[%s22157_s7 + $0x48] sm:$0xff]  }
 0x5f4   : > { %13093 = vmatpush2.bf16.msra.mxu1 %v17033_v51  ;;  %v17092_v51 = vld [vmem:[%s22157_s7 + $0xa0] sm:$0xff]  }
 0x5f5   : > { %13134 = vmatpush2.bf16.msra.mxu0 %v17036_v2  ;;  %13094 = vmatprep.subr.bf16.mxu1 %v17041_v18  ;;  %v17093_v2 = vld [vmem:[%s22157_s7 + $0xd8] sm:$0xff]   ;;  %v17082_v18 = vld [vmem:[%s22157_s7 + $0x8] sm:$0xff]  }
 0x5f6   : > { %13135 = vmatprep.subr.bf16.mxu0 %v17044_v47  ;;  %v17083_v47 = vld [vmem:[%s22157_s7 + $0x40] sm:$0xff]  }
 0x5f8   : > { %13095 = vmatpush2.bf16.msra.mxu1 %v17039_v48  ;;  %v17094_v48 = vld [vmem:[%s22157_s7 + $0x98] sm:$0xff]  }
 0x5f9   : > { %13136 = vmatpush2.bf16.msra.mxu0 %v17042_v10  ;;  %13096 = vmatprep.subr.bf16.mxu1 %v17047_v24  ;;  %v17084_v10 = vld [vmem:[%s22157_s7] sm:$0xff]   ;;  %v13154_v24 = vmax.f32 %v21824_v59, 0.0  ;;  %v17095_v59 = vld [vmem:[%s22157_s7 + $0xd0] sm:$0xff]  }
 0x5fa   : > { %13137 = vmatprep.subr.bf16.mxu0 %v17050_v16 }
 0x5fb   : > { %v13158_v16 = vpack.c.bf16 %v13154_v24, %v13154_v24 }
 0x5fc   : > { %13097 = vmatpush2.bf16.msra.mxu1 %v17045_v34 }
 0x5fd   : > { %13138 = vmatpush2.bf16.msra.mxu0 %v17048_v17  ;;  %13098 = vmatprep.subr.bf16.mxu1 %v17053_v27 }
 0x5fe   : > { %13139 = vmatprep.subr.bf16.mxu0 %v17056_v62 }
 0x600   : > { %13099 = vmatpush2.bf16.msra.mxu1 %v17051_v42 }
 0x601   : > { %13140 = vmatpush2.bf16.msra.mxu0 %v17054_v35  ;;  %13100 = vmatprep.subr.bf16.mxu1 %v17059_v56 }
 0x602   : > { %13141 = vmatprep.subr.bf16.mxu0 %v17062_v19 }
 0x604   : > { %13101 = vmatpush2.bf16.msra.mxu1 %v17057_v23 }
 0x605   : > { %13142 = vmatpush2.bf16.msra.mxu0 %v17060_v21  ;;  %13102 = vmatprep.subr.bf16.mxu1 %v17065_v61 }
 0x606   : > { %13143 = vmatprep.subr.bf16.mxu0 %v17068_v1  ;;  %v17096_v1 = vld [vmem:[%s22157_s7 + $0x90] sm:$0xff]  }
 0x608   : > { %13103 = vmatpush2.bf16.msra.mxu1 %v17063_v3  ;;  %v17098_v3 = vld [vmem:[%s22157_s7 + $0x88] sm:$0xff]  }
 0x609   : > { %13144 = vmatpush2.bf16.msra.mxu0 %v17066_v12  ;;  %15730 = vmatprep.subr.bf16.mxu1 %v17069_v58  ;;  %v17100_v12 = vld [vmem:[%s22157_s7 + $0x80] sm:$0xff]  }
 0x60a   : > { %15752 = vmatprep.subr.bf16.mxu0 %v17085_v50 }
 0x60b   : > { %v12860_v45 = vpop.f32.mrf.mxu1  ;;  %15014 = vmatmul.mubr.msk.bf16.vlgmr.msra.gmra.mxu1 %vm20464_vm9, %v21162_v37 }
 0x60c   : > { %v12861_v60 = vadd.f32 %v12860_v45, %v12489_v8  ;;  %v12901_v9 = vpop.f32.mrf.mxu0  ;;  %15020 = vmatmul.mubr.msk.bf16.vlgmr.msra.gmra.mxu0 %vm20464_vm9, %v21167_v5  ;;  %15731 = vmatpush3.bf16.msra.mxu1 %v17070_v13 }
 0x60d   : > { %13451 = vmatprep.mubr.bf16.mxu1 %v13159_v11  ;;  %v12862_v15 = vpop.f32.mrf.mxu1  ;;  %15732 = vmatprep.subr.bf16.mxu1 %v17071_v49 }
 0x60e   : > { %v12902_v55 = vadd.f32 %v12901_v9, %v12861_v60  ;;  %v12863_v37 = vadd.f32 %v12862_v15, %v12493_v41  ;;  %v12903_v30 = vpop.f32.mrf.mxu0  ;;  %15753 = vmatpush3.bf16.msra.mxu0 %v17086_v43 }
 0x60f   : > { %v12864_v57 = vpop.f32.mrf.mxu1  ;;  %15754 = vmatprep.subr.bf16.mxu0 %v17087_v36 }
 0x610   : > { %v12904_v53 = vadd.f32 %v12903_v30, %v12863_v37  ;;  %v12905_v20 = vpop.f32.mrf.mxu0  ;;  %15733 = vmatpush3.bf16.msra.mxu1 %v17072_v4 }
 0x611   : > { %v12865_v5 = vpop.f32.mrf.mxu1  ;;  %15734 = vmatprep.subr.bf16.mxu1 %v17073_v63 }
 0x612   : > { %v12906_v22 = vpop.f32.mrf.mxu0  ;;  %15755 = vmatpush3.bf16.msra.mxu0 %v17088_v7 }
 0x613   : > { %15756 = vmatprep.subr.bf16.mxu0 %v17089_v29 }
 0x614   : > { %15735 = vmatpush3.bf16.msra.mxu1 %v17074_v25 }
 0x615   : > { %15736 = vmatprep.subr.bf16.mxu1 %v17075_v40 }
 0x616   : > { %15757 = vmatpush3.bf16.msra.mxu0 %v17090_v44 }
 0x617   : > { %15758 = vmatprep.subr.bf16.mxu0 %v17091_v54 }
 0x618   : > { %15737 = vmatpush3.bf16.msra.mxu1 %v17076_v39 }
 0x619   : > { %15738 = vmatprep.subr.bf16.mxu1 %v17077_v52 }
 0x61a   : > { %15759 = vmatpush3.bf16.msra.mxu0 %v17092_v51 }
 0x61b   : > { %15760 = vmatprep.subr.bf16.mxu0 %v17093_v2 }
 0x61c   : > { %15739 = vmatpush3.bf16.msra.mxu1 %v17078_v46 }
 0x61d   : > { %15740 = vmatprep.subr.bf16.mxu1 %v17079_v31  ;;  %v13226_v31 = vld [vmem:[%s22158_s8] sm:$0x1] }
 0x61e   : > { %15761 = vmatpush3.bf16.msra.mxu0 %v17094_v48 }
 0x61f   : > { %15762 = vmatprep.subr.bf16.mxu0 %v17095_v59 }
 0x620   : > { %15741 = vmatpush3.bf16.msra.mxu1 %v17080_v26 }
 0x621   : > { %15742 = vmatprep.subr.bf16.mxu1 %v17081_v32 }
 0x622   : > { %15763 = vmatpush3.bf16.msra.mxu0 %v17096_v1 }
 0x623   : > { %15764 = vmatprep.subr.bf16.mxu0 %v17097_v6 }
 0x624   : > { %15743 = vmatpush3.bf16.msra.mxu1 %v17082_v18 }
 0x625   : > { %15744 = vmatprep.subr.bf16.mxu1 %v17083_v47 }
 0x626   : > { %15765 = vmatpush3.bf16.msra.mxu0 %v17098_v3 }
 0x627   : > { %15766 = vmatprep.subr.bf16.mxu0 %v17099_v14 }
 0x628   : > { %15745 = vmatpush3.bf16.msra.mxu1 %v17084_v10 }
 0x62a   : > { %15767 = vmatpush3.bf16.msra.mxu0 %v17100_v12 }
 0x62b   : > { %13452 = vmatmul.mubr.bf16.vlgmr.msra.gmra.mxu1 %v13158_v16 }
 0x64b   : > { %v12942_v34 = vpop.f32.mrf.mxu1 }
 0x64c   : > { %v12943_v17 = vadd.f32 %v12942_v34, %v12902_v55  ;;  %v12983_v27 = vpop.f32.mrf.mxu0 }
 0x64d   : > { %v12944_v62 = vpop.f32.mrf.mxu1 }
 0x64e   : > { %v12984_v42 = vadd.f32 %v12983_v27, %v12943_v17  ;;  %v12945_v35 = vadd.f32 %v12944_v62, %v12904_v53  ;;  %v12985_v56 = vpop.f32.mrf.mxu0 }
 0x64f   : > { %v12946_v19 = vpop.f32.mrf.mxu1 }
 0x650   : > { %v12986_v0 = vadd.f32 %v12985_v56, %v12945_v35  ;;  %v12987_v23 = vpop.f32.mrf.mxu0 }
 0x651   : > { %v12947_v21 = vpop.f32.mrf.mxu1 }
 0x652   : > { %v12988_v61 = vpop.f32.mrf.mxu0 }
 0x68b   : > { %v13024_v58 = vpop.f32.mrf.mxu1 }
 0x68c   : > { %v13025_v28 = vadd.f32 %v13024_v58, %v12984_v42  ;;  %v13065_v33 = vpop.f32.mrf.mxu0 }
 0x68d   : > { %v13026_v38 = vpop.f32.mrf.mxu1 }
 0x68e   : > { %v13066_v8 = vadd.f32 %v13065_v33, %v13025_v28  ;;  %v13067_v13 = vpop.f32.mrf.mxu0  ;;  %v13027_v60 = vadd.f32 %v13026_v38, %v12986_v0 }
 0x68f   : > { %v13028_v49 = vpop.f32.mrf.mxu1 }
 0x690   : > { %v13069_v41 = vpop.f32.mrf.mxu0  ;;  %v13068_v4 = vadd.f32 %v13067_v13, %v13027_v60 }
 0x691   : > { %v13029_v11 = vpop.f32.mrf.mxu1 }
 0x692   : > { %v13070_v45 = vpop.f32.mrf.mxu0 }
 0x6cb   : > { %v13106_v9 = vpop.f32.mrf.mxu1 }
 0x6cc   : > { %v13107_v15 = vadd.f32 %v13106_v9, %v13066_v8  ;;  %v13147_v63 = vpop.f32.mrf.mxu0 }
 0x6cd   : > { %v13108_v55 = vpop.f32.mrf.mxu1 }
 0x6ce   : > { %v13148_v37 = vadd.f32 %v13147_v63, %v13107_v15  ;;  %v13109_v30 = vadd.f32 %v13108_v55, %v13068_v4  ;;  %v13149_v57 = vpop.f32.mrf.mxu0 }
 0x6cf   : > { %v13110_v53 = vpop.f32.mrf.mxu1 }
 0x6d0   : > { %v13150_v20 = vadd.f32 %v13149_v57, %v13109_v30  ;;  %v13151_v25 = vpop.f32.mrf.mxu0  ;;  %v13156_v5 = vmax.f32 %v13148_v37, 0.0 }
 0x6d1   : > { %v13111_v40 = vpop.f32.mrf.mxu1 }
 0x6d2   : > { %v13157_v22 = vmax.f32 %v13150_v20, 0.0  ;;  %v13152_v50 = vpop.f32.mrf.mxu0  ;;  %v13160_v36 = vpack.c.bf16 %v13156_v5, %v13156_v5 }
 0x6d4   : > { %v13161_v43 = vpack.c.bf16 %v13157_v22, %v13157_v22 }
 0x6d6   : > { %13491 = vmatprep.mubr.bf16.mxu0 %v13161_v43 }
 0x6d7   : > { %13492 = vmatmul.mubr.bf16.vlgmr.msra.gmra.mxu0 %v13160_v36 }
 0x6eb   : > { %v15746_v39 = vpop.f32.mrf.mxu1 }
 0x6ed   : > { %v15747_v52 = vpop.f32.mrf.mxu1 }
 0x6ee   : > { %v15748_v7 = vadd.f32 %v15747_v52, %v15746_v39 }
 0x6ef   : > { %v15749_v29 = vpop.f32.mrf.mxu1 }
 0x6f0   : > { %v13454_v26 = vadd.f32 %v15748_v7, %v13226_v31 }
 0x6f1   : > { %v15750_v46 = vpop.f32.mrf.mxu1 }
 0x797   : > { %v15768_v44 = vpop.f32.mrf.mxu0 }
 0x799   : > { %v15769_v54 = vpop.f32.mrf.mxu0 }
 0x79a   : > { %v15770_v32 = vadd.f32 %v15769_v54, %v15768_v44 }
 0x79b   : > { %v15771_v51 = vpop.f32.mrf.mxu0 }
 0x79c   : > { %v13494_v2 = vadd.f32 %v15770_v32, %v13454_v26 }
 0x79d   : > { %v15772_v18 = vpop.f32.mrf.mxu0 }
 0x79e   : > { %13499 = vst [vmem:[%s324_s14] sm:$0x1] %v13494_v2 }
 0x79f   : > { %17121 = shalt.err (!%p17118_p3)
}
 0x7a0   : > { %s17122_s28 = scalar_lea.hbm %s22115_s22, 16  ;;  %s17126_s14 = scalar_lea.hbm %s22159_s9, 32 }
 0x7a1   : > { %p17123_p4 = scmp.ne.s32.totalorder %s22115_s22, %s17122_s28  ;;  %p17127_p9 = scmp.lt.s32.totalorder %s22115_s22, %s22159_s9 }
 0x7a2   : > { %p17128_p10 = scmp.lt.s32.totalorder %s17126_s14, %s17122_s28 }
 0x7a3   : > { %p17124_p7 = pnand %p17123_p4, %p17260_p5 }
 0x7a4   : > { %p17129_p11 = por %p17128_p10, %p17127_p9 }
 0x7a5   : > { %p17125_p8 = pneg %p17124_p7 }
 0x7a7   : > { %p17130_p12 = pnand %p17129_p11, %p17125_p8 }
 0x7a9   : > { %17133 = shalt.err (!%p17130_p12)
}
 0x7aa   : > { %15875 = dma.vmem_to_hbm [thread:$0]  (%p17260_p5), %s13514_s16, 16, %s22115_s22, %s13501_s23  }
 0x7ab PF: > { %p15881_p13 = scmp.ge.s32.totalorder %s17168_s12, 2  ;;  %s13525_s24 = sand.u32 1, %s17156_s30  }
 0x7ac   : > { %s13526_s13 = scalar_lea.sflag [#allocation4], %s13525_s24 }
 0x7ad   : > { %p15878_p0 = pnand %p15881_p13, %p17264_p6 }
 0x7af   : > { %p15879_p1 = pneg %p15878_p0 }
 0x7b1   : > { %17151 = dma.done.wait (%p15879_p1), %s13526_s13, 16  }
 0x7b2   : > { %17153 = vsyncadd (%p15879_p1), %s13526_s13, 4294967280  ;;  %p19_p2 = scmp.ge.s32.totalorder %s17247_s15, 4   ;;  %s22172_s30 = smov %s17160_s10 }
 0x7b3   : > { %s22173_s10 = smov %s17164_s11  ;;  %s22174_s11 = smov %s17258_s18 }
 0x7b4   : > { %s22175_s12 = smov %s17247_s15  ;;  %21 = sbr.rel (!%p19_p2) target bundleno = 3 (0x3), region = 91 }
 0x7b9   :  { %13530 = vsyncpa [#allocation4], 1 }
 0x7ba   :  { %13532 = vsyncpa [#allocation4 + $0x1], 1 }

</bundles_post_ra>
